<compile_context>
chip_gen: v7x
topology: tpu7x:2x2x1
jax: 0.10.0
libtpu: 0.0.40
codegen_flags: <defaults>
</compile_context>

<pallas_src>
import numpy as np
import jax
import jax.numpy as jnp
from jax.experimental import pallas as pl
from jax.experimental.pallas import tpu as pltpu

H0, W0 = 16, 16
C_IN, C1, C2, C3 = 2, 16, 32, 64
H3 = 10                       # spatial extent after the three VALID 3x3 convs
FC_IN = C3 * H3 * H3          # 6400
FC_HID = 256
FC_K_CHUNK = 1280             # 6400 / 5; multiple of 128 lanes & 8 sublanes

# row counts per layer (each conv reads input rows up to +2*W0+2 = 34 further)
R3 = H3 * W0                  # 160  covers every valid (h<10, w<10) conv3 output
R2 = R3 + 64                  # 224  >= R3 + 34
R1 = R2 + 48                  # 272  >= R2 + 34
R_IN = H0 * W0 + 64           # 320  >= R1 + 34 (zero padded past the 256 real rows)


def cnn_dqn_kernel(x_ref, w1_ref, b1_ref, w2_ref, b2_ref, w3_ref, b3_ref,
                   wf1_hbm, bf1_ref, wf2_ref, bf2_ref, out_ref,
                   a3_ref, flat_ref, wf1_vmem, dma_sem):
    # Kick off the big FC1 weight stream HBM -> VMEM; it overlaps with the convs
    # (with a plain VMEM in_spec the kernel could not start until it landed).
    wf1_copy = pltpu.make_async_copy(wf1_hbm, wf1_vmem, dma_sem)
    wf1_copy.start()

    def conv3x3_relu(act, w_ref, b_ref, c_in, r_out):
        c_out = w_ref.shape[1]
        acc = jnp.zeros((r_out, c_out), jnp.float32)
        for ky in range(3):
            for kx in range(3):
                off = ky * W0 + kx               # shift in flattened-spatial rows
                tap = (ky * 3 + kx) * c_in       # row block of the packed weight
                acc = acc + jnp.dot(
                    act[off:off + r_out, :].astype(jnp.bfloat16),
                    w_ref[tap:tap + c_in, :],
                    preferred_element_type=jnp.float32)
        return jnp.maximum(acc + b_ref[...], 0.0)

    a1 = conv3x3_relu(x_ref[...], w1_ref, b1_ref, C_IN, R1)      # (272, 16)
    a2 = conv3x3_relu(a1, w2_ref, b2_ref, C1, R2)                # (224, 32)
    a3_ref[...] = conv3x3_relu(a2, w3_ref, b3_ref, C2, R3)       # (160, 64)

    # Compact + flatten the valid conv3 outputs (h, w < 10) into a (1, 6400)
    # lane vector in (h, w, c) order.  wf1 was permuted at prep time to match,
    # so no zero-padded weight rows are ever loaded from HBM.
    for h in range(H3):
        for w in range(H3):
            r = h * W0 + w
            col = (h * H3 + w) * C3
            flat_ref[0:1, col:col + C3] = a3_ref[r:r + 1, :]

    # FC1: one pipelined contraction over K=6400, chunked into 5 K=1280 dots
    # (replaces 64 per-channel M=1 GEMVs + an XLU transpose).
    wf1_copy.wait()
    acc = bf1_ref[...]                                           # (1, 256) f32
    for t in range(FC_IN // FC_K_CHUNK):
        k0 = t * FC_K_CHUNK
        acc = acc + jnp.dot(
            flat_ref[0:1, k0:k0 + FC_K_CHUNK].astype(jnp.bfloat16),
            wf1_vmem[k0:k0 + FC_K_CHUNK, :],
            preferred_element_type=jnp.float32)
    h1 = jnp.maximum(acc, 0.0)                                   # (1, 256)

    out_ref[...] = jnp.dot(h1.astype(jnp.bfloat16), wf2_ref[...],
                           preferred_element_type=jnp.float32) + bf2_ref[...]


def prepare_params(params):
    """One-time re-layout of the PyTorch-layout weights (NOT per forward call)."""
    (w1, b1, w2, b2, w3, b3, wf1, bf1, wf2, bf2) = params

    def pack_conv(w):                     # torch (co, ci, 3, 3) -> (9*ci, co) bf16
        co, ci = w.shape[0], w.shape[1]
        return jnp.transpose(w, (2, 3, 1, 0)).reshape(9 * ci, co).astype(jnp.bfloat16)

    # torch Flatten order of the (64,10,10) conv3 output is c*100 + h*10 + w.
    # The kernel builds its FC1 input in (h, w, c) order, so permute the FC1
    # weight rows to k = (h*10 + w)*64 + c.  No zero padding -> (6400, 256).
    wf1_k = jnp.transpose(wf1.reshape(FC_HID, C3, H3, H3), (2, 3, 1, 0))
    wf1_k = wf1_k.reshape(FC_IN, FC_HID).astype(jnp.bfloat16)

    return (pack_conv(w1), b1.reshape(1, C1).astype(jnp.float32),
            pack_conv(w2), b2.reshape(1, C2).astype(jnp.float32),
            pack_conv(w3), b3.reshape(1, C3).astype(jnp.float32),
            wf1_k, bf1.reshape(1, FC_HID).astype(jnp.float32),
            wf2.T.astype(jnp.bfloat16), bf2.reshape(1, -1).astype(jnp.float32))


@jax.jit
def cnn_dqn_forward(x_chw, packed_params):
    (w1p, b1, w2p, b2, w3p, b3, wf1_k, bf1, wf2t, bf2) = packed_params
    out_size = wf2t.shape[1]

    # CHW -> HWC -> (H*W, C), zero-padded rows so every shifted slice is in-bounds.
    x_flat = jnp.transpose(x_chw, (1, 2, 0)).reshape(H0 * W0, C_IN).astype(jnp.float32)
    x_pad = jnp.zeros((R_IN, C_IN), jnp.float32).at[:H0 * W0].set(x_flat)

    args = (x_pad, w1p, b1, w2p, b2, w3p, b3, wf1_k, bf1, wf2t, bf2)

    vmem = pl.BlockSpec(memory_space=pltpu.MemorySpace.VMEM)
    hbm = pl.BlockSpec(memory_space=pl.ANY)        # wf1_k: manual overlapped DMA
    in_specs = [vmem] * 7 + [hbm] + [vmem] * 3

    out = pl.pallas_call(
        cnn_dqn_kernel,
        out_shape=jax.ShapeDtypeStruct((1, out_size), jnp.float32),
        in_specs=in_specs,
        out_specs=vmem,
        scratch_shapes=[
            pltpu.VMEM((R3, C3), jnp.float32),          # conv3 output
            pltpu.VMEM((1, FC_IN), jnp.float32),        # flattened FC1 input
            pltpu.VMEM((FC_IN, FC_HID), jnp.bfloat16),  # FC1 weight landing buffer
            pltpu.SemaphoreType.DMA,                    # completion semaphore
        ],
        compiler_params=pltpu.CompilerParams(vmem_limit_bytes=16 * 1024 * 1024),
    )(*args)
    return out[0]


def init_params(key, out_size):
    """Deterministic PyTorch-default-style init (uniform +-1/sqrt(fan_in))."""
    keys = jax.random.split(key, 10)

    def unif(k, shape, fan_in):
        lim = 1.0 / np.sqrt(fan_in)
        return jax.random.uniform(k, shape, jnp.float32, -lim, lim)

    w1 = unif(keys[0], (C1, C_IN, 3, 3), C_IN * 9)
    b1 = unif(keys[1], (C1,), C_IN * 9)
    w2 = unif(keys[2], (C2, C1, 3, 3), C1 * 9)
    b2 = unif(keys[3], (C2,), C1 * 9)
    w3 = unif(keys[4], (C3, C2, 3, 3), C2 * 9)
    b3 = unif(keys[5], (C3,), C2 * 9)
    wf1 = unif(keys[6], (FC_HID, FC_IN), FC_IN)
    bf1 = unif(keys[7], (FC_HID,), FC_IN)
    wf2 = unif(keys[8], (out_size, FC_HID), FC_HID)
    bf2 = unif(keys[9], (out_size,), FC_HID)
    return (w1, b1, w2, b2, w3, b3, wf1, bf1, wf2, bf2)


def reference_forward(x_chw, params):
    """Pure-JAX (f32) reference reproducing the PyTorch forward semantics."""
    (w1, b1, w2, b2, w3, b3, wf1, bf1, wf2, bf2) = params

    def conv(a, w, b):
        y = jax.lax.conv_general_dilated(
            a[None], w, (1, 1), 'VALID',
            dimension_numbers=('NCHW', 'OIHW', 'NCHW'))[0]
        return jax.nn.relu(y + b[:, None, None])

    a = conv(x_chw, w1, b1)
    a = conv(a, w2, b2)
    a = conv(a, w3, b3)
    flat = a.reshape(-1)               # nn.Flatten(0, -1) on (C, H, W)
    h = jax.nn.relu(wf1 @ flat + bf1)
    return wf2 @ h + bf2


if __name__ == "__main__":
    out_size = 4
    key = jax.random.PRNGKey(0)
    k_x, k_p = jax.random.split(key)

    # Unbatched CHW input, as implied by Flatten(0, -1) + Linear(6400, .)
    x = jax.random.normal(k_x, (C_IN, H0, W0), jnp.float32)
    params = init_params(k_p, out_size)

    # Weight packing happens exactly once (would be done at model-load time).
    packed = prepare_params(params)

    y = jax.block_until_ready(cnn_dqn_forward(x, packed))
    y_ref = np.asarray(reference_forward(x, params))

    assert y.shape == (out_size,)
    if not np.allclose(np.asarray(y), y_ref, rtol=5e-2, atol=2e-2):
        raise AssertionError(f"Pallas output {np.asarray(y)} != reference {y_ref}")
    print("KERNEL_OK")
</pallas_src>

<mosaic_0001>
module attributes {stable_mosaic.version = 11 : i64} {
  func.func @cnn_dqn_kernel(%arg0: memref<320x2xf32, #tpu.memory_space<vmem>>, %arg1: memref<18x16xbf16, #tpu.memory_space<vmem>>, %arg2: memref<1x16xf32, #tpu.memory_space<vmem>>, %arg3: memref<144x32xbf16, #tpu.memory_space<vmem>>, %arg4: memref<1x32xf32, #tpu.memory_space<vmem>>, %arg5: memref<288x64xbf16, #tpu.memory_space<vmem>>, %arg6: memref<1x64xf32, #tpu.memory_space<vmem>>, %arg7: memref<6400x256xbf16, #tpu.memory_space<any>>, %arg8: memref<1x256xf32, #tpu.memory_space<vmem>>, %arg9: memref<256x4xbf16, #tpu.memory_space<vmem>>, %arg10: memref<1x4xf32, #tpu.memory_space<vmem>>, %arg11: memref<1x4xf32, #tpu.memory_space<vmem>>, %arg12: memref<160x64xf32, #tpu.memory_space<vmem>>, %arg13: memref<1x6400xf32, #tpu.memory_space<vmem>>, %arg14: memref<6400x256xbf16, #tpu.memory_space<vmem>>, %arg15: memref<!tpu.dma_semaphore, #tpu.memory_space<semaphore_mem>>) attributes {dimension_semantics = [], scalar_prefetch = 0 : i64, scratch_operands = 4 : i64, tpu.core_type = #tpu.core_type<tc>} {
    tpu.enqueue_dma source(%arg7 : memref<6400x256xbf16, #tpu.memory_space<any>>) target(%arg14 : memref<6400x256xbf16, #tpu.memory_space<vmem>>) target_semaphore(%arg15 : memref<!tpu.dma_semaphore, #tpu.memory_space<semaphore_mem>>)
    %c0 = arith.constant 0 : index
    %c0_0 = arith.constant 0 : index
    %0 = vector.load %arg0[%c0, %c0_0] : memref<320x2xf32, #tpu.memory_space<vmem>>, vector<320x2xf32>
    %cst = arith.constant 0.000000e+00 : f32
    %1 = vector.broadcast %cst : f32 to vector<272x16xf32>
    %2 = vector.extract_strided_slice %0 {offsets = [0, 0], sizes = [272, 2], strides = [1, 1]} : vector<320x2xf32> to vector<272x2xf32>
    %3 = arith.truncf %2 : vector<272x2xf32> to vector<272x2xbf16>
    %c0_1 = arith.constant 0 : index
    %c0_2 = arith.constant 0 : index
    %4 = vector.load %arg1[%c0_1, %c0_2] : memref<18x16xbf16, #tpu.memory_space<vmem>>, vector<2x16xbf16>
    %cst_3 = arith.constant dense<0.000000e+00> : vector<272x16xf32>
    %5 = tpu.matmul %3, %4, %cst_3 {dimension_numbers = #tpu.dot_dimension_numbers<[1], [0], [0], [1], [0, 0, 1, 1], [], []>} : vector<272x2xbf16>, vector<2x16xbf16>, vector<272x16xf32> -> vector<272x16xf32>
    %6 = arith.addf %1, %5 : vector<272x16xf32>
    %7 = vector.extract_strided_slice %0 {offsets = [1, 0], sizes = [272, 2], strides = [1, 1]} : vector<320x2xf32> to vector<272x2xf32>
    %8 = arith.truncf %7 : vector<272x2xf32> to vector<272x2xbf16>
    %c2 = arith.constant 2 : index
    %c0_4 = arith.constant 0 : index
    %9 = vector.load %arg1[%c2, %c0_4] : memref<18x16xbf16, #tpu.memory_space<vmem>>, vector<2x16xbf16>
    %cst_5 = arith.constant dense<0.000000e+00> : vector<272x16xf32>
    %10 = tpu.matmul %8, %9, %cst_5 {dimension_numbers = #tpu.dot_dimension_numbers<[1], [0], [0], [1], [0, 0, 1, 1], [], []>} : vector<272x2xbf16>, vector<2x16xbf16>, vector<272x16xf32> -> vector<272x16xf32>
    %11 = arith.addf %6, %10 : vector<272x16xf32>
    %12 = vector.extract_strided_slice %0 {offsets = [2, 0], sizes = [272, 2], strides = [1, 1]} : vector<320x2xf32> to vector<272x2xf32>
    %13 = arith.truncf %12 : vector<272x2xf32> to vector<272x2xbf16>
    %c4 = arith.constant 4 : index
    %c0_6 = arith.constant 0 : index
    %14 = vector.load %arg1[%c4, %c0_6] : memref<18x16xbf16, #tpu.memory_space<vmem>>, vector<2x16xbf16>
    %cst_7 = arith.constant dense<0.000000e+00> : vector<272x16xf32>
    %15 = tpu.matmul %13, %14, %cst_7 {dimension_numbers = #tpu.dot_dimension_numbers<[1], [0], [0], [1], [0, 0, 1, 1], [], []>} : vector<272x2xbf16>, vector<2x16xbf16>, vector<272x16xf32> -> vector<272x16xf32>
    %16 = arith.addf %11, %15 : vector<272x16xf32>
    %17 = vector.extract_strided_slice %0 {offsets = [16, 0], sizes = [272, 2], strides = [1, 1]} : vector<320x2xf32> to vector<272x2xf32>
    %18 = arith.truncf %17 : vector<272x2xf32> to vector<272x2xbf16>
    %c6 = arith.constant 6 : index
    %c0_8 = arith.constant 0 : index
    %19 = vector.load %arg1[%c6, %c0_8] : memref<18x16xbf16, #tpu.memory_space<vmem>>, vector<2x16xbf16>
    %cst_9 = arith.constant dense<0.000000e+00> : vector<272x16xf32>
    %20 = tpu.matmul %18, %19, %cst_9 {dimension_numbers = #tpu.dot_dimension_numbers<[1], [0], [0], [1], [0, 0, 1, 1], [], []>} : vector<272x2xbf16>, vector<2x16xbf16>, vector<272x16xf32> -> vector<272x16xf32>
    %21 = arith.addf %16, %20 : vector<272x16xf32>
    %22 = vector.extract_strided_slice %0 {offsets = [17, 0], sizes = [272, 2], strides = [1, 1]} : vector<320x2xf32> to vector<272x2xf32>
    %23 = arith.truncf %22 : vector<272x2xf32> to vector<272x2xbf16>
    %c8 = arith.constant 8 : index
    %c0_10 = arith.constant 0 : index
    %24 = vector.load %arg1[%c8, %c0_10] : memref<18x16xbf16, #tpu.memory_space<vmem>>, vector<2x16xbf16>
    %cst_11 = arith.constant dense<0.000000e+00> : vector<272x16xf32>
    %25 = tpu.matmul %23, %24, %cst_11 {dimension_numbers = #tpu.dot_dimension_numbers<[1], [0], [0], [1], [0, 0, 1, 1], [], []>} : vector<272x2xbf16>, vector<2x16xbf16>, vector<272x16xf32> -> vector<272x16xf32>
    %26 = arith.addf %21, %25 : vector<272x16xf32>
    %27 = vector.extract_strided_slice %0 {offsets = [18, 0], sizes = [272, 2], strides = [1, 1]} : vector<320x2xf32> to vector<272x2xf32>
    %28 = arith.truncf %27 : vector<272x2xf32> to vector<272x2xbf16>
    %c10 = arith.constant 10 : index
    %c0_12 = arith.constant 0 : index
    %29 = vector.load %arg1[%c10, %c0_12] : memref<18x16xbf16, #tpu.memory_space<vmem>>, vector<2x16xbf16>
    %cst_13 = arith.constant dense<0.000000e+00> : vector<272x16xf32>
    %30 = tpu.matmul %28, %29, %cst_13 {dimension_numbers = #tpu.dot_dimension_numbers<[1], [0], [0], [1], [0, 0, 1, 1], [], []>} : vector<272x2xbf16>, vector<2x16xbf16>, vector<272x16xf32> -> vector<272x16xf32>
    %31 = arith.addf %26, %30 : vector<272x16xf32>
    %32 = vector.extract_strided_slice %0 {offsets = [32, 0], sizes = [272, 2], strides = [1, 1]} : vector<320x2xf32> to vector<272x2xf32>
    %33 = arith.truncf %32 : vector<272x2xf32> to vector<272x2xbf16>
    %c12 = arith.constant 12 : index
    %c0_14 = arith.constant 0 : index
    %34 = vector.load %arg1[%c12, %c0_14] : memref<18x16xbf16, #tpu.memory_space<vmem>>, vector<2x16xbf16>
    %cst_15 = arith.constant dense<0.000000e+00> : vector<272x16xf32>
    %35 = tpu.matmul %33, %34, %cst_15 {dimension_numbers = #tpu.dot_dimension_numbers<[1], [0], [0], [1], [0, 0, 1, 1], [], []>} : vector<272x2xbf16>, vector<2x16xbf16>, vector<272x16xf32> -> vector<272x16xf32>
    %36 = arith.addf %31, %35 : vector<272x16xf32>
    %37 = vector.extract_strided_slice %0 {offsets = [33, 0], sizes = [272, 2], strides = [1, 1]} : vector<320x2xf32> to vector<272x2xf32>
    %38 = arith.truncf %37 : vector<272x2xf32> to vector<272x2xbf16>
    %c14 = arith.constant 14 : index
    %c0_16 = arith.constant 0 : index
    %39 = vector.load %arg1[%c14, %c0_16] : memref<18x16xbf16, #tpu.memory_space<vmem>>, vector<2x16xbf16>
    %cst_17 = arith.constant dense<0.000000e+00> : vector<272x16xf32>
    %40 = tpu.matmul %38, %39, %cst_17 {dimension_numbers = #tpu.dot_dimension_numbers<[1], [0], [0], [1], [0, 0, 1, 1], [], []>} : vector<272x2xbf16>, vector<2x16xbf16>, vector<272x16xf32> -> vector<272x16xf32>
    %41 = arith.addf %36, %40 : vector<272x16xf32>
    %42 = vector.extract_strided_slice %0 {offsets = [34, 0], sizes = [272, 2], strides = [1, 1]} : vector<320x2xf32> to vector<272x2xf32>
    %43 = arith.truncf %42 : vector<272x2xf32> to vector<272x2xbf16>
    %c16 = arith.constant 16 : index
    %c0_18 = arith.constant 0 : index
    %44 = vector.load %arg1[%c16, %c0_18] : memref<18x16xbf16, #tpu.memory_space<vmem>>, vector<2x16xbf16>
    %cst_19 = arith.constant dense<0.000000e+00> : vector<272x16xf32>
    %45 = tpu.matmul %43, %44, %cst_19 {dimension_numbers = #tpu.dot_dimension_numbers<[1], [0], [0], [1], [0, 0, 1, 1], [], []>} : vector<272x2xbf16>, vector<2x16xbf16>, vector<272x16xf32> -> vector<272x16xf32>
    %46 = arith.addf %41, %45 : vector<272x16xf32>
    %c0_20 = arith.constant 0 : index
    %c0_21 = arith.constant 0 : index
    %47 = vector.load %arg2[%c0_20, %c0_21] : memref<1x16xf32, #tpu.memory_space<vmem>>, vector<1x16xf32>
    %48 = vector.broadcast %47 : vector<1x16xf32> to vector<272x16xf32>
    %49 = arith.addf %46, %48 : vector<272x16xf32>
    %cst_22 = arith.constant 0.000000e+00 : f32
    %50 = vector.broadcast %cst_22 : f32 to vector<272x16xf32>
    %51 = arith.maximumf %49, %50 : vector<272x16xf32>
    %cst_23 = arith.constant 0.000000e+00 : f32
    %52 = vector.broadcast %cst_23 : f32 to vector<224x32xf32>
    %53 = vector.extract_strided_slice %51 {offsets = [0, 0], sizes = [224, 16], strides = [1, 1]} : vector<272x16xf32> to vector<224x16xf32>
    %54 = arith.truncf %53 : vector<224x16xf32> to vector<224x16xbf16>
    %c0_24 = arith.constant 0 : index
    %c0_25 = arith.constant 0 : index
    %55 = vector.load %arg3[%c0_24, %c0_25] : memref<144x32xbf16, #tpu.memory_space<vmem>>, vector<16x32xbf16>
    %cst_26 = arith.constant dense<0.000000e+00> : vector<224x32xf32>
    %56 = tpu.matmul %54, %55, %cst_26 {dimension_numbers = #tpu.dot_dimension_numbers<[1], [0], [0], [1], [0, 0, 1, 1], [], []>} : vector<224x16xbf16>, vector<16x32xbf16>, vector<224x32xf32> -> vector<224x32xf32>
    %57 = arith.addf %52, %56 : vector<224x32xf32>
    %58 = vector.extract_strided_slice %51 {offsets = [1, 0], sizes = [224, 16], strides = [1, 1]} : vector<272x16xf32> to vector<224x16xf32>
    %59 = arith.truncf %58 : vector<224x16xf32> to vector<224x16xbf16>
    %c16_27 = arith.constant 16 : index
    %c0_28 = arith.constant 0 : index
    %60 = vector.load %arg3[%c16_27, %c0_28] : memref<144x32xbf16, #tpu.memory_space<vmem>>, vector<16x32xbf16>
    %cst_29 = arith.constant dense<0.000000e+00> : vector<224x32xf32>
    %61 = tpu.matmul %59, %60, %cst_29 {dimension_numbers = #tpu.dot_dimension_numbers<[1], [0], [0], [1], [0, 0, 1, 1], [], []>} : vector<224x16xbf16>, vector<16x32xbf16>, vector<224x32xf32> -> vector<224x32xf32>
    %62 = arith.addf %57, %61 : vector<224x32xf32>
    %63 = vector.extract_strided_slice %51 {offsets = [2, 0], sizes = [224, 16], strides = [1, 1]} : vector<272x16xf32> to vector<224x16xf32>
    %64 = arith.truncf %63 : vector<224x16xf32> to vector<224x16xbf16>
    %c32 = arith.constant 32 : index
    %c0_30 = arith.constant 0 : index
    %65 = vector.load %arg3[%c32, %c0_30] : memref<144x32xbf16, #tpu.memory_space<vmem>>, vector<16x32xbf16>
    %cst_31 = arith.constant dense<0.000000e+00> : vector<224x32xf32>
    %66 = tpu.matmul %64, %65, %cst_31 {dimension_numbers = #tpu.dot_dimension_numbers<[1], [0], [0], [1], [0, 0, 1, 1], [], []>} : vector<224x16xbf16>, vector<16x32xbf16>, vector<224x32xf32> -> vector<224x32xf32>
    %67 = arith.addf %62, %66 : vector<224x32xf32>
    %68 = vector.extract_strided_slice %51 {offsets = [16, 0], sizes = [224, 16], strides = [1, 1]} : vector<272x16xf32> to vector<224x16xf32>
    %69 = arith.truncf %68 : vector<224x16xf32> to vector<224x16xbf16>
    %c48 = arith.constant 48 : index
    %c0_32 = arith.constant 0 : index
    %70 = vector.load %arg3[%c48, %c0_32] : memref<144x32xbf16, #tpu.memory_space<vmem>>, vector<16x32xbf16>
    %cst_33 = arith.constant dense<0.000000e+00> : vector<224x32xf32>
    %71 = tpu.matmul %69, %70, %cst_33 {dimension_numbers = #tpu.dot_dimension_numbers<[1], [0], [0], [1], [0, 0, 1, 1], [], []>} : vector<224x16xbf16>, vector<16x32xbf16>, vector<224x32xf32> -> vector<224x32xf32>
    %72 = arith.addf %67, %71 : vector<224x32xf32>
    %73 = vector.extract_strided_slice %51 {offsets = [17, 0], sizes = [224, 16], strides = [1, 1]} : vector<272x16xf32> to vector<224x16xf32>
    %74 = arith.truncf %73 : vector<224x16xf32> to vector<224x16xbf16>
    %c64 = arith.constant 64 : index
    %c0_34 = arith.constant 0 : index
    %75 = vector.load %arg3[%c64, %c0_34] : memref<144x32xbf16, #tpu.memory_space<vmem>>, vector<16x32xbf16>
    %cst_35 = arith.constant dense<0.000000e+00> : vector<224x32xf32>
    %76 = tpu.matmul %74, %75, %cst_35 {dimension_numbers = #tpu.dot_dimension_numbers<[1], [0], [0], [1], [0, 0, 1, 1], [], []>} : vector<224x16xbf16>, vector<16x32xbf16>, vector<224x32xf32> -> vector<224x32xf32>
    %77 = arith.addf %72, %76 : vector<224x32xf32>
    %78 = vector.extract_strided_slice %51 {offsets = [18, 0], sizes = [224, 16], strides = [1, 1]} : vector<272x16xf32> to vector<224x16xf32>
    %79 = arith.truncf %78 : vector<224x16xf32> to vector<224x16xbf16>
    %c80 = arith.constant 80 : index
    %c0_36 = arith.constant 0 : index
    %80 = vector.load %arg3[%c80, %c0_36] : memref<144x32xbf16, #tpu.memory_space<vmem>>, vector<16x32xbf16>
    %cst_37 = arith.constant dense<0.000000e+00> : vector<224x32xf32>
    %81 = tpu.matmul %79, %80, %cst_37 {dimension_numbers = #tpu.dot_dimension_numbers<[1], [0], [0], [1], [0, 0, 1, 1], [], []>} : vector<224x16xbf16>, vector<16x32xbf16>, vector<224x32xf32> -> vector<224x32xf32>
    %82 = arith.addf %77, %81 : vector<224x32xf32>
    %83 = vector.extract_strided_slice %51 {offsets = [32, 0], sizes = [224, 16], strides = [1, 1]} : vector<272x16xf32> to vector<224x16xf32>
    %84 = arith.truncf %83 : vector<224x16xf32> to vector<224x16xbf16>
    %c96 = arith.constant 96 : index
    %c0_38 = arith.constant 0 : index
    %85 = vector.load %arg3[%c96, %c0_38] : memref<144x32xbf16, #tpu.memory_space<vmem>>, vector<16x32xbf16>
    %cst_39 = arith.constant dense<0.000000e+00> : vector<224x32xf32>
    %86 = tpu.matmul %84, %85, %cst_39 {dimension_numbers = #tpu.dot_dimension_numbers<[1], [0], [0], [1], [0, 0, 1, 1], [], []>} : vector<224x16xbf16>, vector<16x32xbf16>, vector<224x32xf32> -> vector<224x32xf32>
    %87 = arith.addf %82, %86 : vector<224x32xf32>
    %88 = vector.extract_strided_slice %51 {offsets = [33, 0], sizes = [224, 16], strides = [1, 1]} : vector<272x16xf32> to vector<224x16xf32>
    %89 = arith.truncf %88 : vector<224x16xf32> to vector<224x16xbf16>
    %c112 = arith.constant 112 : index
    %c0_40 = arith.constant 0 : index
    %90 = vector.load %arg3[%c112, %c0_40] : memref<144x32xbf16, #tpu.memory_space<vmem>>, vector<16x32xbf16>
    %cst_41 = arith.constant dense<0.000000e+00> : vector<224x32xf32>
    %91 = tpu.matmul %89, %90, %cst_41 {dimension_numbers = #tpu.dot_dimension_numbers<[1], [0], [0], [1], [0, 0, 1, 1], [], []>} : vector<224x16xbf16>, vector<16x32xbf16>, vector<224x32xf32> -> vector<224x32xf32>
    %92 = arith.addf %87, %91 : vector<224x32xf32>
    %93 = vector.extract_strided_slice %51 {offsets = [34, 0], sizes = [224, 16], strides = [1, 1]} : vector<272x16xf32> to vector<224x16xf32>
    %94 = arith.truncf %93 : vector<224x16xf32> to vector<224x16xbf16>
    %c128 = arith.constant 128 : index
    %c0_42 = arith.constant 0 : index
    %95 = vector.load %arg3[%c128, %c0_42] : memref<144x32xbf16, #tpu.memory_space<vmem>>, vector<16x32xbf16>
    %cst_43 = arith.constant dense<0.000000e+00> : vector<224x32xf32>
    %96 = tpu.matmul %94, %95, %cst_43 {dimension_numbers = #tpu.dot_dimension_numbers<[1], [0], [0], [1], [0, 0, 1, 1], [], []>} : vector<224x16xbf16>, vector<16x32xbf16>, vector<224x32xf32> -> vector<224x32xf32>
    %97 = arith.addf %92, %96 : vector<224x32xf32>
    %c0_44 = arith.constant 0 : index
    %c0_45 = arith.constant 0 : index
    %98 = vector.load %arg4[%c0_44, %c0_45] : memref<1x32xf32, #tpu.memory_space<vmem>>, vector<1x32xf32>
    %99 = vector.broadcast %98 : vector<1x32xf32> to vector<224x32xf32>
    %100 = arith.addf %97, %99 : vector<224x32xf32>
    %cst_46 = arith.constant 0.000000e+00 : f32
    %101 = vector.broadcast %cst_46 : f32 to vector<224x32xf32>
    %102 = arith.maximumf %100, %101 : vector<224x32xf32>
    %cst_47 = arith.constant 0.000000e+00 : f32
    %103 = vector.broadcast %cst_47 : f32 to vector<160x64xf32>
    %104 = vector.extract_strided_slice %102 {offsets = [0, 0], sizes = [160, 32], strides = [1, 1]} : vector<224x32xf32> to vector<160x32xf32>
    %105 = arith.truncf %104 : vector<160x32xf32> to vector<160x32xbf16>
    %c0_48 = arith.constant 0 : index
    %c0_49 = arith.constant 0 : index
    %106 = vector.load %arg5[%c0_48, %c0_49] : memref<288x64xbf16, #tpu.memory_space<vmem>>, vector<32x64xbf16>
    %cst_50 = arith.constant dense<0.000000e+00> : vector<160x64xf32>
    %107 = tpu.matmul %105, %106, %cst_50 {dimension_numbers = #tpu.dot_dimension_numbers<[1], [0], [0], [1], [0, 0, 1, 1], [], []>} : vector<160x32xbf16>, vector<32x64xbf16>, vector<160x64xf32> -> vector<160x64xf32>
    %108 = arith.addf %103, %107 : vector<160x64xf32>
    %109 = vector.extract_strided_slice %102 {offsets = [1, 0], sizes = [160, 32], strides = [1, 1]} : vector<224x32xf32> to vector<160x32xf32>
    %110 = arith.truncf %109 : vector<160x32xf32> to vector<160x32xbf16>
    %c32_51 = arith.constant 32 : index
    %c0_52 = arith.constant 0 : index
    %111 = vector.load %arg5[%c32_51, %c0_52] : memref<288x64xbf16, #tpu.memory_space<vmem>>, vector<32x64xbf16>
    %cst_53 = arith.constant dense<0.000000e+00> : vector<160x64xf32>
    %112 = tpu.matmul %110, %111, %cst_53 {dimension_numbers = #tpu.dot_dimension_numbers<[1], [0], [0], [1], [0, 0, 1, 1], [], []>} : vector<160x32xbf16>, vector<32x64xbf16>, vector<160x64xf32> -> vector<160x64xf32>
    %113 = arith.addf %108, %112 : vector<160x64xf32>
    %114 = vector.extract_strided_slice %102 {offsets = [2, 0], sizes = [160, 32], strides = [1, 1]} : vector<224x32xf32> to vector<160x32xf32>
    %115 = arith.truncf %114 : vector<160x32xf32> to vector<160x32xbf16>
    %c64_54 = arith.constant 64 : index
    %c0_55 = arith.constant 0 : index
    %116 = vector.load %arg5[%c64_54, %c0_55] : memref<288x64xbf16, #tpu.memory_space<vmem>>, vector<32x64xbf16>
    %cst_56 = arith.constant dense<0.000000e+00> : vector<160x64xf32>
    %117 = tpu.matmul %115, %116, %cst_56 {dimension_numbers = #tpu.dot_dimension_numbers<[1], [0], [0], [1], [0, 0, 1, 1], [], []>} : vector<160x32xbf16>, vector<32x64xbf16>, vector<160x64xf32> -> vector<160x64xf32>
    %118 = arith.addf %113, %117 : vector<160x64xf32>
    %119 = vector.extract_strided_slice %102 {offsets = [16, 0], sizes = [160, 32], strides = [1, 1]} : vector<224x32xf32> to vector<160x32xf32>
    %120 = arith.truncf %119 : vector<160x32xf32> to vector<160x32xbf16>
    %c96_57 = arith.constant 96 : index
    %c0_58 = arith.constant 0 : index
    %121 = vector.load %arg5[%c96_57, %c0_58] : memref<288x64xbf16, #tpu.memory_space<vmem>>, vector<32x64xbf16>
    %cst_59 = arith.constant dense<0.000000e+00> : vector<160x64xf32>
    %122 = tpu.matmul %120, %121, %cst_59 {dimension_numbers = #tpu.dot_dimension_numbers<[1], [0], [0], [1], [0, 0, 1, 1], [], []>} : vector<160x32xbf16>, vector<32x64xbf16>, vector<160x64xf32> -> vector<160x64xf32>
    %123 = arith.addf %118, %122 : vector<160x64xf32>
    %124 = vector.extract_strided_slice %102 {offsets = [17, 0], sizes = [160, 32], strides = [1, 1]} : vector<224x32xf32> to vector<160x32xf32>
    %125 = arith.truncf %124 : vector<160x32xf32> to vector<160x32xbf16>
    %c128_60 = arith.constant 128 : index
    %c0_61 = arith.constant 0 : index
    %126 = vector.load %arg5[%c128_60, %c0_61] : memref<288x64xbf16, #tpu.memory_space<vmem>>, vector<32x64xbf16>
    %cst_62 = arith.constant dense<0.000000e+00> : vector<160x64xf32>
    %127 = tpu.matmul %125, %126, %cst_62 {dimension_numbers = #tpu.dot_dimension_numbers<[1], [0], [0], [1], [0, 0, 1, 1], [], []>} : vector<160x32xbf16>, vector<32x64xbf16>, vector<160x64xf32> -> vector<160x64xf32>
    %128 = arith.addf %123, %127 : vector<160x64xf32>
    %129 = vector.extract_strided_slice %102 {offsets = [18, 0], sizes = [160, 32], strides = [1, 1]} : vector<224x32xf32> to vector<160x32xf32>
    %130 = arith.truncf %129 : vector<160x32xf32> to vector<160x32xbf16>
    %c160 = arith.constant 160 : index
    %c0_63 = arith.constant 0 : index
    %131 = vector.load %arg5[%c160, %c0_63] : memref<288x64xbf16, #tpu.memory_space<vmem>>, vector<32x64xbf16>
    %cst_64 = arith.constant dense<0.000000e+00> : vector<160x64xf32>
    %132 = tpu.matmul %130, %131, %cst_64 {dimension_numbers = #tpu.dot_dimension_numbers<[1], [0], [0], [1], [0, 0, 1, 1], [], []>} : vector<160x32xbf16>, vector<32x64xbf16>, vector<160x64xf32> -> vector<160x64xf32>
    %133 = arith.addf %128, %132 : vector<160x64xf32>
    %134 = vector.extract_strided_slice %102 {offsets = [32, 0], sizes = [160, 32], strides = [1, 1]} : vector<224x32xf32> to vector<160x32xf32>
    %135 = arith.truncf %134 : vector<160x32xf32> to vector<160x32xbf16>
    %c192 = arith.constant 192 : index
    %c0_65 = arith.constant 0 : index
    %136 = vector.load %arg5[%c192, %c0_65] : memref<288x64xbf16, #tpu.memory_space<vmem>>, vector<32x64xbf16>
    %cst_66 = arith.constant dense<0.000000e+00> : vector<160x64xf32>
    %137 = tpu.matmul %135, %136, %cst_66 {dimension_numbers = #tpu.dot_dimension_numbers<[1], [0], [0], [1], [0, 0, 1, 1], [], []>} : vector<160x32xbf16>, vector<32x64xbf16>, vector<160x64xf32> -> vector<160x64xf32>
    %138 = arith.addf %133, %137 : vector<160x64xf32>
    %139 = vector.extract_strided_slice %102 {offsets = [33, 0], sizes = [160, 32], strides = [1, 1]} : vector<224x32xf32> to vector<160x32xf32>
    %140 = arith.truncf %139 : vector<160x32xf32> to vector<160x32xbf16>
    %c224 = arith.constant 224 : index
    %c0_67 = arith.constant 0 : index
    %141 = vector.load %arg5[%c224, %c0_67] : memref<288x64xbf16, #tpu.memory_space<vmem>>, vector<32x64xbf16>
    %cst_68 = arith.constant dense<0.000000e+00> : vector<160x64xf32>
    %142 = tpu.matmul %140, %141, %cst_68 {dimension_numbers = #tpu.dot_dimension_numbers<[1], [0], [0], [1], [0, 0, 1, 1], [], []>} : vector<160x32xbf16>, vector<32x64xbf16>, vector<160x64xf32> -> vector<160x64xf32>
    %143 = arith.addf %138, %142 : vector<160x64xf32>
    %144 = vector.extract_strided_slice %102 {offsets = [34, 0], sizes = [160, 32], strides = [1, 1]} : vector<224x32xf32> to vector<160x32xf32>
    %145 = arith.truncf %144 : vector<160x32xf32> to vector<160x32xbf16>
    %c256 = arith.constant 256 : index
    %c0_69 = arith.constant 0 : index
    %146 = vector.load %arg5[%c256, %c0_69] : memref<288x64xbf16, #tpu.memory_space<vmem>>, vector<32x64xbf16>
    %cst_70 = arith.constant dense<0.000000e+00> : vector<160x64xf32>
    %147 = tpu.matmul %145, %146, %cst_70 {dimension_numbers = #tpu.dot_dimension_numbers<[1], [0], [0], [1], [0, 0, 1, 1], [], []>} : vector<160x32xbf16>, vector<32x64xbf16>, vector<160x64xf32> -> vector<160x64xf32>
    %148 = arith.addf %143, %147 : vector<160x64xf32>
    %c0_71 = arith.constant 0 : index
    %c0_72 = arith.constant 0 : index
    %149 = vector.load %arg6[%c0_71, %c0_72] : memref<1x64xf32, #tpu.memory_space<vmem>>, vector<1x64xf32>
    %150 = vector.broadcast %149 : vector<1x64xf32> to vector<160x64xf32>
    %151 = arith.addf %148, %150 : vector<160x64xf32>
    %cst_73 = arith.constant 0.000000e+00 : f32
    %152 = vector.broadcast %cst_73 : f32 to vector<160x64xf32>
    %153 = arith.maximumf %151, %152 : vector<160x64xf32>
    %c0_74 = arith.constant 0 : index
    %c0_75 = arith.constant 0 : index
    %154 = vector.load %arg12[%c0_74, %c0_75] : memref<160x64xf32, #tpu.memory_space<vmem>>, vector<160x64xf32>
    tpu.vector_store %arg12[%c0_74, %c0_75], %153 {strides = array<i32>} : memref<160x64xf32, #tpu.memory_space<vmem>>, vector<160x64xf32>,
    %c0_76 = arith.constant 0 : index
    %c0_77 = arith.constant 0 : index
    %155 = vector.load %arg12[%c0_76, %c0_77] : memref<160x64xf32, #tpu.memory_space<vmem>>, vector<1x64xf32>
    %c0_78 = arith.constant 0 : index
    %c0_79 = arith.constant 0 : index
    %156 = vector.load %arg13[%c0_78, %c0_79] : memref<1x6400xf32, #tpu.memory_space<vmem>>, vector<1x64xf32>
    tpu.vector_store %arg13[%c0_78, %c0_79], %155 {strides = array<i32>} : memref<1x6400xf32, #tpu.memory_space<vmem>>, vector<1x64xf32>,
    %c1 = arith.constant 1 : index
    %c0_80 = arith.constant 0 : index
    %157 = vector.load %arg12[%c1, %c0_80] : memref<160x64xf32, #tpu.memory_space<vmem>>, vector<1x64xf32>
    %c0_81 = arith.constant 0 : index
    %c64_82 = arith.constant 64 : index
    %158 = vector.load %arg13[%c0_81, %c64_82] : memref<1x6400xf32, #tpu.memory_space<vmem>>, vector<1x64xf32>
    tpu.vector_store %arg13[%c0_81, %c64_82], %157 {strides = array<i32>} : memref<1x6400xf32, #tpu.memory_space<vmem>>, vector<1x64xf32>,
    %c2_83 = arith.constant 2 : index
    %c0_84 = arith.constant 0 : index
    %159 = vector.load %arg12[%c2_83, %c0_84] : memref<160x64xf32, #tpu.memory_space<vmem>>, vector<1x64xf32>
    %c0_85 = arith.constant 0 : index
    %c128_86 = arith.constant 128 : index
    %160 = vector.load %arg13[%c0_85, %c128_86] : memref<1x6400xf32, #tpu.memory_space<vmem>>, vector<1x64xf32>
    tpu.vector_store %arg13[%c0_85, %c128_86], %159 {strides = array<i32>} : memref<1x6400xf32, #tpu.memory_space<vmem>>, vector<1x64xf32>,
    %c3 = arith.constant 3 : index
    %c0_87 = arith.constant 0 : index
    %161 = vector.load %arg12[%c3, %c0_87] : memref<160x64xf32, #tpu.memory_space<vmem>>, vector<1x64xf32>
    %c0_88 = arith.constant 0 : index
    %c192_89 = arith.constant 192 : index
    %162 = vector.load %arg13[%c0_88, %c192_89] : memref<1x6400xf32, #tpu.memory_space<vmem>>, vector<1x64xf32>
    tpu.vector_store %arg13[%c0_88, %c192_89], %161 {strides = array<i32>} : memref<1x6400xf32, #tpu.memory_space<vmem>>, vector<1x64xf32>,
    %c4_90 = arith.constant 4 : index
    %c0_91 = arith.constant 0 : index
    %163 = vector.load %arg12[%c4_90, %c0_91] : memref<160x64xf32, #tpu.memory_space<vmem>>, vector<1x64xf32>
    %c0_92 = arith.constant 0 : index
    %c256_93 = arith.constant 256 : index
    %164 = vector.load %arg13[%c0_92, %c256_93] : memref<1x6400xf32, #tpu.memory_space<vmem>>, vector<1x64xf32>
    tpu.vector_store %arg13[%c0_92, %c256_93], %163 {strides = array<i32>} : memref<1x6400xf32, #tpu.memory_space<vmem>>, vector<1x64xf32>,
    %c5 = arith.constant 5 : index
    %c0_94 = arith.constant 0 : index
    %165 = vector.load %arg12[%c5, %c0_94] : memref<160x64xf32, #tpu.memory_space<vmem>>, vector<1x64xf32>
    %c0_95 = arith.constant 0 : index
    %c320 = arith.constant 320 : index
    %166 = vector.load %arg13[%c0_95, %c320] : memref<1x6400xf32, #tpu.memory_space<vmem>>, vector<1x64xf32>
    tpu.vector_store %arg13[%c0_95, %c320], %165 {strides = array<i32>} : memref<1x6400xf32, #tpu.memory_space<vmem>>, vector<1x64xf32>,
    %c6_96 = arith.constant 6 : index
    %c0_97 = arith.constant 0 : index
    %167 = vector.load %arg12[%c6_96, %c0_97] : memref<160x64xf32, #tpu.memory_space<vmem>>, vector<1x64xf32>
    %c0_98 = arith.constant 0 : index
    %c384 = arith.constant 384 : index
    %168 = vector.load %arg13[%c0_98, %c384] : memref<1x6400xf32, #tpu.memory_space<vmem>>, vector<1x64xf32>
    tpu.vector_store %arg13[%c0_98, %c384], %167 {strides = array<i32>} : memref<1x6400xf32, #tpu.memory_space<vmem>>, vector<1x64xf32>,
    %c7 = arith.constant 7 : index
    %c0_99 = arith.constant 0 : index
    %169 = vector.load %arg12[%c7, %c0_99] : memref<160x64xf32, #tpu.memory_space<vmem>>, vector<1x64xf32>
    %c0_100 = arith.constant 0 : index
    %c448 = arith.constant 448 : index
    %170 = vector.load %arg13[%c0_100, %c448] : memref<1x6400xf32, #tpu.memory_space<vmem>>, vector<1x64xf32>
    tpu.vector_store %arg13[%c0_100, %c448], %169 {strides = array<i32>} : memref<1x6400xf32, #tpu.memory_space<vmem>>, vector<1x64xf32>,
    %c8_101 = arith.constant 8 : index
    %c0_102 = arith.constant 0 : index
    %171 = vector.load %arg12[%c8_101, %c0_102] : memref<160x64xf32, #tpu.memory_space<vmem>>, vector<1x64xf32>
    %c0_103 = arith.constant 0 : index
    %c512 = arith.constant 512 : index
    %172 = vector.load %arg13[%c0_103, %c512] : memref<1x6400xf32, #tpu.memory_space<vmem>>, vector<1x64xf32>
    tpu.vector_store %arg13[%c0_103, %c512], %171 {strides = array<i32>} : memref<1x6400xf32, #tpu.memory_space<vmem>>, vector<1x64xf32>,
    %c9 = arith.constant 9 : index
    %c0_104 = arith.constant 0 : index
    %173 = vector.load %arg12[%c9, %c0_104] : memref<160x64xf32, #tpu.memory_space<vmem>>, vector<1x64xf32>
    %c0_105 = arith.constant 0 : index
    %c576 = arith.constant 576 : index
    %174 = vector.load %arg13[%c0_105, %c576] : memref<1x6400xf32, #tpu.memory_space<vmem>>, vector<1x64xf32>
    tpu.vector_store %arg13[%c0_105, %c576], %173 {strides = array<i32>} : memref<1x6400xf32, #tpu.memory_space<vmem>>, vector<1x64xf32>,
    %c16_106 = arith.constant 16 : index
    %c0_107 = arith.constant 0 : index
    %175 = vector.load %arg12[%c16_106, %c0_107] : memref<160x64xf32, #tpu.memory_space<vmem>>, vector<1x64xf32>
    %c0_108 = arith.constant 0 : index
    %c640 = arith.constant 640 : index
    %176 = vector.load %arg13[%c0_108, %c640] : memref<1x6400xf32, #tpu.memory_space<vmem>>, vector<1x64xf32>
    tpu.vector_store %arg13[%c0_108, %c640], %175 {strides = array<i32>} : memref<1x6400xf32, #tpu.memory_space<vmem>>, vector<1x64xf32>,
    %c17 = arith.constant 17 : index
    %c0_109 = arith.constant 0 : index
    %177 = vector.load %arg12[%c17, %c0_109] : memref<160x64xf32, #tpu.memory_space<vmem>>, vector<1x64xf32>
    %c0_110 = arith.constant 0 : index
    %c704 = arith.constant 704 : index
    %178 = vector.load %arg13[%c0_110, %c704] : memref<1x6400xf32, #tpu.memory_space<vmem>>, vector<1x64xf32>
    tpu.vector_store %arg13[%c0_110, %c704], %177 {strides = array<i32>} : memref<1x6400xf32, #tpu.memory_space<vmem>>, vector<1x64xf32>,
    %c18 = arith.constant 18 : index
    %c0_111 = arith.constant 0 : index
    %179 = vector.load %arg12[%c18, %c0_111] : memref<160x64xf32, #tpu.memory_space<vmem>>, vector<1x64xf32>
    %c0_112 = arith.constant 0 : index
    %c768 = arith.constant 768 : index
    %180 = vector.load %arg13[%c0_112, %c768] : memref<1x6400xf32, #tpu.memory_space<vmem>>, vector<1x64xf32>
    tpu.vector_store %arg13[%c0_112, %c768], %179 {strides = array<i32>} : memref<1x6400xf32, #tpu.memory_space<vmem>>, vector<1x64xf32>,
    %c19 = arith.constant 19 : index
    %c0_113 = arith.constant 0 : index
    %181 = vector.load %arg12[%c19, %c0_113] : memref<160x64xf32, #tpu.memory_space<vmem>>, vector<1x64xf32>
    %c0_114 = arith.constant 0 : index
    %c832 = arith.constant 832 : index
    %182 = vector.load %arg13[%c0_114, %c832] : memref<1x6400xf32, #tpu.memory_space<vmem>>, vector<1x64xf32>
    tpu.vector_store %arg13[%c0_114, %c832], %181 {strides = array<i32>} : memref<1x6400xf32, #tpu.memory_space<vmem>>, vector<1x64xf32>,
    %c20 = arith.constant 20 : index
    %c0_115 = arith.constant 0 : index
    %183 = vector.load %arg12[%c20, %c0_115] : memref<160x64xf32, #tpu.memory_space<vmem>>, vector<1x64xf32>
    %c0_116 = arith.constant 0 : index
    %c896 = arith.constant 896 : index
    %184 = vector.load %arg13[%c0_116, %c896] : memref<1x6400xf32, #tpu.memory_space<vmem>>, vector<1x64xf32>
    tpu.vector_store %arg13[%c0_116, %c896], %183 {strides = array<i32>} : memref<1x6400xf32, #tpu.memory_space<vmem>>, vector<1x64xf32>,
    %c21 = arith.constant 21 : index
    %c0_117 = arith.constant 0 : index
    %185 = vector.load %arg12[%c21, %c0_117] : memref<160x64xf32, #tpu.memory_space<vmem>>, vector<1x64xf32>
    %c0_118 = arith.constant 0 : index
    %c960 = arith.constant 960 : index
    %186 = vector.load %arg13[%c0_118, %c960] : memref<1x6400xf32, #tpu.memory_space<vmem>>, vector<1x64xf32>
    tpu.vector_store %arg13[%c0_118, %c960], %185 {strides = array<i32>} : memref<1x6400xf32, #tpu.memory_space<vmem>>, vector<1x64xf32>,
    %c22 = arith.constant 22 : index
    %c0_119 = arith.constant 0 : index
    %187 = vector.load %arg12[%c22, %c0_119] : memref<160x64xf32, #tpu.memory_space<vmem>>, vector<1x64xf32>
    %c0_120 = arith.constant 0 : index
    %c1024 = arith.constant 1024 : index
    %188 = vector.load %arg13[%c0_120, %c1024] : memref<1x6400xf32, #tpu.memory_space<vmem>>, vector<1x64xf32>
    tpu.vector_store %arg13[%c0_120, %c1024], %187 {strides = array<i32>} : memref<1x6400xf32, #tpu.memory_space<vmem>>, vector<1x64xf32>,
    %c23 = arith.constant 23 : index
    %c0_121 = arith.constant 0 : index
    %189 = vector.load %arg12[%c23, %c0_121] : memref<160x64xf32, #tpu.memory_space<vmem>>, vector<1x64xf32>
    %c0_122 = arith.constant 0 : index
    %c1088 = arith.constant 1088 : index
    %190 = vector.load %arg13[%c0_122, %c1088] : memref<1x6400xf32, #tpu.memory_space<vmem>>, vector<1x64xf32>
    tpu.vector_store %arg13[%c0_122, %c1088], %189 {strides = array<i32>} : memref<1x6400xf32, #tpu.memory_space<vmem>>, vector<1x64xf32>,
    %c24 = arith.constant 24 : index
    %c0_123 = arith.constant 0 : index
    %191 = vector.load %arg12[%c24, %c0_123] : memref<160x64xf32, #tpu.memory_space<vmem>>, vector<1x64xf32>
    %c0_124 = arith.constant 0 : index
    %c1152 = arith.constant 1152 : index
    %192 = vector.load %arg13[%c0_124, %c1152] : memref<1x6400xf32, #tpu.memory_space<vmem>>, vector<1x64xf32>
    tpu.vector_store %arg13[%c0_124, %c1152], %191 {strides = array<i32>} : memref<1x6400xf32, #tpu.memory_space<vmem>>, vector<1x64xf32>,
    %c25 = arith.constant 25 : index
    %c0_125 = arith.constant 0 : index
    %193 = vector.load %arg12[%c25, %c0_125] : memref<160x64xf32, #tpu.memory_space<vmem>>, vector<1x64xf32>
    %c0_126 = arith.constant 0 : index
    %c1216 = arith.constant 1216 : index
    %194 = vector.load %arg13[%c0_126, %c1216] : memref<1x6400xf32, #tpu.memory_space<vmem>>, vector<1x64xf32>
    tpu.vector_store %arg13[%c0_126, %c1216], %193 {strides = array<i32>} : memref<1x6400xf32, #tpu.memory_space<vmem>>, vector<1x64xf32>,
    %c32_127 = arith.constant 32 : index
    %c0_128 = arith.constant 0 : index
    %195 = vector.load %arg12[%c32_127, %c0_128] : memref<160x64xf32, #tpu.memory_space<vmem>>, vector<1x64xf32>
    %c0_129 = arith.constant 0 : index
    %c1280 = arith.constant 1280 : index
    %196 = vector.load %arg13[%c0_129, %c1280] : memref<1x6400xf32, #tpu.memory_space<vmem>>, vector<1x64xf32>
    tpu.vector_store %arg13[%c0_129, %c1280], %195 {strides = array<i32>} : memref<1x6400xf32, #tpu.memory_space<vmem>>, vector<1x64xf32>,
    %c33 = arith.constant 33 : index
    %c0_130 = arith.constant 0 : index
    %197 = vector.load %arg12[%c33, %c0_130] : memref<160x64xf32, #tpu.memory_space<vmem>>, vector<1x64xf32>
    %c0_131 = arith.constant 0 : index
    %c1344 = arith.constant 1344 : index
    %198 = vector.load %arg13[%c0_131, %c1344] : memref<1x6400xf32, #tpu.memory_space<vmem>>, vector<1x64xf32>
    tpu.vector_store %arg13[%c0_131, %c1344], %197 {strides = array<i32>} : memref<1x6400xf32, #tpu.memory_space<vmem>>, vector<1x64xf32>,
    %c34 = arith.constant 34 : index
    %c0_132 = arith.constant 0 : index
    %199 = vector.load %arg12[%c34, %c0_132] : memref<160x64xf32, #tpu.memory_space<vmem>>, vector<1x64xf32>
    %c0_133 = arith.constant 0 : index
    %c1408 = arith.constant 1408 : index
    %200 = vector.load %arg13[%c0_133, %c1408] : memref<1x6400xf32, #tpu.memory_space<vmem>>, vector<1x64xf32>
    tpu.vector_store %arg13[%c0_133, %c1408], %199 {strides = array<i32>} : memref<1x6400xf32, #tpu.memory_space<vmem>>, vector<1x64xf32>,
    %c35 = arith.constant 35 : index
    %c0_134 = arith.constant 0 : index
    %201 = vector.load %arg12[%c35, %c0_134] : memref<160x64xf32, #tpu.memory_space<vmem>>, vector<1x64xf32>
    %c0_135 = arith.constant 0 : index
    %c1472 = arith.constant 1472 : index
    %202 = vector.load %arg13[%c0_135, %c1472] : memref<1x6400xf32, #tpu.memory_space<vmem>>, vector<1x64xf32>
    tpu.vector_store %arg13[%c0_135, %c1472], %201 {strides = array<i32>} : memref<1x6400xf32, #tpu.memory_space<vmem>>, vector<1x64xf32>,
    %c36 = arith.constant 36 : index
    %c0_136 = arith.constant 0 : index
    %203 = vector.load %arg12[%c36, %c0_136] : memref<160x64xf32, #tpu.memory_space<vmem>>, vector<1x64xf32>
    %c0_137 = arith.constant 0 : index
    %c1536 = arith.constant 1536 : index
    %204 = vector.load %arg13[%c0_137, %c1536] : memref<1x6400xf32, #tpu.memory_space<vmem>>, vector<1x64xf32>
    tpu.vector_store %arg13[%c0_137, %c1536], %203 {strides = array<i32>} : memref<1x6400xf32, #tpu.memory_space<vmem>>, vector<1x64xf32>,
    %c37 = arith.constant 37 : index
    %c0_138 = arith.constant 0 : index
    %205 = vector.load %arg12[%c37, %c0_138] : memref<160x64xf32, #tpu.memory_space<vmem>>, vector<1x64xf32>
    %c0_139 = arith.constant 0 : index
    %c1600 = arith.constant 1600 : index
    %206 = vector.load %arg13[%c0_139, %c1600] : memref<1x6400xf32, #tpu.memory_space<vmem>>, vector<1x64xf32>
    tpu.vector_store %arg13[%c0_139, %c1600], %205 {strides = array<i32>} : memref<1x6400xf32, #tpu.memory_space<vmem>>, vector<1x64xf32>,
    %c38 = arith.constant 38 : index
    %c0_140 = arith.constant 0 : index
    %207 = vector.load %arg12[%c38, %c0_140] : memref<160x64xf32, #tpu.memory_space<vmem>>, vector<1x64xf32>
    %c0_141 = arith.constant 0 : index
    %c1664 = arith.constant 1664 : index
    %208 = vector.load %arg13[%c0_141, %c1664] : memref<1x6400xf32, #tpu.memory_space<vmem>>, vector<1x64xf32>
    tpu.vector_store %arg13[%c0_141, %c1664], %207 {strides = array<i32>} : memref<1x6400xf32, #tpu.memory_space<vmem>>, vector<1x64xf32>,
    %c39 = arith.constant 39 : index
    %c0_142 = arith.constant 0 : index
    %209 = vector.load %arg12[%c39, %c0_142] : memref<160x64xf32, #tpu.memory_space<vmem>>, vector<1x64xf32>
    %c0_143 = arith.constant 0 : index
    %c1728 = arith.constant 1728 : index
    %210 = vector.load %arg13[%c0_143, %c1728] : memref<1x6400xf32, #tpu.memory_space<vmem>>, vector<1x64xf32>
    tpu.vector_store %arg13[%c0_143, %c1728], %209 {strides = array<i32>} : memref<1x6400xf32, #tpu.memory_space<vmem>>, vector<1x64xf32>,
    %c40 = arith.constant 40 : index
    %c0_144 = arith.constant 0 : index
    %211 = vector.load %arg12[%c40, %c0_144] : memref<160x64xf32, #tpu.memory_space<vmem>>, vector<1x64xf32>
    %c0_145 = arith.constant 0 : index
    %c1792 = arith.constant 1792 : index
    %212 = vector.load %arg13[%c0_145, %c1792] : memref<1x6400xf32, #tpu.memory_space<vmem>>, vector<1x64xf32>
    tpu.vector_store %arg13[%c0_145, %c1792], %211 {strides = array<i32>} : memref<1x6400xf32, #tpu.memory_space<vmem>>, vector<1x64xf32>,
    %c41 = arith.constant 41 : index
    %c0_146 = arith.constant 0 : index
    %213 = vector.load %arg12[%c41, %c0_146] : memref<160x64xf32, #tpu.memory_space<vmem>>, vector<1x64xf32>
    %c0_147 = arith.constant 0 : index
    %c1856 = arith.constant 1856 : index
    %214 = vector.load %arg13[%c0_147, %c1856] : memref<1x6400xf32, #tpu.memory_space<vmem>>, vector<1x64xf32>
    tpu.vector_store %arg13[%c0_147, %c1856], %213 {strides = array<i32>} : memref<1x6400xf32, #tpu.memory_space<vmem>>, vector<1x64xf32>,
    %c48_148 = arith.constant 48 : index
    %c0_149 = arith.constant 0 : index
    %215 = vector.load %arg12[%c48_148, %c0_149] : memref<160x64xf32, #tpu.memory_space<vmem>>, vector<1x64xf32>
    %c0_150 = arith.constant 0 : index
    %c1920 = arith.constant 1920 : index
    %216 = vector.load %arg13[%c0_150, %c1920] : memref<1x6400xf32, #tpu.memory_space<vmem>>, vector<1x64xf32>
    tpu.vector_store %arg13[%c0_150, %c1920], %215 {strides = array<i32>} : memref<1x6400xf32, #tpu.memory_space<vmem>>, vector<1x64xf32>,
    %c49 = arith.constant 49 : index
    %c0_151 = arith.constant 0 : index
    %217 = vector.load %arg12[%c49, %c0_151] : memref<160x64xf32, #tpu.memory_space<vmem>>, vector<1x64xf32>
    %c0_152 = arith.constant 0 : index
    %c1984 = arith.constant 1984 : index
    %218 = vector.load %arg13[%c0_152, %c1984] : memref<1x6400xf32, #tpu.memory_space<vmem>>, vector<1x64xf32>
    tpu.vector_store %arg13[%c0_152, %c1984], %217 {strides = array<i32>} : memref<1x6400xf32, #tpu.memory_space<vmem>>, vector<1x64xf32>,
    %c50 = arith.constant 50 : index
    %c0_153 = arith.constant 0 : index
    %219 = vector.load %arg12[%c50, %c0_153] : memref<160x64xf32, #tpu.memory_space<vmem>>, vector<1x64xf32>
    %c0_154 = arith.constant 0 : index
    %c2048 = arith.constant 2048 : index
    %220 = vector.load %arg13[%c0_154, %c2048] : memref<1x6400xf32, #tpu.memory_space<vmem>>, vector<1x64xf32>
    tpu.vector_store %arg13[%c0_154, %c2048], %219 {strides = array<i32>} : memref<1x6400xf32, #tpu.memory_space<vmem>>, vector<1x64xf32>,
    %c51 = arith.constant 51 : index
    %c0_155 = arith.constant 0 : index
    %221 = vector.load %arg12[%c51, %c0_155] : memref<160x64xf32, #tpu.memory_space<vmem>>, vector<1x64xf32>
    %c0_156 = arith.constant 0 : index
    %c2112 = arith.constant 2112 : index
    %222 = vector.load %arg13[%c0_156, %c2112] : memref<1x6400xf32, #tpu.memory_space<vmem>>, vector<1x64xf32>
    tpu.vector_store %arg13[%c0_156, %c2112], %221 {strides = array<i32>} : memref<1x6400xf32, #tpu.memory_space<vmem>>, vector<1x64xf32>,
    %c52 = arith.constant 52 : index
    %c0_157 = arith.constant 0 : index
    %223 = vector.load %arg12[%c52, %c0_157] : memref<160x64xf32, #tpu.memory_space<vmem>>, vector<1x64xf32>
    %c0_158 = arith.constant 0 : index
    %c2176 = arith.constant 2176 : index
    %224 = vector.load %arg13[%c0_158, %c2176] : memref<1x6400xf32, #tpu.memory_space<vmem>>, vector<1x64xf32>
    tpu.vector_store %arg13[%c0_158, %c2176], %223 {strides = array<i32>} : memref<1x6400xf32, #tpu.memory_space<vmem>>, vector<1x64xf32>,
    %c53 = arith.constant 53 : index
    %c0_159 = arith.constant 0 : index
    %225 = vector.load %arg12[%c53, %c0_159] : memref<160x64xf32, #tpu.memory_space<vmem>>, vector<1x64xf32>
    %c0_160 = arith.constant 0 : index
    %c2240 = arith.constant 2240 : index
    %226 = vector.load %arg13[%c0_160, %c2240] : memref<1x6400xf32, #tpu.memory_space<vmem>>, vector<1x64xf32>
    tpu.vector_store %arg13[%c0_160, %c2240], %225 {strides = array<i32>} : memref<1x6400xf32, #tpu.memory_space<vmem>>, vector<1x64xf32>,
    %c54 = arith.constant 54 : index
    %c0_161 = arith.constant 0 : index
    %227 = vector.load %arg12[%c54, %c0_161] : memref<160x64xf32, #tpu.memory_space<vmem>>, vector<1x64xf32>
    %c0_162 = arith.constant 0 : index
    %c2304 = arith.constant 2304 : index
    %228 = vector.load %arg13[%c0_162, %c2304] : memref<1x6400xf32, #tpu.memory_space<vmem>>, vector<1x64xf32>
    tpu.vector_store %arg13[%c0_162, %c2304], %227 {strides = array<i32>} : memref<1x6400xf32, #tpu.memory_space<vmem>>, vector<1x64xf32>,
    %c55 = arith.constant 55 : index
    %c0_163 = arith.constant 0 : index
    %229 = vector.load %arg12[%c55, %c0_163] : memref<160x64xf32, #tpu.memory_space<vmem>>, vector<1x64xf32>
    %c0_164 = arith.constant 0 : index
    %c2368 = arith.constant 2368 : index
    %230 = vector.load %arg13[%c0_164, %c2368] : memref<1x6400xf32, #tpu.memory_space<vmem>>, vector<1x64xf32>
    tpu.vector_store %arg13[%c0_164, %c2368], %229 {strides = array<i32>} : memref<1x6400xf32, #tpu.memory_space<vmem>>, vector<1x64xf32>,
    %c56 = arith.constant 56 : index
    %c0_165 = arith.constant 0 : index
    %231 = vector.load %arg12[%c56, %c0_165] : memref<160x64xf32, #tpu.memory_space<vmem>>, vector<1x64xf32>
    %c0_166 = arith.constant 0 : index
    %c2432 = arith.constant 2432 : index
    %232 = vector.load %arg13[%c0_166, %c2432] : memref<1x6400xf32, #tpu.memory_space<vmem>>, vector<1x64xf32>
    tpu.vector_store %arg13[%c0_166, %c2432], %231 {strides = array<i32>} : memref<1x6400xf32, #tpu.memory_space<vmem>>, vector<1x64xf32>,
    %c57 = arith.constant 57 : index
    %c0_167 = arith.constant 0 : index
    %233 = vector.load %arg12[%c57, %c0_167] : memref<160x64xf32, #tpu.memory_space<vmem>>, vector<1x64xf32>
    %c0_168 = arith.constant 0 : index
    %c2496 = arith.constant 2496 : index
    %234 = vector.load %arg13[%c0_168, %c2496] : memref<1x6400xf32, #tpu.memory_space<vmem>>, vector<1x64xf32>
    tpu.vector_store %arg13[%c0_168, %c2496], %233 {strides = array<i32>} : memref<1x6400xf32, #tpu.memory_space<vmem>>, vector<1x64xf32>,
    %c64_169 = arith.constant 64 : index
    %c0_170 = arith.constant 0 : index
    %235 = vector.load %arg12[%c64_169, %c0_170] : memref<160x64xf32, #tpu.memory_space<vmem>>, vector<1x64xf32>
    %c0_171 = arith.constant 0 : index
    %c2560 = arith.constant 2560 : index
    %236 = vector.load %arg13[%c0_171, %c2560] : memref<1x6400xf32, #tpu.memory_space<vmem>>, vector<1x64xf32>
    tpu.vector_store %arg13[%c0_171, %c2560], %235 {strides = array<i32>} : memref<1x6400xf32, #tpu.memory_space<vmem>>, vector<1x64xf32>,
    %c65 = arith.constant 65 : index
    %c0_172 = arith.constant 0 : index
    %237 = vector.load %arg12[%c65, %c0_172] : memref<160x64xf32, #tpu.memory_space<vmem>>, vector<1x64xf32>
    %c0_173 = arith.constant 0 : index
    %c2624 = arith.constant 2624 : index
    %238 = vector.load %arg13[%c0_173, %c2624] : memref<1x6400xf32, #tpu.memory_space<vmem>>, vector<1x64xf32>
    tpu.vector_store %arg13[%c0_173, %c2624], %237 {strides = array<i32>} : memref<1x6400xf32, #tpu.memory_space<vmem>>, vector<1x64xf32>,
    %c66 = arith.constant 66 : index
    %c0_174 = arith.constant 0 : index
    %239 = vector.load %arg12[%c66, %c0_174] : memref<160x64xf32, #tpu.memory_space<vmem>>, vector<1x64xf32>
    %c0_175 = arith.constant 0 : index
    %c2688 = arith.constant 2688 : index
    %240 = vector.load %arg13[%c0_175, %c2688] : memref<1x6400xf32, #tpu.memory_space<vmem>>, vector<1x64xf32>
    tpu.vector_store %arg13[%c0_175, %c2688], %239 {strides = array<i32>} : memref<1x6400xf32, #tpu.memory_space<vmem>>, vector<1x64xf32>,
    %c67 = arith.constant 67 : index
    %c0_176 = arith.constant 0 : index
    %241 = vector.load %arg12[%c67, %c0_176] : memref<160x64xf32, #tpu.memory_space<vmem>>, vector<1x64xf32>
    %c0_177 = arith.constant 0 : index
    %c2752 = arith.constant 2752 : index
    %242 = vector.load %arg13[%c0_177, %c2752] : memref<1x6400xf32, #tpu.memory_space<vmem>>, vector<1x64xf32>
    tpu.vector_store %arg13[%c0_177, %c2752], %241 {strides = array<i32>} : memref<1x6400xf32, #tpu.memory_space<vmem>>, vector<1x64xf32>,
    %c68 = arith.constant 68 : index
    %c0_178 = arith.constant 0 : index
    %243 = vector.load %arg12[%c68, %c0_178] : memref<160x64xf32, #tpu.memory_space<vmem>>, vector<1x64xf32>
    %c0_179 = arith.constant 0 : index
    %c2816 = arith.constant 2816 : index
    %244 = vector.load %arg13[%c0_179, %c2816] : memref<1x6400xf32, #tpu.memory_space<vmem>>, vector<1x64xf32>
    tpu.vector_store %arg13[%c0_179, %c2816], %243 {strides = array<i32>} : memref<1x6400xf32, #tpu.memory_space<vmem>>, vector<1x64xf32>,
    %c69 = arith.constant 69 : index
    %c0_180 = arith.constant 0 : index
    %245 = vector.load %arg12[%c69, %c0_180] : memref<160x64xf32, #tpu.memory_space<vmem>>, vector<1x64xf32>
    %c0_181 = arith.constant 0 : index
    %c2880 = arith.constant 2880 : index
    %246 = vector.load %arg13[%c0_181, %c2880] : memref<1x6400xf32, #tpu.memory_space<vmem>>, vector<1x64xf32>
    tpu.vector_store %arg13[%c0_181, %c2880], %245 {strides = array<i32>} : memref<1x6400xf32, #tpu.memory_space<vmem>>, vector<1x64xf32>,
    %c70 = arith.constant 70 : index
    %c0_182 = arith.constant 0 : index
    %247 = vector.load %arg12[%c70, %c0_182] : memref<160x64xf32, #tpu.memory_space<vmem>>, vector<1x64xf32>
    %c0_183 = arith.constant 0 : index
    %c2944 = arith.constant 2944 : index
    %248 = vector.load %arg13[%c0_183, %c2944] : memref<1x6400xf32, #tpu.memory_space<vmem>>, vector<1x64xf32>
    tpu.vector_store %arg13[%c0_183, %c2944], %247 {strides = array<i32>} : memref<1x6400xf32, #tpu.memory_space<vmem>>, vector<1x64xf32>,
    %c71 = arith.constant 71 : index
    %c0_184 = arith.constant 0 : index
    %249 = vector.load %arg12[%c71, %c0_184] : memref<160x64xf32, #tpu.memory_space<vmem>>, vector<1x64xf32>
    %c0_185 = arith.constant 0 : index
    %c3008 = arith.constant 3008 : index
    %250 = vector.load %arg13[%c0_185, %c3008] : memref<1x6400xf32, #tpu.memory_space<vmem>>, vector<1x64xf32>
    tpu.vector_store %arg13[%c0_185, %c3008], %249 {strides = array<i32>} : memref<1x6400xf32, #tpu.memory_space<vmem>>, vector<1x64xf32>,
    %c72 = arith.constant 72 : index
    %c0_186 = arith.constant 0 : index
    %251 = vector.load %arg12[%c72, %c0_186] : memref<160x64xf32, #tpu.memory_space<vmem>>, vector<1x64xf32>
    %c0_187 = arith.constant 0 : index
    %c3072 = arith.constant 3072 : index
    %252 = vector.load %arg13[%c0_187, %c3072] : memref<1x6400xf32, #tpu.memory_space<vmem>>, vector<1x64xf32>
    tpu.vector_store %arg13[%c0_187, %c3072], %251 {strides = array<i32>} : memref<1x6400xf32, #tpu.memory_space<vmem>>, vector<1x64xf32>,
    %c73 = arith.constant 73 : index
    %c0_188 = arith.constant 0 : index
    %253 = vector.load %arg12[%c73, %c0_188] : memref<160x64xf32, #tpu.memory_space<vmem>>, vector<1x64xf32>
    %c0_189 = arith.constant 0 : index
    %c3136 = arith.constant 3136 : index
    %254 = vector.load %arg13[%c0_189, %c3136] : memref<1x6400xf32, #tpu.memory_space<vmem>>, vector<1x64xf32>
    tpu.vector_store %arg13[%c0_189, %c3136], %253 {strides = array<i32>} : memref<1x6400xf32, #tpu.memory_space<vmem>>, vector<1x64xf32>,
    %c80_190 = arith.constant 80 : index
    %c0_191 = arith.constant 0 : index
    %255 = vector.load %arg12[%c80_190, %c0_191] : memref<160x64xf32, #tpu.memory_space<vmem>>, vector<1x64xf32>
    %c0_192 = arith.constant 0 : index
    %c3200 = arith.constant 3200 : index
    %256 = vector.load %arg13[%c0_192, %c3200] : memref<1x6400xf32, #tpu.memory_space<vmem>>, vector<1x64xf32>
    tpu.vector_store %arg13[%c0_192, %c3200], %255 {strides = array<i32>} : memref<1x6400xf32, #tpu.memory_space<vmem>>, vector<1x64xf32>,
    %c81 = arith.constant 81 : index
    %c0_193 = arith.constant 0 : index
    %257 = vector.load %arg12[%c81, %c0_193] : memref<160x64xf32, #tpu.memory_space<vmem>>, vector<1x64xf32>
    %c0_194 = arith.constant 0 : index
    %c3264 = arith.constant 3264 : index
    %258 = vector.load %arg13[%c0_194, %c3264] : memref<1x6400xf32, #tpu.memory_space<vmem>>, vector<1x64xf32>
    tpu.vector_store %arg13[%c0_194, %c3264], %257 {strides = array<i32>} : memref<1x6400xf32, #tpu.memory_space<vmem>>, vector<1x64xf32>,
    %c82 = arith.constant 82 : index
    %c0_195 = arith.constant 0 : index
    %259 = vector.load %arg12[%c82, %c0_195] : memref<160x64xf32, #tpu.memory_space<vmem>>, vector<1x64xf32>
    %c0_196 = arith.constant 0 : index
    %c3328 = arith.constant 3328 : index
    %260 = vector.load %arg13[%c0_196, %c3328] : memref<1x6400xf32, #tpu.memory_space<vmem>>, vector<1x64xf32>
    tpu.vector_store %arg13[%c0_196, %c3328], %259 {strides = array<i32>} : memref<1x6400xf32, #tpu.memory_space<vmem>>, vector<1x64xf32>,
    %c83 = arith.constant 83 : index
    %c0_197 = arith.constant 0 : index
    %261 = vector.load %arg12[%c83, %c0_197] : memref<160x64xf32, #tpu.memory_space<vmem>>, vector<1x64xf32>
    %c0_198 = arith.constant 0 : index
    %c3392 = arith.constant 3392 : index
    %262 = vector.load %arg13[%c0_198, %c3392] : memref<1x6400xf32, #tpu.memory_space<vmem>>, vector<1x64xf32>
    tpu.vector_store %arg13[%c0_198, %c3392], %261 {strides = array<i32>} : memref<1x6400xf32, #tpu.memory_space<vmem>>, vector<1x64xf32>,
    %c84 = arith.constant 84 : index
    %c0_199 = arith.constant 0 : index
    %263 = vector.load %arg12[%c84, %c0_199] : memref<160x64xf32, #tpu.memory_space<vmem>>, vector<1x64xf32>
    %c0_200 = arith.constant 0 : index
    %c3456 = arith.constant 3456 : index
    %264 = vector.load %arg13[%c0_200, %c3456] : memref<1x6400xf32, #tpu.memory_space<vmem>>, vector<1x64xf32>
    tpu.vector_store %arg13[%c0_200, %c3456], %263 {strides = array<i32>} : memref<1x6400xf32, #tpu.memory_space<vmem>>, vector<1x64xf32>,
    %c85 = arith.constant 85 : index
    %c0_201 = arith.constant 0 : index
    %265 = vector.load %arg12[%c85, %c0_201] : memref<160x64xf32, #tpu.memory_space<vmem>>, vector<1x64xf32>
    %c0_202 = arith.constant 0 : index
    %c3520 = arith.constant 3520 : index
    %266 = vector.load %arg13[%c0_202, %c3520] : memref<1x6400xf32, #tpu.memory_space<vmem>>, vector<1x64xf32>
    tpu.vector_store %arg13[%c0_202, %c3520], %265 {strides = array<i32>} : memref<1x6400xf32, #tpu.memory_space<vmem>>, vector<1x64xf32>,
    %c86 = arith.constant 86 : index
    %c0_203 = arith.constant 0 : index
    %267 = vector.load %arg12[%c86, %c0_203] : memref<160x64xf32, #tpu.memory_space<vmem>>, vector<1x64xf32>
    %c0_204 = arith.constant 0 : index
    %c3584 = arith.constant 3584 : index
    %268 = vector.load %arg13[%c0_204, %c3584] : memref<1x6400xf32, #tpu.memory_space<vmem>>, vector<1x64xf32>
    tpu.vector_store %arg13[%c0_204, %c3584], %267 {strides = array<i32>} : memref<1x6400xf32, #tpu.memory_space<vmem>>, vector<1x64xf32>,
    %c87 = arith.constant 87 : index
    %c0_205 = arith.constant 0 : index
    %269 = vector.load %arg12[%c87, %c0_205] : memref<160x64xf32, #tpu.memory_space<vmem>>, vector<1x64xf32>
    %c0_206 = arith.constant 0 : index
    %c3648 = arith.constant 3648 : index
    %270 = vector.load %arg13[%c0_206, %c3648] : memref<1x6400xf32, #tpu.memory_space<vmem>>, vector<1x64xf32>
    tpu.vector_store %arg13[%c0_206, %c3648], %269 {strides = array<i32>} : memref<1x6400xf32, #tpu.memory_space<vmem>>, vector<1x64xf32>,
    %c88 = arith.constant 88 : index
    %c0_207 = arith.constant 0 : index
    %271 = vector.load %arg12[%c88, %c0_207] : memref<160x64xf32, #tpu.memory_space<vmem>>, vector<1x64xf32>
    %c0_208 = arith.constant 0 : index
    %c3712 = arith.constant 3712 : index
    %272 = vector.load %arg13[%c0_208, %c3712] : memref<1x6400xf32, #tpu.memory_space<vmem>>, vector<1x64xf32>
    tpu.vector_store %arg13[%c0_208, %c3712], %271 {strides = array<i32>} : memref<1x6400xf32, #tpu.memory_space<vmem>>, vector<1x64xf32>,
    %c89 = arith.constant 89 : index
    %c0_209 = arith.constant 0 : index
    %273 = vector.load %arg12[%c89, %c0_209] : memref<160x64xf32, #tpu.memory_space<vmem>>, vector<1x64xf32>
    %c0_210 = arith.constant 0 : index
    %c3776 = arith.constant 3776 : index
    %274 = vector.load %arg13[%c0_210, %c3776] : memref<1x6400xf32, #tpu.memory_space<vmem>>, vector<1x64xf32>
    tpu.vector_store %arg13[%c0_210, %c3776], %273 {strides = array<i32>} : memref<1x6400xf32, #tpu.memory_space<vmem>>, vector<1x64xf32>,
    %c96_211 = arith.constant 96 : index
    %c0_212 = arith.constant 0 : index
    %275 = vector.load %arg12[%c96_211, %c0_212] : memref<160x64xf32, #tpu.memory_space<vmem>>, vector<1x64xf32>
    %c0_213 = arith.constant 0 : index
    %c3840 = arith.constant 3840 : index
    %276 = vector.load %arg13[%c0_213, %c3840] : memref<1x6400xf32, #tpu.memory_space<vmem>>, vector<1x64xf32>
    tpu.vector_store %arg13[%c0_213, %c3840], %275 {strides = array<i32>} : memref<1x6400xf32, #tpu.memory_space<vmem>>, vector<1x64xf32>,
    %c97 = arith.constant 97 : index
    %c0_214 = arith.constant 0 : index
    %277 = vector.load %arg12[%c97, %c0_214] : memref<160x64xf32, #tpu.memory_space<vmem>>, vector<1x64xf32>
    %c0_215 = arith.constant 0 : index
    %c3904 = arith.constant 3904 : index
    %278 = vector.load %arg13[%c0_215, %c3904] : memref<1x6400xf32, #tpu.memory_space<vmem>>, vector<1x64xf32>
    tpu.vector_store %arg13[%c0_215, %c3904], %277 {strides = array<i32>} : memref<1x6400xf32, #tpu.memory_space<vmem>>, vector<1x64xf32>,
    %c98 = arith.constant 98 : index
    %c0_216 = arith.constant 0 : index
    %279 = vector.load %arg12[%c98, %c0_216] : memref<160x64xf32, #tpu.memory_space<vmem>>, vector<1x64xf32>
    %c0_217 = arith.constant 0 : index
    %c3968 = arith.constant 3968 : index
    %280 = vector.load %arg13[%c0_217, %c3968] : memref<1x6400xf32, #tpu.memory_space<vmem>>, vector<1x64xf32>
    tpu.vector_store %arg13[%c0_217, %c3968], %279 {strides = array<i32>} : memref<1x6400xf32, #tpu.memory_space<vmem>>, vector<1x64xf32>,
    %c99 = arith.constant 99 : index
    %c0_218 = arith.constant 0 : index
    %281 = vector.load %arg12[%c99, %c0_218] : memref<160x64xf32, #tpu.memory_space<vmem>>, vector<1x64xf32>
    %c0_219 = arith.constant 0 : index
    %c4032 = arith.constant 4032 : index
    %282 = vector.load %arg13[%c0_219, %c4032] : memref<1x6400xf32, #tpu.memory_space<vmem>>, vector<1x64xf32>
    tpu.vector_store %arg13[%c0_219, %c4032], %281 {strides = array<i32>} : memref<1x6400xf32, #tpu.memory_space<vmem>>, vector<1x64xf32>,
    %c100 = arith.constant 100 : index
    %c0_220 = arith.constant 0 : index
    %283 = vector.load %arg12[%c100, %c0_220] : memref<160x64xf32, #tpu.memory_space<vmem>>, vector<1x64xf32>
    %c0_221 = arith.constant 0 : index
    %c4096 = arith.constant 4096 : index
    %284 = vector.load %arg13[%c0_221, %c4096] : memref<1x6400xf32, #tpu.memory_space<vmem>>, vector<1x64xf32>
    tpu.vector_store %arg13[%c0_221, %c4096], %283 {strides = array<i32>} : memref<1x6400xf32, #tpu.memory_space<vmem>>, vector<1x64xf32>,
    %c101 = arith.constant 101 : index
    %c0_222 = arith.constant 0 : index
    %285 = vector.load %arg12[%c101, %c0_222] : memref<160x64xf32, #tpu.memory_space<vmem>>, vector<1x64xf32>
    %c0_223 = arith.constant 0 : index
    %c4160 = arith.constant 4160 : index
    %286 = vector.load %arg13[%c0_223, %c4160] : memref<1x6400xf32, #tpu.memory_space<vmem>>, vector<1x64xf32>
    tpu.vector_store %arg13[%c0_223, %c4160], %285 {strides = array<i32>} : memref<1x6400xf32, #tpu.memory_space<vmem>>, vector<1x64xf32>,
    %c102 = arith.constant 102 : index
    %c0_224 = arith.constant 0 : index
    %287 = vector.load %arg12[%c102, %c0_224] : memref<160x64xf32, #tpu.memory_space<vmem>>, vector<1x64xf32>
    %c0_225 = arith.constant 0 : index
    %c4224 = arith.constant 4224 : index
    %288 = vector.load %arg13[%c0_225, %c4224] : memref<1x6400xf32, #tpu.memory_space<vmem>>, vector<1x64xf32>
    tpu.vector_store %arg13[%c0_225, %c4224], %287 {strides = array<i32>} : memref<1x6400xf32, #tpu.memory_space<vmem>>, vector<1x64xf32>,
    %c103 = arith.constant 103 : index
    %c0_226 = arith.constant 0 : index
    %289 = vector.load %arg12[%c103, %c0_226] : memref<160x64xf32, #tpu.memory_space<vmem>>, vector<1x64xf32>
    %c0_227 = arith.constant 0 : index
    %c4288 = arith.constant 4288 : index
    %290 = vector.load %arg13[%c0_227, %c4288] : memref<1x6400xf32, #tpu.memory_space<vmem>>, vector<1x64xf32>
    tpu.vector_store %arg13[%c0_227, %c4288], %289 {strides = array<i32>} : memref<1x6400xf32, #tpu.memory_space<vmem>>, vector<1x64xf32>,
    %c104 = arith.constant 104 : index
    %c0_228 = arith.constant 0 : index
    %291 = vector.load %arg12[%c104, %c0_228] : memref<160x64xf32, #tpu.memory_space<vmem>>, vector<1x64xf32>
    %c0_229 = arith.constant 0 : index
    %c4352 = arith.constant 4352 : index
    %292 = vector.load %arg13[%c0_229, %c4352] : memref<1x6400xf32, #tpu.memory_space<vmem>>, vector<1x64xf32>
    tpu.vector_store %arg13[%c0_229, %c4352], %291 {strides = array<i32>} : memref<1x6400xf32, #tpu.memory_space<vmem>>, vector<1x64xf32>,
    %c105 = arith.constant 105 : index
    %c0_230 = arith.constant 0 : index
    %293 = vector.load %arg12[%c105, %c0_230] : memref<160x64xf32, #tpu.memory_space<vmem>>, vector<1x64xf32>
    %c0_231 = arith.constant 0 : index
    %c4416 = arith.constant 4416 : index
    %294 = vector.load %arg13[%c0_231, %c4416] : memref<1x6400xf32, #tpu.memory_space<vmem>>, vector<1x64xf32>
    tpu.vector_store %arg13[%c0_231, %c4416], %293 {strides = array<i32>} : memref<1x6400xf32, #tpu.memory_space<vmem>>, vector<1x64xf32>,
    %c112_232 = arith.constant 112 : index
    %c0_233 = arith.constant 0 : index
    %295 = vector.load %arg12[%c112_232, %c0_233] : memref<160x64xf32, #tpu.memory_space<vmem>>, vector<1x64xf32>
    %c0_234 = arith.constant 0 : index
    %c4480 = arith.constant 4480 : index
    %296 = vector.load %arg13[%c0_234, %c4480] : memref<1x6400xf32, #tpu.memory_space<vmem>>, vector<1x64xf32>
    tpu.vector_store %arg13[%c0_234, %c4480], %295 {strides = array<i32>} : memref<1x6400xf32, #tpu.memory_space<vmem>>, vector<1x64xf32>,
    %c113 = arith.constant 113 : index
    %c0_235 = arith.constant 0 : index
    %297 = vector.load %arg12[%c113, %c0_235] : memref<160x64xf32, #tpu.memory_space<vmem>>, vector<1x64xf32>
    %c0_236 = arith.constant 0 : index
    %c4544 = arith.constant 4544 : index
    %298 = vector.load %arg13[%c0_236, %c4544] : memref<1x6400xf32, #tpu.memory_space<vmem>>, vector<1x64xf32>
    tpu.vector_store %arg13[%c0_236, %c4544], %297 {strides = array<i32>} : memref<1x6400xf32, #tpu.memory_space<vmem>>, vector<1x64xf32>,
    %c114 = arith.constant 114 : index
    %c0_237 = arith.constant 0 : index
    %299 = vector.load %arg12[%c114, %c0_237] : memref<160x64xf32, #tpu.memory_space<vmem>>, vector<1x64xf32>
    %c0_238 = arith.constant 0 : index
    %c4608 = arith.constant 4608 : index
    %300 = vector.load %arg13[%c0_238, %c4608] : memref<1x6400xf32, #tpu.memory_space<vmem>>, vector<1x64xf32>
    tpu.vector_store %arg13[%c0_238, %c4608], %299 {strides = array<i32>} : memref<1x6400xf32, #tpu.memory_space<vmem>>, vector<1x64xf32>,
    %c115 = arith.constant 115 : index
    %c0_239 = arith.constant 0 : index
    %301 = vector.load %arg12[%c115, %c0_239] : memref<160x64xf32, #tpu.memory_space<vmem>>, vector<1x64xf32>
    %c0_240 = arith.constant 0 : index
    %c4672 = arith.constant 4672 : index
    %302 = vector.load %arg13[%c0_240, %c4672] : memref<1x6400xf32, #tpu.memory_space<vmem>>, vector<1x64xf32>
    tpu.vector_store %arg13[%c0_240, %c4672], %301 {strides = array<i32>} : memref<1x6400xf32, #tpu.memory_space<vmem>>, vector<1x64xf32>,
    %c116 = arith.constant 116 : index
    %c0_241 = arith.constant 0 : index
    %303 = vector.load %arg12[%c116, %c0_241] : memref<160x64xf32, #tpu.memory_space<vmem>>, vector<1x64xf32>
    %c0_242 = arith.constant 0 : index
    %c4736 = arith.constant 4736 : index
    %304 = vector.load %arg13[%c0_242, %c4736] : memref<1x6400xf32, #tpu.memory_space<vmem>>, vector<1x64xf32>
    tpu.vector_store %arg13[%c0_242, %c4736], %303 {strides = array<i32>} : memref<1x6400xf32, #tpu.memory_space<vmem>>, vector<1x64xf32>,
    %c117 = arith.constant 117 : index
    %c0_243 = arith.constant 0 : index
    %305 = vector.load %arg12[%c117, %c0_243] : memref<160x64xf32, #tpu.memory_space<vmem>>, vector<1x64xf32>
    %c0_244 = arith.constant 0 : index
    %c4800 = arith.constant 4800 : index
    %306 = vector.load %arg13[%c0_244, %c4800] : memref<1x6400xf32, #tpu.memory_space<vmem>>, vector<1x64xf32>
    tpu.vector_store %arg13[%c0_244, %c4800], %305 {strides = array<i32>} : memref<1x6400xf32, #tpu.memory_space<vmem>>, vector<1x64xf32>,
    %c118 = arith.constant 118 : index
    %c0_245 = arith.constant 0 : index
    %307 = vector.load %arg12[%c118, %c0_245] : memref<160x64xf32, #tpu.memory_space<vmem>>, vector<1x64xf32>
    %c0_246 = arith.constant 0 : index
    %c4864 = arith.constant 4864 : index
    %308 = vector.load %arg13[%c0_246, %c4864] : memref<1x6400xf32, #tpu.memory_space<vmem>>, vector<1x64xf32>
    tpu.vector_store %arg13[%c0_246, %c4864], %307 {strides = array<i32>} : memref<1x6400xf32, #tpu.memory_space<vmem>>, vector<1x64xf32>,
    %c119 = arith.constant 119 : index
    %c0_247 = arith.constant 0 : index
    %309 = vector.load %arg12[%c119, %c0_247] : memref<160x64xf32, #tpu.memory_space<vmem>>, vector<1x64xf32>
    %c0_248 = arith.constant 0 : index
    %c4928 = arith.constant 4928 : index
    %310 = vector.load %arg13[%c0_248, %c4928] : memref<1x6400xf32, #tpu.memory_space<vmem>>, vector<1x64xf32>
    tpu.vector_store %arg13[%c0_248, %c4928], %309 {strides = array<i32>} : memref<1x6400xf32, #tpu.memory_space<vmem>>, vector<1x64xf32>,
    %c120 = arith.constant 120 : index
    %c0_249 = arith.constant 0 : index
    %311 = vector.load %arg12[%c120, %c0_249] : memref<160x64xf32, #tpu.memory_space<vmem>>, vector<1x64xf32>
    %c0_250 = arith.constant 0 : index
    %c4992 = arith.constant 4992 : index
    %312 = vector.load %arg13[%c0_250, %c4992] : memref<1x6400xf32, #tpu.memory_space<vmem>>, vector<1x64xf32>
    tpu.vector_store %arg13[%c0_250, %c4992], %311 {strides = array<i32>} : memref<1x6400xf32, #tpu.memory_space<vmem>>, vector<1x64xf32>,
    %c121 = arith.constant 121 : index
    %c0_251 = arith.constant 0 : index
    %313 = vector.load %arg12[%c121, %c0_251] : memref<160x64xf32, #tpu.memory_space<vmem>>, vector<1x64xf32>
    %c0_252 = arith.constant 0 : index
    %c5056 = arith.constant 5056 : index
    %314 = vector.load %arg13[%c0_252, %c5056] : memref<1x6400xf32, #tpu.memory_space<vmem>>, vector<1x64xf32>
    tpu.vector_store %arg13[%c0_252, %c5056], %313 {strides = array<i32>} : memref<1x6400xf32, #tpu.memory_space<vmem>>, vector<1x64xf32>,
    %c128_253 = arith.constant 128 : index
    %c0_254 = arith.constant 0 : index
    %315 = vector.load %arg12[%c128_253, %c0_254] : memref<160x64xf32, #tpu.memory_space<vmem>>, vector<1x64xf32>
    %c0_255 = arith.constant 0 : index
    %c5120 = arith.constant 5120 : index
    %316 = vector.load %arg13[%c0_255, %c5120] : memref<1x6400xf32, #tpu.memory_space<vmem>>, vector<1x64xf32>
    tpu.vector_store %arg13[%c0_255, %c5120], %315 {strides = array<i32>} : memref<1x6400xf32, #tpu.memory_space<vmem>>, vector<1x64xf32>,
    %c129 = arith.constant 129 : index
    %c0_256 = arith.constant 0 : index
    %317 = vector.load %arg12[%c129, %c0_256] : memref<160x64xf32, #tpu.memory_space<vmem>>, vector<1x64xf32>
    %c0_257 = arith.constant 0 : index
    %c5184 = arith.constant 5184 : index
    %318 = vector.load %arg13[%c0_257, %c5184] : memref<1x6400xf32, #tpu.memory_space<vmem>>, vector<1x64xf32>
    tpu.vector_store %arg13[%c0_257, %c5184], %317 {strides = array<i32>} : memref<1x6400xf32, #tpu.memory_space<vmem>>, vector<1x64xf32>,
    %c130 = arith.constant 130 : index
    %c0_258 = arith.constant 0 : index
    %319 = vector.load %arg12[%c130, %c0_258] : memref<160x64xf32, #tpu.memory_space<vmem>>, vector<1x64xf32>
    %c0_259 = arith.constant 0 : index
    %c5248 = arith.constant 5248 : index
    %320 = vector.load %arg13[%c0_259, %c5248] : memref<1x6400xf32, #tpu.memory_space<vmem>>, vector<1x64xf32>
    tpu.vector_store %arg13[%c0_259, %c5248], %319 {strides = array<i32>} : memref<1x6400xf32, #tpu.memory_space<vmem>>, vector<1x64xf32>,
    %c131 = arith.constant 131 : index
    %c0_260 = arith.constant 0 : index
    %321 = vector.load %arg12[%c131, %c0_260] : memref<160x64xf32, #tpu.memory_space<vmem>>, vector<1x64xf32>
    %c0_261 = arith.constant 0 : index
    %c5312 = arith.constant 5312 : index
    %322 = vector.load %arg13[%c0_261, %c5312] : memref<1x6400xf32, #tpu.memory_space<vmem>>, vector<1x64xf32>
    tpu.vector_store %arg13[%c0_261, %c5312], %321 {strides = array<i32>} : memref<1x6400xf32, #tpu.memory_space<vmem>>, vector<1x64xf32>,
    %c132 = arith.constant 132 : index
    %c0_262 = arith.constant 0 : index
    %323 = vector.load %arg12[%c132, %c0_262] : memref<160x64xf32, #tpu.memory_space<vmem>>, vector<1x64xf32>
    %c0_263 = arith.constant 0 : index
    %c5376 = arith.constant 5376 : index
    %324 = vector.load %arg13[%c0_263, %c5376] : memref<1x6400xf32, #tpu.memory_space<vmem>>, vector<1x64xf32>
    tpu.vector_store %arg13[%c0_263, %c5376], %323 {strides = array<i32>} : memref<1x6400xf32, #tpu.memory_space<vmem>>, vector<1x64xf32>,
    %c133 = arith.constant 133 : index
    %c0_264 = arith.constant 0 : index
    %325 = vector.load %arg12[%c133, %c0_264] : memref<160x64xf32, #tpu.memory_space<vmem>>, vector<1x64xf32>
    %c0_265 = arith.constant 0 : index
    %c5440 = arith.constant 5440 : index
    %326 = vector.load %arg13[%c0_265, %c5440] : memref<1x6400xf32, #tpu.memory_space<vmem>>, vector<1x64xf32>
    tpu.vector_store %arg13[%c0_265, %c5440], %325 {strides = array<i32>} : memref<1x6400xf32, #tpu.memory_space<vmem>>, vector<1x64xf32>,
    %c134 = arith.constant 134 : index
    %c0_266 = arith.constant 0 : index
    %327 = vector.load %arg12[%c134, %c0_266] : memref<160x64xf32, #tpu.memory_space<vmem>>, vector<1x64xf32>
    %c0_267 = arith.constant 0 : index
    %c5504 = arith.constant 5504 : index
    %328 = vector.load %arg13[%c0_267, %c5504] : memref<1x6400xf32, #tpu.memory_space<vmem>>, vector<1x64xf32>
    tpu.vector_store %arg13[%c0_267, %c5504], %327 {strides = array<i32>} : memref<1x6400xf32, #tpu.memory_space<vmem>>, vector<1x64xf32>,
    %c135 = arith.constant 135 : index
    %c0_268 = arith.constant 0 : index
    %329 = vector.load %arg12[%c135, %c0_268] : memref<160x64xf32, #tpu.memory_space<vmem>>, vector<1x64xf32>
    %c0_269 = arith.constant 0 : index
    %c5568 = arith.constant 5568 : index
    %330 = vector.load %arg13[%c0_269, %c5568] : memref<1x6400xf32, #tpu.memory_space<vmem>>, vector<1x64xf32>
    tpu.vector_store %arg13[%c0_269, %c5568], %329 {strides = array<i32>} : memref<1x6400xf32, #tpu.memory_space<vmem>>, vector<1x64xf32>,
    %c136 = arith.constant 136 : index
    %c0_270 = arith.constant 0 : index
    %331 = vector.load %arg12[%c136, %c0_270] : memref<160x64xf32, #tpu.memory_space<vmem>>, vector<1x64xf32>
    %c0_271 = arith.constant 0 : index
    %c5632 = arith.constant 5632 : index
    %332 = vector.load %arg13[%c0_271, %c5632] : memref<1x6400xf32, #tpu.memory_space<vmem>>, vector<1x64xf32>
    tpu.vector_store %arg13[%c0_271, %c5632], %331 {strides = array<i32>} : memref<1x6400xf32, #tpu.memory_space<vmem>>, vector<1x64xf32>,
    %c137 = arith.constant 137 : index
    %c0_272 = arith.constant 0 : index
    %333 = vector.load %arg12[%c137, %c0_272] : memref<160x64xf32, #tpu.memory_space<vmem>>, vector<1x64xf32>
    %c0_273 = arith.constant 0 : index
    %c5696 = arith.constant 5696 : index
    %334 = vector.load %arg13[%c0_273, %c5696] : memref<1x6400xf32, #tpu.memory_space<vmem>>, vector<1x64xf32>
    tpu.vector_store %arg13[%c0_273, %c5696], %333 {strides = array<i32>} : memref<1x6400xf32, #tpu.memory_space<vmem>>, vector<1x64xf32>,
    %c144 = arith.constant 144 : index
    %c0_274 = arith.constant 0 : index
    %335 = vector.load %arg12[%c144, %c0_274] : memref<160x64xf32, #tpu.memory_space<vmem>>, vector<1x64xf32>
    %c0_275 = arith.constant 0 : index
    %c5760 = arith.constant 5760 : index
    %336 = vector.load %arg13[%c0_275, %c5760] : memref<1x6400xf32, #tpu.memory_space<vmem>>, vector<1x64xf32>
    tpu.vector_store %arg13[%c0_275, %c5760], %335 {strides = array<i32>} : memref<1x6400xf32, #tpu.memory_space<vmem>>, vector<1x64xf32>,
    %c145 = arith.constant 145 : index
    %c0_276 = arith.constant 0 : index
    %337 = vector.load %arg12[%c145, %c0_276] : memref<160x64xf32, #tpu.memory_space<vmem>>, vector<1x64xf32>
    %c0_277 = arith.constant 0 : index
    %c5824 = arith.constant 5824 : index
    %338 = vector.load %arg13[%c0_277, %c5824] : memref<1x6400xf32, #tpu.memory_space<vmem>>, vector<1x64xf32>
    tpu.vector_store %arg13[%c0_277, %c5824], %337 {strides = array<i32>} : memref<1x6400xf32, #tpu.memory_space<vmem>>, vector<1x64xf32>,
    %c146 = arith.constant 146 : index
    %c0_278 = arith.constant 0 : index
    %339 = vector.load %arg12[%c146, %c0_278] : memref<160x64xf32, #tpu.memory_space<vmem>>, vector<1x64xf32>
    %c0_279 = arith.constant 0 : index
    %c5888 = arith.constant 5888 : index
    %340 = vector.load %arg13[%c0_279, %c5888] : memref<1x6400xf32, #tpu.memory_space<vmem>>, vector<1x64xf32>
    tpu.vector_store %arg13[%c0_279, %c5888], %339 {strides = array<i32>} : memref<1x6400xf32, #tpu.memory_space<vmem>>, vector<1x64xf32>,
    %c147 = arith.constant 147 : index
    %c0_280 = arith.constant 0 : index
    %341 = vector.load %arg12[%c147, %c0_280] : memref<160x64xf32, #tpu.memory_space<vmem>>, vector<1x64xf32>
    %c0_281 = arith.constant 0 : index
    %c5952 = arith.constant 5952 : index
    %342 = vector.load %arg13[%c0_281, %c5952] : memref<1x6400xf32, #tpu.memory_space<vmem>>, vector<1x64xf32>
    tpu.vector_store %arg13[%c0_281, %c5952], %341 {strides = array<i32>} : memref<1x6400xf32, #tpu.memory_space<vmem>>, vector<1x64xf32>,
    %c148 = arith.constant 148 : index
    %c0_282 = arith.constant 0 : index
    %343 = vector.load %arg12[%c148, %c0_282] : memref<160x64xf32, #tpu.memory_space<vmem>>, vector<1x64xf32>
    %c0_283 = arith.constant 0 : index
    %c6016 = arith.constant 6016 : index
    %344 = vector.load %arg13[%c0_283, %c6016] : memref<1x6400xf32, #tpu.memory_space<vmem>>, vector<1x64xf32>
    tpu.vector_store %arg13[%c0_283, %c6016], %343 {strides = array<i32>} : memref<1x6400xf32, #tpu.memory_space<vmem>>, vector<1x64xf32>,
    %c149 = arith.constant 149 : index
    %c0_284 = arith.constant 0 : index
    %345 = vector.load %arg12[%c149, %c0_284] : memref<160x64xf32, #tpu.memory_space<vmem>>, vector<1x64xf32>
    %c0_285 = arith.constant 0 : index
    %c6080 = arith.constant 6080 : index
    %346 = vector.load %arg13[%c0_285, %c6080] : memref<1x6400xf32, #tpu.memory_space<vmem>>, vector<1x64xf32>
    tpu.vector_store %arg13[%c0_285, %c6080], %345 {strides = array<i32>} : memref<1x6400xf32, #tpu.memory_space<vmem>>, vector<1x64xf32>,
    %c150 = arith.constant 150 : index
    %c0_286 = arith.constant 0 : index
    %347 = vector.load %arg12[%c150, %c0_286] : memref<160x64xf32, #tpu.memory_space<vmem>>, vector<1x64xf32>
    %c0_287 = arith.constant 0 : index
    %c6144 = arith.constant 6144 : index
    %348 = vector.load %arg13[%c0_287, %c6144] : memref<1x6400xf32, #tpu.memory_space<vmem>>, vector<1x64xf32>
    tpu.vector_store %arg13[%c0_287, %c6144], %347 {strides = array<i32>} : memref<1x6400xf32, #tpu.memory_space<vmem>>, vector<1x64xf32>,
    %c151 = arith.constant 151 : index
    %c0_288 = arith.constant 0 : index
    %349 = vector.load %arg12[%c151, %c0_288] : memref<160x64xf32, #tpu.memory_space<vmem>>, vector<1x64xf32>
    %c0_289 = arith.constant 0 : index
    %c6208 = arith.constant 6208 : index
    %350 = vector.load %arg13[%c0_289, %c6208] : memref<1x6400xf32, #tpu.memory_space<vmem>>, vector<1x64xf32>
    tpu.vector_store %arg13[%c0_289, %c6208], %349 {strides = array<i32>} : memref<1x6400xf32, #tpu.memory_space<vmem>>, vector<1x64xf32>,
    %c152 = arith.constant 152 : index
    %c0_290 = arith.constant 0 : index
    %351 = vector.load %arg12[%c152, %c0_290] : memref<160x64xf32, #tpu.memory_space<vmem>>, vector<1x64xf32>
    %c0_291 = arith.constant 0 : index
    %c6272 = arith.constant 6272 : index
    %352 = vector.load %arg13[%c0_291, %c6272] : memref<1x6400xf32, #tpu.memory_space<vmem>>, vector<1x64xf32>
    tpu.vector_store %arg13[%c0_291, %c6272], %351 {strides = array<i32>} : memref<1x6400xf32, #tpu.memory_space<vmem>>, vector<1x64xf32>,
    %c153 = arith.constant 153 : index
    %c0_292 = arith.constant 0 : index
    %353 = vector.load %arg12[%c153, %c0_292] : memref<160x64xf32, #tpu.memory_space<vmem>>, vector<1x64xf32>
    %c0_293 = arith.constant 0 : index
    %c6336 = arith.constant 6336 : index
    %354 = vector.load %arg13[%c0_293, %c6336] : memref<1x6400xf32, #tpu.memory_space<vmem>>, vector<1x64xf32>
    tpu.vector_store %arg13[%c0_293, %c6336], %353 {strides = array<i32>} : memref<1x6400xf32, #tpu.memory_space<vmem>>, vector<1x64xf32>,
    tpu.wait_dma2 semaphore(%arg15 : memref<!tpu.dma_semaphore, #tpu.memory_space<semaphore_mem>>) src(%arg7 : memref<6400x256xbf16, #tpu.memory_space<any>>) dst(%arg14 : memref<6400x256xbf16, #tpu.memory_space<vmem>>)
    %c0_294 = arith.constant 0 : index
    %c0_295 = arith.constant 0 : index
    %355 = vector.load %arg8[%c0_294, %c0_295] : memref<1x256xf32, #tpu.memory_space<vmem>>, vector<1x256xf32>
    %c0_296 = arith.constant 0 : index
    %c0_297 = arith.constant 0 : index
    %356 = vector.load %arg13[%c0_296, %c0_297] : memref<1x6400xf32, #tpu.memory_space<vmem>>, vector<1x1280xf32>
    %357 = arith.truncf %356 : vector<1x1280xf32> to vector<1x1280xbf16>
    %c0_298 = arith.constant 0 : index
    %c0_299 = arith.constant 0 : index
    %358 = vector.load %arg14[%c0_298, %c0_299] : memref<6400x256xbf16, #tpu.memory_space<vmem>>, vector<1280x256xbf16>
    %cst_300 = arith.constant dense<0.000000e+00> : vector<1x256xf32>
    %359 = tpu.matmul %357, %358, %cst_300 {dimension_numbers = #tpu.dot_dimension_numbers<[1], [0], [0], [1], [0, 0, 1, 1], [], []>} : vector<1x1280xbf16>, vector<1280x256xbf16>, vector<1x256xf32> -> vector<1x256xf32>
    %360 = arith.addf %355, %359 : vector<1x256xf32>
    %c0_301 = arith.constant 0 : index
    %c1280_302 = arith.constant 1280 : index
    %361 = vector.load %arg13[%c0_301, %c1280_302] : memref<1x6400xf32, #tpu.memory_space<vmem>>, vector<1x1280xf32>
    %362 = arith.truncf %361 : vector<1x1280xf32> to vector<1x1280xbf16>
    %c1280_303 = arith.constant 1280 : index
    %c0_304 = arith.constant 0 : index
    %363 = vector.load %arg14[%c1280_303, %c0_304] : memref<6400x256xbf16, #tpu.memory_space<vmem>>, vector<1280x256xbf16>
    %cst_305 = arith.constant dense<0.000000e+00> : vector<1x256xf32>
    %364 = tpu.matmul %362, %363, %cst_305 {dimension_numbers = #tpu.dot_dimension_numbers<[1], [0], [0], [1], [0, 0, 1, 1], [], []>} : vector<1x1280xbf16>, vector<1280x256xbf16>, vector<1x256xf32> -> vector<1x256xf32>
    %365 = arith.addf %360, %364 : vector<1x256xf32>
    %c0_306 = arith.constant 0 : index
    %c2560_307 = arith.constant 2560 : index
    %366 = vector.load %arg13[%c0_306, %c2560_307] : memref<1x6400xf32, #tpu.memory_space<vmem>>, vector<1x1280xf32>
    %367 = arith.truncf %366 : vector<1x1280xf32> to vector<1x1280xbf16>
    %c2560_308 = arith.constant 2560 : index
    %c0_309 = arith.constant 0 : index
    %368 = vector.load %arg14[%c2560_308, %c0_309] : memref<6400x256xbf16, #tpu.memory_space<vmem>>, vector<1280x256xbf16>
    %cst_310 = arith.constant dense<0.000000e+00> : vector<1x256xf32>
    %369 = tpu.matmul %367, %368, %cst_310 {dimension_numbers = #tpu.dot_dimension_numbers<[1], [0], [0], [1], [0, 0, 1, 1], [], []>} : vector<1x1280xbf16>, vector<1280x256xbf16>, vector<1x256xf32> -> vector<1x256xf32>
    %370 = arith.addf %365, %369 : vector<1x256xf32>
    %c0_311 = arith.constant 0 : index
    %c3840_312 = arith.constant 3840 : index
    %371 = vector.load %arg13[%c0_311, %c3840_312] : memref<1x6400xf32, #tpu.memory_space<vmem>>, vector<1x1280xf32>
    %372 = arith.truncf %371 : vector<1x1280xf32> to vector<1x1280xbf16>
    %c3840_313 = arith.constant 3840 : index
    %c0_314 = arith.constant 0 : index
    %373 = vector.load %arg14[%c3840_313, %c0_314] : memref<6400x256xbf16, #tpu.memory_space<vmem>>, vector<1280x256xbf16>
    %cst_315 = arith.constant dense<0.000000e+00> : vector<1x256xf32>
    %374 = tpu.matmul %372, %373, %cst_315 {dimension_numbers = #tpu.dot_dimension_numbers<[1], [0], [0], [1], [0, 0, 1, 1], [], []>} : vector<1x1280xbf16>, vector<1280x256xbf16>, vector<1x256xf32> -> vector<1x256xf32>
    %375 = arith.addf %370, %374 : vector<1x256xf32>
    %c0_316 = arith.constant 0 : index
    %c5120_317 = arith.constant 5120 : index
    %376 = vector.load %arg13[%c0_316, %c5120_317] : memref<1x6400xf32, #tpu.memory_space<vmem>>, vector<1x1280xf32>
    %377 = arith.truncf %376 : vector<1x1280xf32> to vector<1x1280xbf16>
    %c5120_318 = arith.constant 5120 : index
    %c0_319 = arith.constant 0 : index
    %378 = vector.load %arg14[%c5120_318, %c0_319] : memref<6400x256xbf16, #tpu.memory_space<vmem>>, vector<1280x256xbf16>
    %cst_320 = arith.constant dense<0.000000e+00> : vector<1x256xf32>
    %379 = tpu.matmul %377, %378, %cst_320 {dimension_numbers = #tpu.dot_dimension_numbers<[1], [0], [0], [1], [0, 0, 1, 1], [], []>} : vector<1x1280xbf16>, vector<1280x256xbf16>, vector<1x256xf32> -> vector<1x256xf32>
    %380 = arith.addf %375, %379 : vector<1x256xf32>
    %cst_321 = arith.constant 0.000000e+00 : f32
    %381 = vector.broadcast %cst_321 : f32 to vector<1x256xf32>
    %382 = arith.maximumf %380, %381 : vector<1x256xf32>
    %383 = arith.truncf %382 : vector<1x256xf32> to vector<1x256xbf16>
    %c0_322 = arith.constant 0 : index
    %c0_323 = arith.constant 0 : index
    %384 = vector.load %arg9[%c0_322, %c0_323] : memref<256x4xbf16, #tpu.memory_space<vmem>>, vector<256x4xbf16>
    %cst_324 = arith.constant dense<0.000000e+00> : vector<1x4xf32>
    %385 = tpu.matmul %383, %384, %cst_324 {dimension_numbers = #tpu.dot_dimension_numbers<[1], [0], [0], [1], [0, 0, 1, 1], [], []>} : vector<1x256xbf16>, vector<256x4xbf16>, vector<1x4xf32> -> vector<1x4xf32>
    %c0_325 = arith.constant 0 : index
    %c0_326 = arith.constant 0 : index
    %386 = vector.load %arg10[%c0_325, %c0_326] : memref<1x4xf32, #tpu.memory_space<vmem>>, vector<1x4xf32>
    %387 = arith.addf %385, %386 : vector<1x4xf32>
    %c0_327 = arith.constant 0 : index
    %c0_328 = arith.constant 0 : index
    %388 = vector.load %arg11[%c0_327, %c0_328] : memref<1x4xf32, #tpu.memory_space<vmem>>, vector<1x4xf32>
    tpu.vector_store %arg11[%c0_327, %c0_328], %387 {strides = array<i32>} : memref<1x4xf32, #tpu.memory_space<vmem>>, vector<1x4xf32>,
    return
  }
}

</mosaic_0001>

<bundles_post_ra>
// kernel: cnn_dqn_forward.1
= control target key start
LH: loop header
LB: loop body
LE: loop exit
PB: predicated region body
PF: predicated region fallthrough
CT: control target
= control target key end

     0   :  { %16 = vsyncpa [#allocation7], 0  ;;  %s15683_s0 = inlined_call_operand.vmem [shape: f32[320,2], index: 0, kind: input, shape index: {}]   ;;  %s15684_s1 = inlined_call_operand.vmem [shape: bf16[18,16], index: 1, kind: input, shape index: {}]   ;;  %s15685_s2 = inlined_call_operand.hbm [shape: f32[1,16], index: 2, kind: input, shape index: {}]   ;;  %s15686_s3 = inlined_call_operand.vmem [shape: bf16[144,32], index: 3, kind: input, shape index: {}]   ;;  %s15687_s4 = inlined_call_operand.hbm [shape: f32[1,32], index: 4, kind: input, shape index: {}]   ;;  %s15688_s5 = inlined_call_operand.vmem [shape: bf16[288,64], index: 5, kind: input, shape index: {}]   ;;  %s15689_s6 = inlined_call_operand.hbm [shape: f32[1,64], index: 6, kind: input, shape index: {}]   ;;  %s15690_s7 = inlined_call_operand.hbm [shape: bf16[6400,256], index: 7, kind: input, shape index: {}]   ;;  %s15691_s8 = inlined_call_operand.hbm [shape: f32[1,256], index: 8, kind: input, shape index: {}]   ;;  %s15692_s9 = inlined_call_operand.vmem [shape: bf16[256,4], index: 9, kind: input, shape index: {}]   ;;  %s15693_s10 = inlined_call_operand.hbm [shape: f32[1,4], index: 10, kind: input, shape index: {}]   ;;  %s15694_s11 = inlined_call_operand.hbm [shape: f32[1,4], index: 11, kind: output, shape index: {}]  }
   0x1   :  { %17 = vsyncpa [#allocation10], 0 }
   0x2   :  { %18 = vsyncpa [#allocation13], 0 }
   0x3   :  { %19 = vsyncpa [#allocation8], 0  ;;  %s12275_s17 = smov [#allocation9]   ;;  %s12276_s19 = smov [#allocation12]  }
   0x4   :  { %s42_s18 = sshll.u32 %s12275_s17, 4  ;;  %s64_s20 = sshll.u32 %s12276_s19, 4  ;;  %s43_s18 = int_to_ptr.vmem [resolvable:$true] %s42_s18  ;;  %s65_s20 = int_to_ptr.vmem [resolvable:$true] %s64_s20 }
   0x5   :  { %s12133_s23 = scalar_lea.hbm %s15687_s4, 16 }
   0x6   :  { %p12134_p0 = scmp.ne.s32.totalorder %s15687_s4, %s12133_s23  ;;  %p12137_p1 = scmp.lt.u32.totalorder %s12133_s23, %s15687_s4 }
   0x8   :  { %p12139_p2 = pnand %p12137_p1, %p12134_p0 }
   0xa   :  { %12142 = shalt.err (!%p12139_p2)
}
   0xb   :  { %s12143_s28 = scalar_lea.vmem %s43_s18, 16  ;;  %s12147_s29 = scalar_lea.vmem %s43_s18, 32 }
   0xc   :  { %p12144_p3 = scmp.ne.s32.totalorder %s43_s18, %s12143_s28  ;;  %p12148_p4 = scmp.lt.s32.totalorder %s43_s18, %s43_s18 }
   0xd   :  { %p12149_p5 = scmp.lt.s32.totalorder %s12147_s29, %s12143_s28 }
   0xf   :  { %p12150_p6 = por %p12149_p5, %p12148_p4 }
  0x11   :  { %p12151_p7 = pnand %p12150_p6, %p12144_p3 }
  0x13   :  { %12154 = shalt.err (!%p12151_p7)
}
  0x14   :  { %45 = dma.hbm_to_vmem [thread:$0]  %s15687_s4, 16, %s43_s18, [#allocation10]  }
  0x15   :  { %s12155_s15 = scalar_lea.hbm %s15691_s8, 32 }
  0x16   :  { %p12156_p8 = scmp.ne.s32.totalorder %s15691_s8, %s12155_s15  ;;  %p12159_p9 = scmp.lt.u32.totalorder %s12155_s15, %s15691_s8 }
  0x18   :  { %p12161_p10 = pnand %p12159_p9, %p12156_p8 }
  0x1a   :  { %12164 = shalt.err (!%p12161_p10)
}
  0x1b   :  { %s12165_s22 = scalar_lea.vmem %s65_s20, 32  ;;  %p12170_p12 = scmp.lt.s32.totalorder %s65_s20, %s65_s20 }
  0x1c   :  { %p12166_p11 = scmp.ne.s32.totalorder %s65_s20, %s12165_s22  ;;  %p12171_p13 = scmp.lt.s32.totalorder %s12165_s22, %s12165_s22 }
  0x1e   :  { %p12172_p0 = por %p12171_p13, %p12170_p12 }
  0x20   :  { %p12173_p1 = pnand %p12172_p0, %p12166_p11 }
  0x22   :  { %12176 = shalt.err (!%p12173_p1)
}
  0x23   :  { %67 = dma.hbm_to_vmem [thread:$0]  %s15691_s8, 32, %s65_s20, [#allocation13]  }
  0x24   :  { %s12277_s23 = smov [#allocation6]   ;;  %s12278_s25 = smov [#allocation11]  }
  0x25   :  { %s30_s24 = sshll.u32 %s12277_s23, 4  ;;  %s54_s26 = sshll.u32 %s12278_s25, 4  ;;  %s31_s24 = int_to_ptr.vmem [resolvable:$true] %s30_s24  ;;  %s55_s26 = int_to_ptr.vmem [resolvable:$true] %s54_s26 }
  0x26   :  { %s12177_s29 = scalar_lea.hbm %s15685_s2, 16 }
  0x27   :  { %p12178_p2 = scmp.ne.s32.totalorder %s15685_s2, %s12177_s29  ;;  %p12181_p3 = scmp.lt.u32.totalorder %s12177_s29, %s15685_s2 }
  0x29   :  { %p12183_p4 = pnand %p12181_p3, %p12178_p2 }
  0x2b   :  { %12186 = shalt.err (!%p12183_p4)
}
  0x2c   :  { %s12187_s8 = scalar_lea.vmem %s31_s24, 16  ;;  %s12191_s20 = scalar_lea.vmem %s31_s24, 32 }
  0x2d   :  { %p12188_p5 = scmp.ne.s32.totalorder %s31_s24, %s12187_s8  ;;  %p12192_p6 = scmp.lt.s32.totalorder %s31_s24, %s31_s24 }
  0x2e   :  { %p12193_p7 = scmp.lt.s32.totalorder %s12191_s20, %s12187_s8 }
  0x30   :  { %p12194_p8 = por %p12193_p7, %p12192_p6 }
  0x32   :  { %p12195_p9 = pnand %p12194_p8, %p12188_p5 }
  0x34   :  { %12198 = shalt.err (!%p12195_p9)
}
  0x35   :  { %33 = dma.hbm_to_vmem [thread:$0]  %s15685_s2, 16, %s31_s24, [#allocation7]  }
  0x36   :  { %s12199_s21 = scalar_lea.hbm %s15689_s6, 16 }
  0x37   :  { %p12200_p10 = scmp.ne.s32.totalorder %s15689_s6, %s12199_s21  ;;  %p12203_p11 = scmp.lt.u32.totalorder %s12199_s21, %s15689_s6 }
  0x39   :  { %p12205_p12 = pnand %p12203_p11, %p12200_p10 }
  0x3b   :  { %12208 = shalt.err (!%p12205_p12)
}
  0x3c   :  { %s12209_s25 = scalar_lea.vmem %s55_s26, 16  ;;  %s12213_s27 = scalar_lea.vmem %s55_s26, 32 }
  0x3d   :  { %p12210_p13 = scmp.ne.s32.totalorder %s55_s26, %s12209_s25  ;;  %p12214_p0 = scmp.lt.s32.totalorder %s55_s26, %s55_s26 }
  0x3e   :  { %p12215_p1 = scmp.lt.s32.totalorder %s12213_s27, %s12209_s25 }
  0x40   :  { %p12216_p2 = por %p12215_p1, %p12214_p0 }
  0x42   :  { %p12217_p3 = pnand %p12216_p2, %p12210_p13 }
  0x44   :  { %12220 = shalt.err (!%p12217_p3)
}
  0x45   :  { %57 = dma.hbm_to_vmem [thread:$0]  %s15689_s6, 16, %s55_s26, [#allocation10]  }
  0x46   :  { %s12279_s28 = smov [#allocation14]   ;;  %s12221_s13 = scalar_lea.hbm %s15693_s10, 16 }
  0x47   :  { %s76_s29 = sshll.u32 %s12279_s28, 4  ;;  %p12222_p4 = scmp.ne.s32.totalorder %s15693_s10, %s12221_s13  ;;  %s77_s29 = int_to_ptr.vmem [resolvable:$true] %s76_s29 }
  0x48   :  { %p12225_p5 = scmp.lt.u32.totalorder %s12221_s13, %s15693_s10 }
  0x4a   :  { %p12227_p6 = pnand %p12225_p5, %p12222_p4 }
  0x4c   :  { %12230 = shalt.err (!%p12227_p6)
}
  0x4d   :  { %s12231_s16 = scalar_lea.vmem %s77_s29, 16  ;;  %s12235_s6 = scalar_lea.vmem %s77_s29, 32 }
  0x4e   :  { %p12232_p7 = scmp.ne.s32.totalorder %s77_s29, %s12231_s16  ;;  %p12236_p8 = scmp.lt.s32.totalorder %s77_s29, %s77_s29 }
  0x4f   :  { %p12237_p9 = scmp.lt.s32.totalorder %s12235_s6, %s12231_s16 }
  0x51   :  { %p12238_p10 = por %p12237_p9, %p12236_p8 }
  0x53   :  { %p12239_p11 = pnand %p12238_p10, %p12232_p7 }
  0x55   :  { %12242 = shalt.err (!%p12239_p11)
}
  0x56   :  { %79 = dma.hbm_to_vmem [thread:$0]  %s15693_s10, 16, %s77_s29, [#allocation13]  }
  0x57   :  { %12265 = dma.done.wait [#allocation7], 16  }
  0x58   :  { %12266 = vsyncadd [#allocation7], 4294967280 }
  0x59   :  { %12267 = dma.done.wait [#allocation10], 32  }
  0x5a   :  { %12268 = vsyncadd [#allocation10], 4294967264 }
  0x5b   :  { %12269 = dma.done.wait [#allocation13], 48  }
  0x5c   :  { %12270 = vsyncadd [#allocation13], 4294967248  ;;  %s100_s19 = sld [smem:[#allocation0]]   ;;  %s12280_s21 = smov 256   ;;  %v15722_v0 = vmov 0.0   ;;  %vm12282_vm0 = vmmov 0  }
  0x5d   :  { %112 = sst [smem:[#allocation17]] %s12280_s21  ;;  %10515 = vmatprep.subr.bf16.mxu0 %v15722_v0  ;;  %10725 = vmatprep.subr.bf16.mxu1 %v15722_v0  ;;  %s12283_s10 = smov 2   ;;  %vm387_vm1 = vcmask 1040384   ;;  %vm190_vm2 = vsmask.f32 7424  ;;  %vm335_vm3 = vcmask 15360  }
  0x5e   :  { %114 = sst [smem:[#allocation17 + $0x1]] %s12280_s21  ;;  %10517 = vmatprep.mubr.msk.bf16.mxu0 %vm12282_vm0, %v15722_v0  ;;  %10727 = vmatprep.mubr.msk.bf16.mxu1 %vm12282_vm0, %v15722_v0  ;;  %s12284_s22 = smov 64   ;;  %vm783_vm4 = vcmask 1046528   ;;  %vm2608_vm5 = vcmask 130048   ;;  %vm4522_vm6 = vcmask 261120   ;;  %vm6033_vm7 = vcmask 523264  }
  0x5f   :  { %116 = sst [smem:[#allocation17 + $0x2]] %s12283_s10  ;;  %s12285_s4 = smov 128  }
  0x60   :  { %118 = sst [smem:[#allocation17 + $0x3]] %s12284_s22  ;;  %s12286_s18 = smov [#allocation4]  }
  0x61   :  { %120 = sst [smem:[#allocation17 + $0x4]] %s12285_s4  ;;  %s108_s23 = sshll.u32 %s12286_s18, 4  ;;  %s109_s23 = int_to_ptr.vmem [resolvable:$true] %s108_s23 }
  0x62   :  { %122 = sst [smem:[#allocation17 + $0x5]] %s12283_s10  ;;  %s9614_s25 = sshll.u32 %s100_s19, 26 }
  0x63   :  { %124 = sst [smem:[#allocation17 + $0x6]] %s12285_s4  ;;  %s9615_s27 = sadd.s32 134217728, %s9614_s25 }
  0x64   :  { %126 = sst [smem:[#allocation17 + $0x7]] %s12284_s22  ;;  %s12287_s2 = smov 4  }
  0x65   :  { %128 = sst [smem:[#allocation17 + $0x8]] %s12287_s2  ;;  %s12288_s24 = smov [#allocation5]  }
  0x66   :  { %s12289_s28 = smov [#allocation16]  }
  0x67   :  { %130 = dma.general %s15690_s7, 102400, %s109_s23, %s12288_s24, %s12289_s28, [#allocation17], %s9615_s27, 0  }
  0x68   :  { %v12080_v1 = vld [vmem:[%s15684_s1] ss:$0 sps:$4 sm:$0x22]   ;;  %v132_v3 = vld [vmem:[%s15683_s0 + $0x8] sm:$0xff]  ;;  %v133_v4 = vld [vmem:[%s15683_s0 + $0x10] sm:$0xff] }
  0x69   :  { %v131_v2 = vld [vmem:[%s15683_s0] sm:$0xff]  ;;  %v134_v5 = vld [vmem:[%s15683_s0 + $0x18] sm:$0xff]  ;;  %v334_v6 = vrot.slane %v12080_v1, 1  ;;  %v136_v10 = vld [vmem:[%s15683_s0 + $0x28] sm:$0xff] }
  0x6a   :  { %v12438_v7 = vpack.c.bf16 %v132_v3, %v131_v2  ;;  %v12440_v8 = vpack.c.bf16 %v134_v5, %v133_v4  ;;  %v135_v9 = vld [vmem:[%s15683_s0 + $0x20] sm:$0xff]  ;;  %v137_v23 = vld [vmem:[%s15683_s0 + $0x30] sm:$0xff]  ;;  %v138_v24 = vld [vmem:[%s15683_s0 + $0x38] sm:$0xff] }
  0x6b   :  { %v12448_v11 = vpack.c.bf16 %v136_v10, %v135_v9  ;;  %v389_v12 = vsel %vm387_vm1, %v334_v6, 0  ;;  %v187_v18 = vld [vmem:[%s15684_s1] sm:$0x1]  ;;  %v12471_v28 = vpack.c.bf16 %v138_v24, %v137_v23  ;;  %v140_v33 = vld [vmem:[%s15683_s0 + $0x48] sm:$0xff]  ;;  %v141_v34 = vld [vmem:[%s15683_s0 + $0x50] sm:$0xff] }
  0x6c   :  { %v192_v13 = vshrl.u32 %v12438_v7, 16  ;;  %v194_v14 = vshll.u32 %v12438_v7, 16  ;;  %v199_v15 = vshll.u32 %v12440_v8, 16  ;;  %10516 = vmatpush3.bf16.msra.mxu0 %v389_v12  ;;  %v203_v20 = vshrl.u32 %v12440_v8, 16  ;;  %v139_v32 = vld [vmem:[%s15683_s0 + $0x40] sm:$0xff]  ;;  %v142_v35 = vld [vmem:[%s15683_s0 + $0x58] sm:$0xff] }
  0x6d   :  { %15739 = vst [vmem:[#allocation23_spill] sm:$0xff] %v12448_v11  ;;  %10585 = vmatprep.subr.bf16.mxu0 %v15722_v0  ;;  %v207_v21 = vshll.u32 %v12448_v11, 16  ;;  %v594_v22 = vsel %vm387_vm1, %v187_v18, 0  ;;  %15740 = vst [vmem:[#allocation24_spill] sm:$0xff] %v12471_v28  ;;  %v211_v30 = vshrl.u32 %v12448_v11, 16  ;;  %v215_v31 = vshll.u32 %v12471_v28, 16 }
  0x6e   :  { %v196_v16 = vrot.slane %v194_v14, 1  ;;  %v201_v17 = vrot.slane %v199_v15, 1  ;;  %v12495_v38 = vpack.c.bf16 %v140_v33, %v139_v32  ;;  %v12497_v39 = vpack.c.bf16 %v142_v35, %v141_v34  ;;  %v143_v48 = vld [vmem:[%s15683_s0 + $0x60] sm:$0xff]  ;;  %v144_v49 = vld [vmem:[%s15683_s0 + $0x68] sm:$0xff]  ;;  %v145_v56 = vld [vmem:[%s15683_s0 + $0x70] sm:$0xff] }
  0x6f   :  { %v209_v27 = vrot.slane %v207_v21, 1  ;;  %v217_v37 = vrot.slane %v215_v31, 1  ;;  %v219_v41 = vshrl.u32 %v12471_v28, 16  ;;  %v12523_v52 = vpack.c.bf16 %v144_v49, %v143_v48  ;;  %v146_v57 = vld [vmem:[%s15683_s0 + $0x78] sm:$0xff]  ;;  %v147_v1 = vld [vmem:[%s15683_s0 + $0x80] sm:$0xff]  ;;  %v148_v2 = vld [vmem:[%s15683_s0 + $0x88] sm:$0xff] }
  0x70   :  { %v197_v19 = vor.u32 %v196_v16, %v192_v13  ;;  %v205_v26 = vor.u32 %v203_v20, %v201_v17  ;;  %15741 = vst [vmem:[#allocation25_spill] sm:$0xff] %v12495_v38  ;;  %15742 = vst [vmem:[#allocation26_spill] sm:$0xff] %v12497_v39  ;;  %v223_v42 = vshll.u32 %v12495_v38, 16  ;;  %v231_v43 = vshll.u32 %v12497_v39, 16  ;;  %v149_v12 = vld [vmem:[%s15683_s0 + $0x90] sm:$0xff]  ;;  %v150_v13 = vld [vmem:[%s15683_s0 + $0x98] sm:$0xff] }
  0x71   :  { %v213_v36 = vor.u32 %v211_v30, %v209_v27  ;;  %v221_v44 = vor.u32 %v219_v41, %v217_v37  ;;  %v227_v46 = vshrl.u32 %v12495_v38, 16  ;;  %15743 = vst [vmem:[#allocation27_spill] sm:$0xff] %v12523_v52  ;;  %v235_v54 = vshrl.u32 %v12497_v39, 16  ;;  %v151_v20 = vld [vmem:[%s15683_s0 + $0xa0] sm:$0xff]  ;;  %v152_v21 = vld [vmem:[%s15683_s0 + $0xa8] sm:$0xff]  ;;  %v153_v30 = vld [vmem:[%s15683_s0 + $0xb0] sm:$0xff] }
  0x72   :  { %v202_v25 = vsel %vm190_vm2, %v197_v19, %v201_v17  ;;  %v12475_v29 = vsel %vm190_vm2, %v205_v26, %v209_v27  ;;  %v225_v45 = vrot.slane %v223_v42, 1  ;;  %v233_v47 = vrot.slane %v231_v43, 1  ;;  %v154_v31 = vld [vmem:[%s15683_s0 + $0xb8] sm:$0xff]  ;;  %v155_v41 = vld [vmem:[%s15683_s0 + $0xc0] sm:$0xff]  ;;  %v156_v42 = vld [vmem:[%s15683_s0 + $0xc8] sm:$0xff] }
  0x73   :  { %10518 = vmatmul.mubr.msk.bf16.vlgmr.msra.gmra.mrb[0].mxu0 %vm335_vm3, %v202_v25  ;;  %v12500_v40 = vsel %vm190_vm2, %v213_v36, %v217_v37  ;;  %v239_v55 = vshll.u32 %v12523_v52, 16  ;;  %v12540_v60 = vpack.c.bf16 %v146_v57, %v145_v56  ;;  %v243_v62 = vshrl.u32 %v12523_v52, 16  ;;  %v157_v49 = vld [vmem:[%s15683_s0 + $0xd0] sm:$0xff] }
  0x74   :  { %10586 = vmatpush3.bf16.msra.mxu0 %v594_v22  ;;  %10521 = vmatprep.mubr.msk.bf16.mxu0 %vm12282_vm0, %v15722_v0  ;;  %v12517_v50 = vsel %vm190_vm2, %v221_v44, %v225_v45  ;;  %v229_v51 = vor.u32 %v227_v46, %v225_v45  ;;  %v237_v58 = vor.u32 %v235_v54, %v233_v47 }
  0x75   :  { %10655 = vmatprep.subr.bf16.mxu0 %v15722_v0  ;;  %v241_v59 = vrot.slane %v239_v55, 1  ;;  %15744 = vst [vmem:[#allocation28_spill] sm:$0xff] %v12540_v60  ;;  %v247_v63 = vshll.u32 %v12540_v60, 16  ;;  %v12557_v5 = vpack.c.bf16 %v148_v2, %v147_v1  ;;  %v251_v9 = vshrl.u32 %v12540_v60, 16 }
  0x76   :  { %v12526_v53 = vsel %vm190_vm2, %v229_v51, %v233_v47  ;;  %v12574_v16 = vpack.c.bf16 %v150_v13, %v149_v12  ;;  %v12591_v24 = vpack.c.bf16 %v152_v21, %v151_v20  ;;  %v12608_v34 = vpack.c.bf16 %v154_v31, %v153_v30  ;;  %v158_v51 = vld [vmem:[%s15683_s0 + $0xd8] sm:$0xff]  ;;  %v161_v12 = vld [vmem:[%s15683_s0 + $0xf0] sm:$0xff] }
  0x77   :  { %v12543_v61 = vsel %vm190_vm2, %v237_v58, %v241_v59  ;;  %v245_v3 = vor.u32 %v243_v62, %v241_v59  ;;  %v249_v4 = vrot.slane %v247_v63, 1  ;;  %15745 = vst [vmem:[#allocation29_spill] sm:$0xff] %v12557_v5  ;;  %v255_v10 = vshll.u32 %v12557_v5, 16  ;;  %v159_v62 = vld [vmem:[%s15683_s0 + $0xe0] sm:$0xff]  ;;  %v160_v63 = vld [vmem:[%s15683_s0 + $0xe8] sm:$0xff]  ;;  %v162_v13 = vld [vmem:[%s15683_s0 + $0xf8] sm:$0xff] }
  0x78   :  { %15746 = vst [vmem:[#allocation30_spill] sm:$0xff] %v12574_v16  ;;  %v259_v18 = vshrl.u32 %v12557_v5, 16  ;;  %v263_v19 = vshll.u32 %v12574_v16, 16  ;;  %15747 = vst [vmem:[#allocation31_spill] sm:$0xff] %v12591_v24  ;;  %v267_v26 = vshrl.u32 %v12574_v16, 16  ;;  %v271_v27 = vshll.u32 %v12591_v24, 16 }
  0x79   :  { %v12560_v6 = vsel %vm190_vm2, %v245_v3, %v249_v4  ;;  %v253_v14 = vor.u32 %v251_v9, %v249_v4  ;;  %v257_v15 = vrot.slane %v255_v10, 1  ;;  %15748 = vst [vmem:[#allocation32_spill] sm:$0xff] %v12608_v34  ;;  %v275_v36 = vshrl.u32 %v12591_v24, 16 }
  0x7a   :  { %v265_v23 = vrot.slane %v263_v19, 1  ;;  %v273_v33 = vrot.slane %v271_v27, 1  ;;  %v279_v37 = vshll.u32 %v12608_v34, 16  ;;  %v12625_v45 = vpack.c.bf16 %v156_v42, %v155_v41 }
  0x7b   :  { %10522 = vmatmul.mubr.msk.bf16.gmra.mrb[4].mxu0 %vm335_vm3, %v12475_v29  ;;  %v12577_v17 = vsel %vm190_vm2, %v253_v14, %v257_v15  ;;  %v261_v22 = vor.u32 %v259_v18, %v257_v15  ;;  %v283_v47 = vshrl.u32 %v12608_v34, 16  ;;  %v12642_v56 = vpack.c.bf16 %v158_v51, %v157_v49 }
  0x7c   :  { %10525 = vmatprep.mubr.msk.bf16.mxu0 %vm12282_vm0, %v15722_v0  ;;  %v269_v32 = vor.u32 %v267_v26, %v265_v23  ;;  %v277_v43 = vor.u32 %v275_v36, %v273_v33  ;;  %v281_v44 = vrot.slane %v279_v37, 1  ;;  %15749 = vst [vmem:[#allocation33_spill] sm:$0xff] %v12625_v45  ;;  %v287_v48 = vshll.u32 %v12625_v45, 16  ;;  %v12703_v36 = vld [vmem:[%s15683_s0 + $0x110] sm:$0xff] }
  0x7d   :  { %v12594_v25 = vsel %vm190_vm2, %v261_v22, %v265_v23  ;;  %15750 = vst [vmem:[#allocation34_spill] sm:$0xff] %v12642_v56  ;;  %v291_v58 = vshrl.u32 %v12625_v45, 16  ;;  %v295_v59 = vshll.u32 %v12642_v56, 16  ;;  %v12659_v3 = vpack.c.bf16 %v160_v63, %v159_v62  ;;  %v163_v22 = vld [vmem:[%s15683_s0 + $0x100] sm:$0xff]  ;;  %v164_v23 = vld [vmem:[%s15683_s0 + $0x108] sm:$0xff] }
  0x7e   :  { %v12611_v35 = vsel %vm190_vm2, %v269_v32, %v273_v33  ;;  %v12628_v46 = vsel %vm190_vm2, %v277_v43, %v281_v44  ;;  %v285_v54 = vor.u32 %v283_v47, %v281_v44  ;;  %v289_v55 = vrot.slane %v287_v48, 1 }
  0x7f   :  { %v297_v2 = vrot.slane %v295_v59, 1  ;;  %15751 = vst [vmem:[#allocation35_spill] sm:$0xff] %v12659_v3  ;;  %v299_v9 = vshrl.u32 %v12642_v56, 16  ;;  %v303_v10 = vshll.u32 %v12659_v3, 16  ;;  %v12676_v18 = vpack.c.bf16 %v162_v13, %v161_v12 }
  0x80   :  { %v12645_v57 = vsel %vm190_vm2, %v285_v54, %v289_v55  ;;  %v293_v1 = vor.u32 %v291_v58, %v289_v55  ;;  %v307_v20 = vshrl.u32 %v12659_v3, 16  ;;  %v12693_v30 = vpack.c.bf16 %v164_v23, %v163_v22  ;;  %v12081_v54 = vld [vmem:[%s15684_s1] ss:$0 sps:$4 sm:$0x44]  }
  0x81   :  { %v301_v14 = vor.u32 %v299_v9, %v297_v2  ;;  %v305_v15 = vrot.slane %v303_v10, 1  ;;  %15753 = vst [vmem:[#allocation37_spill] sm:$0xff] %v12676_v18  ;;  %v311_v21 = vshll.u32 %v12676_v18, 16  ;;  %v315_v32 = vshrl.u32 %v12676_v18, 16 }
  0x82   :  { %v12662_v4 = vsel %vm190_vm2, %v293_v1, %v297_v2  ;;  %15755 = vst [vmem:[#allocation39_spill] sm:$0xff] %v12693_v30  ;;  %v319_v33 = vshll.u32 %v12693_v30, 16  ;;  %v12711_v42 = vpack.c.bf16 %v12703_v36, %v12703_v36  ;;  %v323_v44 = vshrl.u32 %v12693_v30, 16  ;;  %v12082_v59 = vld [vmem:[%s15684_s1] ss:$0 sps:$4 sm:$0x88]  }
  0x83   :  { %10526 = vmatmul.mubr.msk.bf16.gmra.mrb[8].mxu0 %vm335_vm3, %v12500_v40  ;;  %15752 = vst [vmem:[#allocation36_spill] sm:$0xff] %v12662_v4  ;;  %v12679_v19 = vsel %vm190_vm2, %v301_v14, %v305_v15  ;;  %v309_v26 = vor.u32 %v307_v20, %v305_v15  ;;  %v313_v27 = vrot.slane %v311_v21, 1  ;;  %v822_v55 = vrot.slane %v12081_v54, 2 }
  0x84   :  { %10529 = vmatprep.mubr.msk.bf16.mxu0 %vm12282_vm0, %v15722_v0  ;;  %15754 = vst [vmem:[#allocation38_spill] sm:$0xff] %v12679_v19  ;;  %v321_v41 = vrot.slane %v319_v33, 1  ;;  %v327_v47 = vshll.u32 %v12711_v42, 16  ;;  %v1083_v62 = vrot.slane %v12082_v59, 3 }
  0x85   :  { %v12696_v31 = vsel %vm190_vm2, %v309_v26, %v313_v27  ;;  %v317_v37 = vor.u32 %v315_v32, %v313_v27  ;;  %v875_v58 = vsel %vm387_vm1, %v822_v55, 0 }
  0x86   :  { %15756 = vst [vmem:[#allocation40_spill] sm:$0xff] %v12696_v31  ;;  %v12722_v48 = vor.u32 %v323_v44, %v321_v41  ;;  %v329_v49 = vrot.slane %v327_v47, 1  ;;  %v1088_v63 = vsel %vm387_vm1, %v1083_v62, 0 }
  0x87   :  { %v12714_v43 = vsel %vm190_vm2, %v317_v37, %v321_v41  ;;  %10726 = vmatpush3.bf16.msra.mxu1 %v1088_v63 }
  0x88   :  { %15757 = vst [vmem:[#allocation41_spill] sm:$0xff] %v12714_v43  ;;  %15758 = vst [vmem:[#allocation42_spill] sm:$0xff] %v12722_v48  ;;  %v330_v51 = vsel %vm190_vm2, %v12722_v48, %v329_v49  ;;  %10865 = vmatprep.subr.bf16.mxu1 %v15722_v0 }
  0x8a   :  { %10728 = vmatmul.mubr.msk.bf16.vlgmr.msra.gmra.mrb[0].mxu1 %vm335_vm3, %v12440_v8 }
  0x8b   :  { %10530 = vmatmul.mubr.msk.bf16.gmra.mrb[12].mxu0 %vm335_vm3, %v12517_v50  ;;  %10731 = vmatprep.mubr.msk.bf16.mxu1 %vm12282_vm0, %v15722_v0 }
  0x8c   :  { %10533 = vmatprep.mubr.msk.bf16.mxu0 %vm12282_vm0, %v15722_v0 }
  0x92   :  { %10732 = vmatmul.mubr.msk.bf16.gmra.mrb[4].mxu1 %vm335_vm3, %v12448_v11 }
  0x93   :  { %10534 = vmatmul.mubr.msk.bf16.gmra.mrb[16].mxu0 %vm335_vm3, %v12526_v53  ;;  %10735 = vmatprep.mubr.msk.bf16.mxu1 %vm12282_vm0, %v15722_v0 }
  0x94   :  { %10537 = vmatprep.mubr.msk.bf16.mxu0 %vm12282_vm0, %v15722_v0 }
  0x9a   :  { %10736 = vmatmul.mubr.msk.bf16.gmra.mrb[8].mxu1 %vm335_vm3, %v12471_v28 }
  0x9b   :  { %10538 = vmatmul.mubr.msk.bf16.gmra.mrb[20].mxu0 %vm335_vm3, %v12543_v61  ;;  %10739 = vmatprep.mubr.msk.bf16.mxu1 %vm12282_vm0, %v15722_v0 }
  0x9c   :  { %10541 = vmatprep.mubr.msk.bf16.mxu0 %vm12282_vm0, %v15722_v0 }
  0xa2   :  { %10740 = vmatmul.mubr.msk.bf16.gmra.mrb[12].mxu1 %vm335_vm3, %v12495_v38 }
  0xa3   :  { %10542 = vmatmul.mubr.msk.bf16.gmra.mrb[24].mxu0 %vm335_vm3, %v12560_v6  ;;  %10743 = vmatprep.mubr.msk.bf16.mxu1 %vm12282_vm0, %v15722_v0 }
  0xa4   :  { %10545 = vmatprep.mubr.msk.bf16.mxu0 %vm12282_vm0, %v15722_v0 }
  0xaa   :  { %10744 = vmatmul.mubr.msk.bf16.gmra.mrb[16].mxu1 %vm335_vm3, %v12497_v39 }
  0xab   :  { %10546 = vmatmul.mubr.msk.bf16.gmra.mrb[28].mxu0 %vm335_vm3, %v12577_v17  ;;  %10747 = vmatprep.mubr.msk.bf16.mxu1 %vm12282_vm0, %v15722_v0 }
  0xac   :  { %10549 = vmatprep.mubr.msk.bf16.mxu0 %vm12282_vm0, %v15722_v0 }
  0xb2   :  { %10748 = vmatmul.mubr.msk.bf16.gmra.mrb[20].mxu1 %vm335_vm3, %v12523_v52 }
  0xb3   :  { %10550 = vmatmul.mubr.msk.bf16.gmra.mrb[32].mxu0 %vm335_vm3, %v12594_v25  ;;  %10751 = vmatprep.mubr.msk.bf16.mxu1 %vm12282_vm0, %v15722_v0 }
  0xb4   :  { %10553 = vmatprep.mubr.msk.bf16.mxu0 %vm12282_vm0, %v15722_v0 }
  0xba   :  { %10752 = vmatmul.mubr.msk.bf16.gmra.mrb[24].mxu1 %vm335_vm3, %v12540_v60 }
  0xbb   :  { %10554 = vmatmul.mubr.msk.bf16.gmra.mrb[36].mxu0 %vm335_vm3, %v12611_v35  ;;  %10755 = vmatprep.mubr.msk.bf16.mxu1 %vm12282_vm0, %v15722_v0 }
  0xbc   :  { %10557 = vmatprep.mubr.msk.bf16.mxu0 %vm12282_vm0, %v15722_v0 }
  0xc2   :  { %10756 = vmatmul.mubr.msk.bf16.gmra.mrb[28].mxu1 %vm335_vm3, %v12557_v5 }
  0xc3   :  { %10558 = vmatmul.mubr.msk.bf16.gmra.mrb[40].mxu0 %vm335_vm3, %v12628_v46  ;;  %10759 = vmatprep.mubr.msk.bf16.mxu1 %vm12282_vm0, %v15722_v0 }
  0xc4   :  { %10561 = vmatprep.mubr.msk.bf16.mxu0 %vm12282_vm0, %v15722_v0 }
  0xca   :  { %10760 = vmatmul.mubr.msk.bf16.gmra.mrb[32].mxu1 %vm335_vm3, %v12574_v16 }
  0xcb   :  { %10562 = vmatmul.mubr.msk.bf16.gmra.mrb[44].mxu0 %vm335_vm3, %v12645_v57  ;;  %10763 = vmatprep.mubr.msk.bf16.mxu1 %vm12282_vm0, %v15722_v0 }
  0xcc   :  { %10565 = vmatprep.mubr.msk.bf16.mxu0 %vm12282_vm0, %v15722_v0 }
  0xd2   :  { %10764 = vmatmul.mubr.msk.bf16.gmra.mrb[36].mxu1 %vm335_vm3, %v12591_v24 }
  0xd3   :  { %10566 = vmatmul.mubr.msk.bf16.gmra.mrb[48].mxu0 %vm335_vm3, %v12662_v4  ;;  %10767 = vmatprep.mubr.msk.bf16.mxu1 %vm12282_vm0, %v15722_v0 }
  0xd4   :  { %10569 = vmatprep.mubr.msk.bf16.mxu0 %vm12282_vm0, %v15722_v0 }
  0xda   :  { %10768 = vmatmul.mubr.msk.bf16.gmra.mrb[40].mxu1 %vm335_vm3, %v12608_v34 }
  0xdb   :  { %10570 = vmatmul.mubr.msk.bf16.gmra.mrb[52].mxu0 %vm335_vm3, %v12679_v19  ;;  %10771 = vmatprep.mubr.msk.bf16.mxu1 %vm12282_vm0, %v15722_v0 }
  0xdc   :  { %10573 = vmatprep.mubr.msk.bf16.mxu0 %vm12282_vm0, %v15722_v0 }
  0xe2   :  { %10772 = vmatmul.mubr.msk.bf16.gmra.mrb[44].mxu1 %vm335_vm3, %v12625_v45 }
  0xe3   :  { %10574 = vmatmul.mubr.msk.bf16.gmra.mrb[56].mxu0 %vm335_vm3, %v12696_v31  ;;  %10775 = vmatprep.mubr.msk.bf16.mxu1 %vm12282_vm0, %v15722_v0 }
  0xe4   :  { %10577 = vmatprep.mubr.msk.bf16.mxu0 %vm12282_vm0, %v15722_v0 }
  0xea   :  { %10776 = vmatmul.mubr.msk.bf16.gmra.mrb[48].mxu1 %vm335_vm3, %v12642_v56 }
  0xeb   :  { %10578 = vmatmul.mubr.msk.bf16.gmra.mrb[60].mxu0 %vm335_vm3, %v12714_v43  ;;  %10779 = vmatprep.mubr.msk.bf16.mxu1 %vm12282_vm0, %v15722_v0 }
  0xec   :  { %10581 = vmatprep.mubr.msk.bf16.mxu0 %vm12282_vm0, %v15722_v0 }
  0xf2   :  { %10780 = vmatmul.mubr.msk.bf16.gmra.mrb[52].mxu1 %vm335_vm3, %v12659_v3 }
  0xf3   :  { %10582 = vmatmul.mubr.msk.bf16.gmra.mrb[64].mxu0 %vm335_vm3, %v330_v51  ;;  %10783 = vmatprep.mubr.msk.bf16.mxu1 %vm12282_vm0, %v15722_v0 }
  0xf4   :  { %10587 = vmatprep.mubr.msk.bf16.mxu0 %vm12282_vm0, %v15722_v0 }
  0xfa   :  { %10784 = vmatmul.mubr.msk.bf16.gmra.mrb[56].mxu1 %vm335_vm3, %v12676_v18 }
  0xfb   :  { %10588 = vmatmul.mubr.msk.bf16.vlgmr.msra.gmra.mrb[68].mxu0 %vm335_vm3, %v12438_v7  ;;  %10787 = vmatprep.mubr.msk.bf16.mxu1 %vm12282_vm0, %v15722_v0 }
  0xfc   :  { %10656 = vmatpush3.bf16.msra.mxu0 %v875_v58  ;;  %10591 = vmatprep.mubr.msk.bf16.mxu0 %vm12282_vm0, %v15722_v0 }
  0xfd   :  { %10795 = vmatprep.subr.bf16.mxu0 %v15722_v0 }
 0x102   :  { %10788 = vmatmul.mubr.msk.bf16.gmra.mrb[60].mxu1 %vm335_vm3, %v12693_v30 }
 0x103   :  { %10592 = vmatmul.mubr.msk.bf16.gmra.mrb[72].mxu0 %vm335_vm3, %v12440_v8  ;;  %10791 = vmatprep.mubr.msk.bf16.mxu1 %vm12282_vm0, %v15722_v0 }
 0x104   :  { %10595 = vmatprep.mubr.msk.bf16.mxu0 %vm12282_vm0, %v15722_v0 }
 0x10b   :  { %10596 = vmatmul.mubr.msk.bf16.gmra.mrb[76].mxu0 %vm335_vm3, %v12448_v11 }
 0x10c   :  { %10599 = vmatprep.mubr.msk.bf16.mxu0 %vm12282_vm0, %v15722_v0 }
 0x113   :  { %10600 = vmatmul.mubr.msk.bf16.gmra.mrb[80].mxu0 %vm335_vm3, %v12471_v28 }
 0x114   :  { %10603 = vmatprep.mubr.msk.bf16.mxu0 %vm12282_vm0, %v15722_v0 }
 0x11b   :  { %10604 = vmatmul.mubr.msk.bf16.gmra.mrb[84].mxu0 %vm335_vm3, %v12495_v38 }
 0x11c   :  { %10607 = vmatprep.mubr.msk.bf16.mxu0 %vm12282_vm0, %v15722_v0 }
 0x123   :  { %10608 = vmatmul.mubr.msk.bf16.gmra.mrb[88].mxu0 %vm335_vm3, %v12497_v39 }
 0x124   :  { %10611 = vmatprep.mubr.msk.bf16.mxu0 %vm12282_vm0, %v15722_v0 }
 0x12b   :  { %10612 = vmatmul.mubr.msk.bf16.gmra.mrb[92].mxu0 %vm335_vm3, %v12523_v52 }
 0x12c   :  { %10615 = vmatprep.mubr.msk.bf16.mxu0 %vm12282_vm0, %v15722_v0 }
 0x133   :  { %10616 = vmatmul.mubr.msk.bf16.gmra.mrb[96].mxu0 %vm335_vm3, %v12540_v60 }
 0x134   :  { %10619 = vmatprep.mubr.msk.bf16.mxu0 %vm12282_vm0, %v15722_v0 }
 0x13b   :  { %10620 = vmatmul.mubr.msk.bf16.gmra.mrb[100].mxu0 %vm335_vm3, %v12557_v5 }
 0x13c   :  { %10623 = vmatprep.mubr.msk.bf16.mxu0 %vm12282_vm0, %v15722_v0 }
 0x143   :  { %10624 = vmatmul.mubr.msk.bf16.gmra.mrb[104].mxu0 %vm335_vm3, %v12574_v16 }
 0x144   :  { %10627 = vmatprep.mubr.msk.bf16.mxu0 %vm12282_vm0, %v15722_v0 }
 0x146   :  { %v12813_v1 = vpop.f32.mrb[0].mxu0 }
 0x147   :  { %v10519_v2 = vpop.f32.mrb[1].mxu0 }
 0x148   :  { %v12817_v9 = vpop.f32.mrb[2].mxu0  ;;  %v784_v2 = vrot.slane %v12438_v7, 1 }
 0x149   :  { %v10520_v10 = vpop.f32.mrb[3].mxu0 }
 0x14a   :  { %v785_v10 = vrot.slane %v12440_v8, 1 }
 0x14b   :  { %10628 = vmatmul.mubr.msk.bf16.gmra.mrb[108].mxu0 %vm335_vm3, %v12591_v24 }
 0x14c   :  { %10631 = vmatprep.mubr.msk.bf16.mxu0 %vm12282_vm0, %v15722_v0  ;;  %v786_v7 = vsel %vm783_vm4, %v784_v2, %v785_v10 }
 0x14e   :  { %v12825_v12 = vpop.f32.mrb[4].mxu0 }
 0x14f   :  { %v10523_v13 = vpop.f32.mrb[5].mxu0 }
 0x150   :  { %v12829_v14 = vpop.f32.mrb[6].mxu0 }
 0x151   :  { %v10524_v15 = vpop.f32.mrb[7].mxu0 }
 0x152   :  { %v1292_v15 = vld [vmem:[%s15684_s1 + $0x4] sm:$0x1] }
 0x153   :  { %10632 = vmatmul.mubr.msk.bf16.gmra.mrb[112].mxu0 %vm335_vm3, %v12608_v34  ;;  %v1312_v8 = vsel %vm387_vm1, %v1292_v15, 0 }
 0x154   :  { %10635 = vmatprep.mubr.msk.bf16.mxu0 %vm12282_vm0, %v15722_v0 }
 0x156   :  { %v12837_v20 = vpop.f32.mrb[8].mxu0 }
 0x157   :  { %v10527_v21 = vpop.f32.mrb[9].mxu0 }
 0x158   :  { %v12841_v22 = vpop.f32.mrb[10].mxu0 }
 0x159   :  { %v10528_v23 = vpop.f32.mrb[11].mxu0 }
 0x15b   :  { %10636 = vmatmul.mubr.msk.bf16.gmra.mrb[116].mxu0 %vm335_vm3, %v12625_v45 }
 0x15c   :  { %10639 = vmatprep.mubr.msk.bf16.mxu0 %vm12282_vm0, %v15722_v0 }
 0x15e   :  { %v12849_v26 = vpop.f32.mrb[12].mxu0 }
 0x15f   :  { %v10531_v27 = vpop.f32.mrb[13].mxu0 }
 0x160   :  { %v12853_v32 = vpop.f32.mrb[14].mxu0 }
 0x161   :  { %v10532_v33 = vpop.f32.mrb[15].mxu0 }
 0x162   :  { %v166_v33 = vld [vmem:[%s15683_s0 + $0x118] sm:$0xff] }
 0x163   :  { %10640 = vmatmul.mubr.msk.bf16.gmra.mrb[120].mxu0 %vm335_vm3, %v12642_v56 }
 0x164   :  { %10643 = vmatprep.mubr.msk.bf16.mxu0 %vm12282_vm0, %v15722_v0 }
 0x166   :  { %v12861_v37 = vpop.f32.mrb[16].mxu0 }
 0x167   :  { %v10535_v41 = vpop.f32.mrb[17].mxu0 }
 0x168   :  { %v12865_v44 = vpop.f32.mrb[18].mxu0  ;;  %v12915_v41 = vpack.c.bf16 %v166_v33, %v12703_v36 }
 0x169   :  { %v10536_v47 = vpop.f32.mrb[19].mxu0 }
 0x16a   :  { %15759 = vst [vmem:[#allocation43_spill] sm:$0xff] %v12915_v41  ;;  %v787_v47 = vrot.slane %v12448_v11, 1  ;;  %10792 = vmatmul.mubr.msk.bf16.gmra.mrb[64].mxu1 %vm335_vm3, %v12915_v41 }
 0x16b   :  { %10644 = vmatmul.mubr.msk.bf16.gmra.mrb[124].mxu0 %vm335_vm3, %v12659_v3  ;;  %10867 = vmatprep.mubr.msk.bf16.mxu1 %vm12282_vm0, %v15722_v0 }
 0x16c   :  { %10647 = vmatprep.mubr.msk.bf16.mxu0 %vm12282_vm0, %v15722_v0  ;;  %v788_v2 = vsel %vm783_vm4, %v785_v10, %v787_v47 }
 0x16e   :  { %v12873_v49 = vpop.f32.mrb[20].mxu0 }
 0x16f   :  { %v10539_v51 = vpop.f32.mrb[21].mxu0 }
 0x170   :  { %v12877_v54 = vpop.f32.mrb[22].mxu0  ;;  %v12083_v51 = vld [vmem:[%s15684_s1 + $0x4] ss:$0 sps:$4 sm:$0x22]  }
 0x171   :  { %v10540_v55 = vpop.f32.mrb[23].mxu0 }
 0x173   :  { %10648 = vmatmul.mubr.msk.bf16.gmra.mrb[128].mxu0 %vm335_vm3, %v12676_v18 }
 0x174   :  { %10651 = vmatprep.mubr.msk.bf16.mxu0 %vm12282_vm0, %v15722_v0 }
 0x176   :  { %v12885_v58 = vpop.f32.mrb[24].mxu0 }
 0x177   :  { %v10543_v59 = vpop.f32.mrb[25].mxu0 }
 0x178   :  { %v12889_v62 = vpop.f32.mrb[26].mxu0  ;;  %v1525_v59 = vrot.slane %v12083_v51, 1 }
 0x179   :  { %v10544_v63 = vpop.f32.mrb[27].mxu0 }
 0x17b   :  { %10652 = vmatmul.mubr.msk.bf16.gmra.mrb[132].mxu0 %vm335_vm3, %v12693_v30 }
 0x17c   :  { %10657 = vmatprep.mubr.msk.bf16.mxu0 %vm12282_vm0, %v15722_v0 }
 0x17e   :  { %v12899_v13 = vpop.f32.mrb[28].mxu0 }
 0x17f   :  { %v10547_v21 = vpop.f32.mrb[29].mxu0 }
 0x180   :  { %v12906_v23 = vpop.f32.mrb[30].mxu0  ;;  %v1533_v21 = vsel %vm387_vm1, %v1525_v59, 0 }
 0x181   :  { %v10548_v27 = vpop.f32.mrb[31].mxu0  ;;  %10866 = vmatpush3.bf16.msra.mxu1 %v1533_v21 }
 0x182   :  { %11005 = vmatprep.subr.bf16.mxu1 %v15722_v0 }
 0x183   :  { %10658 = vmatmul.mubr.msk.bf16.vlgmr.msra.gmra.mrb[136].mxu0 %vm335_vm3, %v786_v7  ;;  %v789_v7 = vrot.slane %v12471_v28, 1 }
 0x184   :  { %10796 = vmatpush3.bf16.msra.mxu0 %v1312_v8  ;;  %10661 = vmatprep.mubr.msk.bf16.mxu0 %vm12282_vm0, %v15722_v0 }
 0x185   :  { %10935 = vmatprep.subr.bf16.mxu0 %v15722_v0  ;;  %10868 = vmatmul.mubr.msk.bf16.vlgmr.msra.gmra.mrb[68].mxu1 %vm335_vm3, %v788_v2  ;;  %v12947_v33 = vsel %vm783_vm4, %v787_v47, %v789_v7 }
 0x186   :  { %v12926_v55 = vpop.f32.mrb[32].mxu0  ;;  %10871 = vmatprep.mubr.msk.bf16.mxu1 %vm12282_vm0, %v15722_v0  ;;  %15760 = vst [vmem:[#allocation44_spill] sm:$0xff] %v12947_v33 }
 0x187   :  { %v10551_v36 = vpop.f32.mrb[33].mxu0 }
 0x188   :  { %v12930_v63 = vpop.f32.mrb[34].mxu0  ;;  %v791_v36 = vrot.slane %v12495_v38, 1 }
 0x189   :  { %v10552_v15 = vpop.f32.mrb[35].mxu0 }
 0x18a   :  { %v12963_v15 = vsel %vm783_vm4, %v789_v7, %v791_v36 }
 0x18b   :  { %10662 = vmatmul.mubr.msk.bf16.gmra.mrb[140].mxu0 %vm335_vm3, %v788_v2  ;;  %15761 = vst [vmem:[#allocation45_spill] sm:$0xff] %v12963_v15 }
 0x18c   :  { %10665 = vmatprep.mubr.msk.bf16.mxu0 %vm12282_vm0, %v15722_v0 }
 0x18d   :  { %10872 = vmatmul.mubr.msk.bf16.gmra.mrb[72].mxu1 %vm335_vm3, %v12947_v33 }
 0x18e   :  { %v12940_v27 = vpop.f32.mrb[36].mxu0  ;;  %10875 = vmatprep.mubr.msk.bf16.mxu1 %vm12282_vm0, %v15722_v0 }
 0x18f   :  { %v10555_v10 = vpop.f32.mrb[37].mxu0 }
 0x190   :  { %v12944_v8 = vpop.f32.mrb[38].mxu0  ;;  %v793_v10 = vrot.slane %v12497_v39, 1 }
 0x191   :  { %v10556_v51 = vpop.f32.mrb[39].mxu0 }
 0x193   :  { %10666 = vmatmul.mubr.msk.bf16.gmra.mrb[144].mxu0 %vm335_vm3, %v12947_v33 }
 0x194   :  { %10669 = vmatprep.mubr.msk.bf16.mxu0 %vm12282_vm0, %v15722_v0 }
 0x195   :  { %10876 = vmatmul.mubr.msk.bf16.gmra.mrb[76].mxu1 %vm335_vm3, %v12963_v15 }
 0x196   :  { %v12956_v59 = vpop.f32.mrb[40].mxu0  ;;  %10879 = vmatprep.mubr.msk.bf16.mxu1 %vm12282_vm0, %v15722_v0 }
 0x197   :  { %v10559_v2 = vpop.f32.mrb[41].mxu0 }
 0x198   :  { %v12960_v47 = vpop.f32.mrb[42].mxu0 }
 0x199   :  { %v10560_v21 = vpop.f32.mrb[43].mxu0 }
 0x19a   :  { %v12979_v21 = vsel %vm783_vm4, %v791_v36, %v793_v10 }
 0x19b   :  { %10670 = vmatmul.mubr.msk.bf16.gmra.mrb[148].mxu0 %vm335_vm3, %v12963_v15  ;;  %15762 = vst [vmem:[#allocation46_spill] sm:$0xff] %v12979_v21  ;;  %v795_v15 = vrot.slane %v12523_v52, 1 }
 0x19c   :  { %10673 = vmatprep.mubr.msk.bf16.mxu0 %vm12282_vm0, %v15722_v0 }
 0x19d   :  { %10880 = vmatmul.mubr.msk.bf16.gmra.mrb[80].mxu1 %vm335_vm3, %v12979_v21 }
 0x19e   :  { %v12972_v51 = vpop.f32.mrb[44].mxu0  ;;  %10883 = vmatprep.mubr.msk.bf16.mxu1 %vm12282_vm0, %v15722_v0 }
 0x19f   :  { %v10563_v2 = vpop.f32.mrb[45].mxu0 }
 0x1a0   :  { %v12976_v7 = vpop.f32.mrb[46].mxu0 }
 0x1a1   :  { %v10564_v33 = vpop.f32.mrb[47].mxu0 }
 0x1a2   :  { %v12995_v33 = vsel %vm783_vm4, %v793_v10, %v795_v15 }
 0x1a3   :  { %10674 = vmatmul.mubr.msk.bf16.gmra.mrb[152].mxu0 %vm335_vm3, %v12979_v21  ;;  %15763 = vst [vmem:[#allocation47_spill] sm:$0xff] %v12995_v33  ;;  %v797_v21 = vrot.slane %v12540_v60, 1 }
 0x1a4   :  { %10677 = vmatprep.mubr.msk.bf16.mxu0 %vm12282_vm0, %v15722_v0 }
 0x1a5   :  { %10884 = vmatmul.mubr.msk.bf16.gmra.mrb[84].mxu1 %vm335_vm3, %v12995_v33 }
 0x1a6   :  { %v12988_v39 = vpop.f32.mrb[48].mxu0  ;;  %10887 = vmatprep.mubr.msk.bf16.mxu1 %vm12282_vm0, %v15722_v0 }
 0x1a7   :  { %v10567_v2 = vpop.f32.mrb[49].mxu0 }
 0x1a8   :  { %v12992_v36 = vpop.f32.mrb[50].mxu0 }
 0x1a9   :  { %v10568_v38 = vpop.f32.mrb[51].mxu0 }
 0x1aa   :  { %v13011_v38 = vsel %vm783_vm4, %v795_v15, %v797_v21 }
 0x1ab   :  { %10678 = vmatmul.mubr.msk.bf16.gmra.mrb[156].mxu0 %vm335_vm3, %v12995_v33  ;;  %15764 = vst [vmem:[#allocation48_spill] sm:$0xff] %v13011_v38  ;;  %v799_v33 = vrot.slane %v12557_v5, 1 }
 0x1ac   :  { %10681 = vmatprep.mubr.msk.bf16.mxu0 %vm12282_vm0, %v15722_v0 }
 0x1ad   :  { %10888 = vmatmul.mubr.msk.bf16.gmra.mrb[88].mxu1 %vm335_vm3, %v13011_v38 }
 0x1ae   :  { %v13004_v52 = vpop.f32.mrb[52].mxu0  ;;  %10891 = vmatprep.mubr.msk.bf16.mxu1 %vm12282_vm0, %v15722_v0 }
 0x1af   :  { %v10571_v2 = vpop.f32.mrb[53].mxu0 }
 0x1b0   :  { %v13008_v10 = vpop.f32.mrb[54].mxu0 }
 0x1b1   :  { %v10572_v28 = vpop.f32.mrb[55].mxu0 }
 0x1b2   :  { %v13027_v28 = vsel %vm783_vm4, %v797_v21, %v799_v33 }
 0x1b3   :  { %10682 = vmatmul.mubr.msk.bf16.gmra.mrb[160].mxu0 %vm335_vm3, %v13011_v38  ;;  %15765 = vst [vmem:[#allocation49_spill] sm:$0xff] %v13027_v28  ;;  %v801_v38 = vrot.slane %v12574_v16, 1 }
 0x1b4   :  { %10685 = vmatprep.mubr.msk.bf16.mxu0 %vm12282_vm0, %v15722_v0 }
 0x1b5   :  { %10892 = vmatmul.mubr.msk.bf16.gmra.mrb[92].mxu1 %vm335_vm3, %v13027_v28 }
 0x1b6   :  { %v13020_v60 = vpop.f32.mrb[56].mxu0  ;;  %10895 = vmatprep.mubr.msk.bf16.mxu1 %vm12282_vm0, %v15722_v0 }
 0x1b7   :  { %v10575_v2 = vpop.f32.mrb[57].mxu0 }
 0x1b8   :  { %v13024_v15 = vpop.f32.mrb[58].mxu0 }
 0x1b9   :  { %v10576_v11 = vpop.f32.mrb[59].mxu0 }
 0x1ba   :  { %v13043_v11 = vsel %vm783_vm4, %v799_v33, %v801_v38 }
 0x1bb   :  { %10686 = vmatmul.mubr.msk.bf16.gmra.mrb[164].mxu0 %vm335_vm3, %v13027_v28  ;;  %15766 = vst [vmem:[#allocation50_spill] sm:$0xff] %v13043_v11  ;;  %v803_v28 = vrot.slane %v12591_v24, 1  ;;  %v805_v24 = vrot.slane %v12608_v34, 1 }
 0x1bc   :  { %10689 = vmatprep.mubr.msk.bf16.mxu0 %vm12282_vm0, %v15722_v0 }
 0x1bd   :  { %10896 = vmatmul.mubr.msk.bf16.gmra.mrb[96].mxu1 %vm335_vm3, %v13043_v11 }
 0x1be   :  { %v13036_v5 = vpop.f32.mrb[60].mxu0  ;;  %10899 = vmatprep.mubr.msk.bf16.mxu1 %vm12282_vm0, %v15722_v0 }
 0x1bf   :  { %v10579_v2 = vpop.f32.mrb[61].mxu0 }
 0x1c0   :  { %v13040_v21 = vpop.f32.mrb[62].mxu0 }
 0x1c1   :  { %v10580_v48 = vpop.f32.mrb[63].mxu0 }
 0x1c2   :  { %v13057_v48 = vsel %vm783_vm4, %v801_v38, %v803_v28 }
 0x1c3   :  { %10690 = vmatmul.mubr.msk.bf16.gmra.mrb[168].mxu0 %vm335_vm3, %v13043_v11  ;;  %15767 = vst [vmem:[#allocation51_spill] sm:$0xff] %v13057_v48 }
 0x1c4   :  { %10693 = vmatprep.mubr.msk.bf16.mxu0 %vm12282_vm0, %v15722_v0 }
 0x1c5   :  { %10900 = vmatmul.mubr.msk.bf16.gmra.mrb[100].mxu1 %vm335_vm3, %v13057_v48 }
 0x1c6   :  { %v13052_v16 = vpop.f32.mrb[64].mxu0  ;;  %10903 = vmatprep.mubr.msk.bf16.mxu1 %vm12282_vm0, %v15722_v0 }
 0x1c7   :  { %v10583_v2 = vpop.f32.mrb[65].mxu0 }
 0x1c8   :  { %v556_v33 = vpop.f32.mrb[66].mxu0 }
 0x1c9   :  { %v10584_v43 = vpop.f32.mrb[67].mxu0  ;;  %v13072_v33 = vsel %vm783_vm4, %v803_v28, %v805_v24 }
 0x1ca   :  { %15768 = vst [vmem:[#allocation52_spill] sm:$0xff] %v13072_v33 }
 0x1cb   :  { %10694 = vmatmul.mubr.msk.bf16.gmra.mrb[172].mxu0 %vm335_vm3, %v13057_v48  ;;  %v807_v48 = vrot.slane %v12625_v45, 1 }
 0x1cc   :  { %10697 = vmatprep.mubr.msk.bf16.mxu0 %vm12282_vm0, %v15722_v0 }
 0x1cd   :  { %10904 = vmatmul.mubr.msk.bf16.gmra.mrb[104].mxu1 %vm335_vm3, %v13072_v33 }
 0x1ce   :  { %v630_v11 = vpop.f32.mrb[68].mxu0  ;;  %10907 = vmatprep.mubr.msk.bf16.mxu1 %vm12282_vm0, %v15722_v0 }
 0x1cf   :  { %v13069_v2 = vadd.f32 %v630_v11, %v12813_v1  ;;  %v10589_v38 = vpop.f32.mrb[69].mxu0  ;;  %v13090_v11 = vsel %vm783_vm4, %v805_v24, %v807_v48 }
 0x1d0   :  { %v633_v43 = vpop.f32.mrb[70].mxu0  ;;  %15769 = vst [vmem:[#allocation53_spill] sm:$0xff] %v13090_v11  ;;  %v13092_v38 = vpop.f32.mrb[0].mxu1 }
 0x1d1   :  { %v13075_v31 = vadd.f32 %v633_v43, %v12817_v9  ;;  %v10590_v19 = vpop.f32.mrb[71].mxu0  ;;  %v10729_v34 = vpop.f32.mrb[1].mxu1 }
 0x1d3   :  { %10698 = vmatmul.mubr.msk.bf16.gmra.mrb[176].mxu0 %vm335_vm3, %v13072_v33  ;;  %v13097_v33 = vpop.f32.mrb[2].mxu1 }
 0x1d4   :  { %10701 = vmatprep.mubr.msk.bf16.mxu0 %vm12282_vm0, %v15722_v0  ;;  %v10730_v0 = vpop.f32.mrb[3].mxu1 }
 0x1d5   :  { %10908 = vmatmul.mubr.msk.bf16.gmra.mrb[108].mxu1 %vm335_vm3, %v13090_v11  ;;  %v13114_v0 = vpop.f32.mrb[4].mxu1 }
 0x1d6   :  { %v638_v1 = vpop.f32.mrb[72].mxu0  ;;  %v10733_v4 = vpop.f32.mrb[5].mxu1 }
 0x1d7   :  { %v13087_v28 = vadd.f32 %v638_v1, %v12825_v12  ;;  %v10593_v9 = vpop.f32.mrb[73].mxu0  ;;  %v15771_v12 = vmov 0.0   ;;  %v809_v1 = vrot.slane %v12642_v56, 1 }
 0x1d8   :  { %v641_v19 = vpop.f32.mrb[74].mxu0  ;;  %10911 = vmatprep.mubr.msk.bf16.mxu1 %vm12282_vm0, %v15771_v12 }
 0x1d9   :  { %v13095_v43 = vadd.f32 %v641_v19, %v12829_v14  ;;  %v10594_v45 = vpop.f32.mrb[75].mxu0  ;;  %v13112_v9 = vsel %vm783_vm4, %v807_v48, %v809_v1 }
 0x1da   :  { %15772 = vst [vmem:[#allocation55_spill] sm:$0xff] %v13112_v9 }
 0x1db   :  { %15770 = vst [vmem:[#allocation54_spill] sm:$0xff] %v13095_v43  ;;  %10702 = vmatmul.mubr.msk.bf16.gmra.mrb[180].mxu0 %vm335_vm3, %v13090_v11  ;;  %v13119_v11 = vpop.f32.mrb[6].mxu1 }
 0x1dc   :  { %10705 = vmatprep.mubr.msk.bf16.mxu0 %vm12282_vm0, %v15771_v12  ;;  %v10734_v43 = vpop.f32.mrb[7].mxu1 }
 0x1dd   :  { %10912 = vmatmul.mubr.msk.bf16.gmra.mrb[112].mxu1 %vm335_vm3, %v13112_v9  ;;  %v13136_v43 = vpop.f32.mrb[8].mxu1 }
 0x1de   :  { %v646_v24 = vpop.f32.mrb[76].mxu0  ;;  %10915 = vmatprep.mubr.msk.bf16.mxu1 %vm12282_vm0, %v15771_v12 }
 0x1df   :  { %v13109_v34 = vadd.f32 %v646_v24, %v12837_v20  ;;  %v10597_v45 = vpop.f32.mrb[77].mxu0  ;;  %v811_v20 = vrot.slane %v12659_v3, 1  ;;  %v10737_v3 = vpop.f32.mrb[9].mxu1 }
 0x1e0   :  { %v649_v14 = vpop.f32.mrb[78].mxu0 }
 0x1e1   :  { %v13117_v19 = vadd.f32 %v649_v14, %v12841_v22  ;;  %v10598_v56 = vpop.f32.mrb[79].mxu0  ;;  %v13134_v24 = vsel %vm783_vm4, %v809_v1, %v811_v20 }
 0x1e2   :  { %15774 = vst [vmem:[#allocation57_spill] sm:$0xff] %v13134_v24 }
 0x1e3   :  { %15773 = vst [vmem:[#allocation56_spill] sm:$0xff] %v13117_v19  ;;  %10706 = vmatmul.mubr.msk.bf16.gmra.mrb[184].mxu0 %vm335_vm3, %v13112_v9  ;;  %v13141_v9 = vpop.f32.mrb[10].mxu1 }
 0x1e4   :  { %10709 = vmatprep.mubr.msk.bf16.mxu0 %vm12282_vm0, %v15771_v12  ;;  %v10738_v19 = vpop.f32.mrb[11].mxu1 }
 0x1e5   :  { %10916 = vmatmul.mubr.msk.bf16.gmra.mrb[116].mxu1 %vm335_vm3, %v13134_v24  ;;  %v13158_v19 = vpop.f32.mrb[12].mxu1 }
 0x1e6   :  { %v654_v48 = vpop.f32.mrb[80].mxu0  ;;  %10919 = vmatprep.mubr.msk.bf16.mxu1 %vm12282_vm0, %v15771_v12 }
 0x1e7   :  { %v13131_v56 = vadd.f32 %v654_v48, %v12849_v26  ;;  %v10601_v4 = vpop.f32.mrb[81].mxu0  ;;  %v813_v26 = vrot.slane %v12676_v18, 1  ;;  %v10741_v18 = vpop.f32.mrb[13].mxu1 }
 0x1e8   :  { %v657_v22 = vpop.f32.mrb[82].mxu0 }
 0x1e9   :  { %v13139_v45 = vadd.f32 %v657_v22, %v12853_v32  ;;  %v10602_v14 = vpop.f32.mrb[83].mxu0  ;;  %v13156_v4 = vsel %vm783_vm4, %v811_v20, %v813_v26 }
 0x1ea   :  { %15776 = vst [vmem:[#allocation59_spill] sm:$0xff] %v13156_v4 }
 0x1eb   :  { %15775 = vst [vmem:[#allocation58_spill] sm:$0xff] %v13139_v45  ;;  %10710 = vmatmul.mubr.msk.bf16.gmra.mrb[188].mxu0 %vm335_vm3, %v13134_v24  ;;  %v13163_v24 = vpop.f32.mrb[14].mxu1 }
 0x1ec   :  { %10713 = vmatprep.mubr.msk.bf16.mxu0 %vm12282_vm0, %v15771_v12  ;;  %v10742_v45 = vpop.f32.mrb[15].mxu1 }
 0x1ed   :  { %10920 = vmatmul.mubr.msk.bf16.gmra.mrb[120].mxu1 %vm335_vm3, %v13156_v4  ;;  %v13180_v45 = vpop.f32.mrb[16].mxu1 }
 0x1ee   :  { %v662_v1 = vpop.f32.mrb[84].mxu0  ;;  %10923 = vmatprep.mubr.msk.bf16.mxu1 %vm12282_vm0, %v15771_v12 }
 0x1ef   :  { %v13153_v3 = vadd.f32 %v662_v1, %v12861_v37  ;;  %v10605_v32 = vpop.f32.mrb[85].mxu0  ;;  %v815_v37 = vrot.slane %v12693_v30, 1  ;;  %v10745_v30 = vpop.f32.mrb[17].mxu1 }
 0x1f0   :  { %v665_v48 = vpop.f32.mrb[86].mxu0 }
 0x1f1   :  { %v13161_v22 = vadd.f32 %v665_v48, %v12865_v44  ;;  %v10606_v14 = vpop.f32.mrb[87].mxu0  ;;  %v13178_v32 = vsel %vm783_vm4, %v813_v26, %v815_v37 }
 0x1f2   :  { %15778 = vst [vmem:[#allocation61_spill] sm:$0xff] %v13178_v32 }
 0x1f3   :  { %15777 = vst [vmem:[#allocation60_spill] sm:$0xff] %v13161_v22  ;;  %10714 = vmatmul.mubr.msk.bf16.gmra.mrb[192].mxu0 %vm335_vm3, %v13156_v4  ;;  %v13185_v4 = vpop.f32.mrb[18].mxu1 }
 0x1f4   :  { %10717 = vmatprep.mubr.msk.bf16.mxu0 %vm12282_vm0, %v15771_v12  ;;  %v10746_v22 = vpop.f32.mrb[19].mxu1 }
 0x1f5   :  { %10924 = vmatmul.mubr.msk.bf16.gmra.mrb[124].mxu1 %vm335_vm3, %v13178_v32  ;;  %v13200_v22 = vpop.f32.mrb[20].mxu1 }
 0x1f6   :  { %v670_v20 = vpop.f32.mrb[88].mxu0  ;;  %10927 = vmatprep.mubr.msk.bf16.mxu1 %vm12282_vm0, %v15771_v12 }
 0x1f7   :  { %v13175_v18 = vadd.f32 %v670_v20, %v12873_v49  ;;  %v10609_v44 = vpop.f32.mrb[89].mxu0  ;;  %v817_v49 = vrot.slane %v12711_v42, 1 }
 0x1f8   :  { %v673_v1 = vpop.f32.mrb[90].mxu0 }
 0x1f9   :  { %v13183_v48 = vadd.f32 %v673_v1, %v12877_v54  ;;  %v10610_v14 = vpop.f32.mrb[91].mxu0  ;;  %v818_v44 = vsel %vm783_vm4, %v815_v37, %v817_v49 }
 0x1fa   :  { %v12084_v14 = vld [vmem:[%s15684_s1 + $0x4] ss:$0 sps:$4 sm:$0x44]  }
 0x1fb   :  { %15779 = vst [vmem:[#allocation62_spill] sm:$0xff] %v13183_v48  ;;  %10718 = vmatmul.mubr.msk.bf16.gmra.mrb[196].mxu0 %vm335_vm3, %v13178_v32  ;;  %v10749_v32 = vpop.f32.mrb[21].mxu1  ;;  %v1741_v49 = vrot.slane %v12084_v14, 2 }
 0x1fc   :  { %10721 = vmatprep.mubr.msk.bf16.mxu0 %vm12282_vm0, %v15771_v12  ;;  %v13208_v48 = vpop.f32.mrb[22].mxu1  ;;  %v13223_v32 = vld [vmem:[%s15683_s0 + $0x120] sm:$0xff] }
 0x1fd   :  { %15782 = vst [vmem:[#allocation65_spill] sm:$0xff] %v13208_v48  ;;  %v13236_v14 = vpack.c.bf16 %v13223_v32, %v13223_v32 }
 0x1fe   :  { %v678_v26 = vpop.f32.mrb[92].mxu0 }
 0x1ff   :  { %v13197_v30 = vadd.f32 %v678_v26, %v12885_v58  ;;  %v10613_v54 = vpop.f32.mrb[93].mxu0  ;;  %v13211_v58 = vrot.slane %v12915_v41, 1  ;;  %v10750_v26 = vpop.f32.mrb[23].mxu1 }
 0x200   :  { %v681_v20 = vpop.f32.mrb[94].mxu0 }
 0x201   :  { %15780 = vst [vmem:[#allocation63_spill] sm:$0xff] %v13197_v30  ;;  %v13203_v1 = vadd.f32 %v681_v20, %v12889_v62  ;;  %v10614_v42 = vpop.f32.mrb[95].mxu0  ;;  %15783 = vst [vmem:[#allocation66_spill] sm:$0xff] %v13211_v58  ;;  %v13218_v62 = vsel %vm783_vm4, %v815_v37, %v13211_v58  ;;  %v13232_v37 = vpop.f32.mrb[24].mxu1 }
 0x202   :  { %15784 = vst [vmem:[#allocation67_spill] sm:$0xff] %v13218_v62  ;;  %10928 = vmatmul.mubr.msk.bf16.gmra.mrb[128].mxu1 %vm335_vm3, %v13218_v62  ;;  %v1746_v62 = vsel %vm387_vm1, %v1741_v49, 0  ;;  %v10753_v30 = vpop.f32.mrb[25].mxu1 }
 0x203   :  { %15781 = vst [vmem:[#allocation64_spill] sm:$0xff] %v13203_v1  ;;  %10722 = vmatmul.mubr.msk.bf16.gmra.mrb[200].mxu0 %vm335_vm3, %v818_v44  ;;  %10931 = vmatprep.mubr.msk.bf16.mxu1 %vm12282_vm0, %v15771_v12  ;;  %v13242_v48 = vpop.f32.mrb[26].mxu1  ;;  %v12085_v30 = vld [vmem:[%s15684_s1 + $0x4] ss:$0 sps:$4 sm:$0x88]  }
 0x204   :  { %10797 = vmatprep.mubr.msk.bf16.mxu0 %vm12282_vm0, %v15771_v12  ;;  %v1966_v49 = vrot.slane %v12085_v30, 3 }
 0x206   :  { %v686_v54 = vpop.f32.mrb[96].mxu0 }
 0x207   :  { %v13230_v20 = vadd.f32 %v686_v54, %v12899_v13  ;;  %v10617_v44 = vpop.f32.mrb[97].mxu0  ;;  %v1520_v13 = vrot.slane %v13236_v14, 1  ;;  %v10754_v54 = vpop.f32.mrb[27].mxu1 }
 0x208   :  { %v689_v42 = vpop.f32.mrb[98].mxu0 }
 0x209   :  { %v13239_v26 = vadd.f32 %v689_v42, %v12906_v23  ;;  %v10618_v1 = vpop.f32.mrb[99].mxu0  ;;  %v1521_v23 = vsel %vm783_vm4, %v13211_v58, %v1520_v13  ;;  %v13261_v42 = vpop.f32.mrb[28].mxu1  ;;  %v1974_v58 = vsel %vm387_vm1, %v1966_v49, 0 }
 0x20a   :  { %10932 = vmatmul.mubr.msk.bf16.gmra.mrb[132].mxu1 %vm335_vm3, %v1521_v23  ;;  %v10757_v23 = vpop.f32.mrb[29].mxu1 }
 0x20b   :  { %15785 = vst [vmem:[#allocation68_spill] sm:$0xff] %v13239_v26  ;;  %10798 = vmatmul.mubr.msk.bf16.vlgmr.msra.gmra.mrb[204].mxu0 %vm335_vm3, %v12475_v29  ;;  %11007 = vmatprep.mubr.msk.bf16.mxu1 %vm12282_vm0, %v15771_v12  ;;  %v13267_v26 = vpop.f32.mrb[30].mxu1 }
 0x20c   :  { %10936 = vmatpush3.bf16.msra.mxu0 %v1746_v62  ;;  %10801 = vmatprep.mubr.msk.bf16.mxu0 %vm12282_vm0, %v15771_v12 }
 0x20d   :  { %11075 = vmatprep.subr.bf16.mxu0 %v15771_v12  ;;  %11006 = vmatpush3.bf16.msra.mxu1 %v1974_v58 }
 0x20e   :  { %v694_v1 = vpop.f32.mrb[100].mxu0 }
 0x20f   :  { %v13259_v29 = vadd.f32 %v694_v1, %v12926_v55  ;;  %v10621_v62 = vpop.f32.mrb[101].mxu0  ;;  %v10758_v55 = vpop.f32.mrb[31].mxu1 }
 0x210   :  { %v697_v44 = vpop.f32.mrb[102].mxu0  ;;  %v13280_v62 = vpop.f32.mrb[32].mxu1 }
 0x211   :  { %v13264_v13 = vadd.f32 %v697_v44, %v12930_v63  ;;  %v10622_v54 = vpop.f32.mrb[103].mxu0  ;;  %v10761_v44 = vpop.f32.mrb[33].mxu1 }
 0x212   :  { %11008 = vmatmul.mubr.msk.bf16.vlgmr.msra.gmra.mrb[136].mxu1 %vm335_vm3, %v12500_v40  ;;  %v13285_v23 = vpop.f32.mrb[34].mxu1 }
 0x213   :  { %10802 = vmatmul.mubr.msk.bf16.gmra.mrb[208].mxu0 %vm335_vm3, %v12500_v40  ;;  %11011 = vmatprep.mubr.msk.bf16.mxu1 %vm12282_vm0, %v15771_v12  ;;  %v10762_v40 = vpop.f32.mrb[35].mxu1 }
 0x214   :  { %10805 = vmatprep.mubr.msk.bf16.mxu0 %vm12282_vm0, %v15771_v12 }
 0x216   :  { %v702_v30 = vpop.f32.mrb[104].mxu0 }
 0x217   :  { %v10625_v63 = vpop.f32.mrb[105].mxu0  ;;  %v13278_v1 = vadd.f32 %v702_v30, %v12940_v27 }
 0x218   :  { %v705_v58 = vpop.f32.mrb[106].mxu0  ;;  %v13298_v63 = vpop.f32.mrb[36].mxu1 }
 0x219   :  { %v10626_v49 = vpop.f32.mrb[107].mxu0  ;;  %v13283_v54 = vadd.f32 %v705_v58, %v12944_v8 }
 0x21a   :  { %11012 = vmatmul.mubr.msk.bf16.gmra.mrb[140].mxu1 %vm335_vm3, %v12517_v50  ;;  %v10765_v49 = vpop.f32.mrb[37].mxu1 }
 0x21b   :  { %10806 = vmatmul.mubr.msk.bf16.gmra.mrb[212].mxu0 %vm335_vm3, %v12517_v50  ;;  %11015 = vmatprep.mubr.msk.bf16.mxu1 %vm12282_vm0, %v15771_v12  ;;  %v13303_v40 = vpop.f32.mrb[38].mxu1 }
 0x21c   :  { %10809 = vmatprep.mubr.msk.bf16.mxu0 %vm12282_vm0, %v15771_v12  ;;  %v10766_v50 = vpop.f32.mrb[39].mxu1 }
 0x21e   :  { %v710_v27 = vpop.f32.mrb[108].mxu0 }
 0x21f   :  { %v10629_v55 = vpop.f32.mrb[109].mxu0  ;;  %v13296_v8 = vadd.f32 %v710_v27, %v12956_v59 }
 0x220   :  { %v713_v30 = vpop.f32.mrb[110].mxu0 }
 0x221   :  { %v10630_v58 = vpop.f32.mrb[111].mxu0  ;;  %v13301_v44 = vadd.f32 %v713_v30, %v12960_v47  ;;  %v13316_v30 = vpop.f32.mrb[40].mxu1 }
 0x222   :  { %11016 = vmatmul.mubr.msk.bf16.gmra.mrb[144].mxu1 %vm335_vm3, %v12526_v53  ;;  %v10769_v49 = vpop.f32.mrb[41].mxu1 }
 0x223   :  { %15786 = vst [vmem:[#allocation69_spill] sm:$0xff] %v13301_v44  ;;  %10810 = vmatmul.mubr.msk.bf16.gmra.mrb[216].mxu0 %vm335_vm3, %v12526_v53  ;;  %11019 = vmatprep.mubr.msk.bf16.mxu1 %vm12282_vm0, %v15771_v12  ;;  %v13321_v44 = vpop.f32.mrb[42].mxu1 }
 0x224   :  { %10813 = vmatprep.mubr.msk.bf16.mxu0 %vm12282_vm0, %v15771_v12  ;;  %v10770_v53 = vpop.f32.mrb[43].mxu1 }
 0x226   :  { %v718_v59 = vpop.f32.mrb[112].mxu0 }
 0x227   :  { %v10633_v27 = vpop.f32.mrb[113].mxu0  ;;  %v13314_v47 = vadd.f32 %v718_v59, %v12972_v51 }
 0x228   :  { %v721_v55 = vpop.f32.mrb[114].mxu0 }
 0x229   :  { %v10634_v58 = vpop.f32.mrb[115].mxu0  ;;  %v13319_v50 = vadd.f32 %v721_v55, %v12976_v7  ;;  %v13334_v55 = vpop.f32.mrb[44].mxu1 }
 0x22a   :  { %11020 = vmatmul.mubr.msk.bf16.gmra.mrb[148].mxu1 %vm335_vm3, %v12543_v61  ;;  %v10773_v49 = vpop.f32.mrb[45].mxu1 }
 0x22b   :  { %15787 = vst [vmem:[#allocation70_spill] sm:$0xff] %v13319_v50  ;;  %10814 = vmatmul.mubr.msk.bf16.gmra.mrb[220].mxu0 %vm335_vm3, %v12543_v61  ;;  %11023 = vmatprep.mubr.msk.bf16.mxu1 %vm12282_vm0, %v15771_v12  ;;  %v13339_v50 = vpop.f32.mrb[46].mxu1 }
 0x22c   :  { %10817 = vmatprep.mubr.msk.bf16.mxu0 %vm12282_vm0, %v15771_v12  ;;  %v10774_v61 = vpop.f32.mrb[47].mxu1 }
 0x22e   :  { %v726_v51 = vpop.f32.mrb[116].mxu0 }
 0x22f   :  { %v10637_v59 = vpop.f32.mrb[117].mxu0  ;;  %v13332_v7 = vadd.f32 %v726_v51, %v12988_v39 }
 0x230   :  { %v729_v27 = vpop.f32.mrb[118].mxu0 }
 0x231   :  { %v10638_v58 = vpop.f32.mrb[119].mxu0  ;;  %v13337_v53 = vadd.f32 %v729_v27, %v12992_v36  ;;  %v13352_v27 = vpop.f32.mrb[48].mxu1 }
 0x232   :  { %11024 = vmatmul.mubr.msk.bf16.gmra.mrb[152].mxu1 %vm335_vm3, %v12560_v6  ;;  %v10777_v49 = vpop.f32.mrb[49].mxu1 }
 0x233   :  { %15788 = vst [vmem:[#allocation71_spill] sm:$0xff] %v13337_v53  ;;  %10818 = vmatmul.mubr.msk.bf16.gmra.mrb[224].mxu0 %vm335_vm3, %v12560_v6  ;;  %11027 = vmatprep.mubr.msk.bf16.mxu1 %vm12282_vm0, %v15771_v12  ;;  %v13357_v53 = vpop.f32.mrb[50].mxu1 }
 0x234   :  { %10821 = vmatprep.mubr.msk.bf16.mxu0 %vm12282_vm0, %v15771_v12  ;;  %v10778_v6 = vpop.f32.mrb[51].mxu1 }
 0x236   :  { %v734_v39 = vpop.f32.mrb[120].mxu0 }
 0x237   :  { %v10641_v51 = vpop.f32.mrb[121].mxu0  ;;  %v13350_v36 = vadd.f32 %v734_v39, %v13004_v52 }
 0x238   :  { %v737_v59 = vpop.f32.mrb[122].mxu0 }
 0x239   :  { %v10642_v58 = vpop.f32.mrb[123].mxu0  ;;  %v13355_v61 = vadd.f32 %v737_v59, %v13008_v10  ;;  %v13370_v59 = vpop.f32.mrb[52].mxu1 }
 0x23a   :  { %11028 = vmatmul.mubr.msk.bf16.gmra.mrb[156].mxu1 %vm335_vm3, %v12577_v17  ;;  %v10781_v49 = vpop.f32.mrb[53].mxu1 }
 0x23b   :  { %15789 = vst [vmem:[#allocation72_spill] sm:$0xff] %v13355_v61  ;;  %10822 = vmatmul.mubr.msk.bf16.gmra.mrb[228].mxu0 %vm335_vm3, %v12577_v17  ;;  %11031 = vmatprep.mubr.msk.bf16.mxu1 %vm12282_vm0, %v15771_v12  ;;  %v13375_v61 = vpop.f32.mrb[54].mxu1 }
 0x23c   :  { %10825 = vmatprep.mubr.msk.bf16.mxu0 %vm12282_vm0, %v15771_v12  ;;  %v10782_v17 = vpop.f32.mrb[55].mxu1 }
 0x23e   :  { %v742_v52 = vpop.f32.mrb[124].mxu0 }
 0x23f   :  { %v10645_v39 = vpop.f32.mrb[125].mxu0  ;;  %v13368_v10 = vadd.f32 %v742_v52, %v13020_v60 }
 0x240   :  { %v745_v51 = vpop.f32.mrb[126].mxu0 }
 0x241   :  { %v10646_v58 = vpop.f32.mrb[127].mxu0  ;;  %v13373_v6 = vadd.f32 %v745_v51, %v13024_v15  ;;  %v13388_v51 = vpop.f32.mrb[56].mxu1 }
 0x242   :  { %11032 = vmatmul.mubr.msk.bf16.gmra.mrb[160].mxu1 %vm335_vm3, %v12594_v25  ;;  %v10785_v49 = vpop.f32.mrb[57].mxu1 }
 0x243   :  { %15790 = vst [vmem:[#allocation73_spill] sm:$0xff] %v13373_v6  ;;  %10826 = vmatmul.mubr.msk.bf16.gmra.mrb[232].mxu0 %vm335_vm3, %v12594_v25  ;;  %11035 = vmatprep.mubr.msk.bf16.mxu1 %vm12282_vm0, %v15771_v12  ;;  %v13393_v6 = vpop.f32.mrb[58].mxu1 }
 0x244   :  { %10829 = vmatprep.mubr.msk.bf16.mxu0 %vm12282_vm0, %v15771_v12  ;;  %v10786_v25 = vpop.f32.mrb[59].mxu1 }
 0x246   :  { %v750_v60 = vpop.f32.mrb[128].mxu0 }
 0x247   :  { %v10649_v52 = vpop.f32.mrb[129].mxu0  ;;  %v13386_v15 = vadd.f32 %v750_v60, %v13036_v5 }
 0x248   :  { %v753_v39 = vpop.f32.mrb[130].mxu0 }
 0x249   :  { %v10650_v58 = vpop.f32.mrb[131].mxu0  ;;  %v13391_v17 = vadd.f32 %v753_v39, %v13040_v21  ;;  %v13406_v39 = vpop.f32.mrb[60].mxu1 }
 0x24a   :  { %11036 = vmatmul.mubr.msk.bf16.gmra.mrb[164].mxu1 %vm335_vm3, %v12611_v35  ;;  %15793 = vst [vmem:[#allocation76_spill] sm:$0xff] %v13406_v39  ;;  %v10789_v49 = vpop.f32.mrb[61].mxu1 }
 0x24b   :  { %15791 = vst [vmem:[#allocation74_spill] sm:$0xff] %v13391_v17  ;;  %10830 = vmatmul.mubr.msk.bf16.gmra.mrb[236].mxu0 %vm335_vm3, %v12611_v35  ;;  %11039 = vmatprep.mubr.msk.bf16.mxu1 %vm12282_vm0, %v15771_v12  ;;  %v13408_v25 = vpop.f32.mrb[62].mxu1 }
 0x24c   :  { %10833 = vmatprep.mubr.msk.bf16.mxu0 %vm12282_vm0, %v15771_v12  ;;  %15794 = vst [vmem:[#allocation77_spill] sm:$0xff] %v13408_v25  ;;  %v10790_v17 = vpop.f32.mrb[63].mxu1 }
 0x24e   :  { %v758_v5 = vpop.f32.mrb[132].mxu0 }
 0x24f   :  { %v10653_v60 = vpop.f32.mrb[133].mxu0  ;;  %v13404_v21 = vadd.f32 %v758_v5, %v13052_v16 }
 0x250   :  { %v761_v52 = vpop.f32.mrb[134].mxu0 }
 0x251   :  { %15792 = vst [vmem:[#allocation75_spill] sm:$0xff] %v13404_v21  ;;  %v10654_v58 = vpop.f32.mrb[135].mxu0  ;;  %v13419_v52 = vpop.f32.mrb[64].mxu1 }
 0x252   :  { %11040 = vmatmul.mubr.msk.bf16.gmra.mrb[168].mxu1 %vm335_vm3, %v12628_v46  ;;  %v10793_v17 = vpop.f32.mrb[65].mxu1 }
 0x253   :  { %10834 = vmatmul.mubr.msk.bf16.gmra.mrb[240].mxu0 %vm335_vm3, %v12628_v46  ;;  %11043 = vmatprep.mubr.msk.bf16.mxu1 %vm12282_vm0, %v15771_v12  ;;  %v1255_v25 = vpop.f32.mrb[66].mxu1 }
 0x254   :  { %10837 = vmatprep.mubr.msk.bf16.mxu0 %vm12282_vm0, %v15771_v12  ;;  %v10794_v46 = vpop.f32.mrb[67].mxu1 }
 0x256   :  { %v911_v35 = vpop.f32.mrb[136].mxu0 }
 0x257   :  { %v1045_v16 = vadd.f32 %v911_v35, %v13069_v2  ;;  %v10659_v5 = vpop.f32.mrb[137].mxu0 }
 0x258   :  { %v914_v60 = vpop.f32.mrb[138].mxu0  ;;  %v13437_v35 = vpop.f32.mrb[68].mxu1 }
 0x259   :  { %v1046_v58 = vadd.f32 %v914_v60, %v13075_v31  ;;  %v10660_v49 = vpop.f32.mrb[139].mxu0  ;;  %v13423_v21 = vadd.f32 %v13092_v38, %v1045_v16  ;;  %v15795_v16 = vld [vmem:[#allocation54_spill] sm:$0xff]  ;;  %v10869_v60 = vpop.f32.mrb[69].mxu1 }
 0x25a   :  { %11044 = vmatmul.mubr.msk.bf16.gmra.mrb[172].mxu1 %vm335_vm3, %v12645_v57  ;;  %v13443_v49 = vpop.f32.mrb[70].mxu1 }
 0x25b   :  { %10838 = vmatmul.mubr.msk.bf16.gmra.mrb[244].mxu0 %vm335_vm3, %v12645_v57  ;;  %v13428_v39 = vadd.f32 %v13097_v33, %v1046_v58  ;;  %11047 = vmatprep.mubr.msk.bf16.mxu1 %vm12282_vm0, %v15771_v12  ;;  %v15796_v57 = vld [vmem:[#allocation36_spill] sm:$0xff]  ;;  %v10870_v17 = vpop.f32.mrb[71].mxu1 }
 0x25c   :  { %10841 = vmatprep.mubr.msk.bf16.mxu0 %vm12282_vm0, %v15771_v12  ;;  %v15799_v17 = vld [vmem:[#allocation38_spill] sm:$0xff] }
 0x25e   :  { %v919_v31 = vpop.f32.mrb[140].mxu0 }
 0x25f   :  { %v1047_v2 = vadd.f32 %v919_v31, %v13087_v28  ;;  %v10663_v38 = vpop.f32.mrb[141].mxu0 }
 0x260   :  { %v922_v25 = vpop.f32.mrb[142].mxu0  ;;  %v13457_v38 = vpop.f32.mrb[72].mxu1 }
 0x261   :  { %v1048_v5 = vadd.f32 %v922_v25, %v15795_v16  ;;  %v10664_v33 = vpop.f32.mrb[143].mxu0  ;;  %v13441_v58 = vadd.f32 %v13114_v0, %v1047_v2  ;;  %v15797_v16 = vld [vmem:[#allocation56_spill] sm:$0xff] }
 0x262   :  { %11048 = vmatmul.mubr.msk.bf16.gmra.mrb[176].mxu1 %vm335_vm3, %v15796_v57  ;;  %v10873_v33 = vpop.f32.mrb[73].mxu1 }
 0x263   :  { %10842 = vmatmul.mubr.msk.bf16.gmra.mrb[248].mxu0 %vm335_vm3, %v15796_v57  ;;  %v13448_v46 = vadd.f32 %v13119_v11, %v1048_v5  ;;  %11051 = vmatprep.mubr.msk.bf16.mxu1 %vm12282_vm0, %v15771_v12  ;;  %v13463_v60 = vpop.f32.mrb[74].mxu1 }
 0x264   :  { %10845 = vmatprep.mubr.msk.bf16.mxu0 %vm12282_vm0, %v15771_v12 }
 0x266   :  { %v927_v28 = vpop.f32.mrb[144].mxu0 }
 0x267   :  { %v10667_v0 = vpop.f32.mrb[145].mxu0  ;;  %v1049_v31 = vadd.f32 %v927_v28, %v13109_v34 }
 0x268   :  { %v930_v2 = vpop.f32.mrb[146].mxu0  ;;  %v10874_v0 = vpop.f32.mrb[75].mxu1 }
 0x269   :  { %v13460_v25 = vadd.f32 %v13136_v43, %v1049_v31  ;;  %v10668_v11 = vpop.f32.mrb[147].mxu0  ;;  %v1050_v5 = vadd.f32 %v930_v2, %v15797_v16  ;;  %v15800_v16 = vld [vmem:[#allocation58_spill] sm:$0xff] }
 0x26a   :  { %11052 = vmatmul.mubr.msk.bf16.gmra.mrb[180].mxu1 %vm335_vm3, %v15799_v17 }
 0x26b   :  { %v13466_v57 = vadd.f32 %v13141_v9, %v1050_v5  ;;  %10846 = vmatmul.mubr.msk.bf16.gmra.mrb[252].mxu0 %vm335_vm3, %v15799_v17  ;;  %11055 = vmatprep.mubr.msk.bf16.mxu1 %vm12282_vm0, %v15771_v12  ;;  %v13477_v9 = vpop.f32.mrb[76].mxu1 }
 0x26c   :  { %10849 = vmatprep.mubr.msk.bf16.mxu0 %vm12282_vm0, %v15771_v12  ;;  %v10877_v33 = vpop.f32.mrb[77].mxu1 }
 0x26d   :  { %15798 = vst [vmem:[#allocation54_spill] sm:$0xff] %v13466_v57  ;;  %v13483_v0 = vpop.f32.mrb[78].mxu1  ;;  %v15802_v57 = vld [vmem:[#allocation40_spill] sm:$0xff] }
 0x26e   :  { %v935_v34 = vpop.f32.mrb[148].mxu0 }
 0x26f   :  { %v10671_v43 = vpop.f32.mrb[149].mxu0  ;;  %v1051_v28 = vadd.f32 %v935_v34, %v13131_v56 }
 0x270   :  { %v938_v31 = vpop.f32.mrb[150].mxu0  ;;  %v10878_v43 = vpop.f32.mrb[79].mxu1 }
 0x271   :  { %v13480_v2 = vadd.f32 %v13158_v19, %v1051_v28  ;;  %v10672_v11 = vpop.f32.mrb[151].mxu0  ;;  %v1052_v5 = vadd.f32 %v938_v31, %v15800_v16  ;;  %v13498_v31 = vpop.f32.mrb[80].mxu1 }
 0x272   :  { %11056 = vmatmul.mubr.msk.bf16.gmra.mrb[184].mxu1 %vm335_vm3, %v15802_v57  ;;  %v10881_v43 = vpop.f32.mrb[81].mxu1 }
 0x273   :  { %v13486_v17 = vadd.f32 %v13163_v24, %v1052_v5  ;;  %10850 = vmatmul.mubr.msk.bf16.gmra.mrb[0].mxu0 %vm335_vm3, %v15802_v57  ;;  %11059 = vmatprep.mubr.msk.bf16.mxu1 %vm12282_vm0, %v15771_v12  ;;  %v1293_v24 = vshll.u32 %v12915_v41, 16  ;;  %v15804_v5 = vld [vmem:[#allocation60_spill] sm:$0xff]  ;;  %v13504_v57 = vpop.f32.mrb[82].mxu1  ;;  %v1301_v43 = vshll.u32 %v13236_v14, 16 }
 0x274   :  { %10853 = vmatprep.mubr.msk.bf16.mxu0 %vm12282_vm0, %v15771_v12  ;;  %15805 = vst [vmem:[#allocation38_spill] sm:$0xff] %v13504_v57 }
 0x275   :  { %15801 = vst [vmem:[#allocation36_spill] sm:$0xff] %v13486_v17 }
 0x276   :  { %v943_v56 = vpop.f32.mrb[152].mxu0 }
 0x277   :  { %v10675_v19 = vpop.f32.mrb[153].mxu0  ;;  %v1053_v34 = vadd.f32 %v943_v56, %v13153_v3  ;;  %v10882_v3 = vpop.f32.mrb[83].mxu1  ;;  %v1295_v56 = vrot.slane %v1293_v24, 1 }
 0x278   :  { %v946_v28 = vpop.f32.mrb[154].mxu0  ;;  %v15807_v19 = vld [vmem:[#allocation41_spill] sm:$0xff]  ;;  %v13522_v3 = vpop.f32.mrb[84].mxu1 }
 0x279   :  { %v13501_v11 = vadd.f32 %v13180_v45, %v1053_v34  ;;  %v10676_v16 = vpop.f32.mrb[155].mxu0  ;;  %v1054_v33 = vadd.f32 %v946_v28, %v15804_v5 }
 0x27a   :  { %11060 = vmatmul.mubr.msk.bf16.gmra.mrb[188].mxu1 %vm335_vm3, %v15807_v19  ;;  %v15808_v16 = vld [vmem:[#allocation42_spill] sm:$0xff] }
 0x27b   :  { %15803 = vst [vmem:[#allocation56_spill] sm:$0xff] %v13501_v11  ;;  %v13507_v17 = vadd.f32 %v13185_v4, %v1054_v33  ;;  %10854 = vmatmul.mubr.msk.bf16.gmra.mrb[4].mxu0 %vm335_vm3, %v15807_v19  ;;  %11063 = vmatprep.mubr.msk.bf16.mxu1 %vm12282_vm0, %v15771_v12  ;;  %v1296_v5 = vsel %vm190_vm2, %v15808_v16, %v1295_v56  ;;  %v1297_v33 = vshrl.u32 %v12915_v41, 16  ;;  %v15811_v16 = vld [vmem:[#allocation65_spill] sm:$0xff] }
 0x27c   :  { %10857 = vmatprep.mubr.msk.bf16.mxu0 %vm12282_vm0, %v15771_v12 }
 0x27d   :  { %15806 = vst [vmem:[#allocation58_spill] sm:$0xff] %v13507_v17  ;;  %v15810_v17 = vld [vmem:[#allocation62_spill] sm:$0xff] }
 0x27e   :  { %v951_v45 = vpop.f32.mrb[156].mxu0 }
 0x27f   :  { %v10679_v34 = vpop.f32.mrb[157].mxu0  ;;  %v1055_v28 = vadd.f32 %v951_v45, %v13175_v18  ;;  %v168_v18 = vld [vmem:[%s15683_s0 + $0x128] sm:$0xff]  ;;  %v10885_v45 = vpop.f32.mrb[85].mxu1 }
 0x280   :  { %v954_v4 = vpop.f32.mrb[158].mxu0  ;;  %v13531_v34 = vpop.f32.mrb[86].mxu1  ;;  %v13538_v41 = vpack.c.bf16 %v168_v18, %v13223_v32 }
 0x281   :  { %v13525_v24 = vadd.f32 %v13200_v22, %v1055_v28  ;;  %v10680_v19 = vpop.f32.mrb[159].mxu0  ;;  %v1056_v11 = vadd.f32 %v954_v4, %v15810_v17  ;;  %v10886_v14 = vpop.f32.mrb[87].mxu1  ;;  %v1299_v22 = vor.u32 %v1297_v33, %v1295_v56  ;;  %v1303_v17 = vrot.slane %v1301_v43, 1  ;;  %v15815_v33 = vld [vmem:[#allocation64_spill] sm:$0xff] }
 0x282   :  { %11064 = vmatmul.mubr.msk.bf16.gmra.mrb[192].mxu1 %vm335_vm3, %v1296_v5  ;;  %v13547_v14 = vpop.f32.mrb[88].mxu1  ;;  %v1951_v32 = vshll.u32 %v13538_v41, 16 }
 0x283   :  { %15809 = vst [vmem:[#allocation40_spill] sm:$0xff] %v13525_v24  ;;  %v13534_v57 = vadd.f32 %v15811_v16, %v1056_v11  ;;  %10858 = vmatmul.mubr.msk.bf16.gmra.mrb[8].mxu0 %vm335_vm3, %v1296_v5  ;;  %11067 = vmatprep.mubr.msk.bf16.mxu1 %vm12282_vm0, %v15771_v12  ;;  %v15813_v11 = vld [vmem:[#allocation63_spill] sm:$0xff]  ;;  %v1304_v16 = vsel %vm190_vm2, %v1299_v22, %v1303_v17  ;;  %v10889_v43 = vpop.f32.mrb[89].mxu1 }
 0x284   :  { %10861 = vmatprep.mubr.msk.bf16.mxu0 %vm12282_vm0, %v15771_v12  ;;  %v1953_v24 = vrot.slane %v1951_v32, 1 }
 0x285   :  { %15812 = vst [vmem:[#allocation60_spill] sm:$0xff] %v13534_v57  ;;  %v13554_v57 = vpop.f32.mrb[90].mxu1 }
 0x286   :  { %v959_v28 = vpop.f32.mrb[160].mxu0  ;;  %v10890_v17 = vpop.f32.mrb[91].mxu1 }
 0x287   :  { %v10683_v4 = vpop.f32.mrb[161].mxu0  ;;  %v1057_v19 = vadd.f32 %v959_v28, %v15813_v11  ;;  %v1954_v28 = vsel %vm190_vm2, %v1299_v22, %v1953_v24  ;;  %v15819_v17 = vld [vmem:[#allocation68_spill] sm:$0xff] }
 0x288   :  { %v962_v45 = vpop.f32.mrb[162].mxu0  ;;  %v13575_v32 = vpop.f32.mrb[92].mxu1 }
 0x289   :  { %v13551_v18 = vadd.f32 %v13232_v37, %v1057_v19  ;;  %v10684_v56 = vpop.f32.mrb[163].mxu0  ;;  %v1058_v5 = vadd.f32 %v962_v45, %v15815_v33  ;;  %v169_v37 = vld [vmem:[%s15683_s0 + $0x130] sm:$0xff]  ;;  %15818 = vst [vmem:[#allocation65_spill] sm:$0xff] %v13575_v32  ;;  %v15820_v32 = vld [vmem:[#allocation23_spill] sm:$0xff] }
 0x28a   :  { %11068 = vmatmul.mubr.msk.bf16.gmra.mrb[196].mxu1 %vm335_vm3, %v1954_v28  ;;  %v13572_v19 = vpack.c.bf16 %v169_v37, %v169_v37  ;;  %v1955_v56 = vshrl.u32 %v13538_v41, 16  ;;  %v10893_v37 = vpop.f32.mrb[93].mxu1 }
 0x28b   :  { %15814 = vst [vmem:[#allocation41_spill] sm:$0xff] %v13551_v18  ;;  %v13557_v4 = vadd.f32 %v13242_v48, %v1058_v5  ;;  %10862 = vmatmul.mubr.msk.bf16.gmra.mrb[12].mxu0 %vm335_vm3, %v1304_v16  ;;  %v2177_v48 = vld [vmem:[%s15684_s1 + $0x8] sm:$0x1]  ;;  %11071 = vmatprep.mubr.msk.bf16.mxu1 %vm12282_vm0, %v15771_v12  ;;  %v13584_v18 = vpop.f32.mrb[94].mxu1 }
 0x28c   :  { %10937 = vmatprep.mubr.msk.bf16.mxu0 %vm12282_vm0, %v15771_v12  ;;  %15817 = vst [vmem:[#allocation62_spill] sm:$0xff] %v13572_v19  ;;  %v1959_v33 = vshll.u32 %v13572_v19, 16  ;;  %v10894_v19 = vpop.f32.mrb[95].mxu1 }
 0x28d   :  { %15816 = vst [vmem:[#allocation42_spill] sm:$0xff] %v13557_v4  ;;  %v2191_v4 = vsel %vm387_vm1, %v2177_v48, 0 }
 0x28e   :  { %v967_v11 = vpop.f32.mrb[164].mxu0 }
 0x28f   :  { %v10687_v45 = vpop.f32.mrb[165].mxu0  ;;  %v1059_v16 = vadd.f32 %v967_v11, %v13230_v20  ;;  %v1961_v20 = vrot.slane %v1959_v33, 1 }
 0x290   :  { %v970_v22 = vpop.f32.mrb[166].mxu0  ;;  %v1957_v45 = vor.u32 %v1955_v56, %v1953_v24  ;;  %v13596_v56 = vpop.f32.mrb[96].mxu1 }
 0x291   :  { %v13580_v5 = vadd.f32 %v13261_v42, %v1059_v16  ;;  %v10688_v43 = vpop.f32.mrb[167].mxu0  ;;  %v1060_v28 = vadd.f32 %v970_v22, %v15819_v17  ;;  %v10897_v19 = vpop.f32.mrb[97].mxu1  ;;  %v15821_v17 = vld [vmem:[#allocation24_spill] sm:$0xff] }
 0x292   :  { %v1962_v42 = vsel %vm190_vm2, %v1957_v45, %v1961_v20  ;;  %v13602_v33 = vpop.f32.mrb[98].mxu1 }
 0x293   :  { %v13587_v11 = vadd.f32 %v13267_v26, %v1060_v28  ;;  %10938 = vmatmul.mubr.msk.bf16.vlgmr.msra.gmra.mrb[16].mxu0 %vm335_vm3, %v15820_v32  ;;  %11072 = vmatmul.mubr.msk.bf16.gmra.mrb[200].mxu1 %vm335_vm3, %v1962_v42  ;;  %v10898_v28 = vpop.f32.mrb[99].mxu1 }
 0x294   :  { %11076 = vmatpush3.bf16.msra.mxu0 %v2191_v4  ;;  %10941 = vmatprep.mubr.msk.bf16.mxu0 %vm12282_vm0, %v15771_v12 }
 0x296   :  { %v975_v48 = vpop.f32.mrb[168].mxu0 }
 0x297   :  { %v10691_v16 = vpop.f32.mrb[169].mxu0  ;;  %v1061_v24 = vadd.f32 %v975_v48, %v13259_v29 }
 0x298   :  { %v978_v22 = vpop.f32.mrb[170].mxu0  ;;  %v13612_v20 = vpop.f32.mrb[100].mxu1 }
 0x299   :  { %v13599_v26 = vadd.f32 %v13280_v62, %v1061_v24  ;;  %v10692_v32 = vpop.f32.mrb[171].mxu0  ;;  %v1062_v4 = vadd.f32 %v978_v22, %v13264_v13  ;;  %v10901_v48 = vpop.f32.mrb[101].mxu1  ;;  %v15822_v22 = vld [vmem:[#allocation25_spill] sm:$0xff] }
 0x29a   :  { %v13618_v16 = vpop.f32.mrb[102].mxu1 }
 0x29b   :  { %v13605_v43 = vadd.f32 %v13285_v23, %v1062_v4  ;;  %10942 = vmatmul.mubr.msk.bf16.gmra.mrb[20].mxu0 %vm335_vm3, %v15821_v17  ;;  %v15823_v17 = vld [vmem:[#allocation69_spill] sm:$0xff] }
 0x29c   :  { %10945 = vmatprep.mubr.msk.bf16.mxu0 %vm12282_vm0, %v15771_v12 }
 0x29e   :  { %v983_v29 = vpop.f32.mrb[172].mxu0 }
 0x29f   :  { %v1063_v62 = vadd.f32 %v983_v29, %v13278_v1  ;;  %v10695_v37 = vpop.f32.mrb[173].mxu0  ;;  %v10902_v1 = vpop.f32.mrb[103].mxu1 }
 0x2a0   :  { %v986_v45 = vpop.f32.mrb[174].mxu0  ;;  %v13628_v19 = vpop.f32.mrb[104].mxu1 }
 0x2a1   :  { %v1064_v13 = vadd.f32 %v986_v45, %v13283_v54  ;;  %v13616_v42 = vadd.f32 %v13298_v63, %v1063_v62  ;;  %v10696_v23 = vpop.f32.mrb[175].mxu0  ;;  %v10905_v62 = vpop.f32.mrb[105].mxu1 }
 0x2a2   :  { %v13634_v37 = vpop.f32.mrb[106].mxu1 }
 0x2a3   :  { %v13621_v24 = vadd.f32 %v13303_v40, %v1064_v13  ;;  %10946 = vmatmul.mubr.msk.bf16.gmra.mrb[24].mxu0 %vm335_vm3, %v15822_v22  ;;  %v15824_v13 = vld [vmem:[#allocation26_spill] sm:$0xff] }
 0x2a4   :  { %10949 = vmatprep.mubr.msk.bf16.mxu0 %vm12282_vm0, %v15771_v12 }
 0x2a6   :  { %v991_v32 = vpop.f32.mrb[176].mxu0 }
 0x2a7   :  { %v1065_v54 = vadd.f32 %v991_v32, %v13296_v8  ;;  %v10699_v4 = vpop.f32.mrb[177].mxu0  ;;  %v10906_v8 = vpop.f32.mrb[107].mxu1  ;;  %v15825_v32 = vld [vmem:[#allocation70_spill] sm:$0xff] }
 0x2a8   :  { %v994_v63 = vpop.f32.mrb[178].mxu0  ;;  %v13644_v1 = vpop.f32.mrb[108].mxu1 }
 0x2a9   :  { %v1066_v28 = vadd.f32 %v994_v63, %v15823_v17  ;;  %v13632_v29 = vadd.f32 %v13316_v30, %v1065_v54  ;;  %v10700_v40 = vpop.f32.mrb[179].mxu0  ;;  %v10909_v63 = vpop.f32.mrb[109].mxu1 }
 0x2aa   :  { %v13650_v17 = vpop.f32.mrb[110].mxu1  ;;  %v15826_v40 = vld [vmem:[#allocation27_spill] sm:$0xff]  ;;  %v15828_v63 = vld [vmem:[#allocation28_spill] sm:$0xff] }
 0x2ab   :  { %v13637_v45 = vadd.f32 %v13321_v44, %v1066_v28  ;;  %10950 = vmatmul.mubr.msk.bf16.gmra.mrb[28].mxu0 %vm335_vm3, %v15824_v13 }
 0x2ac   :  { %10953 = vmatprep.mubr.msk.bf16.mxu0 %vm12282_vm0, %v15771_v12 }
 0x2ae   :  { %v999_v23 = vpop.f32.mrb[180].mxu0 }
 0x2af   :  { %v1067_v48 = vadd.f32 %v999_v23, %v13314_v47  ;;  %v10703_v22 = vpop.f32.mrb[181].mxu0  ;;  %v10910_v47 = vpop.f32.mrb[111].mxu1 }
 0x2b0   :  { %v1002_v30 = vpop.f32.mrb[182].mxu0  ;;  %v13660_v23 = vpop.f32.mrb[112].mxu1 }
 0x2b1   :  { %v1068_v54 = vadd.f32 %v1002_v30, %v15825_v32  ;;  %v13648_v4 = vadd.f32 %v13334_v55, %v1067_v48  ;;  %v10704_v44 = vpop.f32.mrb[183].mxu0  ;;  %v15827_v48 = vld [vmem:[#allocation71_spill] sm:$0xff]  ;;  %v10913_v32 = vpop.f32.mrb[113].mxu1 }
 0x2b3   :  { %v13653_v28 = vadd.f32 %v13339_v50, %v1068_v54  ;;  %10954 = vmatmul.mubr.msk.bf16.gmra.mrb[32].mxu0 %vm335_vm3, %v15826_v40  ;;  %v13666_v54 = vpop.f32.mrb[114].mxu1 }
 0x2b4   :  { %10957 = vmatprep.mubr.msk.bf16.mxu0 %vm12282_vm0, %v15771_v12 }
 0x2b6   :  { %v1007_v62 = vpop.f32.mrb[184].mxu0 }
 0x2b7   :  { %v1069_v13 = vadd.f32 %v1007_v62, %v13332_v7  ;;  %v10707_v8 = vpop.f32.mrb[185].mxu0  ;;  %v10914_v7 = vpop.f32.mrb[115].mxu1 }
 0x2b8   :  { %v1010_v55 = vpop.f32.mrb[186].mxu0  ;;  %v15829_v8 = vld [vmem:[#allocation72_spill] sm:$0xff] }
 0x2b9   :  { %v1070_v22 = vadd.f32 %v1010_v55, %v15827_v48  ;;  %v13664_v30 = vadd.f32 %v13352_v27, %v1069_v13  ;;  %v10708_v50 = vpop.f32.mrb[187].mxu0  ;;  %v13676_v13 = vpop.f32.mrb[116].mxu1 }
 0x2bb   :  { %v13669_v44 = vadd.f32 %v13357_v53, %v1070_v22  ;;  %10958 = vmatmul.mubr.msk.bf16.gmra.mrb[36].mxu0 %vm335_vm3, %v15828_v63  ;;  %v10917_v22 = vpop.f32.mrb[117].mxu1  ;;  %v15830_v63 = vld [vmem:[#allocation29_spill] sm:$0xff] }
 0x2bc   :  { %10961 = vmatprep.mubr.msk.bf16.mxu0 %vm12282_vm0, %v15771_v12  ;;  %v13682_v50 = vpop.f32.mrb[118].mxu1 }
 0x2be   :  { %v1015_v40 = vpop.f32.mrb[188].mxu0 }
 0x2bf   :  { %v1071_v47 = vadd.f32 %v1015_v40, %v13350_v36  ;;  %v10711_v62 = vpop.f32.mrb[189].mxu0  ;;  %v10918_v36 = vpop.f32.mrb[119].mxu1 }
 0x2c0   :  { %v1018_v27 = vpop.f32.mrb[190].mxu0  ;;  %v15835_v36 = vld [vmem:[#allocation30_spill] sm:$0xff] }
 0x2c1   :  { %v1072_v55 = vadd.f32 %v1018_v27, %v15829_v8  ;;  %v13680_v48 = vadd.f32 %v13370_v59, %v1071_v47  ;;  %v10712_v53 = vpop.f32.mrb[191].mxu0  ;;  %v13692_v47 = vpop.f32.mrb[120].mxu1  ;;  %v15831_v27 = vld [vmem:[#allocation73_spill] sm:$0xff] }
 0x2c3   :  { %v13685_v32 = vadd.f32 %v13375_v61, %v1072_v55  ;;  %10962 = vmatmul.mubr.msk.bf16.gmra.mrb[40].mxu0 %vm335_vm3, %v15830_v63  ;;  %v10921_v55 = vpop.f32.mrb[121].mxu1 }
 0x2c4   :  { %10965 = vmatprep.mubr.msk.bf16.mxu0 %vm12282_vm0, %v15771_v12  ;;  %v13698_v22 = vpop.f32.mrb[122].mxu1  ;;  %v15837_v55 = vld [vmem:[#allocation76_spill] sm:$0xff] }
 0x2c5   :  { %15833 = vst [vmem:[#allocation64_spill] sm:$0xff] %v13698_v22  ;;  %v15840_v22 = vld [vmem:[#allocation31_spill] sm:$0xff] }
 0x2c6   :  { %v1023_v7 = vpop.f32.mrb[192].mxu0 }
 0x2c7   :  { %v1073_v40 = vadd.f32 %v1023_v7, %v13368_v10  ;;  %v10715_v62 = vpop.f32.mrb[193].mxu0  ;;  %v10922_v10 = vpop.f32.mrb[123].mxu1 }
 0x2c8   :  { %v1026_v59 = vpop.f32.mrb[194].mxu0 }
 0x2c9   :  { %v1074_v8 = vadd.f32 %v1026_v59, %v15831_v27  ;;  %v13696_v53 = vadd.f32 %v13388_v51, %v1073_v40  ;;  %v10716_v61 = vpop.f32.mrb[195].mxu0  ;;  %v13708_v40 = vpop.f32.mrb[124].mxu1  ;;  %v15836_v27 = vld [vmem:[#allocation74_spill] sm:$0xff] }
 0x2cb   :  { %15832 = vst [vmem:[#allocation63_spill] sm:$0xff] %v13696_v53  ;;  %v13701_v63 = vadd.f32 %v13393_v6, %v1074_v8  ;;  %10966 = vmatmul.mubr.msk.bf16.gmra.mrb[44].mxu0 %vm335_vm3, %v15835_v36  ;;  %v10925_v8 = vpop.f32.mrb[125].mxu1  ;;  %v15838_v36 = vld [vmem:[#allocation77_spill] sm:$0xff] }
 0x2cc   :  { %10969 = vmatprep.mubr.msk.bf16.mxu0 %vm12282_vm0, %v15771_v12 }
 0x2cd   :  { %15834 = vst [vmem:[#allocation68_spill] sm:$0xff] %v13701_v63  ;;  %v13714_v63 = vpop.f32.mrb[126].mxu1 }
 0x2ce   :  { %v1031_v7 = vpop.f32.mrb[196].mxu0 }
 0x2cf   :  { %v1075_v62 = vadd.f32 %v1031_v7, %v13386_v15  ;;  %v10719_v59 = vpop.f32.mrb[197].mxu0  ;;  %v10926_v15 = vpop.f32.mrb[127].mxu1 }
 0x2d0   :  { %v1034_v51 = vpop.f32.mrb[198].mxu0  ;;  %v15841_v59 = vld [vmem:[#allocation75_spill] sm:$0xff] }
 0x2d1   :  { %v1076_v61 = vadd.f32 %v1034_v51, %v15836_v27  ;;  %v13712_v53 = vadd.f32 %v15837_v55, %v1075_v62  ;;  %v10720_v6 = vpop.f32.mrb[199].mxu0 }
 0x2d3   :  { %v13717_v10 = vadd.f32 %v15838_v36, %v1076_v61  ;;  %10970 = vmatmul.mubr.msk.bf16.gmra.mrb[48].mxu0 %vm335_vm3, %v15840_v22 }
 0x2d4   :  { %10973 = vmatprep.mubr.msk.bf16.mxu0 %vm12282_vm0, %v15771_v12 }
 0x2d5   :  { %15839 = vst [vmem:[#allocation23_spill] sm:$0xff] %v13717_v10  ;;  %v13724_v55 = vpop.f32.mrb[128].mxu1  ;;  %v15844_v10 = vld [vmem:[#allocation32_spill] sm:$0xff] }
 0x2d6   :  { %v1039_v7 = vpop.f32.mrb[200].mxu0  ;;  %v10929_v61 = vpop.f32.mrb[129].mxu1 }
 0x2d7   :  { %v1077_v51 = vadd.f32 %v1039_v7, %v15841_v59  ;;  %v10723_v27 = vpop.f32.mrb[201].mxu0  ;;  %v13729_v36 = vpop.f32.mrb[130].mxu1 }
 0x2d8   :  { %v1042_v62 = vpop.f32.mrb[202].mxu0  ;;  %15843 = vst [vmem:[#allocation25_spill] sm:$0xff] %v13729_v36  ;;  %v10930_v22 = vpop.f32.mrb[131].mxu1 }
 0x2d9   :  { %v13727_v6 = vadd.f32 %v13419_v52, %v1077_v51  ;;  %v10724_v8 = vpop.f32.mrb[203].mxu0  ;;  %v15845_v22 = vld [vmem:[#allocation33_spill] sm:$0xff] }
 0x2db   :  { %15842 = vst [vmem:[#allocation24_spill] sm:$0xff] %v13727_v6  ;;  %10974 = vmatmul.mubr.msk.bf16.gmra.mrb[52].mxu0 %vm335_vm3, %v15844_v10 }
 0x2dc   :  { %10977 = vmatprep.mubr.msk.bf16.mxu0 %vm12282_vm0, %v15771_v12 }
 0x2dd   :  { %v13736_v62 = vpop.f32.mrb[132].mxu1 }
 0x2de   :  { %v1348_v15 = vpop.f32.mrb[204].mxu0  ;;  %v10933_v61 = vpop.f32.mrb[133].mxu1 }
 0x2df   :  { %v1482_v7 = vadd.f32 %v1348_v15, %v13423_v21  ;;  %v10799_v59 = vpop.f32.mrb[205].mxu0  ;;  %v1700_v6 = vpop.f32.mrb[134].mxu1 }
 0x2e0   :  { %v1351_v27 = vpop.f32.mrb[206].mxu0  ;;  %v10934_v36 = vpop.f32.mrb[135].mxu1 }
 0x2e1   :  { %v1483_v52 = vadd.f32 %v1351_v27, %v13428_v39  ;;  %v13740_v51 = vadd.f32 %v13437_v35, %v1482_v7  ;;  %v10800_v8 = vpop.f32.mrb[207].mxu0 }
 0x2e2   :  { %v15846_v8 = vld [vmem:[#allocation34_spill] sm:$0xff] }
 0x2e3   :  { %v13743_v10 = vadd.f32 %v13443_v49, %v1483_v52  ;;  %10978 = vmatmul.mubr.msk.bf16.gmra.mrb[56].mxu0 %vm335_vm3, %v15845_v22 }
 0x2e4   :  { %10981 = vmatprep.mubr.msk.bf16.mxu0 %vm12282_vm0, %v15771_v12 }
 0x2e5   :  { %v13750_v35 = vpop.f32.mrb[136].mxu1 }
 0x2e6   :  { %v1356_v21 = vpop.f32.mrb[208].mxu0  ;;  %v11009_v27 = vpop.f32.mrb[137].mxu1 }
 0x2e7   :  { %v1484_v15 = vadd.f32 %v1356_v21, %v13441_v58  ;;  %v10803_v39 = vpop.f32.mrb[209].mxu0  ;;  %v13756_v52 = vpop.f32.mrb[138].mxu1 }
 0x2e8   :  { %v1359_v59 = vpop.f32.mrb[210].mxu0  ;;  %v11010_v58 = vpop.f32.mrb[139].mxu1 }
 0x2e9   :  { %v1485_v7 = vadd.f32 %v1359_v59, %v13448_v46  ;;  %v13754_v6 = vadd.f32 %v13457_v38, %v1484_v15  ;;  %v10804_v49 = vpop.f32.mrb[211].mxu0  ;;  %v15847_v15 = vld [vmem:[#allocation54_spill] sm:$0xff] }
 0x2eb   :  { %v13759_v36 = vadd.f32 %v13463_v60, %v1485_v7  ;;  %10982 = vmatmul.mubr.msk.bf16.gmra.mrb[60].mxu0 %vm335_vm3, %v15846_v8  ;;  %v15849_v8 = vld [vmem:[#allocation35_spill] sm:$0xff] }
 0x2ec   :  { %10985 = vmatprep.mubr.msk.bf16.mxu0 %vm12282_vm0, %v15771_v12 }
 0x2ed   :  { %v13766_v21 = vpop.f32.mrb[140].mxu1 }
 0x2ee   :  { %v1364_v61 = vpop.f32.mrb[212].mxu0  ;;  %v11013_v7 = vpop.f32.mrb[141].mxu1 }
 0x2ef   :  { %v1486_v46 = vadd.f32 %v1364_v61, %v13460_v25  ;;  %v10807_v22 = vpop.f32.mrb[213].mxu0  ;;  %v13772_v49 = vpop.f32.mrb[142].mxu1 }
 0x2f0   :  { %v1367_v38 = vpop.f32.mrb[214].mxu0  ;;  %v11014_v25 = vpop.f32.mrb[143].mxu1 }
 0x2f1   :  { %v1487_v39 = vadd.f32 %v1367_v38, %v15847_v15  ;;  %v13770_v59 = vadd.f32 %v13477_v9, %v1486_v46  ;;  %v10808_v60 = vpop.f32.mrb[215].mxu0  ;;  %v15850_v38 = vld [vmem:[#allocation36_spill] sm:$0xff] }
 0x2f3   :  { %v13775_v27 = vadd.f32 %v13483_v0, %v1487_v39  ;;  %10986 = vmatmul.mubr.msk.bf16.gmra.mrb[64].mxu0 %vm335_vm3, %v15849_v8  ;;  %v15852_v8 = vld [vmem:[#allocation38_spill] sm:$0xff] }
 0x2f4   :  { %10989 = vmatprep.mubr.msk.bf16.mxu0 %vm12282_vm0, %v15771_v12 }
 0x2f5   :  { %15848 = vst [vmem:[#allocation69_spill] sm:$0xff] %v13775_v27  ;;  %v13782_v46 = vpop.f32.mrb[144].mxu1  ;;  %v15854_v27 = vld [vmem:[#allocation37_spill] sm:$0xff] }
 0x2f6   :  { %v1372_v58 = vpop.f32.mrb[216].mxu0  ;;  %v11017_v39 = vpop.f32.mrb[145].mxu1 }
 0x2f7   :  { %v1488_v61 = vadd.f32 %v1372_v58, %v13480_v2  ;;  %v10811_v22 = vpop.f32.mrb[217].mxu0  ;;  %v13788_v7 = vpop.f32.mrb[146].mxu1 }
 0x2f8   :  { %v1375_v9 = vpop.f32.mrb[218].mxu0  ;;  %v11018_v2 = vpop.f32.mrb[147].mxu1  ;;  %v15855_v22 = vld [vmem:[#allocation56_spill] sm:$0xff] }
 0x2f9   :  { %v1489_v15 = vadd.f32 %v1375_v9, %v15850_v38  ;;  %v13786_v60 = vadd.f32 %v13498_v31, %v1488_v61  ;;  %v10812_v0 = vpop.f32.mrb[219].mxu0  ;;  %v15859_v2 = vld [vmem:[#allocation39_spill] sm:$0xff] }
 0x2fa   :  { %v15856_v0 = vld [vmem:[#allocation58_spill] sm:$0xff] }
 0x2fb   :  { %15851 = vst [vmem:[#allocation26_spill] sm:$0xff] %v13786_v60  ;;  %v13791_v25 = vadd.f32 %v15852_v8, %v1489_v15  ;;  %10990 = vmatmul.mubr.msk.bf16.gmra.mrb[68].mxu0 %vm335_vm3, %v15854_v27 }
 0x2fc   :  { %10993 = vmatprep.mubr.msk.bf16.mxu0 %vm12282_vm0, %v15771_v12 }
 0x2fd   :  { %15853 = vst [vmem:[#allocation70_spill] sm:$0xff] %v13791_v25  ;;  %v13798_v61 = vpop.f32.mrb[148].mxu1 }
 0x2fe   :  { %v1380_v58 = vpop.f32.mrb[220].mxu0  ;;  %v11021_v8 = vpop.f32.mrb[149].mxu1 }
 0x2ff   :  { %v1490_v9 = vadd.f32 %v1380_v58, %v15855_v22  ;;  %v10815_v38 = vpop.f32.mrb[221].mxu0  ;;  %v13804_v25 = vpop.f32.mrb[150].mxu1 }
 0x300   :  { %v1383_v31 = vpop.f32.mrb[222].mxu0  ;;  %v11022_v58 = vpop.f32.mrb[151].mxu1  ;;  %v15860_v38 = vld [vmem:[#allocation40_spill] sm:$0xff] }
 0x301   :  { %v1491_v39 = vadd.f32 %v1383_v31, %v15856_v0  ;;  %v13802_v60 = vadd.f32 %v13522_v3, %v1490_v9  ;;  %v10816_v15 = vpop.f32.mrb[223].mxu0  ;;  %v15865_v58 = vld [vmem:[#allocation43_spill] sm:$0xff] }
 0x302   :  { %v15861_v15 = vld [vmem:[#allocation60_spill] sm:$0xff] }
 0x303   :  { %15857 = vst [vmem:[#allocation27_spill] sm:$0xff] %v13802_v60  ;;  %v13807_v27 = vadd.f32 %v13531_v34, %v1491_v39  ;;  %10994 = vmatmul.mubr.msk.bf16.gmra.mrb[72].mxu0 %vm335_vm3, %v15859_v2 }
 0x304   :  { %10997 = vmatprep.mubr.msk.bf16.mxu0 %vm12282_vm0, %v15771_v12 }
 0x305   :  { %15858 = vst [vmem:[#allocation71_spill] sm:$0xff] %v13807_v27  ;;  %v13814_v9 = vpop.f32.mrb[152].mxu1 }
 0x306   :  { %v1388_v22 = vpop.f32.mrb[224].mxu0  ;;  %v11025_v39 = vpop.f32.mrb[153].mxu1 }
 0x307   :  { %v1492_v31 = vadd.f32 %v1388_v22, %v15860_v38  ;;  %v10819_v0 = vpop.f32.mrb[225].mxu0  ;;  %v13820_v27 = vpop.f32.mrb[154].mxu1 }
 0x308   :  { %v1391_v3 = vpop.f32.mrb[226].mxu0  ;;  %15863 = vst [vmem:[#allocation72_spill] sm:$0xff] %v13820_v27  ;;  %v11026_v22 = vpop.f32.mrb[155].mxu1  ;;  %v15866_v0 = vld [vmem:[#allocation41_spill] sm:$0xff] }
 0x309   :  { %v1493_v8 = vadd.f32 %v1391_v3, %v15861_v15  ;;  %v13818_v60 = vadd.f32 %v13547_v14, %v1492_v31  ;;  %v10820_v34 = vpop.f32.mrb[227].mxu0 }
 0x30a   :  { %v15867_v34 = vld [vmem:[#allocation42_spill] sm:$0xff] }
 0x30b   :  { %15862 = vst [vmem:[#allocation28_spill] sm:$0xff] %v13818_v60  ;;  %v13823_v2 = vadd.f32 %v13554_v57, %v1493_v8  ;;  %10998 = vmatmul.mubr.msk.bf16.gmra.mrb[76].mxu0 %vm335_vm3, %v15865_v58  ;;  %v15868_v60 = vld [vmem:[#allocation65_spill] sm:$0xff] }
 0x30c   :  { %11001 = vmatprep.mubr.msk.bf16.mxu0 %vm12282_vm0, %v15771_v12 }
 0x30d   :  { %15864 = vst [vmem:[#allocation29_spill] sm:$0xff] %v13823_v2  ;;  %v13830_v31 = vpop.f32.mrb[156].mxu1 }
 0x30e   :  { %v1396_v38 = vpop.f32.mrb[228].mxu0  ;;  %v11029_v8 = vpop.f32.mrb[157].mxu1 }
 0x30f   :  { %v1494_v3 = vadd.f32 %v1396_v38, %v15866_v0  ;;  %v10823_v15 = vpop.f32.mrb[229].mxu0  ;;  %v13836_v2 = vpop.f32.mrb[158].mxu1 }
 0x310   :  { %v1399_v14 = vpop.f32.mrb[230].mxu0  ;;  %v11030_v22 = vpop.f32.mrb[159].mxu1 }
 0x311   :  { %v1495_v39 = vadd.f32 %v1399_v14, %v15867_v34  ;;  %v13834_v27 = vadd.f32 %v15868_v60, %v1494_v3  ;;  %v10824_v57 = vpop.f32.mrb[231].mxu0  ;;  %v15869_v22 = vld [vmem:[#allocation44_spill] sm:$0xff] }
 0x313   :  { %v13839_v58 = vadd.f32 %v13584_v18, %v1495_v39  ;;  %11002 = vmatmul.mubr.msk.bf16.gmra.mrb[80].mxu0 %vm335_vm3, %v13538_v41 }
 0x314   :  { %11077 = vmatprep.mubr.msk.bf16.mxu0 %vm12282_vm0, %v15771_v12 }
 0x315   :  { %v13846_v3 = vpop.f32.mrb[160].mxu1 }
 0x316   :  { %v1404_v38 = vpop.f32.mrb[232].mxu0  ;;  %v11033_v39 = vpop.f32.mrb[161].mxu1 }
 0x317   :  { %v1496_v0 = vadd.f32 %v1404_v38, %v13580_v5  ;;  %v10827_v15 = vpop.f32.mrb[233].mxu0  ;;  %v13852_v57 = vpop.f32.mrb[162].mxu1 }
 0x318   :  { %v1407_v60 = vpop.f32.mrb[234].mxu0  ;;  %v11034_v5 = vpop.f32.mrb[163].mxu1 }
 0x319   :  { %v1497_v14 = vadd.f32 %v1407_v60, %v13587_v11  ;;  %v13850_v34 = vadd.f32 %v13596_v56, %v1496_v0  ;;  %v10828_v18 = vpop.f32.mrb[235].mxu0  ;;  %v15870_v5 = vld [vmem:[#allocation45_spill] sm:$0xff] }
 0x31b   :  { %v13855_v8 = vadd.f32 %v13602_v33, %v1497_v14  ;;  %11078 = vmatmul.mubr.msk.bf16.vlgmr.msra.gmra.mrb[84].mxu0 %vm335_vm3, %v15869_v22 }
 0x31c   :  { %11081 = vmatprep.mubr.msk.bf16.mxu0 %vm12282_vm0, %v15771_v12 }
 0x31d   :  { %v13862_v0 = vpop.f32.mrb[164].mxu1 }
 0x31e   :  { %v1412_v38 = vpop.f32.mrb[236].mxu0  ;;  %v11037_v14 = vpop.f32.mrb[165].mxu1 }
 0x31f   :  { %v1498_v11 = vadd.f32 %v1412_v38, %v13599_v26  ;;  %v10831_v15 = vpop.f32.mrb[237].mxu0  ;;  %v13868_v39 = vpop.f32.mrb[166].mxu1 }
 0x320   :  { %v1415_v56 = vpop.f32.mrb[238].mxu0  ;;  %v11038_v26 = vpop.f32.mrb[167].mxu1 }
 0x321   :  { %v1499_v60 = vadd.f32 %v1415_v56, %v13605_v43  ;;  %v13866_v18 = vadd.f32 %v13612_v20, %v1498_v11  ;;  %v10832_v33 = vpop.f32.mrb[239].mxu0  ;;  %v15871_v26 = vld [vmem:[#allocation46_spill] sm:$0xff] }
 0x323   :  { %v13871_v22 = vadd.f32 %v13618_v16, %v1499_v60  ;;  %11082 = vmatmul.mubr.msk.bf16.gmra.mrb[88].mxu0 %vm335_vm3, %v15870_v5 }
 0x324   :  { %11085 = vmatprep.mubr.msk.bf16.mxu0 %vm12282_vm0, %v15771_v12 }
 0x325   :  { %v13878_v11 = vpop.f32.mrb[168].mxu1 }
 0x326   :  { %v1420_v38 = vpop.f32.mrb[240].mxu0  ;;  %v11041_v60 = vpop.f32.mrb[169].mxu1 }
 0x327   :  { %v1500_v43 = vadd.f32 %v1420_v38, %v13616_v42  ;;  %v10835_v15 = vpop.f32.mrb[241].mxu0  ;;  %v13884_v14 = vpop.f32.mrb[170].mxu1 }
 0x328   :  { %v1423_v20 = vpop.f32.mrb[242].mxu0  ;;  %v11042_v42 = vpop.f32.mrb[171].mxu1 }
 0x329   :  { %v1501_v56 = vadd.f32 %v1423_v20, %v13621_v24  ;;  %v13882_v33 = vadd.f32 %v13628_v19, %v1500_v43  ;;  %v10836_v16 = vpop.f32.mrb[243].mxu0  ;;  %v15873_v42 = vld [vmem:[#allocation47_spill] sm:$0xff] }
 0x32b   :  { %v13887_v5 = vadd.f32 %v13634_v37, %v1501_v56  ;;  %11086 = vmatmul.mubr.msk.bf16.gmra.mrb[92].mxu0 %vm335_vm3, %v15871_v26 }
 0x32c   :  { %11089 = vmatprep.mubr.msk.bf16.mxu0 %vm12282_vm0, %v15771_v12 }
 0x32d   :  { %v13894_v43 = vpop.f32.mrb[172].mxu1 }
 0x32e   :  { %v1428_v38 = vpop.f32.mrb[244].mxu0  ;;  %v11045_v56 = vpop.f32.mrb[173].mxu1 }
 0x32f   :  { %v1502_v24 = vadd.f32 %v1428_v38, %v13632_v29  ;;  %v10839_v15 = vpop.f32.mrb[245].mxu0  ;;  %v13900_v60 = vpop.f32.mrb[174].mxu1  ;;  %v12086_v29 = vld [vmem:[%s15686_s3 + $0x8] sm:$0xff]  }
 0x330   :  { %v1431_v19 = vpop.f32.mrb[246].mxu0  ;;  %v11046_v38 = vpop.f32.mrb[175].mxu1  ;;  %11145 = vmatprep.subr.bf16.mxu1 %v12086_v29 }
 0x331   :  { %v1503_v20 = vadd.f32 %v1431_v19, %v13637_v45  ;;  %v13898_v16 = vadd.f32 %v13644_v1, %v1502_v24  ;;  %v10840_v37 = vpop.f32.mrb[247].mxu0  ;;  %11146 = vmatpush3.bf16.msra.mxu1 %v12086_v29 }
 0x333   :  { %v13903_v26 = vadd.f32 %v13650_v17, %v1503_v20  ;;  %11090 = vmatmul.mubr.msk.bf16.gmra.mrb[96].mxu0 %vm335_vm3, %v15873_v42 }
 0x334   :  { %11093 = vmatprep.mubr.msk.bf16.mxu0 %vm12282_vm0, %v15771_v12 }
 0x335   :  { %15872 = vst [vmem:[#allocation73_spill] sm:$0xff] %v13903_v26  ;;  %v13913_v17 = vpop.f32.mrb[176].mxu1  ;;  %v15874_v26 = vld [vmem:[#allocation48_spill] sm:$0xff] }
 0x336   :  { %v1436_v45 = vpop.f32.mrb[248].mxu0  ;;  %v11049_v56 = vpop.f32.mrb[177].mxu1 }
 0x337   :  { %v1504_v1 = vadd.f32 %v1436_v45, %v13648_v4  ;;  %v10843_v24 = vpop.f32.mrb[249].mxu0  ;;  %v13919_v42 = vpop.f32.mrb[178].mxu1  ;;  %v15875_v56 = vld [vmem:[#allocation49_spill] sm:$0xff] }
 0x338   :  { %v1439_v15 = vpop.f32.mrb[250].mxu0  ;;  %v11050_v4 = vpop.f32.mrb[179].mxu1 }
 0x339   :  { %v1505_v19 = vadd.f32 %v1439_v15, %v13653_v28  ;;  %v13917_v20 = vadd.f32 %v13660_v23, %v1504_v1  ;;  %v10844_v37 = vpop.f32.mrb[251].mxu0 }
 0x33b   :  { %v13922_v38 = vadd.f32 %v13666_v54, %v1505_v19  ;;  %11094 = vmatmul.mubr.msk.bf16.gmra.mrb[100].mxu0 %vm335_vm3, %v15874_v26 }
 0x33c   :  { %11097 = vmatprep.mubr.msk.bf16.mxu0 %vm12282_vm0, %v15771_v12 }
 0x33d   :  { %v13929_v1 = vpop.f32.mrb[180].mxu1 }
 0x33e   :  { %v1444_v29 = vpop.f32.mrb[252].mxu0  ;;  %v11053_v19 = vpop.f32.mrb[181].mxu1 }
 0x33f   :  { %v1506_v28 = vadd.f32 %v1444_v29, %v13664_v30  ;;  %v10847_v45 = vpop.f32.mrb[253].mxu0  ;;  %v13935_v37 = vpop.f32.mrb[182].mxu1  ;;  %v15877_v19 = vld [vmem:[#allocation64_spill] sm:$0xff] }
 0x340   :  { %v1447_v23 = vpop.f32.mrb[254].mxu0  ;;  %v11054_v30 = vpop.f32.mrb[183].mxu1 }
 0x341   :  { %v1507_v24 = vadd.f32 %v1447_v23, %v13669_v44  ;;  %v13933_v15 = vadd.f32 %v13676_v13, %v1506_v28  ;;  %v10848_v54 = vpop.f32.mrb[255].mxu0  ;;  %v15879_v30 = vld [vmem:[#allocation50_spill] sm:$0xff] }
 0x343   :  { %v13938_v26 = vadd.f32 %v13682_v50, %v1507_v24  ;;  %11098 = vmatmul.mubr.msk.bf16.gmra.mrb[104].mxu0 %vm335_vm3, %v15875_v56 }
 0x344   :  { %11101 = vmatprep.mubr.msk.bf16.mxu0 %vm12282_vm0, %v15771_v12 }
 0x345   :  { %v13945_v28 = vpop.f32.mrb[184].mxu1 }
 0x346   :  { %v1452_v4 = vpop.f32.mrb[0].mxu0  ;;  %v11057_v24 = vpop.f32.mrb[185].mxu1 }
 0x347   :  { %v1508_v44 = vadd.f32 %v1452_v4, %v13680_v48  ;;  %v10851_v29 = vpop.f32.mrb[1].mxu0  ;;  %v13951_v54 = vpop.f32.mrb[186].mxu1 }
 0x348   :  { %v1455_v13 = vpop.f32.mrb[2].mxu0  ;;  %v11058_v48 = vpop.f32.mrb[187].mxu1  ;;  %v15880_v29 = vld [vmem:[#allocation63_spill] sm:$0xff] }
 0x349   :  { %v1509_v45 = vadd.f32 %v1455_v13, %v13685_v32  ;;  %v13949_v23 = vadd.f32 %v13692_v47, %v1508_v44  ;;  %v10852_v50 = vpop.f32.mrb[3].mxu0  ;;  %v15884_v48 = vld [vmem:[#allocation51_spill] sm:$0xff] }
 0x34a   :  { %v15881_v50 = vld [vmem:[#allocation68_spill] sm:$0xff] }
 0x34b   :  { %15876 = vst [vmem:[#allocation30_spill] sm:$0xff] %v13949_v23  ;;  %v13954_v56 = vadd.f32 %v15877_v19, %v1509_v45  ;;  %11102 = vmatmul.mubr.msk.bf16.gmra.mrb[108].mxu0 %vm335_vm3, %v15879_v30 }
 0x34c   :  { %11105 = vmatprep.mubr.msk.bf16.mxu0 %vm12282_vm0, %v15771_v12 }
 0x34d   :  { %15878 = vst [vmem:[#allocation74_spill] sm:$0xff] %v13954_v56  ;;  %v13961_v44 = vpop.f32.mrb[188].mxu1 }
 0x34e   :  { %v1460_v4 = vpop.f32.mrb[4].mxu0  ;;  %v11061_v19 = vpop.f32.mrb[189].mxu1 }
 0x34f   :  { %v1510_v32 = vadd.f32 %v1460_v4, %v15880_v29  ;;  %v10855_v13 = vpop.f32.mrb[5].mxu0  ;;  %v13967_v56 = vpop.f32.mrb[190].mxu1 }
 0x350   :  { %v1463_v47 = vpop.f32.mrb[6].mxu0  ;;  %v11062_v4 = vpop.f32.mrb[191].mxu1 }
 0x351   :  { %v1511_v24 = vadd.f32 %v1463_v47, %v15881_v50  ;;  %v13965_v23 = vadd.f32 %v13708_v40, %v1510_v32  ;;  %v10856_v45 = vpop.f32.mrb[7].mxu0  ;;  %v15885_v50 = vld [vmem:[#allocation23_spill] sm:$0xff] }
 0x353   :  { %15882 = vst [vmem:[#allocation76_spill] sm:$0xff] %v13965_v23  ;;  %v13970_v30 = vadd.f32 %v13714_v63, %v1511_v24  ;;  %11106 = vmatmul.mubr.msk.bf16.gmra.mrb[112].mxu0 %vm335_vm3, %v15884_v48  ;;  %v15886_v48 = vld [vmem:[#allocation25_spill] sm:$0xff]  ;;  %v15888_v23 = vld [vmem:[#allocation52_spill] sm:$0xff] }
 0x354   :  { %11109 = vmatprep.mubr.msk.bf16.mxu0 %vm12282_vm0, %v15771_v12 }
 0x355   :  { %15883 = vst [vmem:[#allocation77_spill] sm:$0xff] %v13970_v30  ;;  %v13977_v32 = vpop.f32.mrb[192].mxu1 }
 0x356   :  { %v1468_v29 = vpop.f32.mrb[8].mxu0  ;;  %v11065_v24 = vpop.f32.mrb[193].mxu1 }
 0x357   :  { %v1512_v13 = vadd.f32 %v1468_v29, %v13712_v53  ;;  %v10859_v47 = vpop.f32.mrb[9].mxu0  ;;  %v13983_v30 = vpop.f32.mrb[194].mxu1 }
 0x358   :  { %v1471_v40 = vpop.f32.mrb[10].mxu0  ;;  %v11066_v53 = vpop.f32.mrb[195].mxu1  ;;  %v15889_v47 = vld [vmem:[#allocation24_spill] sm:$0xff] }
 0x359   :  { %v1513_v45 = vadd.f32 %v1471_v40, %v15885_v50  ;;  %v13981_v19 = vadd.f32 %v13724_v55, %v1512_v13  ;;  %v10860_v63 = vpop.f32.mrb[11].mxu0 }
 0x35b   :  { %v13986_v4 = vadd.f32 %v15886_v48, %v1513_v45  ;;  %11110 = vmatmul.mubr.msk.bf16.gmra.mrb[116].mxu0 %vm335_vm3, %v15888_v23 }
 0x35c   :  { %11113 = vmatprep.mubr.msk.bf16.mxu0 %vm12282_vm0, %v15771_v12 }
 0x35d   :  { %15887 = vst [vmem:[#allocation31_spill] sm:$0xff] %v13986_v4  ;;  %v13993_v13 = vpop.f32.mrb[196].mxu1  ;;  %v15892_v4 = vld [vmem:[#allocation53_spill] sm:$0xff] }
 0x35e   :  { %v1476_v29 = vpop.f32.mrb[12].mxu0  ;;  %v11069_v45 = vpop.f32.mrb[197].mxu1 }
 0x35f   :  { %v1514_v40 = vadd.f32 %v1476_v29, %v15889_v47  ;;  %v10863_v50 = vpop.f32.mrb[13].mxu0  ;;  %v13998_v48 = vpop.f32.mrb[198].mxu1 }
 0x360   :  { %v1479_v55 = vpop.f32.mrb[14].mxu0  ;;  %15891 = vst [vmem:[#allocation32_spill] sm:$0xff] %v13998_v48  ;;  %v11070_v23 = vpop.f32.mrb[199].mxu1 }
 0x361   :  { %v13996_v63 = vadd.f32 %v13736_v62, %v1514_v40  ;;  %v10864_v24 = vpop.f32.mrb[15].mxu0  ;;  %v15893_v23 = vld [vmem:[#allocation55_spill] sm:$0xff] }
 0x363   :  { %15890 = vst [vmem:[#allocation75_spill] sm:$0xff] %v13996_v63  ;;  %11114 = vmatmul.mubr.msk.bf16.gmra.mrb[120].mxu0 %vm335_vm3, %v15892_v4 }
 0x364   :  { %11117 = vmatprep.mubr.msk.bf16.mxu0 %vm12282_vm0, %v15771_v12 }
 0x366   :  { %v1782_v53 = vpop.f32.mrb[16].mxu0  ;;  %v14005_v55 = vpop.f32.mrb[200].mxu1 }
 0x367   :  { %v1916_v29 = vadd.f32 %v1782_v53, %v13740_v51  ;;  %v10939_v47 = vpop.f32.mrb[17].mxu0  ;;  %v11073_v45 = vpop.f32.mrb[201].mxu1 }
 0x368   :  { %v1785_v50 = vpop.f32.mrb[18].mxu0  ;;  %v2141_v63 = vpop.f32.mrb[202].mxu1  ;;  %v15895_v45 = vld [vmem:[#allocation69_spill] sm:$0xff] }
 0x369   :  { %v1917_v62 = vadd.f32 %v1785_v50, %v13743_v10  ;;  %v14009_v40 = vadd.f32 %v13750_v35, %v1916_v29  ;;  %v10940_v24 = vpop.f32.mrb[19].mxu0  ;;  %v11074_v48 = vpop.f32.mrb[203].mxu1  ;;  %v15894_v50 = vld [vmem:[#allocation57_spill] sm:$0xff] }
 0x36b   :  { %v14012_v4 = vadd.f32 %v13756_v52, %v1917_v62  ;;  %11118 = vmatmul.mubr.msk.bf16.gmra.mrb[124].mxu0 %vm335_vm3, %v15893_v23 }
 0x36c   :  { %11121 = vmatprep.mubr.msk.bf16.mxu0 %vm12282_vm0, %v15771_v12 }
 0x36e   :  { %v1790_v51 = vpop.f32.mrb[20].mxu0 }
 0x36f   :  { %v1918_v53 = vadd.f32 %v1790_v51, %v13754_v6  ;;  %v10943_v10 = vpop.f32.mrb[21].mxu0  ;;  %v15896_v51 = vld [vmem:[#allocation59_spill] sm:$0xff] }
 0x370   :  { %v1793_v47 = vpop.f32.mrb[22].mxu0  ;;  %v15897_v10 = vld [vmem:[#allocation26_spill] sm:$0xff] }
 0x371   :  { %v1919_v35 = vadd.f32 %v1793_v47, %v13759_v36  ;;  %v14021_v29 = vadd.f32 %v13766_v21, %v1918_v53  ;;  %v10944_v63 = vpop.f32.mrb[23].mxu0 }
 0x372   :  { %v15898_v63 = vld [vmem:[#allocation70_spill] sm:$0xff] }
 0x373   :  { %v14024_v52 = vadd.f32 %v13772_v49, %v1919_v35  ;;  %11122 = vmatmul.mubr.msk.bf16.gmra.mrb[128].mxu0 %vm335_vm3, %v15894_v50 }
 0x374   :  { %11125 = vmatprep.mubr.msk.bf16.mxu0 %vm12282_vm0, %v15771_v12 }
 0x376   :  { %v1798_v48 = vpop.f32.mrb[24].mxu0 }
 0x377   :  { %v1920_v6 = vadd.f32 %v1798_v48, %v13770_v59  ;;  %v10947_v62 = vpop.f32.mrb[25].mxu0 }
 0x378   :  { %v1801_v24 = vpop.f32.mrb[26].mxu0 }
 0x379   :  { %v1921_v36 = vadd.f32 %v1801_v24, %v15895_v45  ;;  %v14033_v21 = vadd.f32 %v13782_v46, %v1920_v6  ;;  %v10948_v23 = vpop.f32.mrb[27].mxu0  ;;  %v15899_v6 = vld [vmem:[#allocation61_spill] sm:$0xff]  ;;  %v15900_v24 = vld [vmem:[#allocation27_spill] sm:$0xff] }
 0x37b   :  { %v14036_v49 = vadd.f32 %v13788_v7, %v1921_v36  ;;  %11126 = vmatmul.mubr.msk.bf16.gmra.mrb[132].mxu0 %vm335_vm3, %v15896_v51  ;;  %v15901_v51 = vld [vmem:[#allocation71_spill] sm:$0xff] }
 0x37c   :  { %11129 = vmatprep.mubr.msk.bf16.mxu0 %vm12282_vm0, %v15771_v12 }
 0x37e   :  { %v1806_v53 = vpop.f32.mrb[28].mxu0 }
 0x37f   :  { %v1922_v59 = vadd.f32 %v1806_v53, %v15897_v10  ;;  %v10951_v47 = vpop.f32.mrb[29].mxu0 }
 0x380   :  { %v1809_v35 = vpop.f32.mrb[30].mxu0  ;;  %v15903_v47 = vld [vmem:[#allocation67_spill] sm:$0xff] }
 0x381   :  { %v1923_v50 = vadd.f32 %v1809_v35, %v15898_v63  ;;  %v14045_v46 = vadd.f32 %v13798_v61, %v1922_v59  ;;  %v10952_v48 = vpop.f32.mrb[31].mxu0  ;;  %v15902_v59 = vld [vmem:[#allocation72_spill] sm:$0xff]  ;;  %v2180_v35 = vrot.slane %v13538_v41, 1  ;;  %v15907_v41 = vld [vmem:[#allocation62_spill] sm:$0xff] }
 0x383   :  { %v14048_v7 = vadd.f32 %v13804_v25, %v1923_v50  ;;  %11130 = vmatmul.mubr.msk.bf16.gmra.mrb[136].mxu0 %vm335_vm3, %v15899_v6  ;;  %v15904_v50 = vld [vmem:[#allocation28_spill] sm:$0xff] }
 0x384   :  { %11133 = vmatprep.mubr.msk.bf16.mxu0 %vm12282_vm0, %v15771_v12 }
 0x386   :  { %v1814_v62 = vpop.f32.mrb[32].mxu0 }
 0x387   :  { %v1924_v45 = vadd.f32 %v1814_v62, %v15900_v24  ;;  %v10955_v36 = vpop.f32.mrb[33].mxu0  ;;  %v15905_v62 = vld [vmem:[#allocation66_spill] sm:$0xff] }
 0x388   :  { %v1817_v23 = vpop.f32.mrb[34].mxu0 }
 0x389   :  { %v1925_v53 = vadd.f32 %v1817_v23, %v15901_v51  ;;  %v14057_v61 = vadd.f32 %v13814_v9, %v1924_v45  ;;  %v10956_v10 = vpop.f32.mrb[35].mxu0  ;;  %v2181_v9 = vsel %vm783_vm4, %v15905_v62, %v2180_v35  ;;  %v15906_v45 = vld [vmem:[#allocation29_spill] sm:$0xff] }
 0x38a   :  { %v2182_v10 = vrot.slane %v15907_v41, 1 }
 0x38b   :  { %v14060_v25 = vadd.f32 %v15902_v59, %v1925_v53  ;;  %11134 = vmatmul.mubr.msk.bf16.gmra.mrb[140].mxu0 %vm335_vm3, %v15903_v47 }
 0x38c   :  { %11137 = vmatprep.mubr.msk.bf16.mxu0 %vm12282_vm0, %v15771_v12 }
 0x38e   :  { %v1822_v63 = vpop.f32.mrb[36].mxu0 }
 0x38f   :  { %v1926_v48 = vadd.f32 %v1822_v63, %v15904_v50  ;;  %v10959_v6 = vpop.f32.mrb[37].mxu0 }
 0x390   :  { %v1825_v24 = vpop.f32.mrb[38].mxu0  ;;  %v2183_v6 = vsel %vm783_vm4, %v2180_v35, %v2182_v10 }
 0x391   :  { %v1927_v36 = vadd.f32 %v1825_v24, %v15906_v45  ;;  %v14072_v23 = vadd.f32 %v13830_v31, %v1926_v48  ;;  %v10960_v51 = vpop.f32.mrb[39].mxu0 }
 0x393   :  { %v14075_v53 = vadd.f32 %v13836_v2, %v1927_v36  ;;  %11138 = vmatmul.mubr.msk.bf16.gmra.mrb[144].mxu0 %vm335_vm3, %v2181_v9 }
 0x394   :  { %11141 = vmatprep.mubr.msk.bf16.mxu0 %vm12282_vm0, %v15771_v12 }
 0x396   :  { %v1830_v59 = vpop.f32.mrb[40].mxu0 }
 0x397   :  { %v1928_v47 = vadd.f32 %v1830_v59, %v13834_v27  ;;  %v10963_v63 = vpop.f32.mrb[41].mxu0 }
 0x398   :  { %v1833_v50 = vpop.f32.mrb[42].mxu0 }
 0x399   :  { %v1929_v31 = vadd.f32 %v1833_v50, %v13839_v58  ;;  %v14085_v48 = vadd.f32 %v13846_v3, %v1928_v47  ;;  %v10964_v2 = vpop.f32.mrb[43].mxu0 }
 0x39b   :  { %v14088_v62 = vadd.f32 %v13852_v57, %v1929_v31  ;;  %11142 = vmatmul.mubr.msk.bf16.gmra.mrb[148].mxu0 %vm335_vm3, %v2183_v6 }
 0x39e   :  { %v1838_v9 = vpop.f32.mrb[44].mxu0 }
 0x39f   :  { %v1930_v12 = vadd.f32 %v1838_v9, %v13850_v34  ;;  %v10967_v24 = vpop.f32.mrb[45].mxu0  ;;  %v15908_v9 = vld [vmem:[#allocation73_spill] sm:$0xff] }
 0x3a0   :  { %v1841_v27 = vpop.f32.mrb[46].mxu0 }
 0x3a1   :  { %v1931_v45 = vadd.f32 %v1841_v27, %v13855_v8  ;;  %v14094_v35 = vadd.f32 %v13862_v0, %v1930_v12  ;;  %v10968_v58 = vpop.f32.mrb[47].mxu0 }
 0x3a3   :  { %v14097_v3 = vadd.f32 %v13868_v39, %v1931_v45 }
 0x3a6   :  { %v1846_v36 = vpop.f32.mrb[48].mxu0 }
 0x3a7   :  { %v1932_v57 = vadd.f32 %v1846_v36, %v13866_v18  ;;  %v10971_v51 = vpop.f32.mrb[49].mxu0 }
 0x3a8   :  { %v1849_v41 = vpop.f32.mrb[50].mxu0 }
 0x3a9   :  { %v1933_v10 = vadd.f32 %v1849_v41, %v13871_v22  ;;  %v14102_v34 = vadd.f32 %v13878_v11, %v1932_v57  ;;  %v10972_v59 = vpop.f32.mrb[51].mxu0 }
 0x3ab   :  { %v14105_v8 = vadd.f32 %v13884_v14, %v1933_v10 }
 0x3ae   :  { %v1854_v0 = vpop.f32.mrb[52].mxu0 }
 0x3af   :  { %v1934_v47 = vadd.f32 %v1854_v0, %v13882_v33  ;;  %v10975_v63 = vpop.f32.mrb[53].mxu0 }
 0x3b0   :  { %v1857_v39 = vpop.f32.mrb[54].mxu0 }
 0x3b1   :  { %v1935_v50 = vadd.f32 %v1857_v39, %v13887_v5  ;;  %v14110_v18 = vadd.f32 %v13894_v43, %v1934_v47  ;;  %v10976_v6 = vpop.f32.mrb[55].mxu0  ;;  %v15909_v47 = vld [vmem:[#allocation30_spill] sm:$0xff] }
 0x3b3   :  { %v14113_v22 = vadd.f32 %v13900_v60, %v1935_v50  ;;  %v14127_v60 = vld [vmem:[%s15686_s3] sm:$0xff]   ;;  %v15910_v50 = vld [vmem:[#allocation74_spill] sm:$0xff] }
 0x3b4   :  { %11175 = vmatprep.subr.bf16.mxu1 %v14127_v60 }
 0x3b6   :  { %v1862_v11 = vpop.f32.mrb[56].mxu0 }
 0x3b7   :  { %v1936_v31 = vadd.f32 %v1862_v11, %v13898_v16  ;;  %v10979_v2 = vpop.f32.mrb[57].mxu0 }
 0x3b8   :  { %v1865_v14 = vpop.f32.mrb[58].mxu0 }
 0x3b9   :  { %v1937_v12 = vadd.f32 %v1865_v14, %v15908_v9  ;;  %v14118_v33 = vadd.f32 %v13913_v17, %v1936_v31  ;;  %v10980_v24 = vpop.f32.mrb[59].mxu0  ;;  %v15911_v31 = vld [vmem:[#allocation76_spill] sm:$0xff]  ;;  %v15912_v9 = vld [vmem:[#allocation77_spill] sm:$0xff] }
 0x3bb   :  { %v14121_v5 = vadd.f32 %v13919_v42, %v1937_v12 }
 0x3be   :  { %v1870_v43 = vpop.f32.mrb[60].mxu0 }
 0x3bf   :  { %v1938_v27 = vadd.f32 %v1870_v43, %v13917_v20  ;;  %v10983_v45 = vpop.f32.mrb[61].mxu0 }
 0x3c0   :  { %v1873_v16 = vpop.f32.mrb[62].mxu0 }
 0x3c1   :  { %v1939_v58 = vadd.f32 %v1873_v16, %v13922_v38  ;;  %v14131_v36 = vadd.f32 %v13929_v1, %v1938_v27  ;;  %v10984_v17 = vpop.f32.mrb[63].mxu0 }
 0x3c3   :  { %v14135_v42 = vadd.f32 %v13935_v37, %v1939_v58  ;;  %v15913_v58 = vld [vmem:[#allocation31_spill] sm:$0xff] }
 0x3c6   :  { %v1878_v57 = vpop.f32.mrb[64].mxu0 }
 0x3c7   :  { %v1940_v20 = vadd.f32 %v1878_v57, %v13933_v15  ;;  %v10987_v51 = vpop.f32.mrb[65].mxu0 }
 0x3c8   :  { %v1881_v41 = vpop.f32.mrb[66].mxu0  ;;  %v15914_v51 = vld [vmem:[#allocation32_spill] sm:$0xff] }
 0x3c9   :  { %v1941_v10 = vadd.f32 %v1881_v41, %v13938_v26  ;;  %v14140_v59 = vadd.f32 %v13945_v28, %v1940_v20  ;;  %v10988_v38 = vpop.f32.mrb[67].mxu0 }
 0x3cb   :  { %v14143_v1 = vadd.f32 %v13951_v54, %v1941_v10  ;;  %v15915_v10 = vld [vmem:[#allocation75_spill] sm:$0xff] }
 0x3ce   :  { %v1886_v0 = vpop.f32.mrb[68].mxu0 }
 0x3cf   :  { %v1942_v63 = vadd.f32 %v1886_v0, %v15909_v47  ;;  %v10991_v39 = vpop.f32.mrb[69].mxu0 }
 0x3d0   :  { %v1889_v37 = vpop.f32.mrb[70].mxu0  ;;  %v14173_v39 = vld [vmem:[#allocation6] ss:$0 sm:$0xff] }
 0x3d1   :  { %v1943_v6 = vadd.f32 %v1889_v37, %v15910_v50  ;;  %v14148_v15 = vadd.f32 %v13961_v44, %v1942_v63  ;;  %v10992_v11 = vpop.f32.mrb[71].mxu0 }
 0x3d3   :  { %v14151_v26 = vadd.f32 %v13967_v56, %v1943_v6 }
 0x3d6   :  { %v1894_v28 = vpop.f32.mrb[72].mxu0 }
 0x3d7   :  { %v1944_v2 = vadd.f32 %v1894_v28, %v15911_v31  ;;  %v10995_v14 = vpop.f32.mrb[73].mxu0 }
 0x3d8   :  { %v1897_v54 = vpop.f32.mrb[74].mxu0 }
 0x3d9   :  { %v1945_v12 = vadd.f32 %v1897_v54, %v15912_v9  ;;  %v14156_v24 = vadd.f32 %v13977_v32, %v1944_v2  ;;  %v10996_v43 = vpop.f32.mrb[75].mxu0 }
 0x3db   :  { %v14159_v27 = vadd.f32 %v13983_v30, %v1945_v12 }
 0x3de   :  { %v1902_v44 = vpop.f32.mrb[76].mxu0 }
 0x3df   :  { %v1946_v45 = vadd.f32 %v1902_v44, %v13981_v19  ;;  %v10999_v16 = vpop.f32.mrb[77].mxu0 }
 0x3e0   :  { %v1905_v56 = vpop.f32.mrb[78].mxu0 }
 0x3e1   :  { %v1947_v17 = vadd.f32 %v1905_v56, %v15913_v58  ;;  %v14164_v57 = vadd.f32 %v13993_v13, %v1946_v45  ;;  %v11000_v20 = vpop.f32.mrb[79].mxu0 }
 0x3e3   :  { %v14167_v41 = vadd.f32 %v15914_v51, %v1947_v17 }
 0x3e6   :  { %v1910_v32 = vpop.f32.mrb[80].mxu0 }
 0x3e7   :  { %v1948_v38 = vadd.f32 %v1910_v32, %v15915_v10  ;;  %v11003_v0 = vpop.f32.mrb[81].mxu0 }
 0x3e8   :  { %v1913_v30 = vpop.f32.mrb[82].mxu0 }
 0x3e9   :  { %v14171_v47 = vadd.f32 %v14005_v55, %v1948_v38  ;;  %v11004_v19 = vpop.f32.mrb[83].mxu0 }
 0x3ee   :  { %v2227_v63 = vpop.f32.mrb[84].mxu0 }
 0x3ef   :  { %v2361_v37 = vadd.f32 %v2227_v63, %v14009_v40  ;;  %v11079_v13 = vpop.f32.mrb[85].mxu0 }
 0x3f0   :  { %v2230_v50 = vpop.f32.mrb[86].mxu0 }
 0x3f1   :  { %v2401_v6 = vadd.f32 %v14173_v39, %v2361_v37  ;;  %v2362_v11 = vadd.f32 %v2230_v50, %v14012_v4  ;;  %v11080_v28 = vpop.f32.mrb[87].mxu0 }
 0x3f3   :  { %v2402_v31 = vadd.f32 %v14173_v39, %v2362_v11  ;;  %v2434_v2 = vmax.f32 %v2401_v6, 0.0 }
 0x3f5   :  { %v2435_v14 = vmax.f32 %v2402_v31, 0.0 }
 0x3f6   :  { %v2235_v54 = vpop.f32.mrb[88].mxu0 }
 0x3f7   :  { %v14179_v55 = vpack.c.bf16 %v2435_v14, %v2434_v2  ;;  %v2363_v9 = vadd.f32 %v2235_v54, %v14021_v29  ;;  %v11083_v12 = vpop.f32.mrb[89].mxu0 }
 0x3f8   :  { %v2238_v43 = vpop.f32.mrb[90].mxu0 }
 0x3f9   :  { %v2403_v40 = vadd.f32 %v14173_v39, %v2363_v9  ;;  %v2364_v44 = vadd.f32 %v2238_v43, %v14024_v52  ;;  %v11084_v45 = vpop.f32.mrb[91].mxu0  ;;  %v2489_v4 = vshll.u32 %v14179_v55, 16  ;;  %v2487_v30 = vshrl.u32 %v14179_v55, 16 }
 0x3fb   :  { %v2404_v16 = vadd.f32 %v14173_v39, %v2364_v44  ;;  %v2436_v56 = vmax.f32 %v2403_v40, 0.0  ;;  %v2491_v29 = vrot.slane %v2489_v4, 1 }
 0x3fd   :  { %v2437_v58 = vmax.f32 %v2404_v16, 0.0  ;;  %v2492_v37 = vor.u32 %v2491_v29, %v2487_v30  ;;  %v14207_v16 = vld [vmem:[%s15686_s3 + $0x10] sm:$0xff]  }
 0x3fe   :  { %v2243_v17 = vpop.f32.mrb[92].mxu0 }
 0x3ff   :  { %v14186_v20 = vpack.c.bf16 %v2437_v58, %v2436_v56  ;;  %v2365_v51 = vadd.f32 %v2243_v17, %v14033_v21  ;;  %v11087_v32 = vpop.f32.mrb[93].mxu0 }
 0x400   :  { %v2246_v10 = vpop.f32.mrb[94].mxu0 }
 0x401   :  { %v2405_v38 = vadd.f32 %v14173_v39, %v2365_v51  ;;  %v2366_v0 = vadd.f32 %v2246_v10, %v14036_v49  ;;  %v11088_v52 = vpop.f32.mrb[95].mxu0  ;;  %v2494_v19 = vshll.u32 %v14186_v20, 16  ;;  %v2498_v54 = vshrl.u32 %v14186_v20, 16 }
 0x403   :  { %v2406_v63 = vadd.f32 %v14173_v39, %v2366_v0  ;;  %v2496_v13 = vrot.slane %v2494_v19, 1  ;;  %v2438_v50 = vmax.f32 %v2405_v38, 0.0 }
 0x405   :  { %v2439_v6 = vmax.f32 %v2406_v63, 0.0  ;;  %v2497_v21 = vsel %vm190_vm2, %v2492_v37, %v2496_v13  ;;  %v2500_v40 = vor.u32 %v2498_v54, %v2496_v13 }
 0x406   :  { %v2251_v11 = vpop.f32.mrb[96].mxu0  ;;  %11147 = vmatprep.mubr.msk.bf16.mxu1 %vm2608_vm5, %v2497_v21 }
 0x407   :  { %v14196_v28 = vpack.c.bf16 %v2439_v6, %v2438_v50  ;;  %v2367_v49 = vadd.f32 %v2251_v11, %v14045_v46  ;;  %v11091_v31 = vpop.f32.mrb[97].mxu0 }
 0x408   :  { %v2254_v2 = vpop.f32.mrb[98].mxu0 }
 0x409   :  { %v2407_v14 = vadd.f32 %v14173_v39, %v2367_v49  ;;  %v2368_v9 = vadd.f32 %v2254_v2, %v14048_v7  ;;  %v11092_v12 = vpop.f32.mrb[99].mxu0  ;;  %v2502_v43 = vshll.u32 %v14196_v28, 16  ;;  %v2506_v0 = vshrl.u32 %v14196_v28, 16 }
 0x40b   :  { %v2408_v44 = vadd.f32 %v14173_v39, %v2368_v9  ;;  %v2504_v45 = vrot.slane %v2502_v43, 1  ;;  %v2440_v46 = vmax.f32 %v2407_v14, 0.0 }
 0x40d   :  { %v2441_v4 = vmax.f32 %v2408_v44, 0.0  ;;  %v14210_v56 = vsel %vm190_vm2, %v2500_v40, %v2504_v45  ;;  %v2508_v19 = vor.u32 %v2506_v0, %v2504_v45 }
 0x40e   :  { %v2259_v58 = vpop.f32.mrb[100].mxu0  ;;  %11148 = vmatmul.mubr.msk.bf16.vlgmr.msra.gmra.mrb[204].mxu1 %vm2608_vm5, %v14210_v56 }
 0x40f   :  { %v14214_v7 = vpack.c.bf16 %v2441_v4, %v2440_v46  ;;  %v2369_v17 = vadd.f32 %v2259_v58, %v14057_v61  ;;  %v11095_v51 = vpop.f32.mrb[101].mxu0  ;;  %11176 = vmatpush3.bf16.msra.mxu1 %v14127_v60 }
 0x410   :  { %v2262_v32 = vpop.f32.mrb[102].mxu0  ;;  %11205 = vmatprep.subr.bf16.mxu1 %v14207_v16 }
 0x411   :  { %v2409_v29 = vadd.f32 %v14173_v39, %v2369_v17  ;;  %v2370_v10 = vadd.f32 %v2262_v32, %v14060_v25  ;;  %v11096_v38 = vpop.f32.mrb[103].mxu0  ;;  %v2510_v52 = vshll.u32 %v14214_v7, 16  ;;  %v2514_v2 = vshrl.u32 %v14214_v7, 16 }
 0x413   :  { %v2410_v30 = vadd.f32 %v14173_v39, %v2370_v10  ;;  %v2512_v63 = vrot.slane %v2510_v52, 1  ;;  %v2442_v61 = vmax.f32 %v2409_v29, 0.0 }
 0x415   :  { %v2443_v37 = vmax.f32 %v2410_v30, 0.0  ;;  %v14225_v60 = vsel %vm190_vm2, %v2508_v19, %v2512_v63  ;;  %v2516_v9 = vor.u32 %v2514_v2, %v2512_v63 }
 0x416   :  { %v2267_v13 = vpop.f32.mrb[104].mxu0  ;;  %11151 = vmatprep.mubr.msk.bf16.mxu1 %vm2608_vm5, %v14225_v60 }
 0x417   :  { %v14229_v50 = vpack.c.bf16 %v2443_v37, %v2442_v61  ;;  %v2371_v25 = vadd.f32 %v2267_v13, %v14072_v23  ;;  %v11099_v6 = vpop.f32.mrb[105].mxu0 }
 0x418   :  { %v2270_v21 = vpop.f32.mrb[106].mxu0 }
 0x419   :  { %v2411_v11 = vadd.f32 %v14173_v39, %v2371_v25  ;;  %v2372_v49 = vadd.f32 %v2270_v21, %v14075_v53  ;;  %v11100_v31 = vpop.f32.mrb[107].mxu0  ;;  %v2518_v14 = vshll.u32 %v14229_v50, 16  ;;  %v2522_v32 = vshrl.u32 %v14229_v50, 16 }
 0x41b   :  { %v2412_v54 = vadd.f32 %v14173_v39, %v2372_v49  ;;  %v2520_v12 = vrot.slane %v2518_v14, 1  ;;  %v2444_v43 = vmax.f32 %v2411_v11, 0.0 }
 0x41d   :  { %v2445_v40 = vmax.f32 %v2412_v54, 0.0  ;;  %v14238_v44 = vsel %vm190_vm2, %v2516_v9, %v2520_v12  ;;  %v2524_v38 = vor.u32 %v2522_v32, %v2520_v12 }
 0x41e   :  { %v2275_v23 = vpop.f32.mrb[108].mxu0  ;;  %11152 = vmatmul.mubr.msk.bf16.gmra.mrb[208].mxu1 %vm2608_vm5, %v14238_v44 }
 0x41f   :  { %v14242_v45 = vpack.c.bf16 %v2445_v40, %v2444_v43  ;;  %v2373_v53 = vadd.f32 %v2275_v23, %v14085_v48  ;;  %v11103_v46 = vpop.f32.mrb[109].mxu0 }
 0x420   :  { %v2278_v4 = vpop.f32.mrb[110].mxu0 }
 0x421   :  { %v2413_v58 = vadd.f32 %v14173_v39, %v2373_v53  ;;  %v2374_v17 = vadd.f32 %v2278_v4, %v14088_v62  ;;  %v11104_v51 = vpop.f32.mrb[111].mxu0  ;;  %v2526_v29 = vshll.u32 %v14242_v45, 16  ;;  %v2530_v21 = vshrl.u32 %v14242_v45, 16 }
 0x423   :  { %v2414_v10 = vadd.f32 %v14173_v39, %v2374_v17  ;;  %v2528_v0 = vrot.slane %v2526_v29, 1  ;;  %v2446_v52 = vmax.f32 %v2413_v58, 0.0 }
 0x425   :  { %v2447_v30 = vmax.f32 %v2414_v10, 0.0  ;;  %v14251_v19 = vsel %vm190_vm2, %v2524_v38, %v2528_v0  ;;  %v2532_v31 = vor.u32 %v2530_v21, %v2528_v0 }
 0x426   :  { %v2283_v48 = vpop.f32.mrb[112].mxu0  ;;  %11155 = vmatprep.mubr.msk.bf16.mxu1 %vm2608_vm5, %v14251_v19 }
 0x427   :  { %v14255_v63 = vpack.c.bf16 %v2447_v30, %v2446_v52  ;;  %v2375_v62 = vadd.f32 %v2283_v48, %v14094_v35  ;;  %v11107_v61 = vpop.f32.mrb[113].mxu0 }
 0x428   :  { %v2286_v37 = vpop.f32.mrb[114].mxu0 }
 0x429   :  { %v2415_v13 = vadd.f32 %v14173_v39, %v2375_v62  ;;  %v2376_v25 = vadd.f32 %v2286_v37, %v14097_v3  ;;  %v11108_v6 = vpop.f32.mrb[115].mxu0  ;;  %v2534_v11 = vshll.u32 %v14255_v63, 16  ;;  %v2538_v4 = vshrl.u32 %v14255_v63, 16 }
 0x42b   :  { %v2416_v49 = vadd.f32 %v14173_v39, %v2376_v25  ;;  %v2536_v2 = vrot.slane %v2534_v11, 1  ;;  %v2448_v14 = vmax.f32 %v2415_v13, 0.0 }
 0x42d   :  { %v2449_v54 = vmax.f32 %v2416_v49, 0.0  ;;  %v14264_v9 = vsel %vm190_vm2, %v2532_v31, %v2536_v2  ;;  %v2540_v51 = vor.u32 %v2538_v4, %v2536_v2 }
 0x42e   :  { %v2291_v35 = vpop.f32.mrb[116].mxu0  ;;  %11156 = vmatmul.mubr.msk.bf16.gmra.mrb[212].mxu1 %vm2608_vm5, %v14264_v9 }
 0x42f   :  { %v14268_v12 = vpack.c.bf16 %v2449_v54, %v2448_v14  ;;  %v2377_v3 = vadd.f32 %v2291_v35, %v14102_v34  ;;  %v11111_v43 = vpop.f32.mrb[117].mxu0 }
 0x430   :  { %v2294_v40 = vpop.f32.mrb[118].mxu0 }
 0x431   :  { %v2417_v23 = vadd.f32 %v14173_v39, %v2377_v3  ;;  %v2378_v53 = vadd.f32 %v2294_v40, %v14105_v8  ;;  %v11112_v46 = vpop.f32.mrb[119].mxu0  ;;  %v2542_v58 = vshll.u32 %v14268_v12, 16  ;;  %v2546_v37 = vshrl.u32 %v14268_v12, 16 }
 0x433   :  { %v2418_v17 = vadd.f32 %v14173_v39, %v2378_v53  ;;  %v2544_v32 = vrot.slane %v2542_v58, 1  ;;  %v2450_v29 = vmax.f32 %v2417_v23, 0.0 }
 0x435   :  { %v2451_v10 = vmax.f32 %v2418_v17, 0.0  ;;  %v14277_v38 = vsel %vm190_vm2, %v2540_v51, %v2544_v32  ;;  %v2548_v6 = vor.u32 %v2546_v37, %v2544_v32 }
 0x436   :  { %v2299_v34 = vpop.f32.mrb[120].mxu0  ;;  %11159 = vmatprep.mubr.msk.bf16.mxu1 %vm2608_vm5, %v14277_v38 }
 0x437   :  { %v14281_v0 = vpack.c.bf16 %v2451_v10, %v2450_v29  ;;  %v2379_v8 = vadd.f32 %v2299_v34, %v14110_v18  ;;  %v11115_v52 = vpop.f32.mrb[121].mxu0 }
 0x438   :  { %v2302_v30 = vpop.f32.mrb[122].mxu0 }
 0x439   :  { %v2419_v48 = vadd.f32 %v14173_v39, %v2379_v8  ;;  %v2380_v62 = vadd.f32 %v2302_v30, %v14113_v22  ;;  %v11116_v61 = vpop.f32.mrb[123].mxu0  ;;  %v2550_v13 = vshll.u32 %v14281_v0, 16  ;;  %v2554_v40 = vshrl.u32 %v14281_v0, 16 }
 0x43b   :  { %v2420_v25 = vadd.f32 %v14173_v39, %v2380_v62  ;;  %v2552_v21 = vrot.slane %v2550_v13, 1  ;;  %v2452_v11 = vmax.f32 %v2419_v48, 0.0 }
 0x43d   :  { %v2453_v49 = vmax.f32 %v2420_v25, 0.0  ;;  %v14290_v31 = vsel %vm190_vm2, %v2548_v6, %v2552_v21  ;;  %v2556_v46 = vor.u32 %v2554_v40, %v2552_v21 }
 0x43e   :  { %v2307_v18 = vpop.f32.mrb[124].mxu0  ;;  %11160 = vmatmul.mubr.msk.bf16.gmra.mrb[216].mxu1 %vm2608_vm5, %v14290_v31 }
 0x43f   :  { %v14294_v2 = vpack.c.bf16 %v2453_v49, %v2452_v11  ;;  %v2381_v22 = vadd.f32 %v2307_v18, %v14118_v33  ;;  %v11119_v14 = vpop.f32.mrb[125].mxu0 }
 0x440   :  { %v2310_v54 = vpop.f32.mrb[126].mxu0 }
 0x441   :  { %v2421_v35 = vadd.f32 %v14173_v39, %v2381_v22  ;;  %v2382_v3 = vadd.f32 %v2310_v54, %v14121_v5  ;;  %v11120_v43 = vpop.f32.mrb[127].mxu0  ;;  %v2558_v23 = vshll.u32 %v14294_v2, 16  ;;  %v2562_v30 = vshrl.u32 %v14294_v2, 16 }
 0x443   :  { %v2422_v53 = vadd.f32 %v14173_v39, %v2382_v3  ;;  %v2560_v4 = vrot.slane %v2558_v23, 1  ;;  %v2454_v58 = vmax.f32 %v2421_v35, 0.0 }
 0x445   :  { %v2455_v17 = vmax.f32 %v2422_v53, 0.0  ;;  %v14303_v51 = vsel %vm190_vm2, %v2556_v46, %v2560_v4  ;;  %v2564_v61 = vor.u32 %v2562_v30, %v2560_v4 }
 0x446   :  { %v2315_v33 = vpop.f32.mrb[128].mxu0  ;;  %11163 = vmatprep.mubr.msk.bf16.mxu1 %vm2608_vm5, %v14303_v51 }
 0x447   :  { %v14307_v32 = vpack.c.bf16 %v2455_v17, %v2454_v58  ;;  %v2383_v5 = vadd.f32 %v2315_v33, %v14131_v36  ;;  %v11123_v29 = vpop.f32.mrb[129].mxu0 }
 0x448   :  { %v2318_v10 = vpop.f32.mrb[130].mxu0 }
 0x449   :  { %v2423_v34 = vadd.f32 %v14173_v39, %v2383_v5  ;;  %v2384_v8 = vadd.f32 %v2318_v10, %v14135_v42  ;;  %v11124_v52 = vpop.f32.mrb[131].mxu0  ;;  %v2566_v48 = vshll.u32 %v14307_v32, 16  ;;  %v2570_v54 = vshrl.u32 %v14307_v32, 16 }
 0x44b   :  { %v2424_v62 = vadd.f32 %v14173_v39, %v2384_v8  ;;  %v2568_v37 = vrot.slane %v2566_v48, 1  ;;  %v2456_v13 = vmax.f32 %v2423_v34, 0.0 }
 0x44d   :  { %v2457_v25 = vmax.f32 %v2424_v62, 0.0  ;;  %v14316_v6 = vsel %vm190_vm2, %v2564_v61, %v2568_v37  ;;  %v2572_v43 = vor.u32 %v2570_v54, %v2568_v37 }
 0x44e   :  { %v2323_v36 = vpop.f32.mrb[132].mxu0  ;;  %11164 = vmatmul.mubr.msk.bf16.gmra.mrb[220].mxu1 %vm2608_vm5, %v14316_v6 }
 0x44f   :  { %v14320_v21 = vpack.c.bf16 %v2457_v25, %v2456_v13  ;;  %v2385_v42 = vadd.f32 %v2323_v36, %v14140_v59  ;;  %v11127_v11 = vpop.f32.mrb[133].mxu0 }
 0x450   :  { %v2326_v49 = vpop.f32.mrb[134].mxu0 }
 0x451   :  { %v2425_v18 = vadd.f32 %v14173_v39, %v2385_v42  ;;  %v2386_v22 = vadd.f32 %v2326_v49, %v14143_v1  ;;  %v11128_v14 = vpop.f32.mrb[135].mxu0  ;;  %v2574_v35 = vshll.u32 %v14320_v21, 16  ;;  %v2578_v10 = vshrl.u32 %v14320_v21, 16 }
 0x453   :  { %v2426_v3 = vadd.f32 %v14173_v39, %v2386_v22  ;;  %v2576_v40 = vrot.slane %v2574_v35, 1  ;;  %v2458_v23 = vmax.f32 %v2425_v18, 0.0 }
 0x455   :  { %v2459_v53 = vmax.f32 %v2426_v3, 0.0  ;;  %v14329_v46 = vsel %vm190_vm2, %v2572_v43, %v2576_v40  ;;  %v2580_v52 = vor.u32 %v2578_v10, %v2576_v40 }
 0x456   :  { %v2331_v59 = vpop.f32.mrb[136].mxu0  ;;  %11167 = vmatprep.mubr.msk.bf16.mxu1 %vm2608_vm5, %v14329_v46 }
 0x457   :  { %v14333_v4 = vpack.c.bf16 %v2459_v53, %v2458_v23  ;;  %v2387_v1 = vadd.f32 %v2331_v59, %v14148_v15  ;;  %v11131_v58 = vpop.f32.mrb[137].mxu0 }
 0x458   :  { %v2334_v17 = vpop.f32.mrb[138].mxu0 }
 0x459   :  { %v2427_v33 = vadd.f32 %v14173_v39, %v2387_v1  ;;  %v2388_v5 = vadd.f32 %v2334_v17, %v14151_v26  ;;  %v11132_v29 = vpop.f32.mrb[139].mxu0  ;;  %v2582_v34 = vshll.u32 %v14333_v4, 16  ;;  %v2586_v49 = vshrl.u32 %v14333_v4, 16 }
 0x45b   :  { %v2428_v8 = vadd.f32 %v14173_v39, %v2388_v5  ;;  %v2584_v30 = vrot.slane %v2582_v34, 1  ;;  %v2460_v48 = vmax.f32 %v2427_v33, 0.0 }
 0x45d   :  { %v2461_v62 = vmax.f32 %v2428_v8, 0.0  ;;  %v14342_v61 = vsel %vm190_vm2, %v2580_v52, %v2584_v30  ;;  %v2588_v54 = vor.u32 %v2586_v49, %v2584_v30 }
 0x45e   :  { %v2339_v15 = vpop.f32.mrb[140].mxu0  ;;  %11168 = vmatmul.mubr.msk.bf16.gmra.mrb[224].mxu1 %vm2608_vm5, %v14342_v61 }
 0x45f   :  { %v14346_v37 = vpack.c.bf16 %v2461_v62, %v2460_v48  ;;  %v2389_v26 = vadd.f32 %v2339_v15, %v14156_v24  ;;  %v11135_v13 = vpop.f32.mrb[141].mxu0 }
 0x460   :  { %v2342_v25 = vpop.f32.mrb[142].mxu0  ;;  %v12089_v13 = vld [vmem:[%s15686_s3 + $0x18] sm:$0xff]  }
 0x461   :  { %v2429_v36 = vadd.f32 %v14173_v39, %v2389_v26  ;;  %v2390_v42 = vadd.f32 %v2342_v25, %v14159_v27  ;;  %v11136_v11 = vpop.f32.mrb[143].mxu0  ;;  %v2590_v18 = vshll.u32 %v14346_v37, 16  ;;  %v2594_v1 = vshrl.u32 %v14346_v37, 16 }
 0x462   :  { %v12090_v11 = vld [vmem:[%s15686_s3 + $0x20] sm:$0xff]  }
 0x463   :  { %v2462_v22 = vmax.f32 %v2429_v36, 0.0  ;;  %v2430_v14 = vadd.f32 %v14173_v39, %v2390_v42  ;;  %v2592_v35 = vrot.slane %v2590_v18, 1  ;;  %v2989_v36 = vrot.slane %v14196_v28, 1 }
 0x464   :  { %v2991_v42 = vrot.slane %v14214_v7, 1  ;;  %v2993_v18 = vrot.slane %v14229_v50, 1 }
 0x465   :  { %v14354_v3 = vpack.c.bf16 %v2462_v22, %v2462_v22  ;;  %v2463_v43 = vmax.f32 %v2430_v14, 0.0  ;;  %v14357_v24 = vsel %vm190_vm2, %v2588_v54, %v2592_v35  ;;  %v14368_v29 = vor.u32 %v2594_v1, %v2592_v35 }
 0x466   :  { %v2347_v40 = vpop.f32.mrb[144].mxu0  ;;  %11171 = vmatprep.mubr.msk.bf16.mxu1 %vm2608_vm5, %v14357_v24  ;;  %v14436_v14 = vsel %vm783_vm4, %v2991_v42, %v2993_v18  ;;  %v2997_v35 = vrot.slane %v14255_v63, 1 }
 0x467   :  { %v2598_v27 = vshll.u32 %v14354_v3, 16  ;;  %v14362_v23 = vpack.c.bf16 %v2463_v43, %v2462_v22  ;;  %v2391_v53 = vadd.f32 %v2347_v40, %v14164_v57  ;;  %v11139_v59 = vpop.f32.mrb[145].mxu0  ;;  %v2995_v22 = vrot.slane %v14242_v45, 1 }
 0x468   :  { %v2350_v58 = vpop.f32.mrb[146].mxu0  ;;  %v2999_v43 = vrot.slane %v14268_v12, 1  ;;  %v3003_v59 = vrot.slane %v14294_v2, 1 }
 0x469   :  { %v2600_v17 = vrot.slane %v2598_v27, 1  ;;  %v2431_v33 = vadd.f32 %v14173_v39, %v2391_v53  ;;  %v2392_v5 = vadd.f32 %v2350_v58, %v14167_v41  ;;  %v11140_v10 = vpop.f32.mrb[147].mxu0  ;;  %v14441_v54 = vsel %vm783_vm4, %v2993_v18, %v2995_v22 }
 0x46a   :  { %v14448_v40 = vsel %vm783_vm4, %v2995_v22, %v2997_v35  ;;  %v14453_v27 = vsel %vm783_vm4, %v2997_v35, %v2999_v43  ;;  %v3001_v53 = vrot.slane %v14281_v0, 1  ;;  %v3416_v22 = vshrl.u32 %v14362_v23, 16 }
 0x46b   :  { %v2432_v34 = vadd.f32 %v14173_v39, %v2392_v5  ;;  %v2601_v8 = vsel %vm190_vm2, %v14368_v29, %v2600_v17  ;;  %v14374_v57 = vmax.f32 %v2431_v33, 0.0  ;;  %v3005_v17 = vrot.slane %v14307_v32, 1 }
 0x46c   :  { %11172 = vmatmul.mubr.msk.bf16.gmra.mrb[228].mxu1 %vm2608_vm5, %v2601_v8  ;;  %v14460_v1 = vsel %vm783_vm4, %v2999_v43, %v3001_v53  ;;  %v14465_v58 = vsel %vm783_vm4, %v3001_v53, %v3003_v59  ;;  %v3007_v33 = vrot.slane %v14320_v21, 1  ;;  %v14483_v8 = vrot.slane %v14346_v37, 1 }
 0x46d   :  { %v2465_v52 = vmax.f32 %v2432_v34, 0.0  ;;  %11177 = vmatprep.mubr.msk.bf16.mxu1 %vm2608_vm5, %v14179_v55  ;;  %v14472_v5 = vsel %vm783_vm4, %v3003_v59, %v3005_v17  ;;  %v3009_v34 = vrot.slane %v14333_v4, 1  ;;  %v14599_v53 = vrot.slane %v14362_v23, 1 }
 0x46e   :  { %v2355_v30 = vpop.f32.mrb[148].mxu0  ;;  %v14477_v10 = vsel %vm783_vm4, %v3005_v17, %v3007_v33 }
 0x46f   :  { %v14379_v48 = vpack.c.bf16 %v2465_v52, %v14374_v57  ;;  %v14382_v41 = vadd.f32 %v2355_v30, %v14171_v47  ;;  %v11143_v62 = vpop.f32.mrb[149].mxu0  ;;  %v2987_v47 = vrot.slane %v14186_v20, 1  ;;  %v14486_v52 = vsel %vm783_vm4, %v3007_v33, %v3009_v34 }
 0x470   :  { %v2358_v15 = vpop.f32.mrb[150].mxu0  ;;  %v14492_v30 = vsel %vm783_vm4, %v3009_v34, %v14483_v8  ;;  %v3013_v62 = vrot.slane %v14354_v3, 1  ;;  %v3409_v3 = vpack.c.bf16 %v14374_v57, %v14374_v57  ;;  %v14606_v34 = vsel %vm783_vm4, %v14483_v8, %v14599_v53 }
 0x471   :  { %v11144_v26 = vpop.f32.mrb[151].mxu0  ;;  %v14424_v49 = vsel %vm783_vm4, %v2987_v47, %v2989_v36 }
 0x472   :  { %v3014_v15 = vsel %vm783_vm4, %v14483_v8, %v3013_v62  ;;  %v12091_v26 = vld [vmem:[%s15686_s3 + $0x28] sm:$0xff]   ;;  %v3609_v62 = vrot.slane %v3409_v3, 1 }
 0x474   :  { %11178 = vmatmul.mubr.msk.bf16.vlgmr.msra.gmra.mrb[204].mxu1 %vm2608_vm5, %v14186_v20 }
 0x475   :  { %11206 = vmatpush3.bf16.msra.mxu1 %v14207_v16  ;;  %11181 = vmatprep.mubr.msk.bf16.mxu1 %vm2608_vm5, %v14196_v28  ;;  %v2986_v16 = vrot.slane %v14179_v55, 1  ;;  %v14429_v55 = vsel %vm783_vm4, %v2989_v36, %v2991_v42  ;;  %v3420_v42 = vshll.u32 %v3409_v3, 16 }
 0x476   :  { %11235 = vmatprep.subr.bf16.mxu1 %v12089_v13 }
 0x477   :  { %v2988_v25 = vsel %vm783_vm4, %v2986_v16, %v2987_v47  ;;  %v3422_v18 = vrot.slane %v3420_v42, 1 }
 0x47c   :  { %11182 = vmatmul.mubr.msk.bf16.gmra.mrb[208].mxu1 %vm2608_vm5, %v14214_v7 }
 0x47d   :  { %11185 = vmatprep.mubr.msk.bf16.mxu1 %vm2608_vm5, %v14229_v50 }
 0x484   :  { %11186 = vmatmul.mubr.msk.bf16.gmra.mrb[212].mxu1 %vm2608_vm5, %v14242_v45 }
 0x485   :  { %11189 = vmatprep.mubr.msk.bf16.mxu1 %vm2608_vm5, %v14255_v63 }
 0x48c   :  { %11190 = vmatmul.mubr.msk.bf16.gmra.mrb[216].mxu1 %vm2608_vm5, %v14268_v12 }
 0x48d   :  { %11193 = vmatprep.mubr.msk.bf16.mxu1 %vm2608_vm5, %v14281_v0 }
 0x494   :  { %11194 = vmatmul.mubr.msk.bf16.gmra.mrb[220].mxu1 %vm2608_vm5, %v14294_v2 }
 0x495   :  { %11197 = vmatprep.mubr.msk.bf16.mxu1 %vm2608_vm5, %v14307_v32 }
 0x49c   :  { %11198 = vmatmul.mubr.msk.bf16.gmra.mrb[224].mxu1 %vm2608_vm5, %v14320_v21 }
 0x49d   :  { %11201 = vmatprep.mubr.msk.bf16.mxu1 %vm2608_vm5, %v14333_v4 }
 0x4a4   :  { %11202 = vmatmul.mubr.msk.bf16.gmra.mrb[232].mxu1 %vm2608_vm5, %v14346_v37 }
 0x4a5   :  { %11207 = vmatprep.mubr.msk.bf16.mxu1 %vm2608_vm5, %v2988_v25 }
 0x4ac   :  { %11208 = vmatmul.mubr.msk.bf16.vlgmr.msra.gmra.mrb[204].mxu1 %vm2608_vm5, %v14424_v49 }
 0x4ad   :  { %11236 = vmatpush3.bf16.msra.mxu1 %v12089_v13  ;;  %11211 = vmatprep.mubr.msk.bf16.mxu1 %vm2608_vm5, %v14429_v55 }
 0x4ae   :  { %11265 = vmatprep.subr.bf16.mxu1 %v12090_v11 }
 0x4b4   :  { %11212 = vmatmul.mubr.msk.bf16.gmra.mrb[208].mxu1 %vm2608_vm5, %v14436_v14 }
 0x4b5   :  { %11215 = vmatprep.mubr.msk.bf16.mxu1 %vm2608_vm5, %v14441_v54 }
 0x4bc   :  { %11216 = vmatmul.mubr.msk.bf16.gmra.mrb[212].mxu1 %vm2608_vm5, %v14448_v40 }
 0x4bd   :  { %11219 = vmatprep.mubr.msk.bf16.mxu1 %vm2608_vm5, %v14453_v27 }
 0x4c4   :  { %11220 = vmatmul.mubr.msk.bf16.gmra.mrb[216].mxu1 %vm2608_vm5, %v14460_v1 }
 0x4c5   :  { %11223 = vmatprep.mubr.msk.bf16.mxu1 %vm2608_vm5, %v14465_v58 }
 0x4cc   :  { %11224 = vmatmul.mubr.msk.bf16.gmra.mrb[220].mxu1 %vm2608_vm5, %v14472_v5 }
 0x4cd   :  { %11227 = vmatprep.mubr.msk.bf16.mxu1 %vm2608_vm5, %v14477_v10 }
 0x4d4   :  { %11228 = vmatmul.mubr.msk.bf16.gmra.mrb[224].mxu1 %vm2608_vm5, %v14486_v52 }
 0x4d5   :  { %11231 = vmatprep.mubr.msk.bf16.mxu1 %vm2608_vm5, %v14492_v30 }
 0x4dc   :  { %11232 = vmatmul.mubr.msk.bf16.gmra.mrb[236].mxu1 %vm2608_vm5, %v3014_v15  ;;  %v3610_v15 = vsel %vm783_vm4, %v14599_v53, %v3609_v62 }
 0x4dd   :  { %11237 = vmatprep.mubr.msk.bf16.mxu1 %vm2608_vm5, %v14186_v20  ;;  %v12092_v20 = vld [vmem:[%s15686_s3 + $0x30] sm:$0xff]  }
 0x4e4   :  { %11238 = vmatmul.mubr.msk.bf16.vlgmr.msra.gmra.mrb[204].mxu1 %vm2608_vm5, %v14196_v28 }
 0x4e5   :  { %11266 = vmatpush3.bf16.msra.mxu1 %v12090_v11  ;;  %11241 = vmatprep.mubr.msk.bf16.mxu1 %vm2608_vm5, %v14214_v7 }
 0x4e6   :  { %11295 = vmatprep.subr.bf16.mxu1 %v12091_v26 }
 0x4ec   :  { %11242 = vmatmul.mubr.msk.bf16.gmra.mrb[208].mxu1 %vm2608_vm5, %v14229_v50 }
 0x4ed   :  { %11245 = vmatprep.mubr.msk.bf16.mxu1 %vm2608_vm5, %v14242_v45 }
 0x4f4   :  { %11246 = vmatmul.mubr.msk.bf16.gmra.mrb[212].mxu1 %vm2608_vm5, %v14255_v63 }
 0x4f5   :  { %11249 = vmatprep.mubr.msk.bf16.mxu1 %vm2608_vm5, %v14268_v12 }
 0x4fc   :  { %11250 = vmatmul.mubr.msk.bf16.gmra.mrb[216].mxu1 %vm2608_vm5, %v14281_v0 }
 0x4fd   :  { %11253 = vmatprep.mubr.msk.bf16.mxu1 %vm2608_vm5, %v14294_v2 }
 0x504   :  { %11254 = vmatmul.mubr.msk.bf16.gmra.mrb[220].mxu1 %vm2608_vm5, %v14307_v32 }
 0x505   :  { %11257 = vmatprep.mubr.msk.bf16.mxu1 %vm2608_vm5, %v14320_v21 }
 0x50c   :  { %11258 = vmatmul.mubr.msk.bf16.gmra.mrb[224].mxu1 %vm2608_vm5, %v14333_v4 }
 0x50d   :  { %11261 = vmatprep.mubr.msk.bf16.mxu1 %vm2608_vm5, %v14346_v37 }
 0x514   :  { %11262 = vmatmul.mubr.msk.bf16.gmra.mrb[240].mxu1 %vm2608_vm5, %v14362_v23 }
 0x515   :  { %11267 = vmatprep.mubr.msk.bf16.mxu1 %vm2608_vm5, %v14210_v56  ;;  %v3412_v56 = vshll.u32 %v14362_v23, 16 }
 0x517   :  { %v3414_v16 = vrot.slane %v3412_v56, 1 }
 0x519   :  { %v14563_v11 = vsel %vm190_vm2, %v14368_v29, %v3414_v16  ;;  %v14568_v57 = vor.u32 %v3416_v22, %v3414_v16  ;;  %v12093_v29 = vld [vmem:[%s15686_s3 + $0x38] sm:$0xff]  }
 0x51b   :  { %v3423_v35 = vsel %vm190_vm2, %v14568_v57, %v3422_v18 }
 0x51c   :  { %11268 = vmatmul.mubr.msk.bf16.vlgmr.msra.gmra.mrb[204].mxu1 %vm2608_vm5, %v14225_v60 }
 0x51d   :  { %11296 = vmatpush3.bf16.msra.mxu1 %v12091_v26  ;;  %11271 = vmatprep.mubr.msk.bf16.mxu1 %vm2608_vm5, %v14238_v44  ;;  %v12094_v26 = vld [vmem:[%s15686_s3 + $0x40] sm:$0xff]  }
 0x51e   :  { %11325 = vmatprep.subr.bf16.mxu1 %v12092_v20 }
 0x524   :  { %11272 = vmatmul.mubr.msk.bf16.gmra.mrb[208].mxu1 %vm2608_vm5, %v14251_v19 }
 0x525   :  { %11275 = vmatprep.mubr.msk.bf16.mxu1 %vm2608_vm5, %v14264_v9 }
 0x52c   :  { %11276 = vmatmul.mubr.msk.bf16.gmra.mrb[212].mxu1 %vm2608_vm5, %v14277_v38 }
 0x52d   :  { %11279 = vmatprep.mubr.msk.bf16.mxu1 %vm2608_vm5, %v14290_v31 }
 0x534   :  { %11280 = vmatmul.mubr.msk.bf16.gmra.mrb[216].mxu1 %vm2608_vm5, %v14303_v51 }
 0x535   :  { %11283 = vmatprep.mubr.msk.bf16.mxu1 %vm2608_vm5, %v14316_v6 }
 0x53c   :  { %11284 = vmatmul.mubr.msk.bf16.gmra.mrb[220].mxu1 %vm2608_vm5, %v14329_v46 }
 0x53d   :  { %11287 = vmatprep.mubr.msk.bf16.mxu1 %vm2608_vm5, %v14342_v61 }
 0x53f   :  { %v11173_v13 = vpop.f32.mrb[228].mxu1 }
 0x540   :  { %v2781_v47 = vpop.f32.mrb[229].mxu1 }
 0x541   :  { %v11174_v25 = vpop.f32.mrb[230].mxu1 }
 0x542   :  { %v2784_v36 = vpop.f32.mrb[231].mxu1 }
 0x544   :  { %11288 = vmatmul.mubr.msk.bf16.gmra.mrb[224].mxu1 %vm2608_vm5, %v14357_v24 }
 0x545   :  { %11291 = vmatprep.mubr.msk.bf16.mxu1 %vm2608_vm5, %v14563_v11 }
 0x54c   :  { %11292 = vmatmul.mubr.msk.bf16.gmra.mrb[244].mxu1 %vm2608_vm5, %v3423_v35 }
 0x54d   :  { %11297 = vmatprep.mubr.msk.bf16.mxu1 %vm2608_vm5, %v14424_v49 }
 0x554   :  { %11298 = vmatmul.mubr.msk.bf16.vlgmr.msra.gmra.mrb[204].mxu1 %vm2608_vm5, %v14429_v55 }
 0x555   :  { %11326 = vmatpush3.bf16.msra.mxu1 %v12092_v20  ;;  %11301 = vmatprep.mubr.msk.bf16.mxu1 %vm2608_vm5, %v14436_v14 }
 0x556   :  { %11355 = vmatprep.subr.bf16.mxu1 %v12093_v29 }
 0x55c   :  { %11302 = vmatmul.mubr.msk.bf16.gmra.mrb[208].mxu1 %vm2608_vm5, %v14441_v54 }
 0x55d   :  { %11305 = vmatprep.mubr.msk.bf16.mxu1 %vm2608_vm5, %v14448_v40 }
 0x564   :  { %11306 = vmatmul.mubr.msk.bf16.gmra.mrb[212].mxu1 %vm2608_vm5, %v14453_v27 }
 0x565   :  { %11309 = vmatprep.mubr.msk.bf16.mxu1 %vm2608_vm5, %v14460_v1 }
 0x56c   :  { %11310 = vmatmul.mubr.msk.bf16.gmra.mrb[216].mxu1 %vm2608_vm5, %v14465_v58 }
 0x56d   :  { %11313 = vmatprep.mubr.msk.bf16.mxu1 %vm2608_vm5, %v14472_v5 }
 0x574   :  { %11314 = vmatmul.mubr.msk.bf16.gmra.mrb[220].mxu1 %vm2608_vm5, %v14477_v10 }
 0x575   :  { %11317 = vmatprep.mubr.msk.bf16.mxu1 %vm2608_vm5, %v14486_v52 }
 0x577   :  { %v11203_v49 = vpop.f32.mrb[232].mxu1 }
 0x578   :  { %v2957_v43 = vpop.f32.mrb[233].mxu1 }
 0x579   :  { %v2958_v59 = vadd.f32 %v2957_v43, %v2781_v47  ;;  %v11204_v17 = vpop.f32.mrb[234].mxu1 }
 0x57a   :  { %v2960_v33 = vpop.f32.mrb[235].mxu1 }
 0x57c   :  { %11318 = vmatmul.mubr.msk.bf16.gmra.mrb[224].mxu1 %vm2608_vm5, %v14492_v30 }
 0x57d   :  { %11321 = vmatprep.mubr.msk.bf16.mxu1 %vm2608_vm5, %v14606_v34 }
 0x584   :  { %11322 = vmatmul.mubr.msk.bf16.gmra.mrb[248].mxu1 %vm2608_vm5, %v3610_v15 }
 0x585   :  { %11327 = vmatprep.mubr.msk.bf16.mxu1 %vm2608_vm5, %v14196_v28 }
 0x58c   :  { %11328 = vmatmul.mubr.msk.bf16.vlgmr.msra.gmra.mrb[204].mxu1 %vm2608_vm5, %v14214_v7 }
 0x58d   :  { %11356 = vmatpush3.bf16.msra.mxu1 %v12093_v29  ;;  %11331 = vmatprep.mubr.msk.bf16.mxu1 %vm2608_vm5, %v14229_v50 }
 0x58e   :  { %11385 = vmatprep.subr.bf16.mxu1 %v12094_v26 }
 0x594   :  { %11332 = vmatmul.mubr.msk.bf16.gmra.mrb[208].mxu1 %vm2608_vm5, %v14242_v45 }
 0x595   :  { %11335 = vmatprep.mubr.msk.bf16.mxu1 %vm2608_vm5, %v14255_v63 }
 0x59c   :  { %11336 = vmatmul.mubr.msk.bf16.gmra.mrb[212].mxu1 %vm2608_vm5, %v14268_v12 }
 0x59d   :  { %11339 = vmatprep.mubr.msk.bf16.mxu1 %vm2608_vm5, %v14281_v0 }
 0x5a4   :  { %11340 = vmatmul.mubr.msk.bf16.gmra.mrb[216].mxu1 %vm2608_vm5, %v14294_v2 }
 0x5a5   :  { %11343 = vmatprep.mubr.msk.bf16.mxu1 %vm2608_vm5, %v14307_v32 }
 0x5ac   :  { %11344 = vmatmul.mubr.msk.bf16.gmra.mrb[220].mxu1 %vm2608_vm5, %v14320_v21 }
 0x5ad   :  { %11347 = vmatprep.mubr.msk.bf16.mxu1 %vm2608_vm5, %v14333_v4 }
 0x5af   :  { %v11233_v28 = vpop.f32.mrb[236].mxu1 }
 0x5b0   :  { %v3193_v7 = vpop.f32.mrb[237].mxu1 }
 0x5b1   :  { %v3229_v50 = vadd.f32 %v3193_v7, %v2958_v59  ;;  %v11234_v45 = vpop.f32.mrb[238].mxu1 }
 0x5b2   :  { %v3196_v63 = vpop.f32.mrb[239].mxu1 }
 0x5b4   :  { %11348 = vmatmul.mubr.msk.bf16.gmra.mrb[224].mxu1 %vm2608_vm5, %v14346_v37  ;;  %v12096_v37 = vld [vmem:[%s15688_s5 + $0x18] sm:$0xff]  }
 0x5b5   :  { %11351 = vmatprep.mubr.msk.bf16.mxu1 %vm2608_vm5, %v14362_v23 }
 0x5bc   :  { %11352 = vmatmul.mubr.msk.bf16.gmra.mrb[252].mxu1 %vm2608_vm5, %v14379_v48 }
 0x5bd   :  { %11357 = vmatprep.mubr.msk.bf16.mxu1 %vm2608_vm5, %v14225_v60  ;;  %v12095_v60 = vld [vmem:[%s15688_s5 + $0x10] sm:$0xff]  }
 0x5be   :  { %11415 = vmatprep.subr.bf16.mxu0 %v12095_v60 }
 0x5bf   :  { %11416 = vmatpush3.bf16.msra.mxu0 %v12095_v60 }
 0x5c0   :  { %11417 = vmatprep.subr.bf16.mxu0 %v12096_v37 }
 0x5c3   :  { %11418 = vmatpush3.bf16.msra.mxu0 %v12096_v37 }
 0x5c4   :  { %11358 = vmatmul.mubr.msk.bf16.vlgmr.msra.gmra.mrb[204].mxu1 %vm2608_vm5, %v14238_v44  ;;  %v2433_v44 = vadd.f32 %v14173_v39, %v14382_v41  ;;  %v4167_v41 = vrot.slane %v14379_v48, 1 }
 0x5c5   :  { %11386 = vmatpush3.bf16.msra.mxu1 %v12094_v26  ;;  %11361 = vmatprep.mubr.msk.bf16.mxu1 %vm2608_vm5, %v14251_v19 }
 0x5c6   :  { %v2466_v19 = vmax.f32 %v2433_v44, 0.0 }
 0x5c8   :  { %v3969_v12 = vpack.c.bf16 %v2466_v19, %v2466_v19 }
 0x5cc   :  { %11362 = vmatmul.mubr.msk.bf16.gmra.mrb[208].mxu1 %vm2608_vm5, %v14264_v9  ;;  %v3972_v9 = vshll.u32 %v14379_v48, 16 }
 0x5cd   :  { %11365 = vmatprep.mubr.msk.bf16.mxu1 %vm2608_vm5, %v14277_v38 }
 0x5d4   :  { %11366 = vmatmul.mubr.msk.bf16.gmra.mrb[212].mxu1 %vm2608_vm5, %v14290_v31  ;;  %v3974_v31 = vrot.slane %v3972_v9, 1 }
 0x5d5   :  { %11369 = vmatprep.mubr.msk.bf16.mxu1 %vm2608_vm5, %v14303_v51 }
 0x5d6   :  { %v3975_v39 = vsel %vm190_vm2, %v14568_v57, %v3974_v31 }
 0x5dc   :  { %11370 = vmatmul.mubr.msk.bf16.gmra.mrb[216].mxu1 %vm2608_vm5, %v14316_v6  ;;  %v3980_v6 = vshll.u32 %v3969_v12, 16 }
 0x5dd   :  { %11373 = vmatprep.mubr.msk.bf16.mxu1 %vm2608_vm5, %v14329_v46  ;;  %v3976_v46 = vshrl.u32 %v14379_v48, 16 }
 0x5de   :  { %v3982_v21 = vrot.slane %v3980_v6, 1 }
 0x5df   :  { %v3978_v4 = vor.u32 %v3976_v46, %v3974_v31 }
 0x5e4   :  { %11374 = vmatmul.mubr.msk.bf16.gmra.mrb[220].mxu1 %vm2608_vm5, %v14342_v61  ;;  %v3983_v61 = vsel %vm190_vm2, %v3978_v4, %v3982_v21 }
 0x5e5   :  { %11377 = vmatprep.mubr.msk.bf16.mxu1 %vm2608_vm5, %v14357_v24 }
 0x5e7   :  { %v11263_v38 = vpop.f32.mrb[240].mxu1 }
 0x5e8   :  { %v3372_v0 = vpop.f32.mrb[241].mxu1 }
 0x5e9   :  { %v3408_v2 = vadd.f32 %v3372_v0, %v3229_v50  ;;  %v11264_v51 = vpop.f32.mrb[242].mxu1 }
 0x5ea   :  { %v3375_v32 = vpop.f32.mrb[243].mxu1 }
 0x5ec   :  { %11378 = vmatmul.mubr.msk.bf16.gmra.mrb[224].mxu1 %vm2608_vm5, %v14563_v11  ;;  %v14721_v11 = vld [vmem:[#allocation9] ss:$0 sm:$0xff] }
 0x5ed   :  { %11381 = vmatprep.mubr.msk.bf16.mxu1 %vm2608_vm5, %v3975_v39 }
 0x5f4   :  { %11382 = vmatmul.mubr.msk.bf16.gmra.mrb[0].mxu1 %vm2608_vm5, %v3983_v61 }
 0x5f5   :  { %11387 = vmatprep.mubr.msk.bf16.mxu1 %vm2608_vm5, %v14429_v55 }
 0x5fc   :  { %11388 = vmatmul.mubr.msk.bf16.vlgmr.msra.gmra.mrb[204].mxu1 %vm2608_vm5, %v14436_v14 }
 0x5fd   :  { %11391 = vmatprep.mubr.msk.bf16.mxu1 %vm2608_vm5, %v14441_v54 }
 0x604   :  { %11392 = vmatmul.mubr.msk.bf16.gmra.mrb[208].mxu1 %vm2608_vm5, %v14448_v40  ;;  %v4168_v40 = vsel %vm783_vm4, %v14599_v53, %v4167_v41 }
 0x605   :  { %11395 = vmatprep.mubr.msk.bf16.mxu1 %vm2608_vm5, %v14453_v27  ;;  %v4169_v27 = vrot.slane %v3969_v12, 1 }
 0x60c   :  { %11396 = vmatmul.mubr.msk.bf16.gmra.mrb[212].mxu1 %vm2608_vm5, %v14460_v1  ;;  %v4170_v1 = vsel %vm783_vm4, %v4167_v41, %v4169_v27 }
 0x60d   :  { %11399 = vmatprep.mubr.msk.bf16.mxu1 %vm2608_vm5, %v14465_v58 }
 0x614   :  { %11400 = vmatmul.mubr.msk.bf16.gmra.mrb[216].mxu1 %vm2608_vm5, %v14472_v5 }
 0x615   :  { %11403 = vmatprep.mubr.msk.bf16.mxu1 %vm2608_vm5, %v14477_v10 }
 0x61c   :  { %11404 = vmatmul.mubr.msk.bf16.gmra.mrb[220].mxu1 %vm2608_vm5, %v14486_v52  ;;  %v14716_v52 = vld [vmem:[%s15688_s5] sm:$0xff]  }
 0x61d   :  { %11407 = vmatprep.mubr.msk.bf16.mxu1 %vm2608_vm5, %v14492_v30  ;;  %11439 = vmatprep.subr.bf16.mxu0 %v14716_v52 }
 0x61f   :  { %v11293_v24 = vpop.f32.mrb[244].mxu1 }
 0x620   :  { %v3566_v23 = vpop.f32.mrb[245].mxu1 }
 0x621   :  { %v3602_v55 = vadd.f32 %v3566_v23, %v3408_v2  ;;  %v11294_v14 = vpop.f32.mrb[246].mxu1 }
 0x622   :  { %v3569_v54 = vpop.f32.mrb[247].mxu1 }
 0x624   :  { %11408 = vmatmul.mubr.msk.bf16.gmra.mrb[224].mxu1 %vm2608_vm5, %v14606_v34 }
 0x625   :  { %11411 = vmatprep.mubr.msk.bf16.mxu1 %vm2608_vm5, %v4168_v40 }
 0x62c   :  { %11412 = vmatmul.mubr.msk.bf16.gmra.mrb[4].mxu1 %vm2608_vm5, %v4170_v1 }
 0x657   :  { %v11323_v58 = vpop.f32.mrb[248].mxu1 }
 0x658   :  { %v3753_v5 = vpop.f32.mrb[249].mxu1 }
 0x659   :  { %v3789_v10 = vadd.f32 %v3753_v5, %v3602_v55  ;;  %v11324_v48 = vpop.f32.mrb[250].mxu1 }
 0x65a   :  { %v3756_v8 = vpop.f32.mrb[251].mxu1 }
 0x68f   :  { %v11353_v30 = vpop.f32.mrb[252].mxu1 }
 0x690   :  { %v3932_v20 = vpop.f32.mrb[253].mxu1  ;;  %v12098_v30 = vld [vmem:[%s15688_s5 + $0x8] sm:$0xff]  }
 0x691   :  { %v3968_v56 = vadd.f32 %v3932_v20, %v3789_v10  ;;  %v11354_v3 = vpop.f32.mrb[254].mxu1 }
 0x692   :  { %v3935_v13 = vpop.f32.mrb[255].mxu1 }
 0x6c7   :  { %v11383_v47 = vpop.f32.mrb[0].mxu1 }
 0x6c8   :  { %v4126_v16 = vpop.f32.mrb[1].mxu1 }
 0x6c9   :  { %v14719_v25 = vadd.f32 %v4126_v16, %v3968_v56  ;;  %v11384_v36 = vpop.f32.mrb[2].mxu1 }
 0x6ca   :  { %v4129_v42 = vpop.f32.mrb[3].mxu1 }
 0x6cf   :  { %v11389_v18 = vpop.f32.mrb[204].mxu1 }
 0x6d0   :  { %v4359_v22 = vadd.f32 %v11389_v18, %v14721_v11  ;;  %v4217_v57 = vpop.f32.mrb[205].mxu1 }
 0x6d1   :  { %v4357_v35 = vadd.f32 %v14721_v11, %v4217_v57  ;;  %v11390_v29 = vpop.f32.mrb[206].mxu1 }
 0x6d2   :  { %v4360_v49 = vadd.f32 %v11390_v29, %v14721_v11  ;;  %v4220_v43 = vpop.f32.mrb[207].mxu1  ;;  %v4384_v59 = vmax.f32 %v4359_v22, 0.0 }
 0x6d3   :  { %v4358_v53 = vadd.f32 %v14721_v11, %v4220_v43  ;;  %v4382_v33 = vmax.f32 %v4357_v35, 0.0  ;;  %v14775_v35 = vld [vmem:[%s15688_s5 + $0x20] sm:$0xff]  }
 0x6d4   :  { %v4385_v17 = vmax.f32 %v4360_v49, 0.0 }
 0x6d5   :  { %v4383_v34 = vmax.f32 %v4358_v53, 0.0 }
 0x6d6   :  { %v14727_v62 = vpack.c.bf16 %v4385_v17, %v4384_v59 }
 0x6d7   :  { %v14729_v15 = vpack.c.bf16 %v4383_v34, %v4382_v33  ;;  %v11393_v26 = vpop.f32.mrb[208].mxu1 }
 0x6d8   :  { %v4363_v28 = vadd.f32 %v11393_v26, %v14721_v11  ;;  %v4233_v7 = vpop.f32.mrb[209].mxu1  ;;  %v4434_v60 = vshll.u32 %v14727_v62, 16  ;;  %v4438_v41 = vshrl.u32 %v14727_v62, 16 }
 0x6d9   :  { %v4361_v50 = vadd.f32 %v14721_v11, %v4233_v7  ;;  %v11394_v45 = vpop.f32.mrb[210].mxu1  ;;  %v4429_v63 = vshll.u32 %v14729_v15, 16  ;;  %v4427_v12 = vshrl.u32 %v14729_v15, 16 }
 0x6da   :  { %v4364_v44 = vadd.f32 %v11394_v45, %v14721_v11  ;;  %v4236_v19 = vpop.f32.mrb[211].mxu1  ;;  %v4388_v0 = vmax.f32 %v4363_v28, 0.0  ;;  %v4436_v6 = vrot.slane %v4434_v60, 1 }
 0x6db   :  { %v4362_v9 = vadd.f32 %v14721_v11, %v4236_v19  ;;  %v4431_v38 = vrot.slane %v4429_v63, 1  ;;  %v4386_v2 = vmax.f32 %v4361_v50, 0.0 }
 0x6dc   :  { %v4389_v31 = vmax.f32 %v4364_v44, 0.0  ;;  %v4440_v27 = vor.u32 %v4438_v41, %v4436_v6 }
 0x6dd   :  { %v4387_v51 = vmax.f32 %v4362_v9, 0.0  ;;  %v4432_v32 = vor.u32 %v4431_v38, %v4427_v12 }
 0x6de   :  { %v14738_v39 = vpack.c.bf16 %v4389_v31, %v4388_v0 }
 0x6df   :  { %v14740_v21 = vpack.c.bf16 %v4387_v51, %v4386_v2  ;;  %v11397_v46 = vpop.f32.mrb[212].mxu1  ;;  %v4437_v4 = vsel %vm190_vm2, %v4432_v32, %v4436_v6 }
 0x6e0   :  { %v4367_v61 = vadd.f32 %v11397_v46, %v14721_v11  ;;  %v4249_v37 = vpop.f32.mrb[213].mxu1  ;;  %11419 = vmatprep.mubr.msk.bf16.mxu0 %vm4522_vm6, %v4437_v4  ;;  %v4450_v24 = vshll.u32 %v14738_v39, 16  ;;  %v4454_v29 = vshrl.u32 %v14738_v39, 16 }
 0x6e1   :  { %v4365_v23 = vadd.f32 %v14721_v11, %v4249_v37  ;;  %v4442_v55 = vshll.u32 %v14740_v21, 16  ;;  %v11398_v14 = vpop.f32.mrb[214].mxu1  ;;  %v4446_v5 = vshrl.u32 %v14740_v21, 16 }
 0x6e2   :  { %v4368_v54 = vadd.f32 %v11398_v14, %v14721_v11  ;;  %v4252_v40 = vpop.f32.mrb[215].mxu1  ;;  %v4392_v10 = vmax.f32 %v4367_v61, 0.0  ;;  %v4452_v8 = vrot.slane %v4450_v24, 1 }
 0x6e3   :  { %v4444_v1 = vrot.slane %v4442_v55, 1  ;;  %v4366_v58 = vadd.f32 %v14721_v11, %v4252_v40  ;;  %v4390_v20 = vmax.f32 %v4365_v23, 0.0 }
 0x6e4   :  { %v4393_v48 = vmax.f32 %v4368_v54, 0.0  ;;  %v4456_v17 = vor.u32 %v4454_v29, %v4452_v8 }
 0x6e5   :  { %v14756_v56 = vsel %vm190_vm2, %v4440_v27, %v4444_v1  ;;  %v4391_v3 = vmax.f32 %v4366_v58, 0.0  ;;  %v4448_v13 = vor.u32 %v4446_v5, %v4444_v1 }
 0x6e6   :  { %v14758_v47 = vpack.c.bf16 %v4393_v48, %v4392_v10  ;;  %11420 = vmatmul.mubr.msk.bf16.vlgmr.msra.gmra.mrb[152].mxu0 %vm4522_vm6, %v14756_v56 }
 0x6e7   :  { %v14762_v16 = vpack.c.bf16 %v4391_v3, %v4390_v20  ;;  %11440 = vmatpush3.bf16.msra.mxu0 %v14716_v52  ;;  %v11401_v36 = vpop.f32.mrb[216].mxu1  ;;  %v14766_v42 = vsel %vm190_vm2, %v4448_v13, %v4452_v8 }
 0x6e8   :  { %v4371_v18 = vadd.f32 %v11401_v36, %v14721_v11  ;;  %v4265_v22 = vpop.f32.mrb[217].mxu1  ;;  %11423 = vmatprep.mubr.msk.bf16.mxu0 %vm4522_vm6, %v14766_v42  ;;  %v4466_v57 = vshll.u32 %v14758_v47, 16  ;;  %11441 = vmatprep.subr.bf16.mxu0 %v12098_v30  ;;  %v4470_v32 = vshrl.u32 %v14758_v47, 16 }
 0x6e9   :  { %v4369_v52 = vadd.f32 %v14721_v11, %v4265_v22  ;;  %v4458_v49 = vshll.u32 %v14762_v16, 16  ;;  %v11402_v43 = vpop.f32.mrb[218].mxu1  ;;  %v4462_v26 = vshrl.u32 %v14762_v16, 16 }
 0x6ea   :  { %v4372_v53 = vadd.f32 %v11402_v43, %v14721_v11  ;;  %v4268_v59 = vpop.f32.mrb[219].mxu1  ;;  %v4396_v28 = vmax.f32 %v4371_v18, 0.0  ;;  %v4468_v50 = vrot.slane %v4466_v57, 1 }
 0x6eb   :  { %v4460_v33 = vrot.slane %v4458_v49, 1  ;;  %v4370_v34 = vadd.f32 %v14721_v11, %v4268_v59  ;;  %11442 = vmatpush3.bf16.msra.mxu0 %v12098_v30  ;;  %v4394_v45 = vmax.f32 %v4369_v52, 0.0 }
 0x6ec   :  { %v4397_v7 = vmax.f32 %v4372_v53, 0.0  ;;  %11463 = vmatprep.subr.bf16.mxu0 %v14775_v35  ;;  %v4472_v37 = vor.u32 %v4470_v32, %v4468_v50 }
 0x6ed   :  { %v14785_v63 = vsel %vm190_vm2, %v4456_v17, %v4460_v33  ;;  %v4395_v60 = vmax.f32 %v4370_v34, 0.0  ;;  %v4464_v44 = vor.u32 %v4462_v26, %v4460_v33 }
 0x6ee   :  { %v14787_v19 = vpack.c.bf16 %v4397_v7, %v4396_v28  ;;  %11424 = vmatmul.mubr.msk.bf16.gmra.mrb[156].mxu0 %vm4522_vm6, %v14785_v63 }
 0x6ef   :  { %v14791_v9 = vpack.c.bf16 %v4395_v60, %v4394_v45  ;;  %v11405_v12 = vpop.f32.mrb[220].mxu1  ;;  %v14794_v38 = vsel %vm190_vm2, %v4464_v44, %v4468_v50 }
 0x6f0   :  { %v4375_v0 = vadd.f32 %v11405_v12, %v14721_v11  ;;  %v4281_v31 = vpop.f32.mrb[221].mxu1  ;;  %11427 = vmatprep.mubr.msk.bf16.mxu0 %vm4522_vm6, %v14794_v38  ;;  %v4482_v2 = vshll.u32 %v14787_v19, 16  ;;  %v4486_v3 = vshrl.u32 %v14787_v19, 16 }
 0x6f1   :  { %v4373_v51 = vadd.f32 %v14721_v11, %v4281_v31  ;;  %v4474_v6 = vshll.u32 %v14791_v9, 16  ;;  %v11406_v46 = vpop.f32.mrb[222].mxu1  ;;  %v4478_v41 = vshrl.u32 %v14791_v9, 16 }
 0x6f2   :  { %v4376_v4 = vadd.f32 %v11406_v46, %v14721_v11  ;;  %v4284_v61 = vpop.f32.mrb[223].mxu1  ;;  %v4400_v55 = vmax.f32 %v4375_v0, 0.0  ;;  %v4484_v54 = vrot.slane %v4482_v2, 1 }
 0x6f3   :  { %v4476_v24 = vrot.slane %v4474_v6, 1  ;;  %v4374_v23 = vadd.f32 %v14721_v11, %v4284_v61  ;;  %v4398_v40 = vmax.f32 %v4373_v51, 0.0 }
 0x6f4   :  { %v4401_v14 = vmax.f32 %v4376_v4, 0.0  ;;  %v4488_v57 = vor.u32 %v4486_v3, %v4484_v54  ;;  %v4839_v3 = vrot.slane %v14787_v19, 1 }
 0x6f5   :  { %v14807_v27 = vsel %vm190_vm2, %v4472_v37, %v4476_v24  ;;  %v4399_v1 = vmax.f32 %v4374_v23, 0.0  ;;  %v4480_v58 = vor.u32 %v4478_v41, %v4476_v24  ;;  %v4827_v24 = vrot.slane %v14727_v62, 1 }
 0x6f6   :  { %v14809_v5 = vpack.c.bf16 %v4401_v14, %v4400_v55  ;;  %11428 = vmatmul.mubr.msk.bf16.gmra.mrb[160].mxu0 %vm4522_vm6, %v14807_v27  ;;  %v4829_v41 = vrot.slane %v14740_v21, 1  ;;  %v4831_v55 = vrot.slane %v14738_v39, 1  ;;  %v12102_v14 = vld [vmem:[%s15688_s5 + $0x38] sm:$0xff]  }
 0x6f7   :  { %v14813_v10 = vpack.c.bf16 %v4399_v1, %v4398_v40  ;;  %v11409_v48 = vpop.f32.mrb[224].mxu1  ;;  %v14816_v8 = vsel %vm190_vm2, %v4480_v58, %v4484_v54  ;;  %v12103_v40 = vld [vmem:[%s15688_s5 + $0x40] sm:$0xff]   ;;  %v4833_v1 = vrot.slane %v14762_v16, 1  ;;  %v4835_v58 = vrot.slane %v14758_v47, 1 }
 0x6f8   :  { %v4379_v30 = vadd.f32 %v11409_v48, %v14721_v11  ;;  %v4297_v20 = vpop.f32.mrb[225].mxu1  ;;  %11431 = vmatprep.mubr.msk.bf16.mxu0 %vm4522_vm6, %v14816_v8  ;;  %v4498_v13 = vshll.u32 %v14809_v5, 16  ;;  %v4502_v32 = vshrl.u32 %v14809_v5, 16  ;;  %v14895_v54 = vsel %vm783_vm4, %v4827_v24, %v4829_v41 }
 0x6f9   :  { %v4377_v36 = vadd.f32 %v14721_v11, %v4297_v20  ;;  %v4490_v18 = vshll.u32 %v14813_v10, 16  ;;  %v11410_v22 = vpop.f32.mrb[226].mxu1  ;;  %v4494_v59 = vshrl.u32 %v14813_v10, 16  ;;  %v14910_v48 = vsel %vm783_vm4, %v4831_v55, %v4833_v1 }
 0x6fa   :  { %v4380_v52 = vadd.f32 %v11410_v22, %v14721_v11  ;;  %v4300_v29 = vpop.f32.mrb[227].mxu1  ;;  %v14828_v17 = vmax.f32 %v4379_v30, 0.0  ;;  %v4500_v34 = vrot.slane %v4498_v13, 1  ;;  %v14915_v30 = vsel %vm783_vm4, %v4833_v1, %v4835_v58 }
 0x6fb   :  { %v4402_v49 = vmax.f32 %v4377_v36, 0.0  ;;  %v4492_v43 = vrot.slane %v4490_v18, 1  ;;  %v4378_v53 = vadd.f32 %v14721_v11, %v4300_v29  ;;  %v4837_v20 = vrot.slane %v14791_v9, 1 }
 0x6fc   :  { %v4405_v33 = vmax.f32 %v4380_v52, 0.0  ;;  %v14853_v61 = vor.u32 %v4502_v32, %v4500_v34  ;;  %v4841_v18 = vrot.slane %v14813_v10, 1  ;;  %v14933_v22 = vrot.slane %v14809_v5, 1 }
 0x6fd   :  { %v14830_v26 = vpack.c.bf16 %v4402_v49, %v4402_v49  ;;  %v14833_v28 = vsel %vm190_vm2, %v4488_v57, %v4492_v43  ;;  %v4403_v7 = vmax.f32 %v4378_v53, 0.0  ;;  %v4496_v50 = vor.u32 %v4494_v59, %v4492_v43  ;;  %v12104_v43 = vld [vmem:[%s15688_s5 + $0x48] sm:$0xff]   ;;  %v12105_v53 = vld [vmem:[%s15688_s5 + $0x50] sm:$0xff]   ;;  %v12107_v59 = vld [vmem:[%s15688_s5 + $0x60] sm:$0xff]  }
 0x6fe   :  { %v14836_v45 = vpack.c.bf16 %v4405_v33, %v14828_v17  ;;  %11432 = vmatmul.mubr.msk.bf16.gmra.mrb[164].mxu0 %vm4522_vm6, %v14833_v28  ;;  %v14922_v13 = vsel %vm783_vm4, %v4835_v58, %v4837_v20  ;;  %v14927_v36 = vsel %vm783_vm4, %v4837_v20, %v4839_v3  ;;  %v14936_v57 = vsel %vm783_vm4, %v4839_v3, %v4841_v18 }
 0x6ff   :  { %v4506_v60 = vshll.u32 %v14830_v26, 16  ;;  %v14841_v44 = vpack.c.bf16 %v4403_v7, %v4402_v49  ;;  %v11413_v12 = vpop.f32.mrb[4].mxu1  ;;  %v14844_v0 = vsel %vm190_vm2, %v4496_v50, %v4500_v34  ;;  %v14942_v52 = vsel %vm783_vm4, %v4841_v18, %v14933_v22 }
 0x700   :  { %v4313_v31 = vpop.f32.mrb[5].mxu1  ;;  %11435 = vmatprep.mubr.msk.bf16.mxu0 %vm4522_vm6, %v14844_v0  ;;  %v4845_v29 = vrot.slane %v14830_v26, 1  ;;  %v5175_v34 = vpack.c.bf16 %v14828_v17, %v14828_v17  ;;  %v12108_v17 = vld [vmem:[%s15688_s5 + $0x68] sm:$0xff]  }
 0x701   :  { %v4508_v2 = vrot.slane %v4506_v60, 1  ;;  %v4349_v51 = vadd.f32 %v4313_v31, %v14719_v25  ;;  %v11414_v6 = vpop.f32.mrb[6].mxu1  ;;  %v12100_v25 = vld [vmem:[%s15688_s5 + $0x28] sm:$0xff]   ;;  %v5184_v50 = vshrl.u32 %v14841_v44, 16 }
 0x702   :  { %v4316_v46 = vpop.f32.mrb[7].mxu1  ;;  %v4846_v49 = vsel %vm783_vm4, %v14933_v22, %v4845_v29  ;;  %v5188_v7 = vshll.u32 %v5175_v34, 16  ;;  %v5351_v6 = vrot.slane %v5175_v34, 1 }
 0x703   :  { %v14851_v4 = vadd.f32 %v14721_v11, %v4349_v51  ;;  %v4509_v37 = vsel %vm190_vm2, %v14853_v61, %v4508_v2  ;;  %v12101_v11 = vld [vmem:[%s15688_s5 + $0x30] sm:$0xff]   ;;  %v5349_v51 = vrot.slane %v14841_v44, 1 }
 0x704   :  { %v5190_v12 = vrot.slane %v5188_v7, 1  ;;  %v12109_v2 = vld [vmem:[%s15688_s5 + $0x70] sm:$0xff]  }
 0x705   :  { %v5350_v32 = vsel %vm783_vm4, %v14933_v22, %v5349_v51  ;;  %v5352_v46 = vsel %vm783_vm4, %v5349_v51, %v5351_v6 }
 0x706   :  { %11436 = vmatmul.mubr.msk.bf16.gmra.mrb[168].mxu0 %vm4522_vm6, %v4509_v37  ;;  %v12111_v37 = vld [vmem:[%s15688_s5 + $0x80] sm:$0xff]  }
 0x707   :  { %11443 = vmatprep.mubr.msk.bf16.mxu0 %vm4522_vm6, %v14729_v15 }
 0x70e   :  { %11444 = vmatmul.mubr.msk.bf16.vlgmr.msra.gmra.mrb[152].mxu0 %vm4522_vm6, %v14727_v62 }
 0x70f   :  { %11464 = vmatpush3.bf16.msra.mxu0 %v14775_v35  ;;  %11447 = vmatprep.mubr.msk.bf16.mxu0 %vm4522_vm6, %v14740_v21  ;;  %v4826_v35 = vrot.slane %v14729_v15, 1  ;;  %v14900_v15 = vsel %vm783_vm4, %v4829_v41, %v4831_v55 }
 0x710   :  { %11465 = vmatprep.subr.bf16.mxu0 %v12100_v25 }
 0x711   :  { %v4828_v23 = vsel %vm783_vm4, %v4826_v35, %v4827_v24  ;;  %v6055_v35 = vlaneseq  ;;  %v12290_v24 = vmov 1966171168  }
 0x713   :  { %11466 = vmatpush3.bf16.msra.mxu0 %v12100_v25  ;;  %vm15129_vm8 = vcmp.lt.s32.totalorder %v6055_v35, 64  ;;  %vm6079_vm9 = vcmp.ge.s32.totalorder %v6055_v35, 64  ;;  %vm6080_vm10 = vcmp.lt.s32.totalorder %v6055_v35, 128 }
 0x714   :  { %11487 = vmatprep.subr.bf16.mxu0 %v12101_v11  ;;  %vm15361_vm11 = vmand %vm6079_vm9, %vm6080_vm10 }
 0x716   :  { %11448 = vmatmul.mubr.msk.bf16.gmra.mrb[156].mxu0 %vm4522_vm6, %v14738_v39 }
 0x717   :  { %11451 = vmatprep.mubr.msk.bf16.mxu0 %vm4522_vm6, %v14762_v16 }
 0x71e   :  { %11452 = vmatmul.mubr.msk.bf16.gmra.mrb[160].mxu0 %vm4522_vm6, %v14758_v47 }
 0x71f   :  { %11455 = vmatprep.mubr.msk.bf16.mxu0 %vm4522_vm6, %v14791_v9 }
 0x726   :  { %11456 = vmatmul.mubr.msk.bf16.gmra.mrb[164].mxu0 %vm4522_vm6, %v14787_v19 }
 0x727   :  { %11459 = vmatprep.mubr.msk.bf16.mxu0 %vm4522_vm6, %v14813_v10 }
 0x72e   :  { %11460 = vmatmul.mubr.msk.bf16.gmra.mrb[168].mxu0 %vm4522_vm6, %v14809_v5 }
 0x72f   :  { %11467 = vmatprep.mubr.msk.bf16.mxu0 %vm4522_vm6, %v4828_v23 }
 0x736   :  { %11468 = vmatmul.mubr.msk.bf16.vlgmr.msra.gmra.mrb[152].mxu0 %vm4522_vm6, %v14895_v54 }
 0x737   :  { %11488 = vmatpush3.bf16.msra.mxu0 %v12101_v11  ;;  %11471 = vmatprep.mubr.msk.bf16.mxu0 %vm4522_vm6, %v14900_v15 }
 0x738   :  { %11489 = vmatprep.subr.bf16.mxu0 %v12102_v14 }
 0x73b   :  { %11490 = vmatpush3.bf16.msra.mxu0 %v12102_v14 }
 0x73c   :  { %11511 = vmatprep.subr.bf16.mxu0 %v12103_v40 }
 0x73e   :  { %11472 = vmatmul.mubr.msk.bf16.gmra.mrb[156].mxu0 %vm4522_vm6, %v14910_v48 }
 0x73f   :  { %11475 = vmatprep.mubr.msk.bf16.mxu0 %vm4522_vm6, %v14915_v30 }
 0x746   :  { %11476 = vmatmul.mubr.msk.bf16.gmra.mrb[160].mxu0 %vm4522_vm6, %v14922_v13 }
 0x747   :  { %11479 = vmatprep.mubr.msk.bf16.mxu0 %vm4522_vm6, %v14927_v36 }
 0x74e   :  { %11480 = vmatmul.mubr.msk.bf16.gmra.mrb[164].mxu0 %vm4522_vm6, %v14936_v57 }
 0x74f   :  { %11483 = vmatprep.mubr.msk.bf16.mxu0 %vm4522_vm6, %v14942_v52 }
 0x756   :  { %11484 = vmatmul.mubr.msk.bf16.gmra.mrb[168].mxu0 %vm4522_vm6, %v4846_v49 }
 0x757   :  { %11491 = vmatprep.mubr.msk.bf16.mxu0 %vm4522_vm6, %v14727_v62  ;;  %v12106_v62 = vld [vmem:[%s15688_s5 + $0x58] sm:$0xff]  }
 0x75e   :  { %11492 = vmatmul.mubr.msk.bf16.vlgmr.msra.gmra.mrb[152].mxu0 %vm4522_vm6, %v14740_v21 }
 0x75f   :  { %11512 = vmatpush3.bf16.msra.mxu0 %v12103_v40  ;;  %11495 = vmatprep.mubr.msk.bf16.mxu0 %vm4522_vm6, %v14738_v39 }
 0x760   :  { %11513 = vmatprep.subr.bf16.mxu0 %v12104_v43 }
 0x763   :  { %11514 = vmatpush3.bf16.msra.mxu0 %v12104_v43 }
 0x764   :  { %11535 = vmatprep.subr.bf16.mxu0 %v12105_v53 }
 0x766   :  { %11496 = vmatmul.mubr.msk.bf16.gmra.mrb[156].mxu0 %vm4522_vm6, %v14762_v16 }
 0x767   :  { %11499 = vmatprep.mubr.msk.bf16.mxu0 %vm4522_vm6, %v14758_v47 }
 0x76e   :  { %11500 = vmatmul.mubr.msk.bf16.gmra.mrb[160].mxu0 %vm4522_vm6, %v14791_v9 }
 0x76f   :  { %11503 = vmatprep.mubr.msk.bf16.mxu0 %vm4522_vm6, %v14787_v19 }
 0x776   :  { %11504 = vmatmul.mubr.msk.bf16.gmra.mrb[164].mxu0 %vm4522_vm6, %v14813_v10 }
 0x777   :  { %11507 = vmatprep.mubr.msk.bf16.mxu0 %vm4522_vm6, %v14809_v5 }
 0x77e   :  { %11508 = vmatmul.mubr.msk.bf16.gmra.mrb[168].mxu0 %vm4522_vm6, %v14841_v44 }
 0x77f   :  { %11515 = vmatprep.mubr.msk.bf16.mxu0 %vm4522_vm6, %v14756_v56  ;;  %v5180_v56 = vshll.u32 %v14841_v44, 16 }
 0x781   :  { %v5182_v33 = vrot.slane %v5180_v56, 1 }
 0x783   :  { %v5183_v26 = vsel %vm190_vm2, %v14853_v61, %v5182_v33  ;;  %v5186_v60 = vor.u32 %v5184_v50, %v5182_v33  ;;  %v12110_v61 = vld [vmem:[%s15688_s5 + $0x78] sm:$0xff]  }
 0x785   :  { %v5191_v31 = vsel %vm190_vm2, %v5186_v60, %v5190_v12 }
 0x786   :  { %11516 = vmatmul.mubr.msk.bf16.vlgmr.msra.gmra.mrb[152].mxu0 %vm4522_vm6, %v14766_v42 }
 0x787   :  { %11536 = vmatpush3.bf16.msra.mxu0 %v12105_v53  ;;  %11519 = vmatprep.mubr.msk.bf16.mxu0 %vm4522_vm6, %v14785_v63 }
 0x788   :  { %11537 = vmatprep.subr.bf16.mxu0 %v12106_v62 }
 0x78b   :  { %11538 = vmatpush3.bf16.msra.mxu0 %v12106_v62 }
 0x78c   :  { %11559 = vmatprep.subr.bf16.mxu0 %v12107_v59 }
 0x78e   :  { %11520 = vmatmul.mubr.msk.bf16.gmra.mrb[156].mxu0 %vm4522_vm6, %v14794_v38 }
 0x78f   :  { %11523 = vmatprep.mubr.msk.bf16.mxu0 %vm4522_vm6, %v14807_v27 }
 0x796   :  { %11524 = vmatmul.mubr.msk.bf16.gmra.mrb[160].mxu0 %vm4522_vm6, %v14816_v8 }
 0x797   :  { %11527 = vmatprep.mubr.msk.bf16.mxu0 %vm4522_vm6, %v14833_v28 }
 0x79e   :  { %11528 = vmatmul.mubr.msk.bf16.gmra.mrb[164].mxu0 %vm4522_vm6, %v14844_v0 }
 0x79f   :  { %11531 = vmatprep.mubr.msk.bf16.mxu0 %vm4522_vm6, %v5183_v26 }
 0x7a6   :  { %11532 = vmatmul.mubr.msk.bf16.gmra.mrb[168].mxu0 %vm4522_vm6, %v5191_v31 }
 0x7a7   :  { %11539 = vmatprep.mubr.msk.bf16.mxu0 %vm4522_vm6, %v14895_v54 }
 0x7ae   :  { %11540 = vmatmul.mubr.msk.bf16.vlgmr.msra.gmra.mrb[152].mxu0 %vm4522_vm6, %v14900_v15 }
 0x7af   :  { %11560 = vmatpush3.bf16.msra.mxu0 %v12107_v59  ;;  %11543 = vmatprep.mubr.msk.bf16.mxu0 %vm4522_vm6, %v14910_v48 }
 0x7b0   :  { %11561 = vmatprep.subr.bf16.mxu0 %v12108_v17 }
 0x7b3   :  { %11562 = vmatpush3.bf16.msra.mxu0 %v12108_v17 }
 0x7b4   :  { %11583 = vmatprep.subr.bf16.mxu0 %v12109_v2 }
 0x7b6   :  { %11544 = vmatmul.mubr.msk.bf16.gmra.mrb[156].mxu0 %vm4522_vm6, %v14915_v30 }
 0x7b7   :  { %11547 = vmatprep.mubr.msk.bf16.mxu0 %vm4522_vm6, %v14922_v13 }
 0x7be   :  { %11548 = vmatmul.mubr.msk.bf16.gmra.mrb[160].mxu0 %vm4522_vm6, %v14927_v36 }
 0x7bf   :  { %11551 = vmatprep.mubr.msk.bf16.mxu0 %vm4522_vm6, %v14936_v57 }
 0x7c6   :  { %11552 = vmatmul.mubr.msk.bf16.gmra.mrb[164].mxu0 %vm4522_vm6, %v14942_v52 }
 0x7c7   :  { %11555 = vmatprep.mubr.msk.bf16.mxu0 %vm4522_vm6, %v5350_v32 }
 0x7ce   :  { %11556 = vmatmul.mubr.msk.bf16.gmra.mrb[168].mxu0 %vm4522_vm6, %v5352_v46 }
 0x7cf   :  { %11563 = vmatprep.mubr.msk.bf16.mxu0 %vm4522_vm6, %v14740_v21  ;;  %v4406_v21 = vmax.f32 %v14851_v4, 0.0 }
 0x7d6   :  { %11564 = vmatmul.mubr.msk.bf16.vlgmr.msra.gmra.mrb[152].mxu0 %vm4522_vm6, %v14738_v39  ;;  %v12112_v39 = vld [vmem:[%s15688_s5 + $0x88] sm:$0xff]  }
 0x7d7   :  { %11584 = vmatpush3.bf16.msra.mxu0 %v12109_v2  ;;  %11567 = vmatprep.mubr.msk.bf16.mxu0 %vm4522_vm6, %v14762_v16  ;;  %v5657_v16 = vpack.c.bf16 %v4406_v21, %v4406_v21 }
 0x7d8   :  { %11585 = vmatprep.subr.bf16.mxu0 %v12110_v61 }
 0x7db   :  { %11586 = vmatpush3.bf16.msra.mxu0 %v12110_v61 }
 0x7dc   :  { %11607 = vmatprep.subr.bf16.mxu0 %v12111_v37 }
 0x7de   :  { %11568 = vmatmul.mubr.msk.bf16.gmra.mrb[156].mxu0 %vm4522_vm6, %v14758_v47  ;;  %v5662_v47 = vshll.u32 %v14836_v45, 16 }
 0x7df   :  { %11571 = vmatprep.mubr.msk.bf16.mxu0 %vm4522_vm6, %v14791_v9  ;;  %v5666_v9 = vshrl.u32 %v14836_v45, 16 }
 0x7e6   :  { %11572 = vmatmul.mubr.msk.bf16.gmra.mrb[160].mxu0 %vm4522_vm6, %v14787_v19 }
 0x7e7   :  { %11575 = vmatprep.mubr.msk.bf16.mxu0 %vm4522_vm6, %v14813_v10  ;;  %v5831_v10 = vrot.slane %v14836_v45, 1 }
 0x7ee   :  { %11576 = vmatmul.mubr.msk.bf16.gmra.mrb[164].mxu0 %vm4522_vm6, %v14809_v5 }
 0x7ef   :  { %11579 = vmatprep.mubr.msk.bf16.mxu0 %vm4522_vm6, %v14841_v44 }
 0x7f6   :  { %11580 = vmatmul.mubr.msk.bf16.gmra.mrb[168].mxu0 %vm4522_vm6, %v14836_v45  ;;  %v6070_v45 = vunpack.c.l.s4 %v12290_v24 }
 0x7f7   :  { %11587 = vmatprep.mubr.msk.bf16.mxu0 %vm4522_vm6, %v14766_v42  ;;  %v5664_v42 = vrot.slane %v5662_v47, 1 }
 0x7f8   :  { %v6071_v58 = vunpack.c.0.s8 %v6070_v45 }
 0x7f9   :  { %v5665_v19 = vsel %vm190_vm2, %v5186_v60, %v5664_v42 }
 0x7fe   :  { %11588 = vmatmul.mubr.msk.bf16.vlgmr.msra.gmra.mrb[152].mxu0 %vm4522_vm6, %v14785_v63  ;;  %v5670_v63 = vshll.u32 %v5657_v16, 16 }
 0x7ff   :  { %11608 = vmatpush3.bf16.msra.mxu0 %v12111_v37  ;;  %11591 = vmatprep.mubr.msk.bf16.mxu0 %vm4522_vm6, %v14794_v38 }
 0x800   :  { %11609 = vmatprep.subr.bf16.mxu0 %v12112_v39  ;;  %v5672_v38 = vrot.slane %v5670_v63, 1 }
 0x803   :  { %11610 = vmatpush3.bf16.msra.mxu0 %v12112_v39 }
 0x806   :  { %11592 = vmatmul.mubr.msk.bf16.gmra.mrb[156].mxu0 %vm4522_vm6, %v14807_v27  ;;  %v5668_v27 = vor.u32 %v5666_v9, %v5664_v42 }
 0x807   :  { %11595 = vmatprep.mubr.msk.bf16.mxu0 %vm4522_vm6, %v14816_v8  ;;  %v5832_v8 = vsel %vm783_vm4, %v5349_v51, %v5831_v10 }
 0x808   :  { %v5673_v5 = vsel %vm190_vm2, %v5668_v27, %v5672_v38 }
 0x80e   :  { %11596 = vmatmul.mubr.msk.bf16.gmra.mrb[160].mxu0 %vm4522_vm6, %v14833_v28  ;;  %v5833_v28 = vrot.slane %v5657_v16, 1 }
 0x80f   :  { %11599 = vmatprep.mubr.msk.bf16.mxu0 %vm4522_vm6, %v14844_v0  ;;  %v15106_v0 = vld [vmem:[#allocation11] ss:$0 sm:$0xff] }
 0x810   :  { %v5834_v44 = vsel %vm783_vm4, %v5831_v10, %v5833_v28 }
 0x816   :  { %11600 = vmatmul.mubr.msk.bf16.gmra.mrb[164].mxu0 %vm4522_vm6, %v5183_v26 }
 0x817   :  { %11603 = vmatprep.mubr.msk.bf16.mxu0 %vm4522_vm6, %v5665_v19 }
 0x81e   :  { %11604 = vmatmul.mubr.msk.bf16.gmra.mrb[168].mxu0 %vm4522_vm6, %v5673_v5 }
 0x81f   :  { %11611 = vmatprep.mubr.msk.bf16.mxu0 %vm4522_vm6, %v14900_v15 }
 0x826   :  { %11612 = vmatmul.mubr.msk.bf16.vlgmr.msra.gmra.mrb[152].mxu0 %vm4522_vm6, %v14910_v48  ;;  %v15114_v48 = vshrl.u32 %v6055_v35, 7 }
 0x827   :  { %11615 = vmatprep.mubr.msk.bf16.mxu0 %vm4522_vm6, %v14915_v30 }
 0x82e   :  { %11616 = vmatmul.mubr.msk.bf16.gmra.mrb[156].mxu0 %vm4522_vm6, %v14922_v13 }
 0x82f   :  { %11619 = vmatprep.mubr.msk.bf16.mxu0 %vm4522_vm6, %v14927_v36  ;;  %v15121_v36 = vsub.s32 %v6071_v58, %v15114_v48 }
 0x836   :  { %11620 = vmatmul.mubr.msk.bf16.gmra.mrb[160].mxu0 %vm4522_vm6, %v14936_v57 }
 0x837   :  { %11623 = vmatprep.mubr.msk.bf16.mxu0 %vm4522_vm6, %v14942_v52 }
 0x83e   :  { %11624 = vmatmul.mubr.msk.bf16.gmra.mrb[164].mxu0 %vm4522_vm6, %v5350_v32 }
 0x83f   :  { %11627 = vmatprep.mubr.msk.bf16.mxu0 %vm4522_vm6, %v5832_v8 }
 0x846   :  { %11628 = vmatmul.mubr.msk.bf16.gmra.mrb[168].mxu0 %vm4522_vm6, %v5834_v44 }
 0x8f9   :  { %v11613_v4 = vpop.f32.mrb[152].mxu0 }
 0x8fa   :  { %v5995_v25 = vadd.f32 %v11613_v4, %v15106_v0  ;;  %v5887_v11 = vpop.f32.mrb[153].mxu0 }
 0x8fb   :  { %v5993_v23 = vadd.f32 %v15106_v0, %v5887_v11  ;;  %v11614_v41 = vpop.f32.mrb[154].mxu0 }
 0x8fc   :  { %v6015_v55 = vmax.f32 %v5995_v25, 0.0  ;;  %v5996_v14 = vadd.f32 %v11614_v41, %v15106_v0  ;;  %v5890_v54 = vpop.f32.mrb[155].mxu0 }
 0x8fd   :  { %v6013_v15 = vmax.f32 %v5993_v23, 0.0  ;;  %v5994_v40 = vadd.f32 %v15106_v0, %v5890_v54 }
 0x8fe   :  { %6036 = vst.msk [vmem:[#allocation2 + $0x10] sm:$0xff] %vm6033_vm7, %v6015_v55  ;;  %v6016_v1 = vmax.f32 %v5996_v14, 0.0 }
 0x8ff   :  { %6034 = vst.msk [vmem:[#allocation2] sm:$0xff] %vm6033_vm7, %v6013_v15  ;;  %v6014_v30 = vmax.f32 %v5994_v40, 0.0 }
 0x900   :  { %6037 = vst.msk [vmem:[#allocation2 + $0x18] sm:$0xff] %vm6033_vm7, %v6016_v1 }
 0x901   :  { %6035 = vst.msk [vmem:[#allocation2 + $0x8] sm:$0xff] %vm6033_vm7, %v6014_v30  ;;  %v11617_v20 = vpop.f32.mrb[156].mxu0 }
 0x902   :  { %v5999_v3 = vadd.f32 %v11617_v20, %v15106_v0  ;;  %v5903_v13 = vpop.f32.mrb[157].mxu0 }
 0x903   :  { %v5997_v18 = vadd.f32 %v15106_v0, %v5903_v13  ;;  %v11618_v22 = vpop.f32.mrb[158].mxu0 }
 0x904   :  { %v6019_v57 = vmax.f32 %v5999_v3, 0.0  ;;  %v6000_v52 = vadd.f32 %v11618_v22, %v15106_v0  ;;  %v5906_v29 = vpop.f32.mrb[159].mxu0 }
 0x905   :  { %v6017_v49 = vmax.f32 %v5997_v18, 0.0  ;;  %v5998_v43 = vadd.f32 %v15106_v0, %v5906_v29  ;;  %v10027_v53 = vld.sshfl [vmem:[#allocation2 + $0x13] sm:$0x1 pattern:$0x75316420] }
 0x906   :  { %6040 = vst.msk [vmem:[#allocation2 + $0x30] sm:$0xff] %vm6033_vm7, %v6019_v57  ;;  %v6020_v62 = vmax.f32 %v6000_v52, 0.0  ;;  %v6210_v59 = vrot.slane %v10027_v53, %v15121_v36  ;;  %v10026_v56 = vld.sshfl [vmem:[#allocation2 + $0x11] sm:$0x1 pattern:$0x75316420] }
 0x907   :  { %6038 = vst.msk [vmem:[#allocation2 + $0x20] sm:$0xff] %vm6033_vm7, %v6017_v49  ;;  %v6018_v34 = vmax.f32 %v5998_v43, 0.0  ;;  %v6188_v26 = vrot.slane %v10026_v56, %v15121_v36  ;;  %v10029_v7 = vld.sshfl [vmem:[#allocation2 + $0x17] sm:$0x1 pattern:$0x75316420] }
 0x908   :  { %6041 = vst.msk [vmem:[#allocation2 + $0x38] sm:$0xff] %vm6033_vm7, %v6020_v62  ;;  %6211 = vrot.lane.b32.xlu0 %v6210_v59, %s12284_s22  ;;  %v10028_v50 = vld.sshfl [vmem:[#allocation2 + $0x15] sm:$0x1 pattern:$0x75316420]  ;;  %v6254_v2 = vrot.slane %v10029_v7, %v15121_v36 }
 0x909   :  { %v6193_v60 = vld [vmem:[#allocation2 + $0x12] sm:$0x1]  ;;  %6039 = vst.msk [vmem:[#allocation2 + $0x28] sm:$0xff] %vm6033_vm7, %v6018_v34  ;;  %6189 = vrot.lane.b32.xlu1 %v6188_v26, %s12284_s22  ;;  %v11621_v12 = vpop.f32.mrb[160].mxu0  ;;  %v6232_v6 = vrot.slane %v10028_v50, %v15121_v36  ;;  %v6171_v5 = vld [vmem:[#allocation2 + $0x10] sm:$0x1] }
 0x90a   :  { %6194 = vst.msk [vmem:[#allocation3 + $0x6] sm:$0x1] %vm15129_vm8, %v6193_v60  ;;  %v6003_v31 = vadd.f32 %v11621_v12, %v15106_v0  ;;  %v5919_v17 = vpop.f32.mrb[161].mxu0  ;;  %6172 = vst.msk [vmem:[#allocation3 + $0x5] sm:$0x1] %vm15129_vm8, %v6171_v5 }
 0x90b   :  { %v6001_v51 = vadd.f32 %v15106_v0, %v5919_v17  ;;  %v11622_v32 = vpop.f32.mrb[162].mxu0  ;;  %v10021_v46 = vld.sshfl [vmem:[#allocation2 + $0x1] sm:$0x1 pattern:$0x75316420] }
 0x90c   :  { %v6023_v61 = vmax.f32 %v6003_v31, 0.0  ;;  %v6004_v37 = vadd.f32 %v11622_v32, %v15106_v0  ;;  %6255 = vrot.lane.b32.xlu0 %v6254_v2, %s12284_s22  ;;  %v5922_v39 = vpop.f32.mrb[163].mxu0  ;;  %v10023_v21 = vld.sshfl [vmem:[#allocation2 + $0x5] sm:$0x1 pattern:$0x75316420]  ;;  %v6075_v63 = vrot.slane %v10021_v46, %v15121_v36 }
 0x90d   :  { %v6021_v47 = vmax.f32 %v6001_v51, 0.0  ;;  %6233 = vrot.lane.b32.xlu1 %v6232_v6, %s12284_s22  ;;  %v6002_v16 = vadd.f32 %v15106_v0, %v5922_v39  ;;  %v6122_v9 = vrot.slane %v10023_v21, %v15121_v36  ;;  %v10022_v38 = vld.sshfl [vmem:[#allocation2 + $0x3] sm:$0x1 pattern:$0x75316420] }
 0x90e   :  { %6044 = vst.msk [vmem:[#allocation2 + $0x50] sm:$0xff] %vm6033_vm7, %v6023_v61  ;;  %v6024_v42 = vmax.f32 %v6004_v37, 0.0  ;;  %v10024_v27 = vld.sshfl [vmem:[#allocation2 + $0x7] sm:$0x1 pattern:$0x75316420]  ;;  %v6100_v44 = vrot.slane %v10022_v38, %v15121_v36 }
 0x90f   :  { %6042 = vst.msk [vmem:[#allocation2 + $0x40] sm:$0xff] %vm6033_vm7, %v6021_v47  ;;  %v6022_v19 = vmax.f32 %v6002_v16, 0.0  ;;  %v6144_v11 = vrot.slane %v10024_v27, %v15121_v36  ;;  %v10025_v24 = vld.sshfl [vmem:[#allocation2 + $0x9] sm:$0x1 pattern:$0x75316420] }
 0x910   :  { %6045 = vst.msk [vmem:[#allocation2 + $0x58] sm:$0xff] %vm6033_vm7, %v6024_v42  ;;  %6076 = vrot.lane.b32.xlu0 %v6075_v63, %s12284_s22  ;;  %v10030_v55 = vld.sshfl [vmem:[#allocation2 + $0x19] sm:$0x1 pattern:$0x75316420]  ;;  %v6166_v40 = vrot.slane %v10025_v24, %v15121_v36 }
 0x911   :  { %6043 = vst.msk [vmem:[#allocation2 + $0x48] sm:$0xff] %vm6033_vm7, %v6022_v19  ;;  %6123 = vrot.lane.b32.xlu1 %v6122_v9, %s12284_s22  ;;  %v11625_v10 = vpop.f32.mrb[164].mxu0  ;;  %v6276_v58 = vrot.slane %v10030_v55, %v15121_v36  ;;  %v10037_v30 = vld.sshfl [vmem:[#allocation2 + $0x33] sm:$0x1 pattern:$0x75316420] }
 0x912   :  { %v6007_v8 = vadd.f32 %v11625_v10, %v15106_v0  ;;  %v5935_v28 = vpop.f32.mrb[165].mxu0  ;;  %v10036_v20 = vld.sshfl [vmem:[#allocation2 + $0x31] sm:$0x1 pattern:$0x75316420]  ;;  %v6430_v57 = vrot.slane %v10037_v30, %v15121_v36 }
 0x913   :  { %v6005_v4 = vadd.f32 %v15106_v0, %v5935_v28  ;;  %v11626_v25 = vpop.f32.mrb[166].mxu0  ;;  %v6237_v3 = vld [vmem:[#allocation2 + $0x16] sm:$0x1]  ;;  %v6408_v49 = vrot.slane %v10036_v20, %v15121_v36  ;;  %v6215_v2 = vld [vmem:[#allocation2 + $0x14] sm:$0x1] }
 0x914   :  { %v6027_v45 = vmax.f32 %v6007_v8, 0.0  ;;  %v6008_v23 = vadd.f32 %v11626_v25, %v15106_v0  ;;  %6101 = vrot.lane.b32.xlu0 %v6100_v44, %s12284_s22  ;;  %v5938_v41 = vpop.f32.mrb[167].mxu0  ;;  %6238 = vst.msk [vmem:[#allocation3 + $0x8] sm:$0x1] %vm15129_vm8, %v6237_v3  ;;  %6216 = vst.msk [vmem:[#allocation3 + $0x7] sm:$0x1] %vm15129_vm8, %v6215_v2 }
 0x915   :  { %v6025_v14 = vmax.f32 %v6005_v4, 0.0  ;;  %6145 = vrot.lane.b32.xlu1 %v6144_v11, %s12284_s22  ;;  %v6006_v54 = vadd.f32 %v15106_v0, %v5938_v41  ;;  %v10039_v43 = vld.sshfl [vmem:[#allocation2 + $0x37] sm:$0x1 pattern:$0x75316420] }
 0x916   :  { %6048 = vst.msk [vmem:[#allocation2 + $0x70] sm:$0xff] %vm6033_vm7, %v6027_v45  ;;  %v6028_v15 = vmax.f32 %v6008_v23, 0.0  ;;  %v10038_v56 = vld.sshfl [vmem:[#allocation2 + $0x35] sm:$0x1 pattern:$0x75316420]  ;;  %v6474_v50 = vrot.slane %v10039_v43, %v15121_v36 }
 0x917   :  { %6046 = vst.msk [vmem:[#allocation2 + $0x60] sm:$0xff] %vm6033_vm7, %v6025_v14  ;;  %v6026_v1 = vmax.f32 %v6006_v54, 0.0  ;;  %v6452_v12 = vrot.slane %v10038_v56, %v15121_v36  ;;  %v10031_v31 = vld.sshfl [vmem:[#allocation2 + $0x21] sm:$0x1 pattern:$0x75316420] }
 0x918   :  { %6049 = vst.msk [vmem:[#allocation2 + $0x78] sm:$0xff] %vm6033_vm7, %v6028_v15  ;;  %6167 = vrot.lane.b32.xlu0 %v6166_v40, %s12284_s22  ;;  %v10032_v17 = vld.sshfl [vmem:[#allocation2 + $0x23] sm:$0x1 pattern:$0x75316420]  ;;  %v6298_v51 = vrot.slane %v10031_v31, %v15121_v36 }
 0x919   :  { %6047 = vst.msk [vmem:[#allocation2 + $0x68] sm:$0xff] %vm6033_vm7, %v6026_v1  ;;  %6277 = vrot.lane.b32.xlu1 %v6276_v58, %s12284_s22  ;;  %v11629_v13 = vpop.f32.mrb[168].mxu0  ;;  %v6054_v32 = vld [vmem:[#allocation2] sm:$0x1]  ;;  %v6320_v6 = vrot.slane %v10032_v17, %v15121_v36  ;;  %v6127_v61 = vld [vmem:[#allocation2 + $0x6] sm:$0x1] }
 0x91a   :  { %v6011_v18 = vadd.f32 %v11629_v13, %v15106_v0  ;;  %v5951_v22 = vpop.f32.mrb[169].mxu0  ;;  %v10033_v46 = vld.sshfl [vmem:[#allocation2 + $0x25] sm:$0x1 pattern:$0x75316420] }
 0x91b   :  { %v6009_v52 = vadd.f32 %v15106_v0, %v5951_v22  ;;  %v11630_v29 = vpop.f32.mrb[170].mxu0  ;;  %6059 = vst.msk [vmem:[#allocation3] sm:$0x1] %vm15129_vm8, %v6054_v32  ;;  %6128 = vst.msk [vmem:[#allocation3 + $0x3] sm:$0x1] %vm15129_vm8, %v6127_v61  ;;  %v6342_v47 = vrot.slane %v10033_v46, %v15121_v36 }
 0x91c   :  { %v6031_v53 = vmax.f32 %v6011_v18, 0.0  ;;  %v6012_v62 = vadd.f32 %v11630_v29, %v15106_v0  ;;  %6431 = vrot.lane.b32.xlu0 %v6430_v57, %s12284_s22  ;;  %v5954_v59 = vpop.f32.mrb[171].mxu0  ;;  %v10034_v37 = vld.sshfl [vmem:[#allocation2 + $0x27] sm:$0x1 pattern:$0x75316420] }
 0x91d   :  { %v6029_v34 = vmax.f32 %v6009_v52, 0.0  ;;  %6409 = vrot.lane.b32.xlu1 %v6408_v49, %s12284_s22  ;;  %v6010_v26 = vadd.f32 %v15106_v0, %v5954_v59  ;;  %v6105_v0 = vld [vmem:[#allocation2 + $0x4] sm:$0x1]  ;;  %v6083_v39 = vld [vmem:[#allocation2 + $0x2] sm:$0x1]  ;;  %v6364_v42 = vrot.slane %v10034_v37, %v15121_v36 }
 0x91e   :  { %6052 = vst.msk [vmem:[#allocation2 + $0x90] sm:$0xff] %vm6033_vm7, %v6031_v53  ;;  %v6032_v7 = vmax.f32 %v6012_v62, 0.0  ;;  %v6259_v21 = vld [vmem:[#allocation2 + $0x18] sm:$0x1]  ;;  %v6149_v16 = vld [vmem:[#allocation2 + $0x8] sm:$0x1] }
 0x91f   :  { %6050 = vst.msk [vmem:[#allocation2 + $0x80] sm:$0xff] %vm6033_vm7, %v6029_v34  ;;  %v6030_v60 = vmax.f32 %v6010_v26, 0.0  ;;  %v10035_v63 = vld.sshfl [vmem:[#allocation2 + $0x29] sm:$0x1 pattern:$0x75316420] }
 0x920   :  { %6053 = vst.msk [vmem:[#allocation2 + $0x98] sm:$0xff] %vm6033_vm7, %v6032_v7  ;;  %6475 = vrot.lane.b32.xlu0 %v6474_v50, %s12284_s22  ;;  %v6413_v19 = vld [vmem:[#allocation2 + $0x32] sm:$0x1]  ;;  %v6391_v38 = vld [vmem:[#allocation2 + $0x30] sm:$0x1]  ;;  %v6386_v5 = vrot.slane %v10035_v63, %v15121_v36 }
 0x921   :  { %6051 = vst.msk [vmem:[#allocation2 + $0x88] sm:$0xff] %vm6033_vm7, %v6030_v60  ;;  %6453 = vrot.lane.b32.xlu1 %v6452_v12, %s12284_s22  ;;  %v10040_v9 = vld.sshfl [vmem:[#allocation2 + $0x39] sm:$0x1 pattern:$0x75316420] }
 0x922   :  { %6106 = vst.msk [vmem:[#allocation3 + $0x2] sm:$0x1] %vm15129_vm8, %v6105_v0  ;;  %6084 = vst.msk [vmem:[#allocation3 + $0x1] sm:$0x1] %vm15129_vm8, %v6083_v39  ;;  %v6457_v27 = vld [vmem:[#allocation2 + $0x36] sm:$0x1]  ;;  %v6496_v8 = vrot.slane %v10040_v9, %v15121_v36 }
 0x923   :  { %6260 = vst.msk [vmem:[#allocation3 + $0x9] sm:$0x1] %vm15129_vm8, %v6259_v21  ;;  %6150 = vst.msk [vmem:[#allocation3 + $0x4] sm:$0x1] %vm15129_vm8, %v6149_v16  ;;  %v6435_v10 = vld [vmem:[#allocation2 + $0x34] sm:$0x1] }
 0x924   :  { %6299 = vrot.lane.b32.xlu0 %v6298_v51, %s12284_s22  ;;  %6414 = vst.msk [vmem:[#allocation3 + $0x10] sm:$0x1] %vm15129_vm8, %v6413_v19  ;;  %6392 = vst.msk [vmem:[#allocation3 + $0xf] sm:$0x1] %vm15129_vm8, %v6391_v38  ;;  %v6303_v44 = vld [vmem:[#allocation2 + $0x22] sm:$0x1] }
 0x925   :  { %6321 = vrot.lane.b32.xlu1 %v6320_v6, %s12284_s22  ;;  %6458 = vst.msk [vmem:[#allocation3 + $0x12] sm:$0x1] %vm15129_vm8, %v6457_v27  ;;  %v10047_v28 = vld.sshfl [vmem:[#allocation2 + $0x53] sm:$0x1 pattern:$0x75316420] }
 0x926   :  { %6436 = vst.msk [vmem:[#allocation3 + $0x11] sm:$0x1] %vm15129_vm8, %v6435_v10  ;;  %v10046_v4 = vld.sshfl [vmem:[#allocation2 + $0x51] sm:$0x1 pattern:$0x75316420]  ;;  %v6650_v24 = vrot.slane %v10047_v28, %v15121_v36 }
 0x927   :  { %6304 = vst.msk [vmem:[#allocation3 + $0xb] sm:$0x1] %vm15129_vm8, %v6303_v44  ;;  %v6281_v25 = vld [vmem:[#allocation2 + $0x20] sm:$0x1]  ;;  %v6347_v11 = vld [vmem:[#allocation2 + $0x26] sm:$0x1]  ;;  %v6628_v23 = vrot.slane %v10046_v4, %v15121_v36 }
 0x928   :  { %6343 = vrot.lane.b32.xlu0 %v6342_v47, %s12284_s22  ;;  %6282 = vst.msk [vmem:[#allocation3 + $0xa] sm:$0x1] %vm15129_vm8, %v6281_v25  ;;  %6348 = vst.msk [vmem:[#allocation3 + $0xd] sm:$0x1] %vm15129_vm8, %v6347_v11  ;;  %v6325_v45 = vld [vmem:[#allocation2 + $0x24] sm:$0x1] }
 0x929   :  { %6365 = vrot.lane.b32.xlu1 %v6364_v42, %s12284_s22  ;;  %v10049_v41 = vld.sshfl [vmem:[#allocation2 + $0x57] sm:$0x1 pattern:$0x75316420]  ;;  %6326 = vst.msk [vmem:[#allocation3 + $0xc] sm:$0x1] %vm15129_vm8, %v6325_v45 }
 0x92a   :  { %v6479_v55 = vld [vmem:[#allocation2 + $0x38] sm:$0x1]  ;;  %v10048_v14 = vld.sshfl [vmem:[#allocation2 + $0x55] sm:$0x1 pattern:$0x75316420]  ;;  %v6694_v40 = vrot.slane %v10049_v41, %v15121_v36 }
 0x92b   :  { %6480 = vst.msk [vmem:[#allocation3 + $0x13] sm:$0x1] %vm15129_vm8, %v6479_v55  ;;  %v6369_v54 = vld [vmem:[#allocation2 + $0x28] sm:$0x1]  ;;  %v6633_v15 = vld [vmem:[#allocation2 + $0x52] sm:$0x1]  ;;  %v6672_v58 = vrot.slane %v10048_v14, %v15121_v36 }
 0x92c   :  { %6387 = vrot.lane.b32.xlu0 %v6386_v5, %s12284_s22  ;;  %6370 = vst.msk [vmem:[#allocation3 + $0xe] sm:$0x1] %vm15129_vm8, %v6369_v54  ;;  %6634 = vst.msk [vmem:[#allocation3 + $0x1a] sm:$0x1] %vm15129_vm8, %v6633_v15  ;;  %v6611_v1 = vld [vmem:[#allocation2 + $0x50] sm:$0x1] }
 0x92d   :  { %6497 = vrot.lane.b32.xlu1 %v6496_v8, %s12284_s22  ;;  %v10041_v30 = vld.sshfl [vmem:[#allocation2 + $0x41] sm:$0x1 pattern:$0x75316420]  ;;  %6612 = vst.msk [vmem:[#allocation3 + $0x19] sm:$0x1] %vm15129_vm8, %v6611_v1 }
 0x92e   :  { %v6677_v20 = vld [vmem:[#allocation2 + $0x56] sm:$0x1]  ;;  %v10042_v3 = vld.sshfl [vmem:[#allocation2 + $0x43] sm:$0x1 pattern:$0x75316420]  ;;  %v6518_v22 = vrot.slane %v10041_v30, %v15121_v36 }
 0x92f   :  { %6678 = vst.msk [vmem:[#allocation3 + $0x1c] sm:$0x1] %vm15129_vm8, %v6677_v20  ;;  %v6655_v13 = vld [vmem:[#allocation2 + $0x54] sm:$0x1]  ;;  %v6523_v18 = vld [vmem:[#allocation2 + $0x42] sm:$0x1]  ;;  %v6540_v49 = vrot.slane %v10042_v3, %v15121_v36 }
 0x930   :  { %6651 = vrot.lane.b32.xlu0 %v6650_v24, %s12284_s22  ;;  %6656 = vst.msk [vmem:[#allocation3 + $0x1b] sm:$0x1] %vm15129_vm8, %v6655_v13  ;;  %v10044_v57 = vld.sshfl [vmem:[#allocation2 + $0x47] sm:$0x1 pattern:$0x75316420] }
 0x931   :  { %6629 = vrot.lane.b32.xlu1 %v6628_v23, %s12284_s22  ;;  %v10043_v52 = vld.sshfl [vmem:[#allocation2 + $0x45] sm:$0x1 pattern:$0x75316420]  ;;  %6524 = vst.msk [vmem:[#allocation3 + $0x15] sm:$0x1] %vm15129_vm8, %v6523_v18  ;;  %v6584_v51 = vrot.slane %v10044_v57, %v15121_v36 }
 0x932   :  { %v6501_v29 = vld [vmem:[#allocation2 + $0x40] sm:$0x1]  ;;  %v6567_v43 = vld [vmem:[#allocation2 + $0x46] sm:$0x1]  ;;  %v6545_v53 = vld [vmem:[#allocation2 + $0x44] sm:$0x1]  ;;  %v6562_v12 = vrot.slane %v10043_v52, %v15121_v36 }
 0x933   :  { %6502 = vst.msk [vmem:[#allocation3 + $0x14] sm:$0x1] %vm15129_vm8, %v6501_v29  ;;  %v6699_v62 = vld [vmem:[#allocation2 + $0x58] sm:$0x1]  ;;  %6568 = vst.msk [vmem:[#allocation3 + $0x17] sm:$0x1] %vm15129_vm8, %v6567_v43 }
 0x934   :  { %6695 = vrot.lane.b32.xlu0 %v6694_v40, %s12284_s22  ;;  %6546 = vst.msk [vmem:[#allocation3 + $0x16] sm:$0x1] %vm15129_vm8, %v6545_v53  ;;  %6700 = vst.msk [vmem:[#allocation3 + $0x1d] sm:$0x1] %vm15129_vm8, %v6699_v62  ;;  %v6589_v59 = vld [vmem:[#allocation2 + $0x48] sm:$0x1] }
 0x935   :  { %6673 = vrot.lane.b32.xlu1 %v6672_v58, %s12284_s22  ;;  %v6853_v56 = vld [vmem:[#allocation2 + $0x72] sm:$0x1]  ;;  %v6831_v34 = vld [vmem:[#allocation2 + $0x70] sm:$0x1]  ;;  %6590 = vst.msk [vmem:[#allocation3 + $0x18] sm:$0x1] %vm15129_vm8, %v6589_v59 }
 0x936   :  { %v10045_v26 = vld.sshfl [vmem:[#allocation2 + $0x49] sm:$0x1 pattern:$0x75316420]  ;;  %6854 = vst.msk [vmem:[#allocation3 + $0x24] sm:$0x1] %vm15129_vm8, %v6853_v56 }
 0x937   :  { %6832 = vst.msk [vmem:[#allocation3 + $0x23] sm:$0x1] %vm15129_vm8, %v6831_v34  ;;  %v6897_v7 = vld [vmem:[#allocation2 + $0x76] sm:$0x1]  ;;  %v6875_v50 = vld [vmem:[#allocation2 + $0x74] sm:$0x1]  ;;  %v6606_v42 = vrot.slane %v10045_v26, %v15121_v36 }
 0x938   :  { %6519 = vrot.lane.b32.xlu0 %v6518_v22, %s12284_s22  ;;  %v6743_v60 = vld [vmem:[#allocation2 + $0x62] sm:$0x1]  ;;  %v10050_v31 = vld.sshfl [vmem:[#allocation2 + $0x59] sm:$0x1 pattern:$0x75316420] }
 0x939   :  { %6541 = vrot.lane.b32.xlu1 %v6540_v49, %s12284_s22  ;;  %6898 = vst.msk [vmem:[#allocation3 + $0x26] sm:$0x1] %vm15129_vm8, %v6897_v7  ;;  %6876 = vst.msk [vmem:[#allocation3 + $0x25] sm:$0x1] %vm15129_vm8, %v6875_v50  ;;  %v6721_v17 = vld [vmem:[#allocation2 + $0x60] sm:$0x1]  ;;  %v6716_v38 = vrot.slane %v10050_v31, %v15121_v36 }
 0x93a   :  { %6744 = vst.msk [vmem:[#allocation3 + $0x1f] sm:$0x1] %vm15129_vm8, %v6743_v60  ;;  %v6787_v2 = vld [vmem:[#allocation2 + $0x66] sm:$0x1]  ;;  %v6765_v0 = vld [vmem:[#allocation2 + $0x64] sm:$0x1] }
 0x93b   :  { %6722 = vst.msk [vmem:[#allocation3 + $0x1e] sm:$0x1] %vm15129_vm8, %v6721_v17  ;;  %6788 = vst.msk [vmem:[#allocation3 + $0x21] sm:$0x1] %vm15129_vm8, %v6787_v2  ;;  %v6919_v32 = vld [vmem:[#allocation2 + $0x78] sm:$0x1] }
 0x93c   :  { %6766 = vst.msk [vmem:[#allocation3 + $0x20] sm:$0x1] %vm15129_vm8, %v6765_v0  ;;  %v6809_v6 = vld [vmem:[#allocation2 + $0x68] sm:$0x1]  ;;  %v7073_v46 = vld [vmem:[#allocation2 + $0x92] sm:$0x1]  ;;  %6563 = vrot.lane.b32.xlu0 %v6562_v12, %s12284_s22 }
 0x93d   :  { %6920 = vst.msk [vmem:[#allocation3 + $0x27] sm:$0x1] %vm15129_vm8, %v6919_v32  ;;  %6810 = vst.msk [vmem:[#allocation3 + $0x22] sm:$0x1] %vm15129_vm8, %v6809_v6  ;;  %v7051_v61 = vld [vmem:[#allocation2 + $0x90] sm:$0x1]  ;;  %6585 = vrot.lane.b32.xlu1 %v6584_v51, %s12284_s22 }
 0x93e   :  { %7074 = vst.msk [vmem:[#allocation3 + $0x2e] sm:$0x1] %vm15129_vm8, %v7073_v46  ;;  %v7095_v37 = vld [vmem:[#allocation2 + $0x94] sm:$0x1]  ;;  %v6941_v39 = vld [vmem:[#allocation2 + $0x80] sm:$0x1] }
 0x93f   :  { %7052 = vst.msk [vmem:[#allocation3 + $0x2d] sm:$0x1] %vm15129_vm8, %v7051_v61  ;;  %7096 = vst.msk [vmem:[#allocation3 + $0x2f] sm:$0x1] %vm15129_vm8, %v7095_v37  ;;  %v6963_v21 = vld [vmem:[#allocation2 + $0x82] sm:$0x1] }
 0x940   :  { %6942 = vst.msk [vmem:[#allocation3 + $0x28] sm:$0x1] %vm15129_vm8, %v6941_v39  ;;  %v6985_v47 = vld [vmem:[#allocation2 + $0x84] sm:$0x1]  ;;  %v7007_v16 = vld [vmem:[#allocation2 + $0x86] sm:$0x1]  ;;  %6607 = vrot.lane.b32.xlu0 %v6606_v42, %s12284_s22 }
 0x941   :  { %6964 = vst.msk [vmem:[#allocation3 + $0x29] sm:$0x1] %vm15129_vm8, %v6963_v21  ;;  %6986 = vst.msk [vmem:[#allocation3 + $0x2a] sm:$0x1] %vm15129_vm8, %v6985_v47  ;;  %v7029_v63 = vld [vmem:[#allocation2 + $0x88] sm:$0x1]  ;;  %6717 = vrot.lane.b32.xlu1 %v6716_v38, %s12284_s22 }
 0x942   :  { %7008 = vst.msk [vmem:[#allocation3 + $0x2b] sm:$0x1] %vm15129_vm8, %v7007_v16  ;;  %v7139_v19 = vld [vmem:[#allocation2 + $0x98] sm:$0x1]  ;;  %v7117_v9 = vld [vmem:[#allocation2 + $0x96] sm:$0x1] }
 0x943   :  { %v10057_v27 = vld.sshfl [vmem:[#allocation2 + $0x73] sm:$0x1 pattern:$0x75316420]  ;;  %7030 = vst.msk [vmem:[#allocation3 + $0x2c] sm:$0x1] %vm15129_vm8, %v7029_v63 }
 0x944   :  { %7140 = vst.msk [vmem:[#allocation3 + $0x31] sm:$0x1] %vm15129_vm8, %v7139_v19  ;;  %7118 = vst.msk [vmem:[#allocation3 + $0x30] sm:$0x1] %vm15129_vm8, %v7117_v9  ;;  %v6870_v10 = vrot.slane %v10057_v27, %v15121_v36 }
 0x945   :  { %v10056_v5 = vld.sshfl [vmem:[#allocation2 + $0x71] sm:$0x1 pattern:$0x75316420] }
 0x946   :  { %v6848_v8 = vrot.slane %v10056_v5, %v15121_v36  ;;  %v10059_v28 = vld.sshfl [vmem:[#allocation2 + $0x77] sm:$0x1 pattern:$0x75316420]  ;;  %6871 = vrot.lane.b32.xlu0 %v6870_v10, %s12284_s22 }
 0x947   :  { %v10058_v44 = vld.sshfl [vmem:[#allocation2 + $0x75] sm:$0x1 pattern:$0x75316420]  ;;  %v6914_v4 = vrot.slane %v10059_v28, %v15121_v36 }
 0x948   :  { %6849 = vrot.lane.b32.xlu1 %v6848_v8, %s12284_s22  ;;  %v6892_v33 = vrot.slane %v10058_v44, %v15121_v36  ;;  %v10051_v25 = vld.sshfl [vmem:[#allocation2 + $0x61] sm:$0x1 pattern:$0x75316420] }
 0x949   :  { %v10052_v11 = vld.sshfl [vmem:[#allocation2 + $0x63] sm:$0x1 pattern:$0x75316420]  ;;  %v6738_v24 = vrot.slane %v10051_v25, %v15121_v36 }
 0x94a   :  { %6915 = vrot.lane.b32.xlu0 %v6914_v4, %s12284_s22  ;;  %v6760_v45 = vrot.slane %v10052_v11, %v15121_v36  ;;  %v10053_v23 = vld.sshfl [vmem:[#allocation2 + $0x65] sm:$0x1 pattern:$0x75316420] }
 0x94b   :  { %v10054_v41 = vld.sshfl [vmem:[#allocation2 + $0x67] sm:$0x1 pattern:$0x75316420]  ;;  %v6782_v55 = vrot.slane %v10053_v23, %v15121_v36 }
 0x94c   :  { %6893 = vrot.lane.b32.xlu1 %v6892_v33, %s12284_s22  ;;  %v6804_v14 = vrot.slane %v10054_v41, %v15121_v36  ;;  %v10055_v54 = vld.sshfl [vmem:[#allocation2 + $0x69] sm:$0x1 pattern:$0x75316420] }
 0x94d   :  { %v10060_v15 = vld.sshfl [vmem:[#allocation2 + $0x79] sm:$0x1 pattern:$0x75316420]  ;;  %v6826_v40 = vrot.slane %v10055_v54, %v15121_v36 }
 0x94e   :  { %6739 = vrot.lane.b32.xlu0 %v6738_v24, %s12284_s22  ;;  %v6936_v1 = vrot.slane %v10060_v15, %v15121_v36  ;;  %v10067_v58 = vld.sshfl [vmem:[#allocation2 + $0x93] sm:$0x1 pattern:$0x75316420] }
 0x94f   :  { %v10066_v30 = vld.sshfl [vmem:[#allocation2 + $0x91] sm:$0x1 pattern:$0x75316420]  ;;  %v7090_v20 = vrot.slane %v10067_v58, %v15121_v36 }
 0x950   :  { %6761 = vrot.lane.b32.xlu1 %v6760_v45, %s12284_s22  ;;  %v7068_v3 = vrot.slane %v10066_v30, %v15121_v36  ;;  %v10061_v13 = vld.sshfl [vmem:[#allocation2 + $0x81] sm:$0x1 pattern:$0x75316420] }
 0x951   :  { %v10068_v18 = vld.sshfl [vmem:[#allocation2 + $0x95] sm:$0x1 pattern:$0x75316420]  ;;  %v6958_v22 = vrot.slane %v10061_v13, %v15121_v36 }
 0x952   :  { %6783 = vrot.lane.b32.xlu0 %v6782_v55, %s12284_s22  ;;  %v7112_v57 = vrot.slane %v10068_v18, %v15121_v36  ;;  %v10063_v52 = vld.sshfl [vmem:[#allocation2 + $0x85] sm:$0x1 pattern:$0x75316420] }
 0x953   :  { %v10062_v29 = vld.sshfl [vmem:[#allocation2 + $0x83] sm:$0x1 pattern:$0x75316420]  ;;  %v7002_v49 = vrot.slane %v10063_v52, %v15121_v36 }
 0x954   :  { %6805 = vrot.lane.b32.xlu1 %v6804_v14, %s12284_s22  ;;  %v6980_v43 = vrot.slane %v10062_v29, %v15121_v36  ;;  %v10065_v53 = vld.sshfl [vmem:[#allocation2 + $0x89] sm:$0x1 pattern:$0x75316420] }
 0x955   :  { %v10064_v62 = vld.sshfl [vmem:[#allocation2 + $0x87] sm:$0x1 pattern:$0x75316420]  ;;  %v7046_v59 = vrot.slane %v10065_v53, %v15121_v36 }
 0x956   :  { %6827 = vrot.lane.b32.xlu0 %v6826_v40, %s12284_s22  ;;  %v7024_v56 = vrot.slane %v10064_v62, %v15121_v36  ;;  %v10069_v34 = vld.sshfl [vmem:[#allocation2 + $0x97] sm:$0x1 pattern:$0x75316420] }
 0x957   :  { %v10070_v26 = vld.sshfl [vmem:[#allocation2 + $0x99] sm:$0x1 pattern:$0x75316420]  ;;  %v7134_v7 = vrot.slane %v10069_v34, %v15121_v36 }
 0x958   :  { %6937 = vrot.lane.b32.xlu1 %v6936_v1, %s12284_s22  ;;  %v7156_v50 = vrot.slane %v10070_v26, %v15121_v36 }
 0x95a   :  { %7091 = vrot.lane.b32.xlu0 %v7090_v20, %s12284_s22 }
 0x95c   :  { %7069 = vrot.lane.b32.xlu1 %v7068_v3, %s12284_s22 }
 0x95e   :  { %6959 = vrot.lane.b32.xlu0 %v6958_v22, %s12284_s22 }
 0x960   :  { %7113 = vrot.lane.b32.xlu1 %v7112_v57, %s12284_s22 }
 0x962   :  { %7003 = vrot.lane.b32.xlu0 %v7002_v49, %s12284_s22 }
 0x964   :  { %6981 = vrot.lane.b32.xlu1 %v6980_v43, %s12284_s22 }
 0x966   :  { %7047 = vrot.lane.b32.xlu0 %v7046_v59, %s12284_s22 }
 0x968   :  { %7025 = vrot.lane.b32.xlu1 %v7024_v56, %s12284_s22 }
 0x96a   :  { %7135 = vrot.lane.b32.xlu0 %v7134_v7, %s12284_s22 }
 0x96c   :  { %7157 = vrot.lane.b32.xlu1 %v7156_v50, %s12284_s22 }
 0x97a   :  { %v6212_v12 = vpop.permute.xlu0 %6211 }
 0x97b   :  { %6214 = vst.msk [vmem:[#allocation3 + $0x6] sm:$0x1] %vm15361_vm11, %v6212_v12  ;;  %v6190_v31 = vpop.permute.xlu1 %6189 }
 0x97c   :  { %6192 = vst.msk [vmem:[#allocation3 + $0x5] sm:$0x1] %vm15361_vm11, %v6190_v31 }
 0x97e   :  { %v6256_v17 = vpop.permute.xlu0 %6255 }
 0x97f   :  { %6258 = vst.msk [vmem:[#allocation3 + $0x8] sm:$0x1] %vm15361_vm11, %v6256_v17  ;;  %v6234_v2 = vpop.permute.xlu1 %6233 }
 0x980   :  { %6236 = vst.msk [vmem:[#allocation3 + $0x7] sm:$0x1] %vm15361_vm11, %v6234_v2 }
 0x982   :  { %v6077_v35 = vpop.permute.xlu0 %6076 }
 0x983   :  { %v6124_v0 = vpop.permute.xlu1 %6123  ;;  %6082 = vst.msk [vmem:[#allocation3] sm:$0x1] %vm15361_vm11, %v6077_v35 }
 0x984   :  { %6126 = vst.msk [vmem:[#allocation3 + $0x2] sm:$0x1] %vm15361_vm11, %v6124_v0 }
 0x986   :  { %v6102_v51 = vpop.permute.xlu0 %6101 }
 0x987   :  { %v6146_v32 = vpop.permute.xlu1 %6145  ;;  %6104 = vst.msk [vmem:[#allocation3 + $0x1] sm:$0x1] %vm15361_vm11, %v6102_v51 }
 0x988   :  { %6148 = vst.msk [vmem:[#allocation3 + $0x3] sm:$0x1] %vm15361_vm11, %v6146_v32 }
 0x98a   :  { %v6168_v6 = vpop.permute.xlu0 %6167 }
 0x98b   :  { %v6278_v46 = vpop.permute.xlu1 %6277  ;;  %6170 = vst.msk [vmem:[#allocation3 + $0x4] sm:$0x1] %vm15361_vm11, %v6168_v6 }
 0x98c   :  { %6280 = vst.msk [vmem:[#allocation3 + $0x9] sm:$0x1] %vm15361_vm11, %v6278_v46 }
 0x98e   :  { %v6432_v61 = vpop.permute.xlu0 %6431 }
 0x98f   :  { %6434 = vst.msk [vmem:[#allocation3 + $0x10] sm:$0x1] %vm15361_vm11, %v6432_v61  ;;  %v6410_v37 = vpop.permute.xlu1 %6409 }
 0x990   :  { %6412 = vst.msk [vmem:[#allocation3 + $0xf] sm:$0x1] %vm15361_vm11, %v6410_v37 }
 0x992   :  { %v6476_v39 = vpop.permute.xlu0 %6475 }
 0x993   :  { %6478 = vst.msk [vmem:[#allocation3 + $0x12] sm:$0x1] %vm15361_vm11, %v6476_v39  ;;  %v6454_v21 = vpop.permute.xlu1 %6453 }
 0x994   :  { %6456 = vst.msk [vmem:[#allocation3 + $0x11] sm:$0x1] %vm15361_vm11, %v6454_v21 }
 0x996   :  { %v6300_v47 = vpop.permute.xlu0 %6299 }
 0x997   :  { %v6322_v16 = vpop.permute.xlu1 %6321  ;;  %6302 = vst.msk [vmem:[#allocation3 + $0xa] sm:$0x1] %vm15361_vm11, %v6300_v47 }
 0x998   :  { %6324 = vst.msk [vmem:[#allocation3 + $0xb] sm:$0x1] %vm15361_vm11, %v6322_v16 }
 0x99a   :  { %v6344_v42 = vpop.permute.xlu0 %6343 }
 0x99b   :  { %v6366_v63 = vpop.permute.xlu1 %6365  ;;  %6346 = vst.msk [vmem:[#allocation3 + $0xc] sm:$0x1] %vm15361_vm11, %v6344_v42 }
 0x99c   :  { %6368 = vst.msk [vmem:[#allocation3 + $0xd] sm:$0x1] %vm15361_vm11, %v6366_v63 }
 0x99e   :  { %v6388_v19 = vpop.permute.xlu0 %6387 }
 0x99f   :  { %v6498_v9 = vpop.permute.xlu1 %6497  ;;  %6390 = vst.msk [vmem:[#allocation3 + $0xe] sm:$0x1] %vm15361_vm11, %v6388_v19 }
 0x9a0   :  { %6500 = vst.msk [vmem:[#allocation3 + $0x13] sm:$0x1] %vm15361_vm11, %v6498_v9 }
 0x9a2   :  { %v6652_v38 = vpop.permute.xlu0 %6651 }
 0x9a3   :  { %6654 = vst.msk [vmem:[#allocation3 + $0x1a] sm:$0x1] %vm15361_vm11, %v6652_v38  ;;  %v6630_v27 = vpop.permute.xlu1 %6629 }
 0x9a4   :  { %6632 = vst.msk [vmem:[#allocation3 + $0x19] sm:$0x1] %vm15361_vm11, %v6630_v27 }
 0x9a6   :  { %v6696_v5 = vpop.permute.xlu0 %6695 }
 0x9a7   :  { %6698 = vst.msk [vmem:[#allocation3 + $0x1c] sm:$0x1] %vm15361_vm11, %v6696_v5  ;;  %v6674_v10 = vpop.permute.xlu1 %6673 }
 0x9a8   :  { %6676 = vst.msk [vmem:[#allocation3 + $0x1b] sm:$0x1] %vm15361_vm11, %v6674_v10 }
 0x9aa   :  { %v6520_v8 = vpop.permute.xlu0 %6519 }
 0x9ab   :  { %v6542_v28 = vpop.permute.xlu1 %6541  ;;  %6522 = vst.msk [vmem:[#allocation3 + $0x14] sm:$0x1] %vm15361_vm11, %v6520_v8 }
 0x9ac   :  { %6544 = vst.msk [vmem:[#allocation3 + $0x15] sm:$0x1] %vm15361_vm11, %v6542_v28 }
 0x9ae   :  { %v6564_v44 = vpop.permute.xlu0 %6563 }
 0x9af   :  { %v6586_v4 = vpop.permute.xlu1 %6585  ;;  %6566 = vst.msk [vmem:[#allocation3 + $0x16] sm:$0x1] %vm15361_vm11, %v6564_v44 }
 0x9b0   :  { %6588 = vst.msk [vmem:[#allocation3 + $0x17] sm:$0x1] %vm15361_vm11, %v6586_v4 }
 0x9b2   :  { %v6608_v33 = vpop.permute.xlu0 %6607 }
 0x9b3   :  { %v6718_v25 = vpop.permute.xlu1 %6717  ;;  %6610 = vst.msk [vmem:[#allocation3 + $0x18] sm:$0x1] %vm15361_vm11, %v6608_v33 }
 0x9b4   :  { %6720 = vst.msk [vmem:[#allocation3 + $0x1d] sm:$0x1] %vm15361_vm11, %v6718_v25 }
 0x9b8   :  { %v6872_v11 = vpop.permute.xlu0 %6871 }
 0x9b9   :  { %6874 = vst.msk [vmem:[#allocation3 + $0x24] sm:$0x1] %vm15361_vm11, %v6872_v11 }
 0x9ba   :  { %v6850_v24 = vpop.permute.xlu1 %6849 }
 0x9bb   :  { %6852 = vst.msk [vmem:[#allocation3 + $0x23] sm:$0x1] %vm15361_vm11, %v6850_v24 }
 0x9bc   :  { %v6916_v45 = vpop.permute.xlu0 %6915 }
 0x9bd   :  { %6918 = vst.msk [vmem:[#allocation3 + $0x26] sm:$0x1] %vm15361_vm11, %v6916_v45 }
 0x9be   :  { %v6894_v23 = vpop.permute.xlu1 %6893 }
 0x9bf   :  { %6896 = vst.msk [vmem:[#allocation3 + $0x25] sm:$0x1] %vm15361_vm11, %v6894_v23 }
 0x9c0   :  { %v6740_v41 = vpop.permute.xlu0 %6739 }
 0x9c1   :  { %6742 = vst.msk [vmem:[#allocation3 + $0x1e] sm:$0x1] %vm15361_vm11, %v6740_v41 }
 0x9c2   :  { %v6762_v55 = vpop.permute.xlu1 %6761 }
 0x9c3   :  { %6764 = vst.msk [vmem:[#allocation3 + $0x1f] sm:$0x1] %vm15361_vm11, %v6762_v55 }
 0x9c4   :  { %v6784_v14 = vpop.permute.xlu0 %6783 }
 0x9c5   :  { %6786 = vst.msk [vmem:[#allocation3 + $0x20] sm:$0x1] %vm15361_vm11, %v6784_v14 }
 0x9c6   :  { %v6806_v54 = vpop.permute.xlu1 %6805 }
 0x9c7   :  { %6808 = vst.msk [vmem:[#allocation3 + $0x21] sm:$0x1] %vm15361_vm11, %v6806_v54 }
 0x9c8   :  { %v6828_v15 = vpop.permute.xlu0 %6827 }
 0x9c9   :  { %6830 = vst.msk [vmem:[#allocation3 + $0x22] sm:$0x1] %vm15361_vm11, %v6828_v15 }
 0x9ca   :  { %v6938_v40 = vpop.permute.xlu1 %6937 }
 0x9cb   :  { %6940 = vst.msk [vmem:[#allocation3 + $0x27] sm:$0x1] %vm15361_vm11, %v6938_v40 }
 0x9cc   :  { %v7092_v1 = vpop.permute.xlu0 %7091 }
 0x9cd   :  { %7094 = vst.msk [vmem:[#allocation3 + $0x2e] sm:$0x1] %vm15361_vm11, %v7092_v1 }
 0x9ce   :  { %v7070_v58 = vpop.permute.xlu1 %7069 }
 0x9cf   :  { %7072 = vst.msk [vmem:[#allocation3 + $0x2d] sm:$0x1] %vm15361_vm11, %v7070_v58 }
 0x9d0   :  { %v6960_v30 = vpop.permute.xlu0 %6959 }
 0x9d1   :  { %6962 = vst.msk [vmem:[#allocation3 + $0x28] sm:$0x1] %vm15361_vm11, %v6960_v30 }
 0x9d2   :  { %v7114_v20 = vpop.permute.xlu1 %7113 }
 0x9d3   :  { %7116 = vst.msk [vmem:[#allocation3 + $0x2f] sm:$0x1] %vm15361_vm11, %v7114_v20 }
 0x9d4   :  { %v7004_v3 = vpop.permute.xlu0 %7003 }
 0x9d5   :  { %7006 = vst.msk [vmem:[#allocation3 + $0x2a] sm:$0x1] %vm15361_vm11, %v7004_v3 }
 0x9d6   :  { %v6982_v13 = vpop.permute.xlu1 %6981 }
 0x9d7   :  { %6984 = vst.msk [vmem:[#allocation3 + $0x29] sm:$0x1] %vm15361_vm11, %v6982_v13 }
 0x9d8   :  { %v7048_v18 = vpop.permute.xlu0 %7047 }
 0x9d9   :  { %7050 = vst.msk [vmem:[#allocation3 + $0x2c] sm:$0x1] %vm15361_vm11, %v7048_v18 }
 0x9da   :  { %v7026_v22 = vpop.permute.xlu1 %7025 }
 0x9db   :  { %7028 = vst.msk [vmem:[#allocation3 + $0x2b] sm:$0x1] %vm15361_vm11, %v7026_v22 }
 0x9dc   :  { %v7136_v57 = vpop.permute.xlu0 %7135 }
 0x9dd   :  { %7138 = vst.msk [vmem:[#allocation3 + $0x30] sm:$0x1] %vm15361_vm11, %v7136_v57 }
 0x9de   :  { %v7158_v52 = vpop.permute.xlu1 %7157 }
 0x9df   :  { %7160 = vst.msk [vmem:[#allocation3 + $0x31] sm:$0x1] %vm15361_vm11, %v7158_v52 }
 0x9e0   :  { %12271 = dma.done.wait [#allocation5], 102400 }
 0x9e1   :  { %12272 = vsyncadd [#allocation5], 4294864896  ;;  %v7231_v29 = vld [vmem:[#allocation4 + $0x8] sm:$0xff]  ;;  %v7230_v49 = vld [vmem:[#allocation4] sm:$0xff]  ;;  %v15466_v61 = vsub.s32 1, %v15114_v48  ;;  %vm9589_vm12 = vcmask 24576  }
 0x9e2   :  { %v7679_v43 = vld [vmem:[#allocation4 + $0x508] sm:$0xff]  ;;  %7390 = vmatprep.subr.bf16.mxu1 %v7231_v29  ;;  %v7678_v53 = vld [vmem:[#allocation4 + $0x500] sm:$0xff]  ;;  %v7233_v62 = vld [vmem:[#allocation4 + $0x18] sm:$0xff] }
 0x9e3   :  { %7838 = vmatprep.subr.bf16.mxu0 %v7679_v43  ;;  %7391 = vmatpush1.bf16.msra.mxu1 %v7230_v49  ;;  %v7681_v59 = vld [vmem:[#allocation4 + $0x518] sm:$0xff]  ;;  %v7232_v56 = vld [vmem:[#allocation4 + $0x10] sm:$0xff]  ;;  %v7235_v26 = vld [vmem:[#allocation4 + $0x28] sm:$0xff] }
 0x9e4   :  { %7839 = vmatpush1.bf16.msra.mxu0 %v7678_v53  ;;  %7392 = vmatprep.subr.bf16.mxu1 %v7233_v62  ;;  %v7680_v34 = vld [vmem:[#allocation4 + $0x510] sm:$0xff]  ;;  %v7683_v7 = vld [vmem:[#allocation4 + $0x528] sm:$0xff]  ;;  %v7234_v50 = vld [vmem:[#allocation4 + $0x20] sm:$0xff]  ;;  %v15477_v53 = vsub.s32 0, %v15114_v48 }
 0x9e5   :  { %7840 = vmatprep.subr.bf16.mxu0 %v7681_v59  ;;  %v7682_v60 = vld [vmem:[#allocation4 + $0x520] sm:$0xff]  ;;  %v7237_v12 = vld [vmem:[#allocation4 + $0x38] sm:$0xff]  ;;  %v7236_v17 = vld [vmem:[#allocation4 + $0x30] sm:$0xff] }
 0x9e6   :  { %v7685_v31 = vld [vmem:[#allocation4 + $0x538] sm:$0xff]  ;;  %v7684_v2 = vld [vmem:[#allocation4 + $0x530] sm:$0xff]  ;;  %v7239_v35 = vld [vmem:[#allocation4 + $0x48] sm:$0xff] }
 0x9e7   :  { %7393 = vmatpush1.bf16.msra.mxu1 %v7232_v56  ;;  %v7687_v0 = vld [vmem:[#allocation4 + $0x548] sm:$0xff]  ;;  %v7238_v51 = vld [vmem:[#allocation4 + $0x40] sm:$0xff]  ;;  %v7241_v6 = vld [vmem:[#allocation4 + $0x58] sm:$0xff] }
 0x9e8   :  { %7841 = vmatpush1.bf16.msra.mxu0 %v7680_v34  ;;  %7394 = vmatprep.subr.bf16.mxu1 %v7235_v26  ;;  %v7686_v32 = vld [vmem:[#allocation4 + $0x540] sm:$0xff]  ;;  %v7689_v46 = vld [vmem:[#allocation4 + $0x558] sm:$0xff]  ;;  %v7240_v37 = vld [vmem:[#allocation4 + $0x50] sm:$0xff]  ;;  %v15480_v26 = vsub.s32 3, %v15114_v48 }
 0x9e9   :  { %7842 = vmatprep.subr.bf16.mxu0 %v7683_v7  ;;  %v7688_v39 = vld [vmem:[#allocation4 + $0x550] sm:$0xff]  ;;  %v7243_v21 = vld [vmem:[#allocation4 + $0x68] sm:$0xff]  ;;  %v15472_v63 = vld [vmem:[#allocation3 + $0xa] sm:$0xff] }
 0x9ea   :  { %v7691_v47 = vld [vmem:[#allocation4 + $0x568] sm:$0xff]  ;;  %v7242_v19 = vld [vmem:[#allocation4 + $0x60] sm:$0xff]  ;;  %v7625_v38 = vrot.slane %v15472_v63, %v15466_v61  ;;  %v7245_v27 = vld [vmem:[#allocation4 + $0x78] sm:$0xff] }
 0x9eb   :  { %7395 = vmatpush1.bf16.msra.mxu1 %v7234_v50  ;;  %v15468_v16 = vld [vmem:[#allocation3] sm:$0xff]  ;;  %v7690_v9 = vld [vmem:[#allocation4 + $0x560] sm:$0xff]  ;;  %v7693_v5 = vld [vmem:[#allocation4 + $0x578] sm:$0xff]  ;;  %v7621_v50 = vrot.slane %v15472_v63, %v15477_v53 }
 0x9ec   :  { %7843 = vmatpush1.bf16.msra.mxu0 %v7682_v60  ;;  %7396 = vmatprep.subr.bf16.mxu1 %v7237_v12  ;;  %v7177_v42 = vrot.slane %v15468_v16, %v15466_v61  ;;  %v7669_v8 = vpack.c.bf16 %v7625_v38, %v7625_v38  ;;  %v7244_v28 = vld [vmem:[#allocation4 + $0x70] sm:$0xff]  ;;  %v7247_v4 = vld [vmem:[#allocation4 + $0x88] sm:$0xff]  ;;  %v7246_v25 = vld [vmem:[#allocation4 + $0x80] sm:$0xff]  ;;  %v7173_v7 = vrot.slane %v15468_v16, %v15477_v53 }
 0x9ed   :  { %7844 = vmatprep.subr.bf16.mxu0 %v7685_v31  ;;  %v7692_v44 = vld [vmem:[#allocation4 + $0x570] sm:$0xff]  ;;  %v7695_v33 = vld [vmem:[#allocation4 + $0x588] sm:$0xff]  ;;  %v7694_v11 = vld [vmem:[#allocation4 + $0x580] sm:$0xff] }
 0x9ee   :  { %v7221_v10 = vpack.c.bf16 %v7177_v42, %v7177_v42  ;;  %7870 = vmatprep.mubr.bf16.mxu0 %v7669_v8  ;;  %v7249_v24 = vld [vmem:[#allocation4 + $0x98] sm:$0xff]  ;;  %v7248_v23 = vld [vmem:[#allocation4 + $0x90] sm:$0xff]  ;;  %v7251_v55 = vld [vmem:[#allocation4 + $0xa8] sm:$0xff] }
 0x9ef   :  { %7397 = vmatpush1.bf16.msra.mxu1 %v7236_v17  ;;  %v7697_v45 = vld [vmem:[#allocation4 + $0x598] sm:$0xff]  ;;  %v7696_v41 = vld [vmem:[#allocation4 + $0x590] sm:$0xff]  ;;  %v7699_v14 = vld [vmem:[#allocation4 + $0x5a8] sm:$0xff] }
 0x9f0   :  { %7845 = vmatpush1.bf16.msra.mxu0 %v7684_v2  ;;  %7398 = vmatprep.subr.bf16.mxu1 %v7239_v35  ;;  %v7250_v54 = vld [vmem:[#allocation4 + $0xa0] sm:$0xff]  ;;  %v7253_v40 = vld [vmem:[#allocation4 + $0xb8] sm:$0xff]  ;;  %v7252_v58 = vld [vmem:[#allocation4 + $0xb0] sm:$0xff]  ;;  %v7185_v2 = vrot.slane %v15468_v16, %v15480_v26  ;;  %v7633_v35 = vrot.slane %v15472_v63, %v15480_v26 }
 0x9f1   :  { %7846 = vmatprep.subr.bf16.mxu0 %v7687_v0  ;;  %7422 = vmatprep.mubr.bf16.mxu1 %v7221_v10  ;;  %v7698_v15 = vld [vmem:[#allocation4 + $0x5a0] sm:$0xff]  ;;  %v7701_v1 = vld [vmem:[#allocation4 + $0x5b8] sm:$0xff]  ;;  %v7700_v30 = vld [vmem:[#allocation4 + $0x5b0] sm:$0xff]  ;;  %v7220_v0 = vpack.c.bf16 %v7173_v7, %v7173_v7 }
 0x9f2   :  { %v7255_v20 = vld [vmem:[#allocation4 + $0xc8] sm:$0xff]  ;;  %v7254_v13 = vld [vmem:[#allocation4 + $0xc0] sm:$0xff]  ;;  %v7257_v22 = vld [vmem:[#allocation4 + $0xd8] sm:$0xff] }
 0x9f3   :  { %7399 = vmatpush1.bf16.msra.mxu1 %v7238_v51  ;;  %v7703_v3 = vld [vmem:[#allocation4 + $0x5c8] sm:$0xff]  ;;  %v7702_v18 = vld [vmem:[#allocation4 + $0x5c0] sm:$0xff]  ;;  %v7705_v57 = vld [vmem:[#allocation4 + $0x5d8] sm:$0xff]  ;;  %v7668_v51 = vpack.c.bf16 %v7621_v50, %v7621_v50 }
 0x9f4   :  { %7847 = vmatpush1.bf16.msra.mxu0 %v7686_v32  ;;  %7400 = vmatprep.subr.bf16.mxu1 %v7241_v6  ;;  %v7256_v52 = vld [vmem:[#allocation4 + $0xd0] sm:$0xff]  ;;  %v7259_v49 = vld [vmem:[#allocation4 + $0xe8] sm:$0xff]  ;;  %v7258_v62 = vld [vmem:[#allocation4 + $0xe0] sm:$0xff] }
 0x9f5   :  { %7848 = vmatprep.subr.bf16.mxu0 %v7689_v46  ;;  %v7704_v29 = vld [vmem:[#allocation4 + $0x5d0] sm:$0xff]  ;;  %v7707_v43 = vld [vmem:[#allocation4 + $0x5e8] sm:$0xff]  ;;  %v7706_v59 = vld [vmem:[#allocation4 + $0x5e0] sm:$0xff] }
 0x9f6   :  { %v7261_v56 = vld [vmem:[#allocation4 + $0xf8] sm:$0xff]  ;;  %v7260_v60 = vld [vmem:[#allocation4 + $0xf0] sm:$0xff]  ;;  %v7263_v31 = vld [vmem:[#allocation4 + $0x108] sm:$0xff] }
 0x9f7   :  { %7401 = vmatpush1.bf16.msra.mxu1 %v7240_v37  ;;  %v7709_v34 = vld [vmem:[#allocation4 + $0x5f8] sm:$0xff]  ;;  %v7708_v12 = vld [vmem:[#allocation4 + $0x5f0] sm:$0xff]  ;;  %v7711_v17 = vld [vmem:[#allocation4 + $0x608] sm:$0xff] }
 0x9f8   :  { %7849 = vmatpush1.bf16.msra.mxu0 %v7688_v39  ;;  %7402 = vmatprep.subr.bf16.mxu1 %v7243_v21  ;;  %v7262_v32 = vld [vmem:[#allocation4 + $0x100] sm:$0xff]  ;;  %v7265_v46 = vld [vmem:[#allocation4 + $0x118] sm:$0xff]  ;;  %v7223_v39 = vpack.c.bf16 %v7185_v2, %v7185_v2  ;;  %v7671_v21 = vpack.c.bf16 %v7633_v35, %v7633_v35  ;;  %v7712_v42 = vld [vmem:[#allocation4 + $0x610] sm:$0xff] }
 0x9f9   :  { %7850 = vmatprep.subr.bf16.mxu0 %v7691_v47  ;;  %v7710_v6 = vld [vmem:[#allocation4 + $0x600] sm:$0xff]  ;;  %v7713_v37 = vld [vmem:[#allocation4 + $0x618] sm:$0xff]  ;;  %v7264_v47 = vld [vmem:[#allocation4 + $0x110] sm:$0xff] }
 0x9fa   :  { %v7266_v38 = vld [vmem:[#allocation4 + $0x120] sm:$0xff]  ;;  %v7717_v10 = vld [vmem:[#allocation4 + $0x638] sm:$0xff]  ;;  %v7268_v8 = vld [vmem:[#allocation4 + $0x130] sm:$0xff] }
 0x9fb   :  { %7403 = vmatpush1.bf16.msra.mxu1 %v7242_v19  ;;  %v7267_v19 = vld [vmem:[#allocation4 + $0x128] sm:$0xff]  ;;  %v7732_v7 = vld [vmem:[#allocation4 + $0x6b0] sm:$0xff]  ;;  %v7737_v2 = vld [vmem:[#allocation4 + $0x6d8] sm:$0xff] }
 0x9fc   :  { %7851 = vmatpush1.bf16.msra.mxu0 %v7690_v9  ;;  %7404 = vmatprep.subr.bf16.mxu1 %v7245_v27  ;;  %v7715_v9 = vld [vmem:[#allocation4 + $0x628] sm:$0xff]  ;;  %v7714_v27 = vld [vmem:[#allocation4 + $0x620] sm:$0xff]  ;;  %v7288_v35 = vld [vmem:[#allocation4 + $0x1d0] sm:$0xff] }
 0x9fd   :  { %7852 = vmatprep.subr.bf16.mxu0 %v7693_v5  ;;  %v7269_v5 = vld [vmem:[#allocation4 + $0x138] sm:$0xff]  ;;  %v7287_v50 = vld [vmem:[#allocation4 + $0x1c8] sm:$0xff] }
 0x9ff   :  { %7405 = vmatpush1.bf16.msra.mxu1 %v7244_v28  ;;  %v7716_v28 = vld [vmem:[#allocation4 + $0x630] sm:$0xff] }
 0xa00   :  { %7853 = vmatpush1.bf16.msra.mxu0 %v7692_v44  ;;  %7406 = vmatprep.subr.bf16.mxu1 %v7247_v4  ;;  %v7271_v44 = vld [vmem:[#allocation4 + $0x148] sm:$0xff] }
 0xa01   :  { %7854 = vmatprep.subr.bf16.mxu0 %v7695_v33  ;;  %v7719_v4 = vld [vmem:[#allocation4 + $0x648] sm:$0xff]  ;;  %v7270_v33 = vld [vmem:[#allocation4 + $0x140] sm:$0xff] }
 0xa03   :  { %7407 = vmatpush1.bf16.msra.mxu1 %v7246_v25  ;;  %v7718_v25 = vld [vmem:[#allocation4 + $0x640] sm:$0xff] }
 0xa04   :  { %7855 = vmatpush1.bf16.msra.mxu0 %v7694_v11  ;;  %7408 = vmatprep.subr.bf16.mxu1 %v7249_v24  ;;  %v7273_v11 = vld [vmem:[#allocation4 + $0x158] sm:$0xff] }
 0xa05   :  { %7856 = vmatprep.subr.bf16.mxu0 %v7697_v45  ;;  %v7721_v24 = vld [vmem:[#allocation4 + $0x658] sm:$0xff]  ;;  %v7272_v45 = vld [vmem:[#allocation4 + $0x150] sm:$0xff] }
 0xa07   :  { %7409 = vmatpush1.bf16.msra.mxu1 %v7248_v23  ;;  %v7720_v23 = vld [vmem:[#allocation4 + $0x650] sm:$0xff] }
 0xa08   :  { %7857 = vmatpush1.bf16.msra.mxu0 %v7696_v41  ;;  %7410 = vmatprep.subr.bf16.mxu1 %v7251_v55  ;;  %v7275_v41 = vld [vmem:[#allocation4 + $0x168] sm:$0xff] }
 0xa09   :  { %7858 = vmatprep.subr.bf16.mxu0 %v7699_v14  ;;  %v7723_v55 = vld [vmem:[#allocation4 + $0x668] sm:$0xff]  ;;  %v7274_v14 = vld [vmem:[#allocation4 + $0x160] sm:$0xff] }
 0xa0b   :  { %7411 = vmatpush1.bf16.msra.mxu1 %v7250_v54  ;;  %v7722_v54 = vld [vmem:[#allocation4 + $0x660] sm:$0xff] }
 0xa0c   :  { %7859 = vmatpush1.bf16.msra.mxu0 %v7698_v15  ;;  %7412 = vmatprep.subr.bf16.mxu1 %v7253_v40  ;;  %v7277_v15 = vld [vmem:[#allocation4 + $0x178] sm:$0xff] }
 0xa0d   :  { %7860 = vmatprep.subr.bf16.mxu0 %v7701_v1  ;;  %v7725_v40 = vld [vmem:[#allocation4 + $0x678] sm:$0xff]  ;;  %v7276_v1 = vld [vmem:[#allocation4 + $0x170] sm:$0xff] }
 0xa0f   :  { %7413 = vmatpush1.bf16.msra.mxu1 %v7252_v58  ;;  %v7724_v58 = vld [vmem:[#allocation4 + $0x670] sm:$0xff] }
 0xa10   :  { %7861 = vmatpush1.bf16.msra.mxu0 %v7700_v30  ;;  %7414 = vmatprep.subr.bf16.mxu1 %v7255_v20  ;;  %v7279_v30 = vld [vmem:[#allocation4 + $0x188] sm:$0xff] }
 0xa11   :  { %7862 = vmatprep.subr.bf16.mxu0 %v7703_v3  ;;  %v7727_v20 = vld [vmem:[#allocation4 + $0x688] sm:$0xff]  ;;  %v7278_v3 = vld [vmem:[#allocation4 + $0x180] sm:$0xff] }
 0xa13   :  { %7415 = vmatpush1.bf16.msra.mxu1 %v7254_v13  ;;  %v7726_v13 = vld [vmem:[#allocation4 + $0x680] sm:$0xff] }
 0xa14   :  { %7863 = vmatpush1.bf16.msra.mxu0 %v7702_v18  ;;  %7416 = vmatprep.subr.bf16.mxu1 %v7257_v22  ;;  %v7281_v18 = vld [vmem:[#allocation4 + $0x198] sm:$0xff] }
 0xa15   :  { %7864 = vmatprep.subr.bf16.mxu0 %v7705_v57  ;;  %v7729_v22 = vld [vmem:[#allocation4 + $0x698] sm:$0xff]  ;;  %v7280_v57 = vld [vmem:[#allocation4 + $0x190] sm:$0xff] }
 0xa17   :  { %7417 = vmatpush1.bf16.msra.mxu1 %v7256_v52  ;;  %v7728_v52 = vld [vmem:[#allocation4 + $0x690] sm:$0xff] }
 0xa18   :  { %7865 = vmatpush1.bf16.msra.mxu0 %v7704_v29  ;;  %7418 = vmatprep.subr.bf16.mxu1 %v7259_v49  ;;  %v7283_v29 = vld [vmem:[#allocation4 + $0x1a8] sm:$0xff] }
 0xa19   :  { %7866 = vmatprep.subr.bf16.mxu0 %v7707_v43  ;;  %v7731_v49 = vld [vmem:[#allocation4 + $0x6a8] sm:$0xff]  ;;  %v7282_v43 = vld [vmem:[#allocation4 + $0x1a0] sm:$0xff] }
 0xa1b   :  { %7419 = vmatpush1.bf16.msra.mxu1 %v7258_v62  ;;  %v7730_v62 = vld [vmem:[#allocation4 + $0x6a0] sm:$0xff] }
 0xa1c   :  { %7867 = vmatpush1.bf16.msra.mxu0 %v7706_v59  ;;  %7420 = vmatprep.subr.bf16.mxu1 %v7261_v56  ;;  %v7285_v59 = vld [vmem:[#allocation4 + $0x1b8] sm:$0xff] }
 0xa1d   :  { %7868 = vmatprep.subr.bf16.mxu0 %v7709_v34  ;;  %v7733_v56 = vld [vmem:[#allocation4 + $0x6b8] sm:$0xff]  ;;  %v7284_v34 = vld [vmem:[#allocation4 + $0x1b0] sm:$0xff] }
 0xa1f   :  { %7421 = vmatpush1.bf16.msra.mxu1 %v7260_v60  ;;  %v7735_v60 = vld [vmem:[#allocation4 + $0x6c8] sm:$0xff] }
 0xa20   :  { %7869 = vmatpush1.bf16.msra.mxu0 %v7708_v12  ;;  %7431 = vmatprep.subr.bf16.mxu1 %v7263_v31  ;;  %v7286_v12 = vld [vmem:[#allocation4 + $0x1c0] sm:$0xff] }
 0xa21   :  { %7879 = vmatprep.subr.bf16.mxu0 %v7711_v17  ;;  %v7734_v31 = vld [vmem:[#allocation4 + $0x6c0] sm:$0xff]  ;;  %v7289_v17 = vld [vmem:[#allocation4 + $0x1d8] sm:$0xff] }
 0xa22   :  { %7423 = vmatmul.mubr.bf16.vlgmr.msra.gmra.mrb[8].mxu1 %v7220_v0  ;;  %v7736_v0 = vld [vmem:[#allocation4 + $0x6d0] sm:$0xff] }
 0xa23   :  { %7871 = vmatmul.mubr.bf16.vlgmr.msra.gmra.mrb[172].mxu0 %v7668_v51  ;;  %7432 = vmatpush1.bf16.msra.mxu1 %v7262_v32  ;;  %v7291_v51 = vld [vmem:[#allocation4 + $0x1e8] sm:$0xff] }
 0xa24   :  { %7880 = vmatpush1.bf16.msra.mxu0 %v7710_v6  ;;  %7433 = vmatprep.subr.bf16.mxu1 %v7265_v46  ;;  %v7739_v32 = vld [vmem:[#allocation4 + $0x6e8] sm:$0xff]  ;;  %v15491_v6 = vsub.s32 2, %v15114_v48  ;;  %v7290_v46 = vld [vmem:[#allocation4 + $0x1e0] sm:$0xff] }
 0xa25   :  { %7881 = vmatprep.subr.bf16.mxu0 %v7713_v37  ;;  %7463 = vmatprep.mubr.bf16.mxu1 %v7223_v39  ;;  %v7738_v37 = vld [vmem:[#allocation4 + $0x6e0] sm:$0xff]  ;;  %v7293_v39 = vld [vmem:[#allocation4 + $0x1f8] sm:$0xff] }
 0xa26   :  { %7911 = vmatprep.mubr.bf16.mxu0 %v7671_v21  ;;  %v7741_v21 = vld [vmem:[#allocation4 + $0x6f8] sm:$0xff] }
 0xa27   :  { %7434 = vmatpush1.bf16.msra.mxu1 %v7264_v47  ;;  %v15494_v47 = vsub.s32 5, %v15114_v48 }
 0xa28   :  { %7882 = vmatpush1.bf16.msra.mxu0 %v7712_v42  ;;  %7435 = vmatprep.subr.bf16.mxu1 %v7267_v19  ;;  %v7181_v42 = vrot.slane %v15468_v16, %v15491_v6  ;;  %v7629_v19 = vrot.slane %v15472_v63, %v15491_v6 }
 0xa29   :  { %7883 = vmatprep.subr.bf16.mxu0 %v7715_v9  ;;  %v7292_v9 = vld [vmem:[#allocation4 + $0x1f0] sm:$0xff] }
 0xa2b   :  { %7436 = vmatpush1.bf16.msra.mxu1 %v7266_v38  ;;  %v7740_v38 = vld [vmem:[#allocation4 + $0x6f0] sm:$0xff] }
 0xa2c   :  { %7884 = vmatpush1.bf16.msra.mxu0 %v7714_v27  ;;  %7437 = vmatprep.subr.bf16.mxu1 %v7269_v5  ;;  %v7295_v27 = vld [vmem:[#allocation4 + $0x208] sm:$0xff] }
 0xa2d   :  { %7885 = vmatprep.subr.bf16.mxu0 %v7717_v10  ;;  %v7743_v5 = vld [vmem:[#allocation4 + $0x708] sm:$0xff]  ;;  %v7193_v10 = vrot.slane %v15468_v16, %v15494_v47 }
 0xa2f   :  { %7438 = vmatpush1.bf16.msra.mxu1 %v7268_v8  ;;  %v7641_v8 = vrot.slane %v15472_v63, %v15494_v47 }
 0xa30   :  { %7886 = vmatpush1.bf16.msra.mxu0 %v7716_v28  ;;  %7439 = vmatprep.subr.bf16.mxu1 %v7271_v44  ;;  %v7222_v28 = vpack.c.bf16 %v7181_v42, %v7181_v42  ;;  %v7670_v44 = vpack.c.bf16 %v7629_v19, %v7629_v19  ;;  %v7765_v42 = vld [vmem:[#allocation4 + $0x7b8] sm:$0xff]  ;;  %v7316_v19 = vld [vmem:[#allocation4 + $0x2b0] sm:$0xff] }
 0xa31   :  { %7887 = vmatprep.subr.bf16.mxu0 %v7719_v4  ;;  %v7294_v4 = vld [vmem:[#allocation4 + $0x200] sm:$0xff] }
 0xa33   :  { %7440 = vmatpush1.bf16.msra.mxu1 %v7270_v33  ;;  %v7742_v33 = vld [vmem:[#allocation4 + $0x700] sm:$0xff] }
 0xa34   :  { %7888 = vmatpush1.bf16.msra.mxu0 %v7718_v25  ;;  %7441 = vmatprep.subr.bf16.mxu1 %v7273_v11  ;;  %v7297_v25 = vld [vmem:[#allocation4 + $0x218] sm:$0xff] }
 0xa35   :  { %7889 = vmatprep.subr.bf16.mxu0 %v7721_v24  ;;  %v7745_v11 = vld [vmem:[#allocation4 + $0x718] sm:$0xff]  ;;  %v7225_v24 = vpack.c.bf16 %v7193_v10, %v7193_v10  ;;  %v7766_v10 = vld [vmem:[#allocation4 + $0x7c0] sm:$0xff] }
 0xa37   :  { %7442 = vmatpush1.bf16.msra.mxu1 %v7272_v45  ;;  %v7673_v45 = vpack.c.bf16 %v7641_v8, %v7641_v8  ;;  %v7321_v8 = vld [vmem:[#allocation4 + $0x2d8] sm:$0xff] }
 0xa38   :  { %7890 = vmatpush1.bf16.msra.mxu0 %v7720_v23  ;;  %7443 = vmatprep.subr.bf16.mxu1 %v7275_v41  ;;  %v7296_v23 = vld [vmem:[#allocation4 + $0x210] sm:$0xff] }
 0xa39   :  { %7891 = vmatprep.subr.bf16.mxu0 %v7723_v55  ;;  %v7744_v41 = vld [vmem:[#allocation4 + $0x710] sm:$0xff]  ;;  %v7299_v55 = vld [vmem:[#allocation4 + $0x228] sm:$0xff] }
 0xa3b   :  { %7444 = vmatpush1.bf16.msra.mxu1 %v7274_v14  ;;  %v7747_v14 = vld [vmem:[#allocation4 + $0x728] sm:$0xff] }
 0xa3c   :  { %7892 = vmatpush1.bf16.msra.mxu0 %v7722_v54  ;;  %7445 = vmatprep.subr.bf16.mxu1 %v7277_v15  ;;  %v7298_v54 = vld [vmem:[#allocation4 + $0x220] sm:$0xff] }
 0xa3d   :  { %7893 = vmatprep.subr.bf16.mxu0 %v7725_v40  ;;  %v7746_v15 = vld [vmem:[#allocation4 + $0x720] sm:$0xff]  ;;  %v7301_v40 = vld [vmem:[#allocation4 + $0x238] sm:$0xff] }
 0xa3f   :  { %7446 = vmatpush1.bf16.msra.mxu1 %v7276_v1  ;;  %v7749_v1 = vld [vmem:[#allocation4 + $0x738] sm:$0xff] }
 0xa40   :  { %7894 = vmatpush1.bf16.msra.mxu0 %v7724_v58  ;;  %7447 = vmatprep.subr.bf16.mxu1 %v7279_v30  ;;  %v7300_v58 = vld [vmem:[#allocation4 + $0x230] sm:$0xff] }
 0xa41   :  { %7895 = vmatprep.subr.bf16.mxu0 %v7727_v20  ;;  %v7748_v30 = vld [vmem:[#allocation4 + $0x730] sm:$0xff]  ;;  %v7303_v20 = vld [vmem:[#allocation4 + $0x248] sm:$0xff] }
 0xa43   :  { %7448 = vmatpush1.bf16.msra.mxu1 %v7278_v3  ;;  %v7751_v3 = vld [vmem:[#allocation4 + $0x748] sm:$0xff] }
 0xa44   :  { %7896 = vmatpush1.bf16.msra.mxu0 %v7726_v13  ;;  %7449 = vmatprep.subr.bf16.mxu1 %v7281_v18  ;;  %v7302_v13 = vld [vmem:[#allocation4 + $0x240] sm:$0xff] }
 0xa45   :  { %7897 = vmatprep.subr.bf16.mxu0 %v7729_v22  ;;  %v7750_v18 = vld [vmem:[#allocation4 + $0x740] sm:$0xff]  ;;  %v7305_v22 = vld [vmem:[#allocation4 + $0x258] sm:$0xff] }
 0xa47   :  { %7450 = vmatpush1.bf16.msra.mxu1 %v7280_v57  ;;  %v7753_v57 = vld [vmem:[#allocation4 + $0x758] sm:$0xff] }
 0xa48   :  { %7898 = vmatpush1.bf16.msra.mxu0 %v7728_v52  ;;  %7451 = vmatprep.subr.bf16.mxu1 %v7283_v29  ;;  %v7304_v52 = vld [vmem:[#allocation4 + $0x250] sm:$0xff] }
 0xa49   :  { %7899 = vmatprep.subr.bf16.mxu0 %v7731_v49  ;;  %v7752_v29 = vld [vmem:[#allocation4 + $0x750] sm:$0xff]  ;;  %v7307_v49 = vld [vmem:[#allocation4 + $0x268] sm:$0xff] }
 0xa4b   :  { %7452 = vmatpush1.bf16.msra.mxu1 %v7282_v43  ;;  %v7755_v43 = vld [vmem:[#allocation4 + $0x768] sm:$0xff] }
 0xa4c   :  { %7900 = vmatpush1.bf16.msra.mxu0 %v7730_v62  ;;  %7453 = vmatprep.subr.bf16.mxu1 %v7285_v59  ;;  %v7306_v62 = vld [vmem:[#allocation4 + $0x260] sm:$0xff] }
 0xa4d   :  { %7901 = vmatprep.subr.bf16.mxu0 %v7733_v56  ;;  %v7754_v59 = vld [vmem:[#allocation4 + $0x760] sm:$0xff]  ;;  %v7309_v56 = vld [vmem:[#allocation4 + $0x278] sm:$0xff] }
 0xa4f   :  { %7454 = vmatpush1.bf16.msra.mxu1 %v7284_v34  ;;  %v7757_v34 = vld [vmem:[#allocation4 + $0x778] sm:$0xff] }
 0xa50   :  { %7902 = vmatpush1.bf16.msra.mxu0 %v7732_v7  ;;  %7455 = vmatprep.subr.bf16.mxu1 %v7287_v50  ;;  %v7308_v7 = vld [vmem:[#allocation4 + $0x270] sm:$0xff] }
 0xa51   :  { %7903 = vmatprep.subr.bf16.mxu0 %v7735_v60  ;;  %v7756_v50 = vld [vmem:[#allocation4 + $0x770] sm:$0xff]  ;;  %v7311_v60 = vld [vmem:[#allocation4 + $0x288] sm:$0xff] }
 0xa53   :  { %7456 = vmatpush1.bf16.msra.mxu1 %v7286_v12  ;;  %v7759_v12 = vld [vmem:[#allocation4 + $0x788] sm:$0xff] }
 0xa54   :  { %7904 = vmatpush1.bf16.msra.mxu0 %v7734_v31  ;;  %7457 = vmatprep.subr.bf16.mxu1 %v7289_v17  ;;  %v7310_v31 = vld [vmem:[#allocation4 + $0x280] sm:$0xff] }
 0xa55   :  { %7905 = vmatprep.subr.bf16.mxu0 %v7737_v2  ;;  %v7758_v17 = vld [vmem:[#allocation4 + $0x780] sm:$0xff]  ;;  %v7313_v2 = vld [vmem:[#allocation4 + $0x298] sm:$0xff] }
 0xa57   :  { %7458 = vmatpush1.bf16.msra.mxu1 %v7288_v35  ;;  %v7761_v35 = vld [vmem:[#allocation4 + $0x798] sm:$0xff] }
 0xa58   :  { %7906 = vmatpush1.bf16.msra.mxu0 %v7736_v0  ;;  %7459 = vmatprep.subr.bf16.mxu1 %v7291_v51  ;;  %v7312_v0 = vld [vmem:[#allocation4 + $0x290] sm:$0xff] }
 0xa59   :  { %7907 = vmatprep.subr.bf16.mxu0 %v7739_v32  ;;  %v7760_v51 = vld [vmem:[#allocation4 + $0x790] sm:$0xff]  ;;  %v7315_v32 = vld [vmem:[#allocation4 + $0x2a8] sm:$0xff] }
 0xa5b   :  { %7460 = vmatpush1.bf16.msra.mxu1 %v7290_v46  ;;  %v7763_v46 = vld [vmem:[#allocation4 + $0x7a8] sm:$0xff] }
 0xa5c   :  { %7908 = vmatpush1.bf16.msra.mxu0 %v7738_v37  ;;  %7461 = vmatprep.subr.bf16.mxu1 %v7293_v39  ;;  %v7314_v37 = vld [vmem:[#allocation4 + $0x2a0] sm:$0xff] }
 0xa5d   :  { %7909 = vmatprep.subr.bf16.mxu0 %v7741_v21  ;;  %v7762_v39 = vld [vmem:[#allocation4 + $0x7a0] sm:$0xff]  ;;  %v7317_v21 = vld [vmem:[#allocation4 + $0x2b8] sm:$0xff] }
 0xa5f   :  { %7462 = vmatpush1.bf16.msra.mxu1 %v7292_v9  ;;  %v7764_v9 = vld [vmem:[#allocation4 + $0x7b0] sm:$0xff] }
 0xa60   :  { %7910 = vmatpush1.bf16.msra.mxu0 %v7740_v38  ;;  %7472 = vmatprep.subr.bf16.mxu1 %v7295_v27  ;;  %v7319_v38 = vld [vmem:[#allocation4 + $0x2c8] sm:$0xff] }
 0xa61   :  { %7920 = vmatprep.subr.bf16.mxu0 %v7743_v5  ;;  %v7767_v27 = vld [vmem:[#allocation4 + $0x7c8] sm:$0xff]  ;;  %v7318_v5 = vld [vmem:[#allocation4 + $0x2c0] sm:$0xff] }
 0xa62   :  { %7464 = vmatmul.mubr.bf16.vlgmr.msra.gmra.mrb[8].mxu1 %v7222_v28  ;;  %v7769_v28 = vld [vmem:[#allocation4 + $0x7d8] sm:$0xff] }
 0xa63   :  { %7912 = vmatmul.mubr.bf16.vlgmr.msra.gmra.mrb[172].mxu0 %v7670_v44  ;;  %7473 = vmatpush1.bf16.msra.mxu1 %v7294_v4  ;;  %v7320_v44 = vld [vmem:[#allocation4 + $0x2d0] sm:$0xff] }
 0xa64   :  { %7921 = vmatpush1.bf16.msra.mxu0 %v7742_v33  ;;  %7474 = vmatprep.subr.bf16.mxu1 %v7297_v25  ;;  %v7768_v4 = vld [vmem:[#allocation4 + $0x7d0] sm:$0xff]  ;;  %v7323_v33 = vld [vmem:[#allocation4 + $0x2e8] sm:$0xff] }
 0xa65   :  { %7922 = vmatprep.subr.bf16.mxu0 %v7745_v11  ;;  %7504 = vmatprep.mubr.bf16.mxu1 %v7225_v24  ;;  %v7771_v25 = vld [vmem:[#allocation4 + $0x7e8] sm:$0xff]  ;;  %v15505_v11 = vsub.s32 4, %v15114_v48  ;;  %v7322_v24 = vld [vmem:[#allocation4 + $0x2e0] sm:$0xff] }
 0xa66   :  { %7952 = vmatprep.mubr.bf16.mxu0 %v7673_v45  ;;  %v7770_v45 = vld [vmem:[#allocation4 + $0x7e0] sm:$0xff] }
 0xa67   :  { %7475 = vmatpush1.bf16.msra.mxu1 %v7296_v23  ;;  %v7325_v23 = vld [vmem:[#allocation4 + $0x2f8] sm:$0xff] }
 0xa68   :  { %7923 = vmatpush1.bf16.msra.mxu0 %v7744_v41  ;;  %7476 = vmatprep.subr.bf16.mxu1 %v7299_v55  ;;  %v7773_v41 = vld [vmem:[#allocation4 + $0x7f8] sm:$0xff]  ;;  %v15508_v55 = vsub.s32 7, %v15114_v48 }
 0xa69   :  { %7924 = vmatprep.subr.bf16.mxu0 %v7747_v14  ;;  %v7189_v14 = vrot.slane %v15468_v16, %v15505_v11 }
 0xa6b   :  { %7477 = vmatpush1.bf16.msra.mxu1 %v7298_v54  ;;  %v7637_v54 = vrot.slane %v15472_v63, %v15505_v11 }
 0xa6c   :  { %7925 = vmatpush1.bf16.msra.mxu0 %v7746_v15  ;;  %7478 = vmatprep.subr.bf16.mxu1 %v7301_v40  ;;  %v7324_v15 = vld [vmem:[#allocation4 + $0x2f0] sm:$0xff] }
 0xa6d   :  { %7926 = vmatprep.subr.bf16.mxu0 %v7749_v1  ;;  %v7772_v40 = vld [vmem:[#allocation4 + $0x7f0] sm:$0xff]  ;;  %v7327_v1 = vld [vmem:[#allocation4 + $0x308] sm:$0xff] }
 0xa6f   :  { %7479 = vmatpush1.bf16.msra.mxu1 %v7300_v58  ;;  %v7775_v58 = vld [vmem:[#allocation4 + $0x808] sm:$0xff] }
 0xa70   :  { %7927 = vmatpush1.bf16.msra.mxu0 %v7748_v30  ;;  %7480 = vmatprep.subr.bf16.mxu1 %v7303_v20  ;;  %v7201_v30 = vrot.slane %v15468_v16, %v15508_v55  ;;  %v7649_v20 = vrot.slane %v15472_v63, %v15508_v55  ;;  %v7328_v16 = vld [vmem:[#allocation4 + $0x310] sm:$0xff] }
 0xa71   :  { %7928 = vmatprep.subr.bf16.mxu0 %v7751_v3  ;;  %v7224_v3 = vpack.c.bf16 %v7189_v14, %v7189_v14  ;;  %v7776_v63 = vld [vmem:[#allocation4 + $0x810] sm:$0xff]  ;;  %v7797_v14 = vld [vmem:[#allocation4 + $0x8b8] sm:$0xff] }
 0xa73   :  { %7481 = vmatpush1.bf16.msra.mxu1 %v7302_v13  ;;  %v7672_v13 = vpack.c.bf16 %v7637_v54, %v7637_v54  ;;  %v7348_v54 = vld [vmem:[#allocation4 + $0x3b0] sm:$0xff] }
 0xa74   :  { %7929 = vmatpush1.bf16.msra.mxu0 %v7750_v18  ;;  %7482 = vmatprep.subr.bf16.mxu1 %v7305_v22  ;;  %v7326_v18 = vld [vmem:[#allocation4 + $0x300] sm:$0xff] }
 0xa75   :  { %7930 = vmatprep.subr.bf16.mxu0 %v7753_v57  ;;  %v7774_v22 = vld [vmem:[#allocation4 + $0x800] sm:$0xff]  ;;  %v7329_v57 = vld [vmem:[#allocation4 + $0x318] sm:$0xff] }
 0xa77   :  { %7483 = vmatpush1.bf16.msra.mxu1 %v7304_v52  ;;  %v7777_v52 = vld [vmem:[#allocation4 + $0x818] sm:$0xff] }
 0xa78   :  { %7931 = vmatpush1.bf16.msra.mxu0 %v7752_v29  ;;  %7484 = vmatprep.subr.bf16.mxu1 %v7307_v49  ;;  %v7227_v29 = vpack.c.bf16 %v7201_v30, %v7201_v30  ;;  %v7675_v49 = vpack.c.bf16 %v7649_v20, %v7649_v20  ;;  %v7798_v30 = vld [vmem:[#allocation4 + $0x8c0] sm:$0xff]  ;;  %v7353_v20 = vld [vmem:[#allocation4 + $0x3d8] sm:$0xff] }
 0xa79   :  { %7932 = vmatprep.subr.bf16.mxu0 %v7755_v43  ;;  %v7331_v43 = vld [vmem:[#allocation4 + $0x328] sm:$0xff] }
 0xa7b   :  { %7485 = vmatpush1.bf16.msra.mxu1 %v7306_v62  ;;  %v7779_v62 = vld [vmem:[#allocation4 + $0x828] sm:$0xff] }
 0xa7c   :  { %7933 = vmatpush1.bf16.msra.mxu0 %v7754_v59  ;;  %7486 = vmatprep.subr.bf16.mxu1 %v7309_v56  ;;  %v7330_v59 = vld [vmem:[#allocation4 + $0x320] sm:$0xff] }
 0xa7d   :  { %7934 = vmatprep.subr.bf16.mxu0 %v7757_v34  ;;  %v7778_v56 = vld [vmem:[#allocation4 + $0x820] sm:$0xff]  ;;  %v7333_v34 = vld [vmem:[#allocation4 + $0x338] sm:$0xff] }
 0xa7f   :  { %7487 = vmatpush1.bf16.msra.mxu1 %v7308_v7  ;;  %v7781_v7 = vld [vmem:[#allocation4 + $0x838] sm:$0xff] }
 0xa80   :  { %7935 = vmatpush1.bf16.msra.mxu0 %v7756_v50  ;;  %7488 = vmatprep.subr.bf16.mxu1 %v7311_v60  ;;  %v7332_v50 = vld [vmem:[#allocation4 + $0x330] sm:$0xff] }
 0xa81   :  { %7936 = vmatprep.subr.bf16.mxu0 %v7759_v12  ;;  %v7780_v60 = vld [vmem:[#allocation4 + $0x830] sm:$0xff]  ;;  %v7335_v12 = vld [vmem:[#allocation4 + $0x348] sm:$0xff] }
 0xa83   :  { %7489 = vmatpush1.bf16.msra.mxu1 %v7310_v31  ;;  %v7783_v31 = vld [vmem:[#allocation4 + $0x848] sm:$0xff] }
 0xa84   :  { %7937 = vmatpush1.bf16.msra.mxu0 %v7758_v17  ;;  %7490 = vmatprep.subr.bf16.mxu1 %v7313_v2  ;;  %v7334_v17 = vld [vmem:[#allocation4 + $0x340] sm:$0xff] }
 0xa85   :  { %7938 = vmatprep.subr.bf16.mxu0 %v7761_v35  ;;  %v7782_v2 = vld [vmem:[#allocation4 + $0x840] sm:$0xff]  ;;  %v7337_v35 = vld [vmem:[#allocation4 + $0x358] sm:$0xff] }
 0xa87   :  { %7491 = vmatpush1.bf16.msra.mxu1 %v7312_v0  ;;  %v7785_v0 = vld [vmem:[#allocation4 + $0x858] sm:$0xff] }
 0xa88   :  { %7939 = vmatpush1.bf16.msra.mxu0 %v7760_v51  ;;  %7492 = vmatprep.subr.bf16.mxu1 %v7315_v32  ;;  %v7336_v51 = vld [vmem:[#allocation4 + $0x350] sm:$0xff] }
 0xa89   :  { %7940 = vmatprep.subr.bf16.mxu0 %v7763_v46  ;;  %v7784_v32 = vld [vmem:[#allocation4 + $0x850] sm:$0xff]  ;;  %v7339_v46 = vld [vmem:[#allocation4 + $0x368] sm:$0xff] }
 0xa8b   :  { %7493 = vmatpush1.bf16.msra.mxu1 %v7314_v37  ;;  %v7787_v37 = vld [vmem:[#allocation4 + $0x868] sm:$0xff] }
 0xa8c   :  { %7941 = vmatpush1.bf16.msra.mxu0 %v7762_v39  ;;  %7494 = vmatprep.subr.bf16.mxu1 %v7317_v21  ;;  %v7338_v39 = vld [vmem:[#allocation4 + $0x360] sm:$0xff] }
 0xa8d   :  { %7942 = vmatprep.subr.bf16.mxu0 %v7765_v42  ;;  %v7786_v21 = vld [vmem:[#allocation4 + $0x860] sm:$0xff]  ;;  %v7341_v42 = vld [vmem:[#allocation4 + $0x378] sm:$0xff] }
 0xa8f   :  { %7495 = vmatpush1.bf16.msra.mxu1 %v7316_v19  ;;  %v7789_v19 = vld [vmem:[#allocation4 + $0x878] sm:$0xff] }
 0xa90   :  { %7943 = vmatpush1.bf16.msra.mxu0 %v7764_v9  ;;  %7496 = vmatprep.subr.bf16.mxu1 %v7319_v38  ;;  %v7340_v9 = vld [vmem:[#allocation4 + $0x370] sm:$0xff] }
 0xa91   :  { %7944 = vmatprep.subr.bf16.mxu0 %v7767_v27  ;;  %v7788_v38 = vld [vmem:[#allocation4 + $0x870] sm:$0xff]  ;;  %v7343_v27 = vld [vmem:[#allocation4 + $0x388] sm:$0xff] }
 0xa93   :  { %7497 = vmatpush1.bf16.msra.mxu1 %v7318_v5  ;;  %v7791_v5 = vld [vmem:[#allocation4 + $0x888] sm:$0xff] }
 0xa94   :  { %7945 = vmatpush1.bf16.msra.mxu0 %v7766_v10  ;;  %7498 = vmatprep.subr.bf16.mxu1 %v7321_v8  ;;  %v7342_v10 = vld [vmem:[#allocation4 + $0x380] sm:$0xff] }
 0xa95   :  { %7946 = vmatprep.subr.bf16.mxu0 %v7769_v28  ;;  %v7790_v8 = vld [vmem:[#allocation4 + $0x880] sm:$0xff]  ;;  %v7345_v28 = vld [vmem:[#allocation4 + $0x398] sm:$0xff] }
 0xa97   :  { %7499 = vmatpush1.bf16.msra.mxu1 %v7320_v44  ;;  %v7793_v44 = vld [vmem:[#allocation4 + $0x898] sm:$0xff] }
 0xa98   :  { %7947 = vmatpush1.bf16.msra.mxu0 %v7768_v4  ;;  %7500 = vmatprep.subr.bf16.mxu1 %v7323_v33  ;;  %v7344_v4 = vld [vmem:[#allocation4 + $0x390] sm:$0xff] }
 0xa99   :  { %7948 = vmatprep.subr.bf16.mxu0 %v7771_v25  ;;  %v7792_v33 = vld [vmem:[#allocation4 + $0x890] sm:$0xff]  ;;  %v7347_v25 = vld [vmem:[#allocation4 + $0x3a8] sm:$0xff] }
 0xa9b   :  { %7501 = vmatpush1.bf16.msra.mxu1 %v7322_v24  ;;  %v7795_v24 = vld [vmem:[#allocation4 + $0x8a8] sm:$0xff] }
 0xa9c   :  { %7949 = vmatpush1.bf16.msra.mxu0 %v7770_v45  ;;  %7502 = vmatprep.subr.bf16.mxu1 %v7325_v23  ;;  %v7346_v45 = vld [vmem:[#allocation4 + $0x3a0] sm:$0xff] }
 0xa9d   :  { %7950 = vmatprep.subr.bf16.mxu0 %v7773_v41  ;;  %v7794_v23 = vld [vmem:[#allocation4 + $0x8a0] sm:$0xff]  ;;  %v7349_v41 = vld [vmem:[#allocation4 + $0x3b8] sm:$0xff] }
 0xa9f   :  { %7503 = vmatpush1.bf16.msra.mxu1 %v7324_v15  ;;  %v7796_v15 = vld [vmem:[#allocation4 + $0x8b0] sm:$0xff] }
 0xaa0   :  { %7951 = vmatpush1.bf16.msra.mxu0 %v7772_v40  ;;  %7513 = vmatprep.subr.bf16.mxu1 %v7327_v1  ;;  %v7351_v40 = vld [vmem:[#allocation4 + $0x3c8] sm:$0xff] }
 0xaa1   :  { %7961 = vmatprep.subr.bf16.mxu0 %v7775_v58  ;;  %v7799_v1 = vld [vmem:[#allocation4 + $0x8c8] sm:$0xff]  ;;  %v7350_v58 = vld [vmem:[#allocation4 + $0x3c0] sm:$0xff] }
 0xaa2   :  { %7505 = vmatmul.mubr.bf16.vlgmr.msra.gmra.mrb[8].mxu1 %v7224_v3  ;;  %v7801_v3 = vld [vmem:[#allocation4 + $0x8d8] sm:$0xff] }
 0xaa3   :  { %7953 = vmatmul.mubr.bf16.vlgmr.msra.gmra.mrb[172].mxu0 %v7672_v13  ;;  %7514 = vmatpush1.bf16.msra.mxu1 %v7326_v18  ;;  %v7352_v13 = vld [vmem:[#allocation4 + $0x3d0] sm:$0xff] }
 0xaa4   :  { %7962 = vmatpush1.bf16.msra.mxu0 %v7774_v22  ;;  %7515 = vmatprep.subr.bf16.mxu1 %v7329_v57  ;;  %v7800_v18 = vld [vmem:[#allocation4 + $0x8d0] sm:$0xff]  ;;  %v7355_v22 = vld [vmem:[#allocation4 + $0x3e8] sm:$0xff] }
 0xaa5   :  { %7963 = vmatprep.subr.bf16.mxu0 %v7777_v52  ;;  %7545 = vmatprep.mubr.bf16.mxu1 %v7227_v29  ;;  %v7803_v57 = vld [vmem:[#allocation4 + $0x8e8] sm:$0xff]  ;;  %v15519_v52 = vsub.s32 6, %v15114_v48  ;;  %v7354_v29 = vld [vmem:[#allocation4 + $0x3e0] sm:$0xff]  ;;  %v7356_v48 = vld [vmem:[#allocation4 + $0x3f0] sm:$0xff] }
 0xaa6   :  { %7993 = vmatprep.mubr.bf16.mxu0 %v7675_v49  ;;  %v7802_v49 = vld [vmem:[#allocation4 + $0x8e0] sm:$0xff] }
 0xaa7   :  { %7516 = vmatpush1.bf16.msra.mxu1 %v7328_v16  ;;  %v7357_v16 = vld [vmem:[#allocation4 + $0x3f8] sm:$0xff] }
 0xaa8   :  { %7964 = vmatpush1.bf16.msra.mxu0 %v7776_v63  ;;  %7517 = vmatprep.subr.bf16.mxu1 %v7331_v43  ;;  %v7805_v63 = vld [vmem:[#allocation4 + $0x8f8] sm:$0xff]  ;;  %v12129_v43 = vld [vmem:[#allocation3] sm:$0xff] }
 0xaa9   :  { %7965 = vmatprep.subr.bf16.mxu0 %v7779_v62  ;;  %v7197_v62 = vrot.slane %v12129_v43, %v15519_v52  ;;  %v7827_v43 = vld [vmem:[#allocation4 + $0x9a8] sm:$0xff] }
 0xaab   :  { %7518 = vmatpush1.bf16.msra.mxu1 %v7330_v59  ;;  %v12130_v59 = vld [vmem:[#allocation3 + $0xa] sm:$0xff] }
 0xaac   :  { %7966 = vmatpush1.bf16.msra.mxu0 %v7778_v56  ;;  %7519 = vmatprep.subr.bf16.mxu1 %v7333_v34  ;;  %v7645_v56 = vrot.slane %v12130_v59, %v15519_v52  ;;  %v15523_v34 = vld [vmem:[#allocation3 + $0x8] sm:$0x3]  ;;  %v7826_v59 = vld [vmem:[#allocation4 + $0x9a0] sm:$0xff] }
 0xaad   :  { %7967 = vmatprep.subr.bf16.mxu0 %v7781_v7  ;;  %v15525_v7 = vld [vmem:[#allocation3 + $0x12] sm:$0x3] }
 0xaaf   :  { %7520 = vmatpush1.bf16.msra.mxu1 %v7332_v50  ;;  %v7804_v50 = vld [vmem:[#allocation4 + $0x8f0] sm:$0xff] }
 0xab0   :  { %7968 = vmatpush1.bf16.msra.mxu0 %v7780_v60  ;;  %7521 = vmatprep.subr.bf16.mxu1 %v7335_v12  ;;  %v7359_v60 = vld [vmem:[#allocation4 + $0x408] sm:$0xff] }
 0xab1   :  { %7969 = vmatprep.subr.bf16.mxu0 %v7783_v31  ;;  %v7807_v12 = vld [vmem:[#allocation4 + $0x908] sm:$0xff]  ;;  %v7209_v31 = vrot.slane %v15523_v34, %v15466_v61 }
 0xab3   :  { %7522 = vmatpush1.bf16.msra.mxu1 %v7334_v17  ;;  %v7657_v17 = vrot.slane %v15525_v7, %v15466_v61 }
 0xab4   :  { %7970 = vmatpush1.bf16.msra.mxu0 %v7782_v2  ;;  %7523 = vmatprep.subr.bf16.mxu1 %v7337_v35  ;;  %v7226_v2 = vpack.c.bf16 %v7197_v62, %v7197_v62  ;;  %v7674_v35 = vpack.c.bf16 %v7645_v56, %v7645_v56  ;;  %v7378_v62 = vld [vmem:[#allocation4 + $0x4a0] sm:$0xff]  ;;  %v7381_v56 = vld [vmem:[#allocation4 + $0x4b8] sm:$0xff] }
 0xab5   :  { %7971 = vmatprep.subr.bf16.mxu0 %v7785_v0  ;;  %v7358_v0 = vld [vmem:[#allocation4 + $0x400] sm:$0xff] }
 0xab7   :  { %7524 = vmatpush1.bf16.msra.mxu1 %v7336_v51  ;;  %v7806_v51 = vld [vmem:[#allocation4 + $0x900] sm:$0xff] }
 0xab8   :  { %7972 = vmatpush1.bf16.msra.mxu0 %v7784_v32  ;;  %7525 = vmatprep.subr.bf16.mxu1 %v7339_v46  ;;  %v7361_v32 = vld [vmem:[#allocation4 + $0x418] sm:$0xff] }
 0xab9   :  { %7973 = vmatprep.subr.bf16.mxu0 %v7787_v37  ;;  %v7809_v46 = vld [vmem:[#allocation4 + $0x918] sm:$0xff]  ;;  %v7229_v37 = vpack.c.bf16 %v7209_v31, %v7209_v31  ;;  %v7831_v31 = vld [vmem:[#allocation4 + $0x9c8] sm:$0xff] }
 0xabb   :  { %7526 = vmatpush1.bf16.msra.mxu1 %v7338_v39  ;;  %v7677_v39 = vpack.c.bf16 %v7657_v17, %v7657_v17  ;;  %v7382_v17 = vld [vmem:[#allocation4 + $0x4c0] sm:$0xff] }
 0xabc   :  { %7974 = vmatpush1.bf16.msra.mxu0 %v7786_v21  ;;  %7527 = vmatprep.subr.bf16.mxu1 %v7341_v42  ;;  %v7360_v21 = vld [vmem:[#allocation4 + $0x410] sm:$0xff] }
 0xabd   :  { %7975 = vmatprep.subr.bf16.mxu0 %v7789_v19  ;;  %v7808_v42 = vld [vmem:[#allocation4 + $0x910] sm:$0xff]  ;;  %v7363_v19 = vld [vmem:[#allocation4 + $0x428] sm:$0xff] }
 0xabf   :  { %7528 = vmatpush1.bf16.msra.mxu1 %v7340_v9  ;;  %v7811_v9 = vld [vmem:[#allocation4 + $0x928] sm:$0xff] }
 0xac0   :  { %7976 = vmatpush1.bf16.msra.mxu0 %v7788_v38  ;;  %7529 = vmatprep.subr.bf16.mxu1 %v7343_v27  ;;  %v7362_v38 = vld [vmem:[#allocation4 + $0x420] sm:$0xff] }
 0xac1   :  { %7977 = vmatprep.subr.bf16.mxu0 %v7791_v5  ;;  %v7810_v27 = vld [vmem:[#allocation4 + $0x920] sm:$0xff]  ;;  %v7365_v5 = vld [vmem:[#allocation4 + $0x438] sm:$0xff] }
 0xac3   :  { %7530 = vmatpush1.bf16.msra.mxu1 %v7342_v10  ;;  %v7813_v10 = vld [vmem:[#allocation4 + $0x938] sm:$0xff] }
 0xac4   :  { %7978 = vmatpush1.bf16.msra.mxu0 %v7790_v8  ;;  %7531 = vmatprep.subr.bf16.mxu1 %v7345_v28  ;;  %v7364_v8 = vld [vmem:[#allocation4 + $0x430] sm:$0xff] }
 0xac5   :  { %7979 = vmatprep.subr.bf16.mxu0 %v7793_v44  ;;  %v7812_v28 = vld [vmem:[#allocation4 + $0x930] sm:$0xff]  ;;  %v7367_v44 = vld [vmem:[#allocation4 + $0x448] sm:$0xff] }
 0xac7   :  { %7532 = vmatpush1.bf16.msra.mxu1 %v7344_v4  ;;  %v7815_v4 = vld [vmem:[#allocation4 + $0x948] sm:$0xff] }
 0xac8   :  { %7980 = vmatpush1.bf16.msra.mxu0 %v7792_v33  ;;  %7533 = vmatprep.subr.bf16.mxu1 %v7347_v25  ;;  %v7366_v33 = vld [vmem:[#allocation4 + $0x440] sm:$0xff] }
 0xac9   :  { %7981 = vmatprep.subr.bf16.mxu0 %v7795_v24  ;;  %v7814_v25 = vld [vmem:[#allocation4 + $0x940] sm:$0xff]  ;;  %v7369_v24 = vld [vmem:[#allocation4 + $0x458] sm:$0xff] }
 0xacb   :  { %7534 = vmatpush1.bf16.msra.mxu1 %v7346_v45  ;;  %v7817_v45 = vld [vmem:[#allocation4 + $0x958] sm:$0xff] }
 0xacc   :  { %7982 = vmatpush1.bf16.msra.mxu0 %v7794_v23  ;;  %7535 = vmatprep.subr.bf16.mxu1 %v7349_v41  ;;  %v7368_v23 = vld [vmem:[#allocation4 + $0x450] sm:$0xff] }
 0xacd   :  { %7983 = vmatprep.subr.bf16.mxu0 %v7797_v14  ;;  %v7816_v41 = vld [vmem:[#allocation4 + $0x950] sm:$0xff]  ;;  %v7371_v14 = vld [vmem:[#allocation4 + $0x468] sm:$0xff] }
 0xacf   :  { %7536 = vmatpush1.bf16.msra.mxu1 %v7348_v54  ;;  %v7819_v54 = vld [vmem:[#allocation4 + $0x968] sm:$0xff] }
 0xad0   :  { %7984 = vmatpush1.bf16.msra.mxu0 %v7796_v15  ;;  %7537 = vmatprep.subr.bf16.mxu1 %v7351_v40  ;;  %v7370_v15 = vld [vmem:[#allocation4 + $0x460] sm:$0xff] }
 0xad1   :  { %7985 = vmatprep.subr.bf16.mxu0 %v7799_v1  ;;  %v7818_v40 = vld [vmem:[#allocation4 + $0x960] sm:$0xff]  ;;  %v7373_v1 = vld [vmem:[#allocation4 + $0x478] sm:$0xff] }
 0xad3   :  { %7538 = vmatpush1.bf16.msra.mxu1 %v7350_v58  ;;  %v7821_v58 = vld [vmem:[#allocation4 + $0x978] sm:$0xff] }
 0xad4   :  { %7986 = vmatpush1.bf16.msra.mxu0 %v7798_v30  ;;  %7539 = vmatprep.subr.bf16.mxu1 %v7353_v20  ;;  %v7372_v30 = vld [vmem:[#allocation4 + $0x470] sm:$0xff] }
 0xad5   :  { %7987 = vmatprep.subr.bf16.mxu0 %v7801_v3  ;;  %v7820_v20 = vld [vmem:[#allocation4 + $0x970] sm:$0xff]  ;;  %v7375_v3 = vld [vmem:[#allocation4 + $0x488] sm:$0xff] }
 0xad7   :  { %7540 = vmatpush1.bf16.msra.mxu1 %v7352_v13  ;;  %v7823_v13 = vld [vmem:[#allocation4 + $0x988] sm:$0xff] }
 0xad8   :  { %7988 = vmatpush1.bf16.msra.mxu0 %v7800_v18  ;;  %7541 = vmatprep.subr.bf16.mxu1 %v7355_v22  ;;  %v7374_v18 = vld [vmem:[#allocation4 + $0x480] sm:$0xff] }
 0xad9   :  { %7989 = vmatprep.subr.bf16.mxu0 %v7803_v57  ;;  %v7822_v22 = vld [vmem:[#allocation4 + $0x980] sm:$0xff]  ;;  %v7377_v57 = vld [vmem:[#allocation4 + $0x498] sm:$0xff] }
 0xadb   :  { %7542 = vmatpush1.bf16.msra.mxu1 %v7354_v29  ;;  %v7825_v29 = vld [vmem:[#allocation4 + $0x998] sm:$0xff] }
 0xadc   :  { %7990 = vmatpush1.bf16.msra.mxu0 %v7802_v49  ;;  %7543 = vmatprep.subr.bf16.mxu1 %v7357_v16  ;;  %v7376_v49 = vld [vmem:[#allocation4 + $0x490] sm:$0xff] }
 0xadd   :  { %7991 = vmatprep.subr.bf16.mxu0 %v7805_v63  ;;  %v7824_v16 = vld [vmem:[#allocation4 + $0x990] sm:$0xff]  ;;  %v7379_v63 = vld [vmem:[#allocation4 + $0x4a8] sm:$0xff] }
 0xadf   :  { %7544 = vmatpush1.bf16.msra.mxu1 %v7356_v48  ;;  %v7829_v48 = vld [vmem:[#allocation4 + $0x9b8] sm:$0xff] }
 0xae0   :  { %7992 = vmatpush1.bf16.msra.mxu0 %v7804_v50  ;;  %7554 = vmatprep.subr.bf16.mxu1 %v7359_v60  ;;  %v7380_v50 = vld [vmem:[#allocation4 + $0x4b0] sm:$0xff] }
 0xae1   :  { %8002 = vmatprep.subr.bf16.mxu0 %v7807_v12  ;;  %v7828_v60 = vld [vmem:[#allocation4 + $0x9b0] sm:$0xff]  ;;  %v7383_v12 = vld [vmem:[#allocation4 + $0x4c8] sm:$0xff] }
 0xae2   :  { %7546 = vmatmul.mubr.bf16.vlgmr.msra.gmra.mrb[8].mxu1 %v7226_v2  ;;  %v7830_v2 = vld [vmem:[#allocation4 + $0x9c0] sm:$0xff] }
 0xae3   :  { %7994 = vmatmul.mubr.bf16.vlgmr.msra.gmra.mrb[172].mxu0 %v7674_v35  ;;  %7555 = vmatpush1.bf16.msra.mxu1 %v7358_v0  ;;  %v7385_v35 = vld [vmem:[#allocation4 + $0x4d8] sm:$0xff] }
 0xae4   :  { %8003 = vmatpush1.bf16.msra.mxu0 %v7806_v51  ;;  %7556 = vmatprep.subr.bf16.mxu1 %v7361_v32  ;;  %v7833_v0 = vld [vmem:[#allocation4 + $0x9d8] sm:$0xff]  ;;  %v7384_v51 = vld [vmem:[#allocation4 + $0x4d0] sm:$0xff] }
 0xae5   :  { %8004 = vmatprep.subr.bf16.mxu0 %v7809_v46  ;;  %7586 = vmatprep.mubr.bf16.mxu1 %v7229_v37  ;;  %v7832_v32 = vld [vmem:[#allocation4 + $0x9d0] sm:$0xff]  ;;  %v7387_v46 = vld [vmem:[#allocation4 + $0x4e8] sm:$0xff] }
 0xae6   :  { %8034 = vmatprep.mubr.bf16.mxu0 %v7677_v39  ;;  %v7835_v37 = vld [vmem:[#allocation4 + $0x9e8] sm:$0xff]  ;;  %v7386_v39 = vld [vmem:[#allocation4 + $0x4e0] sm:$0xff] }
 0xae7   :  { %7557 = vmatpush1.bf16.msra.mxu1 %v7360_v21  ;;  %v7834_v21 = vld [vmem:[#allocation4 + $0x9e0] sm:$0xff] }
 0xae8   :  { %8005 = vmatpush1.bf16.msra.mxu0 %v7808_v42  ;;  %7558 = vmatprep.subr.bf16.mxu1 %v7363_v19  ;;  %v7389_v42 = vld [vmem:[#allocation4 + $0x4f8] sm:$0xff] }
 0xae9   :  { %8006 = vmatprep.subr.bf16.mxu0 %v7811_v9  ;;  %v7837_v19 = vld [vmem:[#allocation4 + $0x9f8] sm:$0xff]  ;;  %v7205_v9 = vrot.slane %v15523_v34, %v15477_v53 }
 0xaeb   :  { %7559 = vmatpush1.bf16.msra.mxu1 %v7362_v38  ;;  %v7653_v38 = vrot.slane %v15525_v7, %v15477_v53 }
 0xaec   :  { %8007 = vmatpush1.bf16.msra.mxu0 %v7810_v27  ;;  %7560 = vmatprep.subr.bf16.mxu1 %v7365_v5  ;;  %v15535_v27 = vld [vmem:[#allocation3 + $0x14] sm:$0xff]  ;;  %v15537_v5 = vld [vmem:[#allocation3 + $0x1e] sm:$0xff] }
 0xaed   :  { %8008 = vmatprep.subr.bf16.mxu0 %v7813_v10  ;;  %v7388_v10 = vld [vmem:[#allocation4 + $0x4f0] sm:$0xff]  ;;  %v8521_v34 = vrot.slane %v15537_v5, %v15466_v61  ;;  %v7676_v7 = vpack.c.bf16 %v7653_v38, %v7653_v38  ;;  %v8149_v38 = vld [vmem:[#allocation4 + $0xab8] sm:$0xff] }
 0xaef   :  { %7561 = vmatpush1.bf16.msra.mxu1 %v7364_v8  ;;  %v7836_v8 = vld [vmem:[#allocation4 + $0x9f0] sm:$0xff] }
 0xaf0   :  { %8009 = vmatpush1.bf16.msra.mxu0 %v7812_v28  ;;  %7562 = vmatprep.subr.bf16.mxu1 %v7367_v44  ;;  %v8127_v28 = vld [vmem:[#allocation4 + $0xa08] sm:$0xff] }
 0xaf1   :  { %8010 = vmatprep.subr.bf16.mxu0 %v7815_v4  ;;  %v8575_v44 = vld [vmem:[#allocation4 + $0xf08] sm:$0xff]  ;;  %v8073_v4 = vrot.slane %v15535_v27, %v15466_v61 }
 0xaf3   :  { %7563 = vmatpush1.bf16.msra.mxu1 %v7366_v33  ;;  %v7228_v33 = vpack.c.bf16 %v7205_v9, %v7205_v9  ;;  %v8594_v9 = vld [vmem:[#allocation4 + $0xfa0] sm:$0xff] }
 0xaf4   :  { %8011 = vmatpush1.bf16.msra.mxu0 %v7814_v25  ;;  %7564 = vmatprep.subr.bf16.mxu1 %v7369_v24  ;;  %v8126_v25 = vld [vmem:[#allocation4 + $0xa00] sm:$0xff] }
 0xaf5   :  { %8012 = vmatprep.subr.bf16.mxu0 %v7817_v45  ;;  %v8574_v24 = vld [vmem:[#allocation4 + $0xf00] sm:$0xff]  ;;  %v8129_v45 = vld [vmem:[#allocation4 + $0xa18] sm:$0xff] }
 0xaf7   :  { %7565 = vmatpush1.bf16.msra.mxu1 %v7368_v23  ;;  %v8577_v23 = vld [vmem:[#allocation4 + $0xf18] sm:$0xff] }
 0xaf8   :  { %8013 = vmatpush1.bf16.msra.mxu0 %v7816_v41  ;;  %7566 = vmatprep.subr.bf16.mxu1 %v7371_v14  ;;  %v8117_v41 = vpack.c.bf16 %v8073_v4, %v8073_v4  ;;  %v8565_v14 = vpack.c.bf16 %v8521_v34, %v8521_v34  ;;  %v8599_v4 = vld [vmem:[#allocation4 + $0xfc8] sm:$0xff]  ;;  %v8150_v34 = vld [vmem:[#allocation4 + $0xac0] sm:$0xff] }
 0xaf9   :  { %8014 = vmatprep.subr.bf16.mxu0 %v7819_v54  ;;  %v8128_v54 = vld [vmem:[#allocation4 + $0xa10] sm:$0xff] }
 0xafb   :  { %7567 = vmatpush1.bf16.msra.mxu1 %v7370_v15  ;;  %v8576_v15 = vld [vmem:[#allocation4 + $0xf10] sm:$0xff] }
 0xafc   :  { %8015 = vmatpush1.bf16.msra.mxu0 %v7818_v40  ;;  %7568 = vmatprep.subr.bf16.mxu1 %v7373_v1  ;;  %v8131_v40 = vld [vmem:[#allocation4 + $0xa28] sm:$0xff] }
 0xafd   :  { %8016 = vmatprep.subr.bf16.mxu0 %v7821_v58  ;;  %v8579_v1 = vld [vmem:[#allocation4 + $0xf28] sm:$0xff]  ;;  %v8130_v58 = vld [vmem:[#allocation4 + $0xa20] sm:$0xff] }
 0xaff   :  { %7569 = vmatpush1.bf16.msra.mxu1 %v7372_v30  ;;  %v8578_v30 = vld [vmem:[#allocation4 + $0xf20] sm:$0xff] }
 0xb00   :  { %8017 = vmatpush1.bf16.msra.mxu0 %v7820_v20  ;;  %7570 = vmatprep.subr.bf16.mxu1 %v7375_v3  ;;  %v8133_v20 = vld [vmem:[#allocation4 + $0xa38] sm:$0xff] }
 0xb01   :  { %8018 = vmatprep.subr.bf16.mxu0 %v7823_v13  ;;  %v8581_v3 = vld [vmem:[#allocation4 + $0xf38] sm:$0xff]  ;;  %v8132_v13 = vld [vmem:[#allocation4 + $0xa30] sm:$0xff] }
 0xb03   :  { %7571 = vmatpush1.bf16.msra.mxu1 %v7374_v18  ;;  %v8580_v18 = vld [vmem:[#allocation4 + $0xf30] sm:$0xff] }
 0xb04   :  { %8019 = vmatpush1.bf16.msra.mxu0 %v7822_v22  ;;  %7572 = vmatprep.subr.bf16.mxu1 %v7377_v57  ;;  %v8135_v22 = vld [vmem:[#allocation4 + $0xa48] sm:$0xff] }
 0xb05   :  { %8020 = vmatprep.subr.bf16.mxu0 %v7825_v29  ;;  %v8583_v57 = vld [vmem:[#allocation4 + $0xf48] sm:$0xff]  ;;  %v8134_v29 = vld [vmem:[#allocation4 + $0xa40] sm:$0xff] }
 0xb07   :  { %7573 = vmatpush1.bf16.msra.mxu1 %v7376_v49  ;;  %v8582_v49 = vld [vmem:[#allocation4 + $0xf40] sm:$0xff] }
 0xb08   :  { %8021 = vmatpush1.bf16.msra.mxu0 %v7824_v16  ;;  %7574 = vmatprep.subr.bf16.mxu1 %v7379_v63  ;;  %v8137_v16 = vld [vmem:[#allocation4 + $0xa58] sm:$0xff] }
 0xb09   :  { %8022 = vmatprep.subr.bf16.mxu0 %v7827_v43  ;;  %v8585_v63 = vld [vmem:[#allocation4 + $0xf58] sm:$0xff]  ;;  %v8136_v43 = vld [vmem:[#allocation4 + $0xa50] sm:$0xff] }
 0xb0b   :  { %7575 = vmatpush1.bf16.msra.mxu1 %v7378_v62  ;;  %v8584_v62 = vld [vmem:[#allocation4 + $0xf50] sm:$0xff] }
 0xb0c   :  { %8023 = vmatpush1.bf16.msra.mxu0 %v7826_v59  ;;  %7576 = vmatprep.subr.bf16.mxu1 %v7381_v56  ;;  %v8139_v59 = vld [vmem:[#allocation4 + $0xa68] sm:$0xff] }
 0xb0d   :  { %8024 = vmatprep.subr.bf16.mxu0 %v7829_v48  ;;  %v8587_v56 = vld [vmem:[#allocation4 + $0xf68] sm:$0xff]  ;;  %v8138_v48 = vld [vmem:[#allocation4 + $0xa60] sm:$0xff] }
 0xb0f   :  { %7577 = vmatpush1.bf16.msra.mxu1 %v7380_v50  ;;  %v8586_v50 = vld [vmem:[#allocation4 + $0xf60] sm:$0xff] }
 0xb10   :  { %8025 = vmatpush1.bf16.msra.mxu0 %v7828_v60  ;;  %7578 = vmatprep.subr.bf16.mxu1 %v7383_v12  ;;  %v8141_v60 = vld [vmem:[#allocation4 + $0xa78] sm:$0xff] }
 0xb11   :  { %8026 = vmatprep.subr.bf16.mxu0 %v7831_v31  ;;  %v8589_v12 = vld [vmem:[#allocation4 + $0xf78] sm:$0xff]  ;;  %v8140_v31 = vld [vmem:[#allocation4 + $0xa70] sm:$0xff] }
 0xb13   :  { %7579 = vmatpush1.bf16.msra.mxu1 %v7382_v17  ;;  %v8588_v17 = vld [vmem:[#allocation4 + $0xf70] sm:$0xff] }
 0xb14   :  { %8027 = vmatpush1.bf16.msra.mxu0 %v7830_v2  ;;  %7580 = vmatprep.subr.bf16.mxu1 %v7385_v35  ;;  %v8143_v2 = vld [vmem:[#allocation4 + $0xa88] sm:$0xff] }
 0xb15   :  { %8028 = vmatprep.subr.bf16.mxu0 %v7833_v0  ;;  %v8591_v35 = vld [vmem:[#allocation4 + $0xf88] sm:$0xff]  ;;  %v8142_v0 = vld [vmem:[#allocation4 + $0xa80] sm:$0xff] }
 0xb17   :  { %7581 = vmatpush1.bf16.msra.mxu1 %v7384_v51  ;;  %v8590_v51 = vld [vmem:[#allocation4 + $0xf80] sm:$0xff] }
 0xb18   :  { %8029 = vmatpush1.bf16.msra.mxu0 %v7832_v32  ;;  %7582 = vmatprep.subr.bf16.mxu1 %v7387_v46  ;;  %v8145_v32 = vld [vmem:[#allocation4 + $0xa98] sm:$0xff] }
 0xb19   :  { %8030 = vmatprep.subr.bf16.mxu0 %v7835_v37  ;;  %v8593_v46 = vld [vmem:[#allocation4 + $0xf98] sm:$0xff]  ;;  %v8144_v37 = vld [vmem:[#allocation4 + $0xa90] sm:$0xff] }
 0xb1b   :  { %7583 = vmatpush1.bf16.msra.mxu1 %v7386_v39  ;;  %v8592_v39 = vld [vmem:[#allocation4 + $0xf90] sm:$0xff] }
 0xb1c   :  { %8031 = vmatpush1.bf16.msra.mxu0 %v7834_v21  ;;  %7584 = vmatprep.subr.bf16.mxu1 %v7389_v42  ;;  %v8147_v21 = vld [vmem:[#allocation4 + $0xaa8] sm:$0xff] }
 0xb1d   :  { %8032 = vmatprep.subr.bf16.mxu0 %v7837_v19  ;;  %v8595_v42 = vld [vmem:[#allocation4 + $0xfa8] sm:$0xff]  ;;  %v8146_v19 = vld [vmem:[#allocation4 + $0xaa0] sm:$0xff] }
 0xb1f   :  { %7585 = vmatpush1.bf16.msra.mxu1 %v7388_v10  ;;  %v8597_v10 = vld [vmem:[#allocation4 + $0xfb8] sm:$0xff] }
 0xb20   :  { %8033 = vmatpush1.bf16.msra.mxu0 %v7836_v8  ;;  %8286 = vmatprep.subr.bf16.mxu1 %v8127_v28  ;;  %v8148_v8 = vld [vmem:[#allocation4 + $0xab0] sm:$0xff] }
 0xb21   :  { %8734 = vmatprep.subr.bf16.mxu0 %v8575_v44  ;;  %v8596_v28 = vld [vmem:[#allocation4 + $0xfb0] sm:$0xff]  ;;  %v8151_v44 = vld [vmem:[#allocation4 + $0xac8] sm:$0xff] }
 0xb22   :  { %7587 = vmatmul.mubr.bf16.vlgmr.msra.gmra.mrb[8].mxu1 %v7228_v33  ;;  %v8598_v33 = vld [vmem:[#allocation4 + $0xfc0] sm:$0xff] }
 0xb23   :  { %8035 = vmatmul.mubr.bf16.vlgmr.msra.gmra.mrb[172].mxu0 %v7676_v7  ;;  %8287 = vmatpush1.bf16.msra.mxu1 %v8126_v25  ;;  %v8153_v7 = vld [vmem:[#allocation4 + $0xad8] sm:$0xff] }
 0xb24   :  { %8735 = vmatpush1.bf16.msra.mxu0 %v8574_v24  ;;  %8288 = vmatprep.subr.bf16.mxu1 %v8129_v45  ;;  %v8601_v25 = vld [vmem:[#allocation4 + $0xfd8] sm:$0xff]  ;;  %v8152_v24 = vld [vmem:[#allocation4 + $0xad0] sm:$0xff] }
 0xb25   :  { %8736 = vmatprep.subr.bf16.mxu0 %v8577_v23  ;;  %8318 = vmatprep.mubr.bf16.mxu1 %v8117_v41  ;;  %v8600_v45 = vld [vmem:[#allocation4 + $0xfd0] sm:$0xff]  ;;  %v8155_v23 = vld [vmem:[#allocation4 + $0xae8] sm:$0xff] }
 0xb26   :  { %8766 = vmatprep.mubr.bf16.mxu0 %v8565_v14  ;;  %v8603_v41 = vld [vmem:[#allocation4 + $0xfe8] sm:$0xff]  ;;  %v8154_v14 = vld [vmem:[#allocation4 + $0xae0] sm:$0xff] }
 0xb27   :  { %8289 = vmatpush1.bf16.msra.mxu1 %v8128_v54  ;;  %v8602_v54 = vld [vmem:[#allocation4 + $0xfe0] sm:$0xff] }
 0xb28   :  { %8737 = vmatpush1.bf16.msra.mxu0 %v8576_v15  ;;  %8290 = vmatprep.subr.bf16.mxu1 %v8131_v40  ;;  %v8157_v15 = vld [vmem:[#allocation4 + $0xaf8] sm:$0xff] }
 0xb29   :  { %8738 = vmatprep.subr.bf16.mxu0 %v8579_v1  ;;  %v8605_v40 = vld [vmem:[#allocation4 + $0xff8] sm:$0xff]  ;;  %v8069_v1 = vrot.slane %v15535_v27, %v15477_v53 }
 0xb2b   :  { %8291 = vmatpush1.bf16.msra.mxu1 %v8130_v58  ;;  %v8517_v58 = vrot.slane %v15537_v5, %v15477_v53 }
 0xb2c   :  { %8739 = vmatpush1.bf16.msra.mxu0 %v8578_v30  ;;  %8292 = vmatprep.subr.bf16.mxu1 %v8133_v20  ;;  %v8156_v30 = vld [vmem:[#allocation4 + $0xaf0] sm:$0xff] }
 0xb2d   :  { %8740 = vmatprep.subr.bf16.mxu0 %v8581_v3  ;;  %v8604_v20 = vld [vmem:[#allocation4 + $0xff0] sm:$0xff]  ;;  %v8159_v3 = vld [vmem:[#allocation4 + $0xb08] sm:$0xff] }
 0xb2f   :  { %8293 = vmatpush1.bf16.msra.mxu1 %v8132_v13  ;;  %v8607_v13 = vld [vmem:[#allocation4 + $0x1008] sm:$0xff] }
 0xb30   :  { %8741 = vmatpush1.bf16.msra.mxu0 %v8580_v18  ;;  %8294 = vmatprep.subr.bf16.mxu1 %v8135_v22  ;;  %v8081_v18 = vrot.slane %v15535_v27, %v15480_v26  ;;  %v8529_v22 = vrot.slane %v15537_v5, %v15480_v26 }
 0xb31   :  { %8742 = vmatprep.subr.bf16.mxu0 %v8583_v57  ;;  %v8116_v57 = vpack.c.bf16 %v8069_v1, %v8069_v1  ;;  %v8626_v1 = vld [vmem:[#allocation4 + $0x10a0] sm:$0xff] }
 0xb33   :  { %8295 = vmatpush1.bf16.msra.mxu1 %v8134_v29  ;;  %v8564_v29 = vpack.c.bf16 %v8517_v58, %v8517_v58  ;;  %v8181_v58 = vld [vmem:[#allocation4 + $0xbb8] sm:$0xff] }
 0xb34   :  { %8743 = vmatpush1.bf16.msra.mxu0 %v8582_v49  ;;  %8296 = vmatprep.subr.bf16.mxu1 %v8137_v16  ;;  %v8158_v49 = vld [vmem:[#allocation4 + $0xb00] sm:$0xff] }
 0xb35   :  { %8744 = vmatprep.subr.bf16.mxu0 %v8585_v63  ;;  %v8606_v16 = vld [vmem:[#allocation4 + $0x1000] sm:$0xff]  ;;  %v8161_v63 = vld [vmem:[#allocation4 + $0xb18] sm:$0xff] }
 0xb37   :  { %8297 = vmatpush1.bf16.msra.mxu1 %v8136_v43  ;;  %v8609_v43 = vld [vmem:[#allocation4 + $0x1018] sm:$0xff] }
 0xb38   :  { %8745 = vmatpush1.bf16.msra.mxu0 %v8584_v62  ;;  %8298 = vmatprep.subr.bf16.mxu1 %v8139_v59  ;;  %v8119_v62 = vpack.c.bf16 %v8081_v18, %v8081_v18  ;;  %v8567_v59 = vpack.c.bf16 %v8529_v22, %v8529_v22  ;;  %v8631_v18 = vld [vmem:[#allocation4 + $0x10c8] sm:$0xff]  ;;  %v8182_v22 = vld [vmem:[#allocation4 + $0xbc0] sm:$0xff] }
 0xb39   :  { %8746 = vmatprep.subr.bf16.mxu0 %v8587_v56  ;;  %v8160_v56 = vld [vmem:[#allocation4 + $0xb10] sm:$0xff] }
 0xb3b   :  { %8299 = vmatpush1.bf16.msra.mxu1 %v8138_v48  ;;  %v8608_v48 = vld [vmem:[#allocation4 + $0x1010] sm:$0xff] }
 0xb3c   :  { %8747 = vmatpush1.bf16.msra.mxu0 %v8586_v50  ;;  %8300 = vmatprep.subr.bf16.mxu1 %v8141_v60  ;;  %v8163_v50 = vld [vmem:[#allocation4 + $0xb28] sm:$0xff] }
 0xb3d   :  { %8748 = vmatprep.subr.bf16.mxu0 %v8589_v12  ;;  %v8611_v60 = vld [vmem:[#allocation4 + $0x1028] sm:$0xff]  ;;  %v8162_v12 = vld [vmem:[#allocation4 + $0xb20] sm:$0xff] }
 0xb3f   :  { %8301 = vmatpush1.bf16.msra.mxu1 %v8140_v31  ;;  %v8610_v31 = vld [vmem:[#allocation4 + $0x1020] sm:$0xff] }
 0xb40   :  { %8749 = vmatpush1.bf16.msra.mxu0 %v8588_v17  ;;  %8302 = vmatprep.subr.bf16.mxu1 %v8143_v2  ;;  %v8165_v17 = vld [vmem:[#allocation4 + $0xb38] sm:$0xff] }
 0xb41   :  { %8750 = vmatprep.subr.bf16.mxu0 %v8591_v35  ;;  %v8613_v2 = vld [vmem:[#allocation4 + $0x1038] sm:$0xff]  ;;  %v8164_v35 = vld [vmem:[#allocation4 + $0xb30] sm:$0xff] }
 0xb43   :  { %8303 = vmatpush1.bf16.msra.mxu1 %v8142_v0  ;;  %v8612_v0 = vld [vmem:[#allocation4 + $0x1030] sm:$0xff] }
 0xb44   :  { %8751 = vmatpush1.bf16.msra.mxu0 %v8590_v51  ;;  %8304 = vmatprep.subr.bf16.mxu1 %v8145_v32  ;;  %v8167_v51 = vld [vmem:[#allocation4 + $0xb48] sm:$0xff] }
 0xb45   :  { %8752 = vmatprep.subr.bf16.mxu0 %v8593_v46  ;;  %v8615_v32 = vld [vmem:[#allocation4 + $0x1048] sm:$0xff]  ;;  %v8166_v46 = vld [vmem:[#allocation4 + $0xb40] sm:$0xff] }
 0xb47   :  { %8305 = vmatpush1.bf16.msra.mxu1 %v8144_v37  ;;  %v8614_v37 = vld [vmem:[#allocation4 + $0x1040] sm:$0xff] }
 0xb48   :  { %8753 = vmatpush1.bf16.msra.mxu0 %v8592_v39  ;;  %8306 = vmatprep.subr.bf16.mxu1 %v8147_v21  ;;  %v8169_v39 = vld [vmem:[#allocation4 + $0xb58] sm:$0xff] }
 0xb49   :  { %8754 = vmatprep.subr.bf16.mxu0 %v8595_v42  ;;  %v8617_v21 = vld [vmem:[#allocation4 + $0x1058] sm:$0xff]  ;;  %v8168_v42 = vld [vmem:[#allocation4 + $0xb50] sm:$0xff] }
 0xb4b   :  { %8307 = vmatpush1.bf16.msra.mxu1 %v8146_v19  ;;  %v8616_v19 = vld [vmem:[#allocation4 + $0x1050] sm:$0xff] }
 0xb4c   :  { %8755 = vmatpush1.bf16.msra.mxu0 %v8594_v9  ;;  %8308 = vmatprep.subr.bf16.mxu1 %v8149_v38  ;;  %v8171_v9 = vld [vmem:[#allocation4 + $0xb68] sm:$0xff] }
 0xb4d   :  { %8756 = vmatprep.subr.bf16.mxu0 %v8597_v10  ;;  %v8619_v38 = vld [vmem:[#allocation4 + $0x1068] sm:$0xff]  ;;  %v8170_v10 = vld [vmem:[#allocation4 + $0xb60] sm:$0xff] }
 0xb4f   :  { %8309 = vmatpush1.bf16.msra.mxu1 %v8148_v8  ;;  %v8618_v8 = vld [vmem:[#allocation4 + $0x1060] sm:$0xff] }
 0xb50   :  { %8757 = vmatpush1.bf16.msra.mxu0 %v8596_v28  ;;  %8310 = vmatprep.subr.bf16.mxu1 %v8151_v44  ;;  %v8173_v28 = vld [vmem:[#allocation4 + $0xb78] sm:$0xff] }
 0xb51   :  { %8758 = vmatprep.subr.bf16.mxu0 %v8599_v4  ;;  %v8621_v44 = vld [vmem:[#allocation4 + $0x1078] sm:$0xff]  ;;  %v8172_v4 = vld [vmem:[#allocation4 + $0xb70] sm:$0xff] }
 0xb53   :  { %8311 = vmatpush1.bf16.msra.mxu1 %v8150_v34  ;;  %v8620_v34 = vld [vmem:[#allocation4 + $0x1070] sm:$0xff] }
 0xb54   :  { %8759 = vmatpush1.bf16.msra.mxu0 %v8598_v33  ;;  %8312 = vmatprep.subr.bf16.mxu1 %v8153_v7  ;;  %v8175_v33 = vld [vmem:[#allocation4 + $0xb88] sm:$0xff] }
 0xb55   :  { %8760 = vmatprep.subr.bf16.mxu0 %v8601_v25  ;;  %v8623_v7 = vld [vmem:[#allocation4 + $0x1088] sm:$0xff]  ;;  %v8174_v25 = vld [vmem:[#allocation4 + $0xb80] sm:$0xff] }
 0xb57   :  { %8313 = vmatpush1.bf16.msra.mxu1 %v8152_v24  ;;  %v8622_v24 = vld [vmem:[#allocation4 + $0x1080] sm:$0xff] }
 0xb58   :  { %8761 = vmatpush1.bf16.msra.mxu0 %v8600_v45  ;;  %8314 = vmatprep.subr.bf16.mxu1 %v8155_v23  ;;  %v8177_v45 = vld [vmem:[#allocation4 + $0xb98] sm:$0xff] }
 0xb59   :  { %8762 = vmatprep.subr.bf16.mxu0 %v8603_v41  ;;  %v8625_v23 = vld [vmem:[#allocation4 + $0x1098] sm:$0xff]  ;;  %v8176_v41 = vld [vmem:[#allocation4 + $0xb90] sm:$0xff] }
 0xb5b   :  { %8315 = vmatpush1.bf16.msra.mxu1 %v8154_v14  ;;  %v8624_v14 = vld [vmem:[#allocation4 + $0x1090] sm:$0xff] }
 0xb5c   :  { %8763 = vmatpush1.bf16.msra.mxu0 %v8602_v54  ;;  %8316 = vmatprep.subr.bf16.mxu1 %v8157_v15  ;;  %v8179_v54 = vld [vmem:[#allocation4 + $0xba8] sm:$0xff] }
 0xb5d   :  { %8764 = vmatprep.subr.bf16.mxu0 %v8605_v40  ;;  %v8627_v15 = vld [vmem:[#allocation4 + $0x10a8] sm:$0xff]  ;;  %v8178_v40 = vld [vmem:[#allocation4 + $0xba0] sm:$0xff] }
 0xb5f   :  { %8317 = vmatpush1.bf16.msra.mxu1 %v8156_v30  ;;  %v8629_v30 = vld [vmem:[#allocation4 + $0x10b8] sm:$0xff] }
 0xb60   :  { %8765 = vmatpush1.bf16.msra.mxu0 %v8604_v20  ;;  %8327 = vmatprep.subr.bf16.mxu1 %v8159_v3  ;;  %v8180_v20 = vld [vmem:[#allocation4 + $0xbb0] sm:$0xff] }
 0xb61   :  { %8775 = vmatprep.subr.bf16.mxu0 %v8607_v13  ;;  %v8628_v3 = vld [vmem:[#allocation4 + $0x10b0] sm:$0xff]  ;;  %v8183_v13 = vld [vmem:[#allocation4 + $0xbc8] sm:$0xff] }
 0xb62   :  { %8319 = vmatmul.mubr.bf16.vlgmr.msra.gmra.mrb[12].mxu1 %v8116_v57  ;;  %v8630_v57 = vld [vmem:[#allocation4 + $0x10c0] sm:$0xff] }
 0xb63   :  { %8767 = vmatmul.mubr.bf16.vlgmr.msra.gmra.mrb[176].mxu0 %v8564_v29  ;;  %8328 = vmatpush1.bf16.msra.mxu1 %v8158_v49  ;;  %v8185_v29 = vld [vmem:[#allocation4 + $0xbd8] sm:$0xff] }
 0xb64   :  { %8776 = vmatpush1.bf16.msra.mxu0 %v8606_v16  ;;  %8329 = vmatprep.subr.bf16.mxu1 %v8161_v63  ;;  %v8633_v49 = vld [vmem:[#allocation4 + $0x10d8] sm:$0xff]  ;;  %v8184_v16 = vld [vmem:[#allocation4 + $0xbd0] sm:$0xff] }
 0xb65   :  { %8777 = vmatprep.subr.bf16.mxu0 %v8609_v43  ;;  %8359 = vmatprep.mubr.bf16.mxu1 %v8119_v62  ;;  %v8632_v63 = vld [vmem:[#allocation4 + $0x10d0] sm:$0xff]  ;;  %v8187_v43 = vld [vmem:[#allocation4 + $0xbe8] sm:$0xff] }
 0xb66   :  { %8807 = vmatprep.mubr.bf16.mxu0 %v8567_v59  ;;  %v8635_v62 = vld [vmem:[#allocation4 + $0x10e8] sm:$0xff]  ;;  %v8186_v59 = vld [vmem:[#allocation4 + $0xbe0] sm:$0xff] }
 0xb67   :  { %8330 = vmatpush1.bf16.msra.mxu1 %v8160_v56  ;;  %v8634_v56 = vld [vmem:[#allocation4 + $0x10e0] sm:$0xff] }
 0xb68   :  { %8778 = vmatpush1.bf16.msra.mxu0 %v8608_v48  ;;  %8331 = vmatprep.subr.bf16.mxu1 %v8163_v50  ;;  %v8189_v48 = vld [vmem:[#allocation4 + $0xbf8] sm:$0xff] }
 0xb69   :  { %8779 = vmatprep.subr.bf16.mxu0 %v8611_v60  ;;  %v8637_v50 = vld [vmem:[#allocation4 + $0x10f8] sm:$0xff]  ;;  %v8077_v60 = vrot.slane %v15535_v27, %v15491_v6 }
 0xb6b   :  { %8332 = vmatpush1.bf16.msra.mxu1 %v8162_v12  ;;  %v8525_v12 = vrot.slane %v15537_v5, %v15491_v6 }
 0xb6c   :  { %8780 = vmatpush1.bf16.msra.mxu0 %v8610_v31  ;;  %8333 = vmatprep.subr.bf16.mxu1 %v8165_v17  ;;  %v8188_v31 = vld [vmem:[#allocation4 + $0xbf0] sm:$0xff] }
 0xb6d   :  { %8781 = vmatprep.subr.bf16.mxu0 %v8613_v2  ;;  %v8636_v17 = vld [vmem:[#allocation4 + $0x10f0] sm:$0xff]  ;;  %v8191_v2 = vld [vmem:[#allocation4 + $0xc08] sm:$0xff] }
 0xb6f   :  { %8334 = vmatpush1.bf16.msra.mxu1 %v8164_v35  ;;  %v8639_v35 = vld [vmem:[#allocation4 + $0x1108] sm:$0xff] }
 0xb70   :  { %8782 = vmatpush1.bf16.msra.mxu0 %v8612_v0  ;;  %8335 = vmatprep.subr.bf16.mxu1 %v8167_v51  ;;  %v8089_v0 = vrot.slane %v15535_v27, %v15494_v47  ;;  %v8537_v51 = vrot.slane %v15537_v5, %v15494_v47 }
 0xb71   :  { %8783 = vmatprep.subr.bf16.mxu0 %v8615_v32  ;;  %v8118_v32 = vpack.c.bf16 %v8077_v60, %v8077_v60  ;;  %v8658_v60 = vld [vmem:[#allocation4 + $0x11a0] sm:$0xff] }
 0xb73   :  { %8336 = vmatpush1.bf16.msra.mxu1 %v8166_v46  ;;  %v8566_v46 = vpack.c.bf16 %v8525_v12, %v8525_v12  ;;  %v8213_v12 = vld [vmem:[#allocation4 + $0xcb8] sm:$0xff] }
 0xb74   :  { %8784 = vmatpush1.bf16.msra.mxu0 %v8614_v37  ;;  %8337 = vmatprep.subr.bf16.mxu1 %v8169_v39  ;;  %v8190_v37 = vld [vmem:[#allocation4 + $0xc00] sm:$0xff] }
 0xb75   :  { %8785 = vmatprep.subr.bf16.mxu0 %v8617_v21  ;;  %v8638_v39 = vld [vmem:[#allocation4 + $0x1100] sm:$0xff]  ;;  %v8193_v21 = vld [vmem:[#allocation4 + $0xc18] sm:$0xff] }
 0xb77   :  { %8338 = vmatpush1.bf16.msra.mxu1 %v8168_v42  ;;  %v8641_v42 = vld [vmem:[#allocation4 + $0x1118] sm:$0xff] }
 0xb78   :  { %8786 = vmatpush1.bf16.msra.mxu0 %v8616_v19  ;;  %8339 = vmatprep.subr.bf16.mxu1 %v8171_v9  ;;  %v8121_v19 = vpack.c.bf16 %v8089_v0, %v8089_v0  ;;  %v8569_v9 = vpack.c.bf16 %v8537_v51, %v8537_v51  ;;  %v8663_v0 = vld [vmem:[#allocation4 + $0x11c8] sm:$0xff]  ;;  %v8214_v51 = vld [vmem:[#allocation4 + $0xcc0] sm:$0xff] }
 0xb79   :  { %8787 = vmatprep.subr.bf16.mxu0 %v8619_v38  ;;  %v8192_v38 = vld [vmem:[#allocation4 + $0xc10] sm:$0xff] }
 0xb7b   :  { %8340 = vmatpush1.bf16.msra.mxu1 %v8170_v10  ;;  %v8640_v10 = vld [vmem:[#allocation4 + $0x1110] sm:$0xff] }
 0xb7c   :  { %8788 = vmatpush1.bf16.msra.mxu0 %v8618_v8  ;;  %8341 = vmatprep.subr.bf16.mxu1 %v8173_v28  ;;  %v8195_v8 = vld [vmem:[#allocation4 + $0xc28] sm:$0xff] }
 0xb7d   :  { %8789 = vmatprep.subr.bf16.mxu0 %v8621_v44  ;;  %v8643_v28 = vld [vmem:[#allocation4 + $0x1128] sm:$0xff]  ;;  %v8194_v44 = vld [vmem:[#allocation4 + $0xc20] sm:$0xff] }
 0xb7f   :  { %8342 = vmatpush1.bf16.msra.mxu1 %v8172_v4  ;;  %v8642_v4 = vld [vmem:[#allocation4 + $0x1120] sm:$0xff] }
 0xb80   :  { %8790 = vmatpush1.bf16.msra.mxu0 %v8620_v34  ;;  %8343 = vmatprep.subr.bf16.mxu1 %v8175_v33  ;;  %v8197_v34 = vld [vmem:[#allocation4 + $0xc38] sm:$0xff] }
 0xb81   :  { %8791 = vmatprep.subr.bf16.mxu0 %v8623_v7  ;;  %v8645_v33 = vld [vmem:[#allocation4 + $0x1138] sm:$0xff]  ;;  %v8196_v7 = vld [vmem:[#allocation4 + $0xc30] sm:$0xff] }
 0xb83   :  { %8344 = vmatpush1.bf16.msra.mxu1 %v8174_v25  ;;  %v8644_v25 = vld [vmem:[#allocation4 + $0x1130] sm:$0xff] }
 0xb84   :  { %8792 = vmatpush1.bf16.msra.mxu0 %v8622_v24  ;;  %8345 = vmatprep.subr.bf16.mxu1 %v8177_v45  ;;  %v8199_v24 = vld [vmem:[#allocation4 + $0xc48] sm:$0xff] }
 0xb85   :  { %8793 = vmatprep.subr.bf16.mxu0 %v8625_v23  ;;  %v8647_v45 = vld [vmem:[#allocation4 + $0x1148] sm:$0xff]  ;;  %v8198_v23 = vld [vmem:[#allocation4 + $0xc40] sm:$0xff] }
 0xb87   :  { %8346 = vmatpush1.bf16.msra.mxu1 %v8176_v41  ;;  %v8646_v41 = vld [vmem:[#allocation4 + $0x1140] sm:$0xff] }
 0xb88   :  { %8794 = vmatpush1.bf16.msra.mxu0 %v8624_v14  ;;  %8347 = vmatprep.subr.bf16.mxu1 %v8179_v54  ;;  %v8201_v14 = vld [vmem:[#allocation4 + $0xc58] sm:$0xff] }
 0xb89   :  { %8795 = vmatprep.subr.bf16.mxu0 %v8627_v15  ;;  %v8649_v54 = vld [vmem:[#allocation4 + $0x1158] sm:$0xff]  ;;  %v8200_v15 = vld [vmem:[#allocation4 + $0xc50] sm:$0xff] }
 0xb8b   :  { %8348 = vmatpush1.bf16.msra.mxu1 %v8178_v40  ;;  %v8648_v40 = vld [vmem:[#allocation4 + $0x1150] sm:$0xff] }
 0xb8c   :  { %8796 = vmatpush1.bf16.msra.mxu0 %v8626_v1  ;;  %8349 = vmatprep.subr.bf16.mxu1 %v8181_v58  ;;  %v8203_v1 = vld [vmem:[#allocation4 + $0xc68] sm:$0xff] }
 0xb8d   :  { %8797 = vmatprep.subr.bf16.mxu0 %v8629_v30  ;;  %v8651_v58 = vld [vmem:[#allocation4 + $0x1168] sm:$0xff]  ;;  %v8202_v30 = vld [vmem:[#allocation4 + $0xc60] sm:$0xff] }
 0xb8f   :  { %8350 = vmatpush1.bf16.msra.mxu1 %v8180_v20  ;;  %v8650_v20 = vld [vmem:[#allocation4 + $0x1160] sm:$0xff] }
 0xb90   :  { %8798 = vmatpush1.bf16.msra.mxu0 %v8628_v3  ;;  %8351 = vmatprep.subr.bf16.mxu1 %v8183_v13  ;;  %v8205_v3 = vld [vmem:[#allocation4 + $0xc78] sm:$0xff] }
 0xb91   :  { %8799 = vmatprep.subr.bf16.mxu0 %v8631_v18  ;;  %v8653_v13 = vld [vmem:[#allocation4 + $0x1178] sm:$0xff]  ;;  %v8204_v18 = vld [vmem:[#allocation4 + $0xc70] sm:$0xff] }
 0xb93   :  { %8352 = vmatpush1.bf16.msra.mxu1 %v8182_v22  ;;  %v8652_v22 = vld [vmem:[#allocation4 + $0x1170] sm:$0xff] }
 0xb94   :  { %8800 = vmatpush1.bf16.msra.mxu0 %v8630_v57  ;;  %8353 = vmatprep.subr.bf16.mxu1 %v8185_v29  ;;  %v8207_v57 = vld [vmem:[#allocation4 + $0xc88] sm:$0xff] }
 0xb95   :  { %8801 = vmatprep.subr.bf16.mxu0 %v8633_v49  ;;  %v8655_v29 = vld [vmem:[#allocation4 + $0x1188] sm:$0xff]  ;;  %v8206_v49 = vld [vmem:[#allocation4 + $0xc80] sm:$0xff] }
 0xb97   :  { %8354 = vmatpush1.bf16.msra.mxu1 %v8184_v16  ;;  %v8654_v16 = vld [vmem:[#allocation4 + $0x1180] sm:$0xff] }
 0xb98   :  { %8802 = vmatpush1.bf16.msra.mxu0 %v8632_v63  ;;  %8355 = vmatprep.subr.bf16.mxu1 %v8187_v43  ;;  %v8209_v63 = vld [vmem:[#allocation4 + $0xc98] sm:$0xff] }
 0xb99   :  { %8803 = vmatprep.subr.bf16.mxu0 %v8635_v62  ;;  %v8657_v43 = vld [vmem:[#allocation4 + $0x1198] sm:$0xff]  ;;  %v8208_v62 = vld [vmem:[#allocation4 + $0xc90] sm:$0xff] }
 0xb9b   :  { %8356 = vmatpush1.bf16.msra.mxu1 %v8186_v59  ;;  %v8656_v59 = vld [vmem:[#allocation4 + $0x1190] sm:$0xff] }
 0xb9c   :  { %8804 = vmatpush1.bf16.msra.mxu0 %v8634_v56  ;;  %8357 = vmatprep.subr.bf16.mxu1 %v8189_v48  ;;  %v8211_v56 = vld [vmem:[#allocation4 + $0xca8] sm:$0xff] }
 0xb9d   :  { %8805 = vmatprep.subr.bf16.mxu0 %v8637_v50  ;;  %v8659_v48 = vld [vmem:[#allocation4 + $0x11a8] sm:$0xff]  ;;  %v8210_v50 = vld [vmem:[#allocation4 + $0xca0] sm:$0xff] }
 0xb9f   :  { %8358 = vmatpush1.bf16.msra.mxu1 %v8188_v31  ;;  %v8661_v31 = vld [vmem:[#allocation4 + $0x11b8] sm:$0xff] }
 0xba0   :  { %8806 = vmatpush1.bf16.msra.mxu0 %v8636_v17  ;;  %8368 = vmatprep.subr.bf16.mxu1 %v8191_v2  ;;  %v8212_v17 = vld [vmem:[#allocation4 + $0xcb0] sm:$0xff] }
 0xba1   :  { %8816 = vmatprep.subr.bf16.mxu0 %v8639_v35  ;;  %v8660_v2 = vld [vmem:[#allocation4 + $0x11b0] sm:$0xff]  ;;  %v8215_v35 = vld [vmem:[#allocation4 + $0xcc8] sm:$0xff] }
 0xba2   :  { %8360 = vmatmul.mubr.bf16.vlgmr.msra.gmra.mrb[12].mxu1 %v8118_v32  ;;  %v8662_v32 = vld [vmem:[#allocation4 + $0x11c0] sm:$0xff] }
 0xba3   :  { %8808 = vmatmul.mubr.bf16.vlgmr.msra.gmra.mrb[176].mxu0 %v8566_v46  ;;  %8369 = vmatpush1.bf16.msra.mxu1 %v8190_v37  ;;  %v8217_v46 = vld [vmem:[#allocation4 + $0xcd8] sm:$0xff] }
 0xba4   :  { %8817 = vmatpush1.bf16.msra.mxu0 %v8638_v39  ;;  %8370 = vmatprep.subr.bf16.mxu1 %v8193_v21  ;;  %v8665_v37 = vld [vmem:[#allocation4 + $0x11d8] sm:$0xff]  ;;  %v8216_v39 = vld [vmem:[#allocation4 + $0xcd0] sm:$0xff] }
 0xba5   :  { %8818 = vmatprep.subr.bf16.mxu0 %v8641_v42  ;;  %8400 = vmatprep.mubr.bf16.mxu1 %v8121_v19  ;;  %v8664_v21 = vld [vmem:[#allocation4 + $0x11d0] sm:$0xff]  ;;  %v8219_v42 = vld [vmem:[#allocation4 + $0xce8] sm:$0xff] }
 0xba6   :  { %8848 = vmatprep.mubr.bf16.mxu0 %v8569_v9  ;;  %v8667_v19 = vld [vmem:[#allocation4 + $0x11e8] sm:$0xff]  ;;  %v8218_v9 = vld [vmem:[#allocation4 + $0xce0] sm:$0xff] }
 0xba7   :  { %8371 = vmatpush1.bf16.msra.mxu1 %v8192_v38  ;;  %v8666_v38 = vld [vmem:[#allocation4 + $0x11e0] sm:$0xff] }
 0xba8   :  { %8819 = vmatpush1.bf16.msra.mxu0 %v8640_v10  ;;  %8372 = vmatprep.subr.bf16.mxu1 %v8195_v8  ;;  %v8221_v10 = vld [vmem:[#allocation4 + $0xcf8] sm:$0xff] }
 0xba9   :  { %8820 = vmatprep.subr.bf16.mxu0 %v8643_v28  ;;  %v8669_v8 = vld [vmem:[#allocation4 + $0x11f8] sm:$0xff]  ;;  %v8085_v28 = vrot.slane %v15535_v27, %v15505_v11 }
 0xbab   :  { %8373 = vmatpush1.bf16.msra.mxu1 %v8194_v44  ;;  %v8533_v44 = vrot.slane %v15537_v5, %v15505_v11 }
 0xbac   :  { %8821 = vmatpush1.bf16.msra.mxu0 %v8642_v4  ;;  %8374 = vmatprep.subr.bf16.mxu1 %v8197_v34  ;;  %v8220_v4 = vld [vmem:[#allocation4 + $0xcf0] sm:$0xff] }
 0xbad   :  { %8822 = vmatprep.subr.bf16.mxu0 %v8645_v33  ;;  %v8668_v34 = vld [vmem:[#allocation4 + $0x11f0] sm:$0xff]  ;;  %v8223_v33 = vld [vmem:[#allocation4 + $0xd08] sm:$0xff] }
 0xbaf   :  { %8375 = vmatpush1.bf16.msra.mxu1 %v8196_v7  ;;  %v8671_v7 = vld [vmem:[#allocation4 + $0x1208] sm:$0xff] }
 0xbb0   :  { %8823 = vmatpush1.bf16.msra.mxu0 %v8644_v25  ;;  %8376 = vmatprep.subr.bf16.mxu1 %v8199_v24  ;;  %v8097_v25 = vrot.slane %v15535_v27, %v15508_v55  ;;  %v8545_v24 = vrot.slane %v15537_v5, %v15508_v55  ;;  %v8224_v27 = vld [vmem:[#allocation4 + $0xd10] sm:$0xff] }
 0xbb1   :  { %8824 = vmatprep.subr.bf16.mxu0 %v8647_v45  ;;  %v8120_v45 = vpack.c.bf16 %v8085_v28, %v8085_v28  ;;  %v8672_v5 = vld [vmem:[#allocation4 + $0x1210] sm:$0xff] }
 0xbb2   :  { %v8236_v28 = vld [vmem:[#allocation4 + $0xd70] sm:$0xff] }
 0xbb3   :  { %8377 = vmatpush1.bf16.msra.mxu1 %v8198_v23  ;;  %v8568_v23 = vpack.c.bf16 %v8533_v44, %v8533_v44  ;;  %v8684_v44 = vld [vmem:[#allocation4 + $0x1270] sm:$0xff] }
 0xbb4   :  { %8825 = vmatpush1.bf16.msra.mxu0 %v8646_v41  ;;  %8378 = vmatprep.subr.bf16.mxu1 %v8201_v14  ;;  %v8222_v41 = vld [vmem:[#allocation4 + $0xd00] sm:$0xff] }
 0xbb5   :  { %8826 = vmatprep.subr.bf16.mxu0 %v8649_v54  ;;  %v8670_v14 = vld [vmem:[#allocation4 + $0x1200] sm:$0xff]  ;;  %v8225_v54 = vld [vmem:[#allocation4 + $0xd18] sm:$0xff] }
 0xbb7   :  { %8379 = vmatpush1.bf16.msra.mxu1 %v8200_v15  ;;  %v8673_v15 = vld [vmem:[#allocation4 + $0x1218] sm:$0xff] }
 0xbb8   :  { %8827 = vmatpush1.bf16.msra.mxu0 %v8648_v40  ;;  %8380 = vmatprep.subr.bf16.mxu1 %v8203_v1  ;;  %v8123_v40 = vpack.c.bf16 %v8097_v25, %v8097_v25  ;;  %v8571_v1 = vpack.c.bf16 %v8545_v24, %v8545_v24  ;;  %v8238_v25 = vld [vmem:[#allocation4 + $0xd80] sm:$0xff] }
 0xbb9   :  { %8828 = vmatprep.subr.bf16.mxu0 %v8651_v58  ;;  %v8227_v58 = vld [vmem:[#allocation4 + $0xd28] sm:$0xff]  ;;  %v8686_v24 = vld [vmem:[#allocation4 + $0x1280] sm:$0xff] }
 0xbbb   :  { %8381 = vmatpush1.bf16.msra.mxu1 %v8202_v30  ;;  %v8675_v30 = vld [vmem:[#allocation4 + $0x1228] sm:$0xff] }
 0xbbc   :  { %8829 = vmatpush1.bf16.msra.mxu0 %v8650_v20  ;;  %8382 = vmatprep.subr.bf16.mxu1 %v8205_v3  ;;  %v8226_v20 = vld [vmem:[#allocation4 + $0xd20] sm:$0xff] }
 0xbbd   :  { %8830 = vmatprep.subr.bf16.mxu0 %v8653_v13  ;;  %v8674_v3 = vld [vmem:[#allocation4 + $0x1220] sm:$0xff]  ;;  %v8229_v13 = vld [vmem:[#allocation4 + $0xd38] sm:$0xff] }
 0xbbf   :  { %8383 = vmatpush1.bf16.msra.mxu1 %v8204_v18  ;;  %v8677_v18 = vld [vmem:[#allocation4 + $0x1238] sm:$0xff] }
 0xbc0   :  { %8831 = vmatpush1.bf16.msra.mxu0 %v8652_v22  ;;  %8384 = vmatprep.subr.bf16.mxu1 %v8207_v57  ;;  %v8228_v22 = vld [vmem:[#allocation4 + $0xd30] sm:$0xff] }
 0xbc1   :  { %8832 = vmatprep.subr.bf16.mxu0 %v8655_v29  ;;  %v8676_v57 = vld [vmem:[#allocation4 + $0x1230] sm:$0xff]  ;;  %v8231_v29 = vld [vmem:[#allocation4 + $0xd48] sm:$0xff] }
 0xbc3   :  { %8385 = vmatpush1.bf16.msra.mxu1 %v8206_v49  ;;  %v8679_v49 = vld [vmem:[#allocation4 + $0x1248] sm:$0xff] }
 0xbc4   :  { %8833 = vmatpush1.bf16.msra.mxu0 %v8654_v16  ;;  %8386 = vmatprep.subr.bf16.mxu1 %v8209_v63  ;;  %v8230_v16 = vld [vmem:[#allocation4 + $0xd40] sm:$0xff] }
 0xbc5   :  { %8834 = vmatprep.subr.bf16.mxu0 %v8657_v43  ;;  %v8678_v63 = vld [vmem:[#allocation4 + $0x1240] sm:$0xff]  ;;  %v8233_v43 = vld [vmem:[#allocation4 + $0xd58] sm:$0xff] }
 0xbc7   :  { %8387 = vmatpush1.bf16.msra.mxu1 %v8208_v62  ;;  %v8681_v62 = vld [vmem:[#allocation4 + $0x1258] sm:$0xff] }
 0xbc8   :  { %8835 = vmatpush1.bf16.msra.mxu0 %v8656_v59  ;;  %8388 = vmatprep.subr.bf16.mxu1 %v8211_v56  ;;  %v8232_v59 = vld [vmem:[#allocation4 + $0xd50] sm:$0xff] }
 0xbc9   :  { %8836 = vmatprep.subr.bf16.mxu0 %v8659_v48  ;;  %v8680_v56 = vld [vmem:[#allocation4 + $0x1250] sm:$0xff] }
 0xbcb   :  { %8389 = vmatpush1.bf16.msra.mxu1 %v8210_v50 }
 0xbcc   :  { %8837 = vmatpush1.bf16.msra.mxu0 %v8658_v60  ;;  %8390 = vmatprep.subr.bf16.mxu1 %v8213_v12  ;;  %v8235_v60 = vld [vmem:[#allocation4 + $0xd68] sm:$0xff] }
 0xbcd   :  { %8838 = vmatprep.subr.bf16.mxu0 %v8661_v31  ;;  %v8683_v12 = vld [vmem:[#allocation4 + $0x1268] sm:$0xff] }
 0xbcf   :  { %8391 = vmatpush1.bf16.msra.mxu1 %v8212_v17 }
 0xbd0   :  { %8839 = vmatpush1.bf16.msra.mxu0 %v8660_v2  ;;  %8392 = vmatprep.subr.bf16.mxu1 %v8215_v35 }
 0xbd1   :  { %8840 = vmatprep.subr.bf16.mxu0 %v8663_v0 }
 0xbd3   :  { %8393 = vmatpush1.bf16.msra.mxu1 %v8214_v51 }
 0xbd4   :  { %8841 = vmatpush1.bf16.msra.mxu0 %v8662_v32  ;;  %8394 = vmatprep.subr.bf16.mxu1 %v8217_v46  ;;  %v8234_v46 = vld [vmem:[#allocation4 + $0xd60] sm:$0xff] }
 0xbd5   :  { %8842 = vmatprep.subr.bf16.mxu0 %v8665_v37  ;;  %v8682_v37 = vld [vmem:[#allocation4 + $0x1260] sm:$0xff] }
 0xbd7   :  { %8395 = vmatpush1.bf16.msra.mxu1 %v8216_v39 }
 0xbd8   :  { %8843 = vmatpush1.bf16.msra.mxu0 %v8664_v21  ;;  %8396 = vmatprep.subr.bf16.mxu1 %v8219_v42 }
 0xbd9   :  { %8844 = vmatprep.subr.bf16.mxu0 %v8667_v19  ;;  %v8237_v19 = vld [vmem:[#allocation4 + $0xd78] sm:$0xff] }
 0xbdb   :  { %8397 = vmatpush1.bf16.msra.mxu1 %v8218_v9  ;;  %v8685_v9 = vld [vmem:[#allocation4 + $0x1278] sm:$0xff] }
 0xbdc   :  { %8845 = vmatpush1.bf16.msra.mxu0 %v8666_v38  ;;  %8398 = vmatprep.subr.bf16.mxu1 %v8221_v10  ;;  %v7165_v38 = vld [vmem:[#allocation12] sm:$0x3] }
 0xbdd   :  { %8846 = vmatprep.subr.bf16.mxu0 %v8669_v8 }
 0xbdf   :  { %8399 = vmatpush1.bf16.msra.mxu1 %v8220_v4 }
 0xbe0   :  { %8847 = vmatpush1.bf16.msra.mxu0 %v8668_v34  ;;  %8409 = vmatprep.subr.bf16.mxu1 %v8223_v33  ;;  %v8239_v34 = vld [vmem:[#allocation4 + $0xd88] sm:$0xff] }
 0xbe1   :  { %8857 = vmatprep.subr.bf16.mxu0 %v8671_v7  ;;  %v8687_v33 = vld [vmem:[#allocation4 + $0x1288] sm:$0xff] }
 0xbe2   :  { %8401 = vmatmul.mubr.bf16.vlgmr.msra.gmra.mrb[12].mxu1 %v8120_v45  ;;  %v8241_v45 = vld [vmem:[#allocation4 + $0xd98] sm:$0xff] }
 0xbe3   :  { %8849 = vmatmul.mubr.bf16.vlgmr.msra.gmra.mrb[176].mxu0 %v8568_v23  ;;  %8410 = vmatpush1.bf16.msra.mxu1 %v8222_v41  ;;  %v8689_v23 = vld [vmem:[#allocation4 + $0x1298] sm:$0xff]  ;;  %v8240_v41 = vld [vmem:[#allocation4 + $0xd90] sm:$0xff] }
 0xbe4   :  { %8858 = vmatpush1.bf16.msra.mxu0 %v8670_v14  ;;  %8411 = vmatprep.subr.bf16.mxu1 %v8225_v54  ;;  %v8688_v14 = vld [vmem:[#allocation4 + $0x1290] sm:$0xff]  ;;  %v8243_v54 = vld [vmem:[#allocation4 + $0xda8] sm:$0xff] }
 0xbe5   :  { %8859 = vmatprep.subr.bf16.mxu0 %v8673_v15  ;;  %8441 = vmatprep.mubr.bf16.mxu1 %v8123_v40  ;;  %v8691_v15 = vld [vmem:[#allocation4 + $0x12a8] sm:$0xff]  ;;  %v8242_v40 = vld [vmem:[#allocation4 + $0xda0] sm:$0xff] }
 0xbe6   :  { %8889 = vmatprep.mubr.bf16.mxu0 %v8571_v1  ;;  %v8690_v1 = vld [vmem:[#allocation4 + $0x12a0] sm:$0xff] }
 0xbe7   :  { %8412 = vmatpush1.bf16.msra.mxu1 %v8224_v27  ;;  %v8245_v27 = vld [vmem:[#allocation4 + $0xdb8] sm:$0xff] }
 0xbe8   :  { %8860 = vmatpush1.bf16.msra.mxu0 %v8672_v5  ;;  %8413 = vmatprep.subr.bf16.mxu1 %v8227_v58  ;;  %v8693_v5 = vld [vmem:[#allocation4 + $0x12b8] sm:$0xff]  ;;  %v8244_v58 = vld [vmem:[#allocation4 + $0xdb0] sm:$0xff] }
 0xbe9   :  { %8861 = vmatprep.subr.bf16.mxu0 %v8675_v30  ;;  %v8692_v30 = vld [vmem:[#allocation4 + $0x12b0] sm:$0xff] }
 0xbeb   :  { %8414 = vmatpush1.bf16.msra.mxu1 %v8226_v20  ;;  %v8247_v20 = vld [vmem:[#allocation4 + $0xdc8] sm:$0xff] }
 0xbec   :  { %8862 = vmatpush1.bf16.msra.mxu0 %v8674_v3  ;;  %8415 = vmatprep.subr.bf16.mxu1 %v8229_v13  ;;  %v8695_v3 = vld [vmem:[#allocation4 + $0x12c8] sm:$0xff]  ;;  %v8246_v13 = vld [vmem:[#allocation4 + $0xdc0] sm:$0xff] }
 0xbed   :  { %8863 = vmatprep.subr.bf16.mxu0 %v8677_v18  ;;  %v8694_v18 = vld [vmem:[#allocation4 + $0x12c0] sm:$0xff] }
 0xbef   :  { %8416 = vmatpush1.bf16.msra.mxu1 %v8228_v22  ;;  %v8249_v22 = vld [vmem:[#allocation4 + $0xdd8] sm:$0xff] }
 0xbf0   :  { %8864 = vmatpush1.bf16.msra.mxu0 %v8676_v57  ;;  %8417 = vmatprep.subr.bf16.mxu1 %v8231_v29  ;;  %v8697_v57 = vld [vmem:[#allocation4 + $0x12d8] sm:$0xff]  ;;  %v8248_v29 = vld [vmem:[#allocation4 + $0xdd0] sm:$0xff] }
 0xbf1   :  { %8865 = vmatprep.subr.bf16.mxu0 %v8679_v49  ;;  %v8696_v49 = vld [vmem:[#allocation4 + $0x12d0] sm:$0xff] }
 0xbf3   :  { %8418 = vmatpush1.bf16.msra.mxu1 %v8230_v16  ;;  %v8251_v16 = vld [vmem:[#allocation4 + $0xde8] sm:$0xff] }
 0xbf4   :  { %8866 = vmatpush1.bf16.msra.mxu0 %v8678_v63  ;;  %8419 = vmatprep.subr.bf16.mxu1 %v8233_v43  ;;  %v8699_v63 = vld [vmem:[#allocation4 + $0x12e8] sm:$0xff]  ;;  %v8250_v43 = vld [vmem:[#allocation4 + $0xde0] sm:$0xff] }
 0xbf5   :  { %8867 = vmatprep.subr.bf16.mxu0 %v8681_v62  ;;  %v7588_v48 = vpop.f32.mrb[8].mxu1  ;;  %v8698_v62 = vld [vmem:[#allocation4 + $0x12e0] sm:$0xff] }
 0xbf6   :  { %v8036_v50 = vpop.f32.mrb[172].mxu0  ;;  %v7590_v31 = vpop.f32.mrb[9].mxu1 }
 0xbf7   :  { %v8038_v17 = vpop.f32.mrb[173].mxu0  ;;  %v7597_v2 = vcombine.low %v7588_v48, %v7590_v31  ;;  %v7592_v35 = vpop.f32.mrb[10].mxu1  ;;  %8420 = vmatpush1.bf16.msra.mxu1 %v8232_v59  ;;  %v8253_v59 = vld [vmem:[#allocation4 + $0xdf8] sm:$0xff]  ;;  %v12131_v48 = vld [vmem:[#allocation3 + $0x14] sm:$0xff]  ;;  %v15575_v31 = vld [vmem:[#allocation3 + $0x1c] sm:$0x3] }
 0xbf8   :  { %v8045_v0 = vcombine.low %v8036_v50, %v8038_v17  ;;  %8868 = vmatpush1.bf16.msra.mxu0 %v8680_v56  ;;  %v8040_v51 = vpop.f32.mrb[174].mxu0  ;;  %v7593_v32 = vpop.f32.mrb[11].mxu1  ;;  %8421 = vmatprep.subr.bf16.mxu1 %v8235_v60  ;;  %v8701_v56 = vld [vmem:[#allocation4 + $0x12f8] sm:$0xff]  ;;  %v8093_v50 = vrot.slane %v12131_v48, %v15519_v52  ;;  %v12132_v60 = vld [vmem:[#allocation3 + $0x1e] sm:$0xff]  ;;  %v15577_v17 = vld [vmem:[#allocation3 + $0x26] sm:$0x3] }
 0xbf9   :  { %8869 = vmatprep.subr.bf16.mxu0 %v8683_v12  ;;  %v8041_v39 = vpop.f32.mrb[175].mxu0  ;;  %v7604_v21 = vrot.slane %v7597_v2, %v15121_v36  ;;  %v8541_v12 = vrot.slane %v12132_v60, %v15519_v52  ;;  %v8252_v2 = vld [vmem:[#allocation4 + $0xdf0] sm:$0xff]  ;;  %v8703_v51 = vld [vmem:[#allocation4 + $0x1308] sm:$0xff]  ;;  %v8105_v32 = vrot.slane %v15575_v31, %v15466_v61  ;;  %v8274_v60 = vld [vmem:[#allocation4 + $0xea0] sm:$0xff] }
 0xbfa   :  { %v8052_v42 = vrot.slane %v8045_v0, %v15121_v36  ;;  %v8700_v35 = vld [vmem:[#allocation4 + $0x12f0] sm:$0xff]  ;;  %v8255_v0 = vld [vmem:[#allocation4 + $0xe08] sm:$0xff] }
 0xbfb   :  { %v7611_v10 = vrot.slane %v7604_v21, %v15121_v36  ;;  %8422 = vmatpush1.bf16.msra.mxu1 %v8234_v46  ;;  %v8553_v46 = vrot.slane %v15577_v17, %v15466_v61  ;;  %v8570_v39 = vpack.c.bf16 %v8541_v12, %v8541_v12  ;;  %v8254_v21 = vld [vmem:[#allocation4 + $0xe00] sm:$0xff]  ;;  %v8275_v48 = vld [vmem:[#allocation4 + $0xea8] sm:$0xff] }
 0xbfc   :  { %v8059_v8 = vrot.slane %v8052_v42, %v15121_v36  ;;  %8870 = vmatpush1.bf16.msra.mxu0 %v8682_v37  ;;  %8423 = vmatprep.subr.bf16.mxu1 %v8237_v19  ;;  %v8122_v37 = vpack.c.bf16 %v8093_v50, %v8093_v50  ;;  %v8702_v42 = vld [vmem:[#allocation4 + $0x1300] sm:$0xff]  ;;  %v8257_v19 = vld [vmem:[#allocation4 + $0xe18] sm:$0xff]  ;;  %v8723_v50 = vld [vmem:[#allocation4 + $0x13a8] sm:$0xff] }
 0xbfd   :  { %8871 = vmatprep.subr.bf16.mxu0 %v8685_v9  ;;  %v7613_v4 = vadd.f32 %v7611_v10, %v7165_v38  ;;  %v8705_v9 = vld [vmem:[#allocation4 + $0x1318] sm:$0xff]  ;;  %v8125_v38 = vpack.c.bf16 %v8105_v32, %v8105_v32  ;;  %v8573_v10 = vpack.c.bf16 %v8553_v46, %v8553_v46  ;;  %v8722_v12 = vld [vmem:[#allocation4 + $0x13a0] sm:$0xff]  ;;  %v8279_v32 = vld [vmem:[#allocation4 + $0xec8] sm:$0xff] }
 0xbfe   :  { %v8727_v46 = vld [vmem:[#allocation4 + $0x13c8] sm:$0xff] }
 0xbff   :  { %v15571_v7 = vadd.f32 %v8059_v8, %v7613_v4  ;;  %8424 = vmatpush1.bf16.msra.mxu1 %v8236_v28  ;;  %v8256_v8 = vld [vmem:[#allocation4 + $0xe10] sm:$0xff]  ;;  %v8707_v4 = vld [vmem:[#allocation4 + $0x1328] sm:$0xff] }
 0xc00   :  { %8872 = vmatpush1.bf16.msra.mxu0 %v8684_v44  ;;  %8425 = vmatprep.subr.bf16.mxu1 %v8239_v34  ;;  %v8704_v28 = vld [vmem:[#allocation4 + $0x1310] sm:$0xff]  ;;  %v8259_v44 = vld [vmem:[#allocation4 + $0xe28] sm:$0xff]  ;;  %v8258_v34 = vld [vmem:[#allocation4 + $0xe20] sm:$0xff] }
 0xc01   :  { %8873 = vmatprep.subr.bf16.mxu0 %v8687_v33  ;;  %v8706_v33 = vld [vmem:[#allocation4 + $0x1320] sm:$0xff] }
 0xc03   :  { %8426 = vmatpush1.bf16.msra.mxu1 %v8238_v25  ;;  %v8261_v25 = vld [vmem:[#allocation4 + $0xe38] sm:$0xff] }
 0xc04   :  { %8874 = vmatpush1.bf16.msra.mxu0 %v8686_v24  ;;  %8427 = vmatprep.subr.bf16.mxu1 %v8241_v45  ;;  %v8709_v24 = vld [vmem:[#allocation4 + $0x1338] sm:$0xff]  ;;  %v8260_v45 = vld [vmem:[#allocation4 + $0xe30] sm:$0xff] }
 0xc05   :  { %8875 = vmatprep.subr.bf16.mxu0 %v8689_v23  ;;  %v8708_v23 = vld [vmem:[#allocation4 + $0x1330] sm:$0xff] }
 0xc07   :  { %8428 = vmatpush1.bf16.msra.mxu1 %v8240_v41  ;;  %v8263_v41 = vld [vmem:[#allocation4 + $0xe48] sm:$0xff] }
 0xc08   :  { %8876 = vmatpush1.bf16.msra.mxu0 %v8688_v14  ;;  %8429 = vmatprep.subr.bf16.mxu1 %v8243_v54  ;;  %v8711_v14 = vld [vmem:[#allocation4 + $0x1348] sm:$0xff]  ;;  %v8262_v54 = vld [vmem:[#allocation4 + $0xe40] sm:$0xff] }
 0xc09   :  { %8877 = vmatprep.subr.bf16.mxu0 %v8691_v15  ;;  %v8710_v15 = vld [vmem:[#allocation4 + $0x1340] sm:$0xff] }
 0xc0b   :  { %8430 = vmatpush1.bf16.msra.mxu1 %v8242_v40  ;;  %v8265_v40 = vld [vmem:[#allocation4 + $0xe58] sm:$0xff] }
 0xc0c   :  { %8878 = vmatpush1.bf16.msra.mxu0 %v8690_v1  ;;  %8431 = vmatprep.subr.bf16.mxu1 %v8245_v27  ;;  %v8713_v1 = vld [vmem:[#allocation4 + $0x1358] sm:$0xff]  ;;  %v8264_v27 = vld [vmem:[#allocation4 + $0xe50] sm:$0xff] }
 0xc0d   :  { %8879 = vmatprep.subr.bf16.mxu0 %v8693_v5  ;;  %v8712_v5 = vld [vmem:[#allocation4 + $0x1350] sm:$0xff] }
 0xc0f   :  { %8432 = vmatpush1.bf16.msra.mxu1 %v8244_v58  ;;  %v8267_v58 = vld [vmem:[#allocation4 + $0xe68] sm:$0xff] }
 0xc10   :  { %8880 = vmatpush1.bf16.msra.mxu0 %v8692_v30  ;;  %8433 = vmatprep.subr.bf16.mxu1 %v8247_v20  ;;  %v8715_v30 = vld [vmem:[#allocation4 + $0x1368] sm:$0xff]  ;;  %v8266_v20 = vld [vmem:[#allocation4 + $0xe60] sm:$0xff] }
 0xc11   :  { %8881 = vmatprep.subr.bf16.mxu0 %v8695_v3  ;;  %v8714_v3 = vld [vmem:[#allocation4 + $0x1360] sm:$0xff] }
 0xc13   :  { %8434 = vmatpush1.bf16.msra.mxu1 %v8246_v13  ;;  %v8269_v13 = vld [vmem:[#allocation4 + $0xe78] sm:$0xff] }
 0xc14   :  { %8882 = vmatpush1.bf16.msra.mxu0 %v8694_v18  ;;  %8435 = vmatprep.subr.bf16.mxu1 %v8249_v22  ;;  %v8717_v18 = vld [vmem:[#allocation4 + $0x1378] sm:$0xff]  ;;  %v8268_v22 = vld [vmem:[#allocation4 + $0xe70] sm:$0xff] }
 0xc15   :  { %8883 = vmatprep.subr.bf16.mxu0 %v8697_v57  ;;  %v8716_v57 = vld [vmem:[#allocation4 + $0x1370] sm:$0xff] }
 0xc17   :  { %8436 = vmatpush1.bf16.msra.mxu1 %v8248_v29  ;;  %v8271_v29 = vld [vmem:[#allocation4 + $0xe88] sm:$0xff] }
 0xc18   :  { %8884 = vmatpush1.bf16.msra.mxu0 %v8696_v49  ;;  %8437 = vmatprep.subr.bf16.mxu1 %v8251_v16  ;;  %v8719_v49 = vld [vmem:[#allocation4 + $0x1388] sm:$0xff]  ;;  %v8270_v16 = vld [vmem:[#allocation4 + $0xe80] sm:$0xff] }
 0xc19   :  { %8885 = vmatprep.subr.bf16.mxu0 %v8699_v63  ;;  %v8718_v63 = vld [vmem:[#allocation4 + $0x1380] sm:$0xff] }
 0xc1b   :  { %8438 = vmatpush1.bf16.msra.mxu1 %v8250_v43  ;;  %v8273_v43 = vld [vmem:[#allocation4 + $0xe98] sm:$0xff] }
 0xc1c   :  { %8886 = vmatpush1.bf16.msra.mxu0 %v8698_v62  ;;  %8439 = vmatprep.subr.bf16.mxu1 %v8253_v59  ;;  %v8721_v62 = vld [vmem:[#allocation4 + $0x1398] sm:$0xff]  ;;  %v8272_v59 = vld [vmem:[#allocation4 + $0xe90] sm:$0xff] }
 0xc1d   :  { %8887 = vmatprep.subr.bf16.mxu0 %v8701_v56  ;;  %v8720_v56 = vld [vmem:[#allocation4 + $0x1390] sm:$0xff] }
 0xc1f   :  { %8440 = vmatpush1.bf16.msra.mxu1 %v8252_v2  ;;  %v8277_v2 = vld [vmem:[#allocation4 + $0xeb8] sm:$0xff] }
 0xc20   :  { %8888 = vmatpush1.bf16.msra.mxu0 %v8700_v35  ;;  %8450 = vmatprep.subr.bf16.mxu1 %v8255_v0  ;;  %v8725_v35 = vld [vmem:[#allocation4 + $0x13b8] sm:$0xff]  ;;  %v8276_v0 = vld [vmem:[#allocation4 + $0xeb0] sm:$0xff] }
 0xc21   :  { %8898 = vmatprep.subr.bf16.mxu0 %v8703_v51  ;;  %v8724_v51 = vld [vmem:[#allocation4 + $0x13b0] sm:$0xff] }
 0xc22   :  { %8442 = vmatmul.mubr.bf16.vlgmr.msra.gmra.mrb[12].mxu1 %v8122_v37  ;;  %v8278_v37 = vld [vmem:[#allocation4 + $0xec0] sm:$0xff] }
 0xc23   :  { %8890 = vmatmul.mubr.bf16.vlgmr.msra.gmra.mrb[176].mxu0 %v8570_v39  ;;  %8451 = vmatpush1.bf16.msra.mxu1 %v8254_v21  ;;  %v8726_v39 = vld [vmem:[#allocation4 + $0x13c0] sm:$0xff]  ;;  %v8281_v21 = vld [vmem:[#allocation4 + $0xed8] sm:$0xff] }
 0xc24   :  { %8899 = vmatpush1.bf16.msra.mxu0 %v8702_v42  ;;  %8452 = vmatprep.subr.bf16.mxu1 %v8257_v19  ;;  %v8729_v42 = vld [vmem:[#allocation4 + $0x13d8] sm:$0xff]  ;;  %v8280_v19 = vld [vmem:[#allocation4 + $0xed0] sm:$0xff] }
 0xc25   :  { %8900 = vmatprep.subr.bf16.mxu0 %v8705_v9  ;;  %8482 = vmatprep.mubr.bf16.mxu1 %v8125_v38  ;;  %v8728_v9 = vld [vmem:[#allocation4 + $0x13d0] sm:$0xff]  ;;  %v8283_v38 = vld [vmem:[#allocation4 + $0xee8] sm:$0xff] }
 0xc26   :  { %8930 = vmatprep.mubr.bf16.mxu0 %v8573_v10  ;;  %v8731_v10 = vld [vmem:[#allocation4 + $0x13e8] sm:$0xff] }
 0xc27   :  { %8453 = vmatpush1.bf16.msra.mxu1 %v8256_v8  ;;  %v8282_v8 = vld [vmem:[#allocation4 + $0xee0] sm:$0xff] }
 0xc28   :  { %8901 = vmatpush1.bf16.msra.mxu0 %v8704_v28  ;;  %8454 = vmatprep.subr.bf16.mxu1 %v8259_v44  ;;  %v8730_v28 = vld [vmem:[#allocation4 + $0x13e0] sm:$0xff]  ;;  %v15583_v44 = vld [vmem:[#allocation3 + $0x28] sm:$0xff] }
 0xc29   :  { %8902 = vmatprep.subr.bf16.mxu0 %v8707_v4  ;;  %v8285_v4 = vld [vmem:[#allocation4 + $0xef8] sm:$0xff] }
 0xc2b   :  { %8455 = vmatpush1.bf16.msra.mxu1 %v8258_v34  ;;  %v8733_v34 = vld [vmem:[#allocation4 + $0x13f8] sm:$0xff] }
 0xc2c   :  { %8903 = vmatpush1.bf16.msra.mxu0 %v8706_v33  ;;  %8456 = vmatprep.subr.bf16.mxu1 %v8261_v25  ;;  %v8101_v33 = vrot.slane %v15575_v31, %v15477_v53  ;;  %v8549_v25 = vrot.slane %v15577_v17, %v15477_v53  ;;  %v9022_v31 = vld [vmem:[#allocation4 + $0x1400] sm:$0xff]  ;;  %v9024_v17 = vld [vmem:[#allocation4 + $0x1410] sm:$0xff] }
 0xc2d   :  { %8904 = vmatprep.subr.bf16.mxu0 %v8709_v24  ;;  %v8969_v24 = vrot.slane %v15583_v44, %v15466_v61 }
 0xc2f   :  { %8457 = vmatpush1.bf16.msra.mxu1 %v8260_v45  ;;  %v8284_v45 = vld [vmem:[#allocation4 + $0xef0] sm:$0xff] }
 0xc30   :  { %8905 = vmatpush1.bf16.msra.mxu0 %v8708_v23  ;;  %8458 = vmatprep.subr.bf16.mxu1 %v8263_v41  ;;  %v8732_v23 = vld [vmem:[#allocation4 + $0x13f0] sm:$0xff]  ;;  %v9023_v41 = vld [vmem:[#allocation4 + $0x1408] sm:$0xff] }
 0xc31   :  { %8906 = vmatprep.subr.bf16.mxu0 %v8711_v14  ;;  %v8124_v14 = vpack.c.bf16 %v8101_v33, %v8101_v33  ;;  %v9065_v33 = vld [vmem:[#allocation4 + $0x1558] sm:$0xff] }
 0xc33   :  { %8459 = vmatpush1.bf16.msra.mxu1 %v8262_v54  ;;  %v8572_v54 = vpack.c.bf16 %v8549_v25, %v8549_v25  ;;  %v9064_v25 = vld [vmem:[#allocation4 + $0x1550] sm:$0xff] }
 0xc34   :  { %8907 = vmatpush1.bf16.msra.mxu0 %v8710_v15  ;;  %8460 = vmatprep.subr.bf16.mxu1 %v8265_v40  ;;  %v9013_v15 = vpack.c.bf16 %v8969_v24, %v8969_v24  ;;  %v9025_v40 = vld [vmem:[#allocation4 + $0x1418] sm:$0xff]  ;;  %v9067_v24 = vld [vmem:[#allocation4 + $0x1568] sm:$0xff] }
 0xc35   :  { %8908 = vmatprep.subr.bf16.mxu0 %v8713_v1  ;;  %v9027_v1 = vld [vmem:[#allocation4 + $0x1428] sm:$0xff] }
 0xc37   :  { %8461 = vmatpush1.bf16.msra.mxu1 %v8264_v27  ;;  %v9026_v27 = vld [vmem:[#allocation4 + $0x1420] sm:$0xff] }
 0xc38   :  { %8909 = vmatpush1.bf16.msra.mxu0 %v8712_v5  ;;  %8462 = vmatprep.subr.bf16.mxu1 %v8267_v58  ;;  %v9029_v5 = vld [vmem:[#allocation4 + $0x1438] sm:$0xff]  ;;  %v9028_v58 = vld [vmem:[#allocation4 + $0x1430] sm:$0xff] }
 0xc39   :  { %8910 = vmatprep.subr.bf16.mxu0 %v8715_v30  ;;  %v9031_v30 = vld [vmem:[#allocation4 + $0x1448] sm:$0xff] }
 0xc3b   :  { %8463 = vmatpush1.bf16.msra.mxu1 %v8266_v20  ;;  %v9030_v20 = vld [vmem:[#allocation4 + $0x1440] sm:$0xff] }
 0xc3c   :  { %8911 = vmatpush1.bf16.msra.mxu0 %v8714_v3  ;;  %8464 = vmatprep.subr.bf16.mxu1 %v8269_v13  ;;  %v9033_v3 = vld [vmem:[#allocation4 + $0x1458] sm:$0xff]  ;;  %v9032_v13 = vld [vmem:[#allocation4 + $0x1450] sm:$0xff] }
 0xc3d   :  { %8912 = vmatprep.subr.bf16.mxu0 %v8717_v18  ;;  %v9035_v18 = vld [vmem:[#allocation4 + $0x1468] sm:$0xff] }
 0xc3f   :  { %8465 = vmatpush1.bf16.msra.mxu1 %v8268_v22  ;;  %v9034_v22 = vld [vmem:[#allocation4 + $0x1460] sm:$0xff] }
 0xc40   :  { %8913 = vmatpush1.bf16.msra.mxu0 %v8716_v57  ;;  %8466 = vmatprep.subr.bf16.mxu1 %v8271_v29  ;;  %v9037_v57 = vld [vmem:[#allocation4 + $0x1478] sm:$0xff]  ;;  %v9036_v29 = vld [vmem:[#allocation4 + $0x1470] sm:$0xff] }
 0xc41   :  { %8914 = vmatprep.subr.bf16.mxu0 %v8719_v49  ;;  %v9039_v49 = vld [vmem:[#allocation4 + $0x1488] sm:$0xff] }
 0xc43   :  { %8467 = vmatpush1.bf16.msra.mxu1 %v8270_v16  ;;  %v9038_v16 = vld [vmem:[#allocation4 + $0x1480] sm:$0xff] }
 0xc44   :  { %8915 = vmatpush1.bf16.msra.mxu0 %v8718_v63  ;;  %8468 = vmatprep.subr.bf16.mxu1 %v8273_v43  ;;  %v9041_v63 = vld [vmem:[#allocation4 + $0x1498] sm:$0xff]  ;;  %v9040_v43 = vld [vmem:[#allocation4 + $0x1490] sm:$0xff] }
 0xc45   :  { %8916 = vmatprep.subr.bf16.mxu0 %v8721_v62  ;;  %v9043_v62 = vld [vmem:[#allocation4 + $0x14a8] sm:$0xff] }
 0xc47   :  { %8469 = vmatpush1.bf16.msra.mxu1 %v8272_v59  ;;  %v9042_v59 = vld [vmem:[#allocation4 + $0x14a0] sm:$0xff] }
 0xc48   :  { %8917 = vmatpush1.bf16.msra.mxu0 %v8720_v56  ;;  %8470 = vmatprep.subr.bf16.mxu1 %v8275_v48  ;;  %v9045_v56 = vld [vmem:[#allocation4 + $0x14b8] sm:$0xff]  ;;  %v9044_v48 = vld [vmem:[#allocation4 + $0x14b0] sm:$0xff] }
 0xc49   :  { %8918 = vmatprep.subr.bf16.mxu0 %v8723_v50  ;;  %v9047_v50 = vld [vmem:[#allocation4 + $0x14c8] sm:$0xff] }
 0xc4b   :  { %8471 = vmatpush1.bf16.msra.mxu1 %v8274_v60  ;;  %v9046_v60 = vld [vmem:[#allocation4 + $0x14c0] sm:$0xff] }
 0xc4c   :  { %8919 = vmatpush1.bf16.msra.mxu0 %v8722_v12  ;;  %8472 = vmatprep.subr.bf16.mxu1 %v8277_v2  ;;  %v9049_v12 = vld [vmem:[#allocation4 + $0x14d8] sm:$0xff]  ;;  %v9048_v2 = vld [vmem:[#allocation4 + $0x14d0] sm:$0xff] }
 0xc4d   :  { %8920 = vmatprep.subr.bf16.mxu0 %v8725_v35  ;;  %v9051_v35 = vld [vmem:[#allocation4 + $0x14e8] sm:$0xff] }
 0xc4f   :  { %8473 = vmatpush1.bf16.msra.mxu1 %v8276_v0  ;;  %v9050_v0 = vld [vmem:[#allocation4 + $0x14e0] sm:$0xff] }
 0xc50   :  { %8921 = vmatpush1.bf16.msra.mxu0 %v8724_v51  ;;  %8474 = vmatprep.subr.bf16.mxu1 %v8279_v32  ;;  %v9053_v51 = vld [vmem:[#allocation4 + $0x14f8] sm:$0xff]  ;;  %v8965_v32 = vrot.slane %v15583_v44, %v15477_v53 }
 0xc51   :  { %8922 = vmatprep.subr.bf16.mxu0 %v8727_v46  ;;  %v8977_v46 = vrot.slane %v15583_v44, %v15480_v26  ;;  %v9060_v26 = vld [vmem:[#allocation4 + $0x1530] sm:$0xff] }
 0xc53   :  { %8475 = vmatpush1.bf16.msra.mxu1 %v8278_v37  ;;  %v9052_v37 = vld [vmem:[#allocation4 + $0x14f0] sm:$0xff] }
 0xc54   :  { %8923 = vmatpush1.bf16.msra.mxu0 %v8726_v39  ;;  %8476 = vmatprep.subr.bf16.mxu1 %v8281_v21  ;;  %v9055_v39 = vld [vmem:[#allocation4 + $0x1508] sm:$0xff]  ;;  %v9012_v21 = vpack.c.bf16 %v8965_v32, %v8965_v32  ;;  %v9100_v32 = vld [vmem:[#allocation4 + $0x1670] sm:$0xff] }
 0xc55   :  { %8924 = vmatprep.subr.bf16.mxu0 %v8729_v42  ;;  %v9015_v42 = vpack.c.bf16 %v8977_v46, %v8977_v46  ;;  %v9103_v46 = vld [vmem:[#allocation4 + $0x1688] sm:$0xff] }
 0xc57   :  { %8477 = vmatpush1.bf16.msra.mxu1 %v8280_v19  ;;  %v9054_v19 = vld [vmem:[#allocation4 + $0x1500] sm:$0xff] }
 0xc58   :  { %8925 = vmatpush1.bf16.msra.mxu0 %v8728_v9  ;;  %8478 = vmatprep.subr.bf16.mxu1 %v8283_v38  ;;  %v9057_v9 = vld [vmem:[#allocation4 + $0x1518] sm:$0xff]  ;;  %v9056_v38 = vld [vmem:[#allocation4 + $0x1510] sm:$0xff] }
 0xc59   :  { %8926 = vmatprep.subr.bf16.mxu0 %v8731_v10  ;;  %v9059_v10 = vld [vmem:[#allocation4 + $0x1528] sm:$0xff] }
 0xc5b   :  { %8479 = vmatpush1.bf16.msra.mxu1 %v8282_v8  ;;  %v9058_v8 = vld [vmem:[#allocation4 + $0x1520] sm:$0xff] }
 0xc5c   :  { %8927 = vmatpush1.bf16.msra.mxu0 %v8730_v28  ;;  %8480 = vmatprep.subr.bf16.mxu1 %v8285_v4  ;;  %v9061_v28 = vld [vmem:[#allocation4 + $0x1538] sm:$0xff]  ;;  %v9063_v4 = vld [vmem:[#allocation4 + $0x1548] sm:$0xff] }
 0xc5d   :  { %8928 = vmatprep.subr.bf16.mxu0 %v8733_v34  ;;  %v9062_v34 = vld [vmem:[#allocation4 + $0x1540] sm:$0xff] }
 0xc5f   :  { %8481 = vmatpush1.bf16.msra.mxu1 %v8284_v45  ;;  %v9066_v45 = vld [vmem:[#allocation4 + $0x1560] sm:$0xff] }
 0xc60   :  { %8929 = vmatpush1.bf16.msra.mxu0 %v8732_v23  ;;  %9182 = vmatprep.subr.bf16.mxu1 %v9023_v41  ;;  %v9069_v23 = vld [vmem:[#allocation4 + $0x1578] sm:$0xff]  ;;  %v9068_v41 = vld [vmem:[#allocation4 + $0x1570] sm:$0xff] }
 0xc62   :  { %8483 = vmatmul.mubr.bf16.vlgmr.msra.gmra.mrb[12].mxu1 %v8124_v14  ;;  %v9071_v14 = vld [vmem:[#allocation4 + $0x1588] sm:$0xff] }
 0xc63   :  { %8931 = vmatmul.mubr.bf16.vlgmr.msra.gmra.mrb[176].mxu0 %v8572_v54  ;;  %9183 = vmatpush1.bf16.msra.mxu1 %v9022_v31  ;;  %v9070_v54 = vld [vmem:[#allocation4 + $0x1580] sm:$0xff]  ;;  %v9072_v31 = vld [vmem:[#allocation4 + $0x1590] sm:$0xff] }
 0xc64   :  { %9214 = vmatprep.mubr.bf16.mxu1 %v9013_v15  ;;  %9184 = vmatprep.subr.bf16.mxu1 %v9025_v40  ;;  %v9073_v15 = vld [vmem:[#allocation4 + $0x1598] sm:$0xff]  ;;  %v9075_v40 = vld [vmem:[#allocation4 + $0x15a8] sm:$0xff] }
 0xc67   :  { %9185 = vmatpush1.bf16.msra.mxu1 %v9024_v17  ;;  %v9074_v17 = vld [vmem:[#allocation4 + $0x15a0] sm:$0xff] }
 0xc68   :  { %9186 = vmatprep.subr.bf16.mxu1 %v9027_v1  ;;  %v9077_v1 = vld [vmem:[#allocation4 + $0x15b8] sm:$0xff] }
 0xc6b   :  { %9187 = vmatpush1.bf16.msra.mxu1 %v9026_v27  ;;  %v9076_v27 = vld [vmem:[#allocation4 + $0x15b0] sm:$0xff] }
 0xc6c   :  { %9188 = vmatprep.subr.bf16.mxu1 %v9029_v5  ;;  %v9079_v5 = vld [vmem:[#allocation4 + $0x15c8] sm:$0xff] }
 0xc6f   :  { %9189 = vmatpush1.bf16.msra.mxu1 %v9028_v58  ;;  %v9078_v58 = vld [vmem:[#allocation4 + $0x15c0] sm:$0xff] }
 0xc70   :  { %9190 = vmatprep.subr.bf16.mxu1 %v9031_v30  ;;  %v9081_v30 = vld [vmem:[#allocation4 + $0x15d8] sm:$0xff] }
 0xc73   :  { %9191 = vmatpush1.bf16.msra.mxu1 %v9030_v20  ;;  %v9080_v20 = vld [vmem:[#allocation4 + $0x15d0] sm:$0xff] }
 0xc74   :  { %9192 = vmatprep.subr.bf16.mxu1 %v9033_v3  ;;  %v9083_v3 = vld [vmem:[#allocation4 + $0x15e8] sm:$0xff] }
 0xc77   :  { %9193 = vmatpush1.bf16.msra.mxu1 %v9032_v13  ;;  %v9082_v13 = vld [vmem:[#allocation4 + $0x15e0] sm:$0xff] }
 0xc78   :  { %9194 = vmatprep.subr.bf16.mxu1 %v9035_v18  ;;  %v9085_v18 = vld [vmem:[#allocation4 + $0x15f8] sm:$0xff] }
 0xc7b   :  { %9195 = vmatpush1.bf16.msra.mxu1 %v9034_v22  ;;  %v8973_v22 = vrot.slane %v15583_v44, %v15491_v6  ;;  %v9090_v6 = vld [vmem:[#allocation4 + $0x1620] sm:$0xff] }
 0xc7c   :  { %9196 = vmatprep.subr.bf16.mxu1 %v9037_v57  ;;  %v8985_v57 = vrot.slane %v15583_v44, %v15494_v47  ;;  %v9092_v47 = vld [vmem:[#allocation4 + $0x1630] sm:$0xff] }
 0xc7f   :  { %9197 = vmatpush1.bf16.msra.mxu1 %v9036_v29  ;;  %v9084_v29 = vld [vmem:[#allocation4 + $0x15f0] sm:$0xff] }
 0xc80   :  { %9198 = vmatprep.subr.bf16.mxu1 %v9039_v49  ;;  %v9087_v49 = vld [vmem:[#allocation4 + $0x1608] sm:$0xff] }
 0xc83   :  { %9199 = vmatpush1.bf16.msra.mxu1 %v9038_v16  ;;  %v9014_v16 = vpack.c.bf16 %v8973_v22, %v8973_v22  ;;  %v9126_v22 = vld [vmem:[#allocation4 + $0x1740] sm:$0xff] }
 0xc84   :  { %9200 = vmatprep.subr.bf16.mxu1 %v9041_v63  ;;  %v9017_v63 = vpack.c.bf16 %v8985_v57, %v8985_v57  ;;  %v9129_v57 = vld [vmem:[#allocation4 + $0x1758] sm:$0xff] }
 0xc87   :  { %9201 = vmatpush1.bf16.msra.mxu1 %v9040_v43  ;;  %v9086_v43 = vld [vmem:[#allocation4 + $0x1600] sm:$0xff] }
 0xc88   :  { %9202 = vmatprep.subr.bf16.mxu1 %v9043_v62  ;;  %v9089_v62 = vld [vmem:[#allocation4 + $0x1618] sm:$0xff] }
 0xc8b   :  { %9203 = vmatpush1.bf16.msra.mxu1 %v9042_v59  ;;  %v9088_v59 = vld [vmem:[#allocation4 + $0x1610] sm:$0xff] }
 0xc8c   :  { %9204 = vmatprep.subr.bf16.mxu1 %v9045_v56  ;;  %v9091_v56 = vld [vmem:[#allocation4 + $0x1628] sm:$0xff] }
 0xc8f   :  { %9205 = vmatpush1.bf16.msra.mxu1 %v9044_v48  ;;  %v9093_v48 = vld [vmem:[#allocation4 + $0x1638] sm:$0xff] }
 0xc90   :  { %9206 = vmatprep.subr.bf16.mxu1 %v9047_v50  ;;  %v9095_v50 = vld [vmem:[#allocation4 + $0x1648] sm:$0xff] }
 0xc93   :  { %9207 = vmatpush1.bf16.msra.mxu1 %v9046_v60  ;;  %v9094_v60 = vld [vmem:[#allocation4 + $0x1640] sm:$0xff] }
 0xc94   :  { %9208 = vmatprep.subr.bf16.mxu1 %v9049_v12  ;;  %v9097_v12 = vld [vmem:[#allocation4 + $0x1658] sm:$0xff] }
 0xc97   :  { %9209 = vmatpush1.bf16.msra.mxu1 %v9048_v2  ;;  %v9096_v2 = vld [vmem:[#allocation4 + $0x1650] sm:$0xff] }
 0xc98   :  { %9210 = vmatprep.subr.bf16.mxu1 %v9051_v35  ;;  %v9099_v35 = vld [vmem:[#allocation4 + $0x1668] sm:$0xff] }
 0xc9b   :  { %9211 = vmatpush1.bf16.msra.mxu1 %v9050_v0  ;;  %v9098_v0 = vld [vmem:[#allocation4 + $0x1660] sm:$0xff] }
 0xc9c   :  { %9212 = vmatprep.subr.bf16.mxu1 %v9053_v51  ;;  %v9101_v51 = vld [vmem:[#allocation4 + $0x1678] sm:$0xff] }
 0xc9f   :  { %9213 = vmatpush1.bf16.msra.mxu1 %v9052_v37  ;;  %v9102_v37 = vld [vmem:[#allocation4 + $0x1680] sm:$0xff] }
 0xca0   :  { %9223 = vmatprep.subr.bf16.mxu1 %v9055_v39  ;;  %v9105_v39 = vld [vmem:[#allocation4 + $0x1698] sm:$0xff] }
 0xca2   :  { %9215 = vmatmul.mubr.bf16.vlgmr.msra.gmra.mrb[16].mxu1 %v9012_v21  ;;  %v9104_v21 = vld [vmem:[#allocation4 + $0x1690] sm:$0xff] }
 0xca3   :  { %9224 = vmatpush1.bf16.msra.mxu1 %v9054_v19  ;;  %9255 = vmatprep.mubr.bf16.mxu1 %v9015_v42  ;;  %v9107_v42 = vld [vmem:[#allocation4 + $0x16a8] sm:$0xff]  ;;  %v9106_v19 = vld [vmem:[#allocation4 + $0x16a0] sm:$0xff] }
 0xca4   :  { %9225 = vmatprep.subr.bf16.mxu1 %v9057_v9  ;;  %v9109_v9 = vld [vmem:[#allocation4 + $0x16b8] sm:$0xff] }
 0xca7   :  { %9226 = vmatpush1.bf16.msra.mxu1 %v9056_v38  ;;  %v9108_v38 = vld [vmem:[#allocation4 + $0x16b0] sm:$0xff] }
 0xca8   :  { %9227 = vmatprep.subr.bf16.mxu1 %v9059_v10  ;;  %v9111_v10 = vld [vmem:[#allocation4 + $0x16c8] sm:$0xff] }
 0xcab   :  { %9228 = vmatpush1.bf16.msra.mxu1 %v9058_v8  ;;  %v9110_v8 = vld [vmem:[#allocation4 + $0x16c0] sm:$0xff] }
 0xcac   :  { %9229 = vmatprep.subr.bf16.mxu1 %v9061_v28  ;;  %v9113_v28 = vld [vmem:[#allocation4 + $0x16d8] sm:$0xff] }
 0xcaf   :  { %9230 = vmatpush1.bf16.msra.mxu1 %v9060_v26  ;;  %v9112_v26 = vld [vmem:[#allocation4 + $0x16d0] sm:$0xff] }
 0xcb0   :  { %9231 = vmatprep.subr.bf16.mxu1 %v9063_v4  ;;  %v9115_v4 = vld [vmem:[#allocation4 + $0x16e8] sm:$0xff] }
 0xcb3   :  { %9232 = vmatpush1.bf16.msra.mxu1 %v9062_v34  ;;  %v9114_v34 = vld [vmem:[#allocation4 + $0x16e0] sm:$0xff] }
 0xcb4   :  { %9233 = vmatprep.subr.bf16.mxu1 %v9065_v33  ;;  %v9117_v33 = vld [vmem:[#allocation4 + $0x16f8] sm:$0xff] }
 0xcb7   :  { %9234 = vmatpush1.bf16.msra.mxu1 %v9064_v25  ;;  %v8981_v25 = vrot.slane %v15583_v44, %v15505_v11  ;;  %v12114_v11 = vld [vmem:[%s15692_s9] sm:$0xff]  }
 0xcb8   :  { %9235 = vmatprep.subr.bf16.mxu1 %v9067_v24  ;;  %v8993_v24 = vrot.slane %v15583_v44, %v15508_v55  ;;  %v12115_v55 = vld [vmem:[%s15692_s9 + $0x48] sm:$0xff]  }
 0xcbb   :  { %9236 = vmatpush1.bf16.msra.mxu1 %v9066_v45  ;;  %v9116_v45 = vld [vmem:[#allocation4 + $0x16f0] sm:$0xff] }
 0xcbc   :  { %9237 = vmatprep.subr.bf16.mxu1 %v9069_v23  ;;  %v9119_v23 = vld [vmem:[#allocation4 + $0x1708] sm:$0xff] }
 0xcbf   :  { %9238 = vmatpush1.bf16.msra.mxu1 %v9068_v41  ;;  %v9016_v41 = vpack.c.bf16 %v8981_v25, %v8981_v25  ;;  %v15634_v25 = vld [vmem:[#allocation3 + $0x30] sm:$0x3] }
 0xcc0   :  { %9239 = vmatprep.subr.bf16.mxu1 %v9071_v14  ;;  %v9019_v14 = vpack.c.bf16 %v8993_v24, %v8993_v24  ;;  %v9149_v24 = vld [vmem:[#allocation4 + $0x17f8] sm:$0xff] }
 0xcc3   :  { %9240 = vmatpush1.bf16.msra.mxu1 %v9070_v54  ;;  %v9118_v54 = vld [vmem:[#allocation4 + $0x1700] sm:$0xff] }
 0xcc4   :  { %9241 = vmatprep.subr.bf16.mxu1 %v9073_v15  ;;  %v9121_v15 = vld [vmem:[#allocation4 + $0x1718] sm:$0xff] }
 0xcc7   :  { %9242 = vmatpush1.bf16.msra.mxu1 %v9072_v31  ;;  %v12113_v31 = vld [vmem:[%s15692_s9 + $0x40] sm:$0xff]  }
 0xcc8   :  { %9243 = vmatprep.subr.bf16.mxu1 %v9075_v40  ;;  %v9120_v40 = vld [vmem:[#allocation4 + $0x1710] sm:$0xff]  ;;  %10493 = vmatprep.subr.bf16.mxu0 %v12113_v31  ;;  %v9150_v31 = vld [vmem:[#allocation4 + $0x1800] sm:$0xff] }
 0xcc9   :  { %10494 = vmatpush3.bf16.msra.mxu0 %v12114_v11  ;;  %v9153_v11 = vld [vmem:[#allocation4 + $0x1818] sm:$0xff] }
 0xcca   :  { %10495 = vmatprep.subr.bf16.mxu0 %v12115_v55  ;;  %v9152_v55 = vld [vmem:[#allocation4 + $0x1810] sm:$0xff] }
 0xccb   :  { %9244 = vmatpush1.bf16.msra.mxu1 %v9074_v17  ;;  %v9123_v17 = vld [vmem:[#allocation4 + $0x1728] sm:$0xff] }
 0xccc   :  { %9245 = vmatprep.subr.bf16.mxu1 %v9077_v1  ;;  %v12116_v1 = vld [vmem:[%s15692_s9 + $0x8] sm:$0xff]  }
 0xccd   :  { %10496 = vmatpush3.bf16.msra.mxu0 %v12116_v1  ;;  %v9159_v1 = vld [vmem:[#allocation4 + $0x1848] sm:$0xff] }
 0xccf   :  { %9246 = vmatpush1.bf16.msra.mxu1 %v9076_v27  ;;  %v12117_v27 = vld [vmem:[%s15692_s9 + $0x50] sm:$0xff]  }
 0xcd0   :  { %9247 = vmatprep.subr.bf16.mxu1 %v9079_v5  ;;  %v9122_v5 = vld [vmem:[#allocation4 + $0x1720] sm:$0xff]  ;;  %10497 = vmatprep.subr.bf16.mxu0 %v12117_v27 }
 0xcd1   :  { %v9158_v27 = vld [vmem:[#allocation4 + $0x1840] sm:$0xff] }
 0xcd3   :  { %9248 = vmatpush1.bf16.msra.mxu1 %v9078_v58  ;;  %v9125_v58 = vld [vmem:[#allocation4 + $0x1738] sm:$0xff] }
 0xcd4   :  { %9249 = vmatprep.subr.bf16.mxu1 %v9081_v30  ;;  %v12118_v30 = vld [vmem:[%s15692_s9 + $0x10] sm:$0xff]  }
 0xcd5   :  { %10498 = vmatpush3.bf16.msra.mxu0 %v12118_v30  ;;  %v9163_v30 = vld [vmem:[#allocation4 + $0x1868] sm:$0xff] }
 0xcd7   :  { %9250 = vmatpush1.bf16.msra.mxu1 %v9080_v20  ;;  %v12119_v20 = vld [vmem:[%s15692_s9 + $0x58] sm:$0xff]  }
 0xcd8   :  { %9251 = vmatprep.subr.bf16.mxu1 %v9083_v3  ;;  %v9124_v3 = vld [vmem:[#allocation4 + $0x1730] sm:$0xff]  ;;  %10499 = vmatprep.subr.bf16.mxu0 %v12119_v20  ;;  %v9162_v20 = vld [vmem:[#allocation4 + $0x1860] sm:$0xff] }
 0xcdb   :  { %9252 = vmatpush1.bf16.msra.mxu1 %v9082_v13  ;;  %v9127_v13 = vld [vmem:[#allocation4 + $0x1748] sm:$0xff] }
 0xcdc   :  { %9253 = vmatprep.subr.bf16.mxu1 %v9085_v18  ;;  %v12120_v18 = vld [vmem:[%s15692_s9 + $0x18] sm:$0xff]  }
 0xcdd   :  { %10500 = vmatpush3.bf16.msra.mxu0 %v12120_v18  ;;  %v9167_v18 = vld [vmem:[#allocation4 + $0x1888] sm:$0xff] }
 0xcdf   :  { %9254 = vmatpush1.bf16.msra.mxu1 %v9084_v29  ;;  %v9128_v29 = vld [vmem:[#allocation4 + $0x1750] sm:$0xff] }
 0xce0   :  { %9264 = vmatprep.subr.bf16.mxu1 %v9087_v49 }
 0xce2   :  { %9256 = vmatmul.mubr.bf16.vlgmr.msra.gmra.mrb[16].mxu1 %v9014_v16 }
 0xce3   :  { %9265 = vmatpush1.bf16.msra.mxu1 %v9086_v43  ;;  %9296 = vmatprep.mubr.bf16.mxu1 %v9017_v63  ;;  %v9131_v63 = vld [vmem:[#allocation4 + $0x1768] sm:$0xff] }
 0xce4   :  { %9266 = vmatprep.subr.bf16.mxu1 %v9089_v62 }
 0xce7   :  { %9267 = vmatpush1.bf16.msra.mxu1 %v9088_v59 }
 0xce8   :  { %9268 = vmatprep.subr.bf16.mxu1 %v9091_v56 }
 0xceb   :  { %9269 = vmatpush1.bf16.msra.mxu1 %v9090_v6 }
 0xcec   :  { %9270 = vmatprep.subr.bf16.mxu1 %v9093_v48 }
 0xcef   :  { %9271 = vmatpush1.bf16.msra.mxu1 %v9092_v47 }
 0xcf0   :  { %9272 = vmatprep.subr.bf16.mxu1 %v9095_v50  ;;  %v9130_v50 = vld [vmem:[#allocation4 + $0x1760] sm:$0xff] }
 0xcf3   :  { %9273 = vmatpush1.bf16.msra.mxu1 %v9094_v60 }
 0xcf4   :  { %9274 = vmatprep.subr.bf16.mxu1 %v9097_v12 }
 0xcf7   :  { %9275 = vmatpush1.bf16.msra.mxu1 %v9096_v2 }
 0xcf8   :  { %9276 = vmatprep.subr.bf16.mxu1 %v9099_v35  ;;  %v9133_v35 = vld [vmem:[#allocation4 + $0x1778] sm:$0xff] }
 0xcfb   :  { %9277 = vmatpush1.bf16.msra.mxu1 %v9098_v0 }
 0xcfc   :  { %9278 = vmatprep.subr.bf16.mxu1 %v9101_v51 }
 0xcff   :  { %9279 = vmatpush1.bf16.msra.mxu1 %v9100_v32  ;;  %v9132_v32 = vld [vmem:[#allocation4 + $0x1770] sm:$0xff] }
 0xd00   :  { %9280 = vmatprep.subr.bf16.mxu1 %v9103_v46 }
 0xd03   :  { %9281 = vmatpush1.bf16.msra.mxu1 %v9102_v37  ;;  %v9135_v37 = vld [vmem:[#allocation4 + $0x1788] sm:$0xff] }
 0xd04   :  { %9282 = vmatprep.subr.bf16.mxu1 %v9105_v39 }
 0xd07   :  { %9283 = vmatpush1.bf16.msra.mxu1 %v9104_v21  ;;  %v9134_v21 = vld [vmem:[#allocation4 + $0x1780] sm:$0xff] }
 0xd08   :  { %9284 = vmatprep.subr.bf16.mxu1 %v9107_v42  ;;  %v9137_v42 = vld [vmem:[#allocation4 + $0x1798] sm:$0xff] }
 0xd0b   :  { %9285 = vmatpush1.bf16.msra.mxu1 %v9106_v19  ;;  %v9136_v19 = vld [vmem:[#allocation4 + $0x1790] sm:$0xff] }
 0xd0c   :  { %9286 = vmatprep.subr.bf16.mxu1 %v9109_v9  ;;  %v9139_v9 = vld [vmem:[#allocation4 + $0x17a8] sm:$0xff] }
 0xd0f   :  { %9287 = vmatpush1.bf16.msra.mxu1 %v9108_v38  ;;  %v9138_v38 = vld [vmem:[#allocation4 + $0x17a0] sm:$0xff] }
 0xd10   :  { %9288 = vmatprep.subr.bf16.mxu1 %v9111_v10  ;;  %v9141_v10 = vld [vmem:[#allocation4 + $0x17b8] sm:$0xff] }
 0xd13   :  { %9289 = vmatpush1.bf16.msra.mxu1 %v9110_v8  ;;  %v9140_v8 = vld [vmem:[#allocation4 + $0x17b0] sm:$0xff] }
 0xd14   :  { %9290 = vmatprep.subr.bf16.mxu1 %v9113_v28  ;;  %v9143_v28 = vld [vmem:[#allocation4 + $0x17c8] sm:$0xff] }
 0xd17   :  { %9291 = vmatpush1.bf16.msra.mxu1 %v9112_v26  ;;  %v9145_v26 = vld [vmem:[#allocation4 + $0x17d8] sm:$0xff] }
 0xd18   :  { %9292 = vmatprep.subr.bf16.mxu1 %v9115_v4  ;;  %v9144_v4 = vld [vmem:[#allocation4 + $0x17d0] sm:$0xff] }
 0xd1b   :  { %9293 = vmatpush1.bf16.msra.mxu1 %v9114_v34  ;;  %v9147_v34 = vld [vmem:[#allocation4 + $0x17e8] sm:$0xff] }
 0xd1c   :  { %9294 = vmatprep.subr.bf16.mxu1 %v9117_v33  ;;  %v9146_v33 = vld [vmem:[#allocation4 + $0x17e0] sm:$0xff] }
 0xd1f   :  { %9295 = vmatpush1.bf16.msra.mxu1 %v9116_v45  ;;  %v8989_v45 = vrot.slane %v15583_v44, %v15519_v52  ;;  %v9154_v52 = vld [vmem:[#allocation4 + $0x1820] sm:$0xff]  ;;  %v9157_v44 = vld [vmem:[#allocation4 + $0x1838] sm:$0xff] }
 0xd20   :  { %9305 = vmatprep.subr.bf16.mxu1 %v9119_v23  ;;  %v9001_v23 = vrot.slane %v15634_v25, %v15466_v61 }
 0xd22   :  { %9297 = vmatmul.mubr.bf16.vlgmr.msra.gmra.mrb[16].mxu1 %v9016_v41  ;;  %v9148_v41 = vld [vmem:[#allocation4 + $0x17f0] sm:$0xff] }
 0xd23   :  { %9306 = vmatpush1.bf16.msra.mxu1 %v9118_v54  ;;  %9337 = vmatprep.mubr.bf16.mxu1 %v9019_v14  ;;  %v9151_v14 = vld [vmem:[#allocation4 + $0x1808] sm:$0xff]  ;;  %v9018_v54 = vpack.c.bf16 %v8989_v45, %v8989_v45 }
 0xd24   :  { %9307 = vmatprep.subr.bf16.mxu1 %v9121_v15  ;;  %v9021_v15 = vpack.c.bf16 %v9001_v23, %v9001_v23  ;;  %v9452_v23 = vld [vmem:[#allocation14] sm:$0x1] }
 0xd27   :  { %9308 = vmatpush1.bf16.msra.mxu1 %v9120_v40  ;;  %v9155_v40 = vld [vmem:[#allocation4 + $0x1828] sm:$0xff] }
 0xd28   :  { %9309 = vmatprep.subr.bf16.mxu1 %v9123_v17  ;;  %v9156_v17 = vld [vmem:[#allocation4 + $0x1830] sm:$0xff] }
 0xd2b   :  { %9310 = vmatpush1.bf16.msra.mxu1 %v9122_v5  ;;  %v9161_v5 = vld [vmem:[#allocation4 + $0x1858] sm:$0xff] }
 0xd2c   :  { %9311 = vmatprep.subr.bf16.mxu1 %v9125_v58  ;;  %v9160_v58 = vld [vmem:[#allocation4 + $0x1850] sm:$0xff] }
 0xd2f   :  { %9312 = vmatpush1.bf16.msra.mxu1 %v9124_v3  ;;  %v9165_v3 = vld [vmem:[#allocation4 + $0x1878] sm:$0xff] }
 0xd30   :  { %9313 = vmatprep.subr.bf16.mxu1 %v9127_v13  ;;  %v9164_v13 = vld [vmem:[#allocation4 + $0x1870] sm:$0xff] }
 0xd33   :  { %9314 = vmatpush1.bf16.msra.mxu1 %v9126_v22  ;;  %v9166_v22 = vld [vmem:[#allocation4 + $0x1880] sm:$0xff] }
 0xd34   :  { %9315 = vmatprep.subr.bf16.mxu1 %v9129_v57  ;;  %v9169_v57 = vld [vmem:[#allocation4 + $0x1898] sm:$0xff] }
 0xd35   :  { %v8484_v49 = vpop.f32.mrb[12].mxu1 }
 0xd36   :  { %v8932_v16 = vpop.f32.mrb[176].mxu0  ;;  %v8486_v43 = vpop.f32.mrb[13].mxu1 }
 0xd37   :  { %v8934_v62 = vpop.f32.mrb[177].mxu0  ;;  %v8493_v59 = vcombine.low %v8484_v49, %v8486_v43  ;;  %v8488_v56 = vpop.f32.mrb[14].mxu1  ;;  %9316 = vmatpush1.bf16.msra.mxu1 %v9128_v29  ;;  %v9168_v29 = vld [vmem:[#allocation4 + $0x1890] sm:$0xff]  ;;  %v9171_v49 = vld [vmem:[#allocation4 + $0x18a8] sm:$0xff] }
 0xd38   :  { %v8941_v6 = vcombine.low %v8932_v16, %v8934_v62  ;;  %v8936_v48 = vpop.f32.mrb[178].mxu0  ;;  %v8489_v47 = vpop.f32.mrb[15].mxu1  ;;  %9317 = vmatprep.subr.bf16.mxu1 %v9131_v63  ;;  %v9170_v16 = vld [vmem:[#allocation4 + $0x18a0] sm:$0xff]  ;;  %v9173_v63 = vld [vmem:[#allocation4 + $0x18b8] sm:$0xff]  ;;  %v9172_v43 = vld [vmem:[#allocation4 + $0x18b0] sm:$0xff] }
 0xd39   :  { %v8937_v60 = vpop.f32.mrb[179].mxu0  ;;  %v8500_v12 = vrot.slane %v8493_v59, %v15121_v36  ;;  %v9175_v62 = vld [vmem:[#allocation4 + $0x18c8] sm:$0xff]  ;;  %v9174_v59 = vld [vmem:[#allocation4 + $0x18c0] sm:$0xff]  ;;  %v9177_v56 = vld [vmem:[#allocation4 + $0x18d8] sm:$0xff] }
 0xd3a   :  { %v8948_v2 = vrot.slane %v8941_v6, %v15121_v36  ;;  %v9176_v6 = vld [vmem:[#allocation4 + $0x18d0] sm:$0xff]  ;;  %v9179_v48 = vld [vmem:[#allocation4 + $0x18e8] sm:$0xff]  ;;  %v9178_v47 = vld [vmem:[#allocation4 + $0x18e0] sm:$0xff]  ;;  %v8997_v60 = vrot.slane %v15634_v25, %v15477_v53 }
 0xd3b   :  { %v8507_v0 = vrot.slane %v8500_v12, %v15121_v36  ;;  %9318 = vmatpush1.bf16.msra.mxu1 %v9130_v50  ;;  %v9181_v50 = vld [vmem:[#allocation4 + $0x18f8] sm:$0xff]  ;;  %v9180_v12 = vld [vmem:[#allocation4 + $0x18f0] sm:$0xff] }
 0xd3c   :  { %v8955_v51 = vrot.slane %v8948_v2, %v15121_v36  ;;  %9319 = vmatprep.subr.bf16.mxu1 %v9133_v35  ;;  %v9020_v2 = vpack.c.bf16 %v8997_v60, %v8997_v60  ;;  %v12121_v35 = vld [vmem:[%s15692_s9 + $0x60] sm:$0xff]  }
 0xd3d   :  { %v8509_v46 = vadd.f32 %v8507_v0, %v15571_v7  ;;  %v9142_v7 = vld [vmem:[#allocation4 + $0x17c0] sm:$0xff]  ;;  %v12122_v0 = vld [vmem:[%s15692_s9 + $0x20] sm:$0xff]   ;;  %10501 = vmatprep.subr.bf16.mxu0 %v12121_v35 }
 0xd3e   :  { %10502 = vmatpush3.bf16.msra.mxu0 %v12122_v0 }
 0xd3f   :  { %v15632_v39 = vadd.f32 %v8955_v51, %v8509_v46  ;;  %9320 = vmatpush1.bf16.msra.mxu1 %v9132_v32  ;;  %v12123_v51 = vld [vmem:[%s15692_s9 + $0x68] sm:$0xff]   ;;  %v12125_v46 = vld [vmem:[%s15692_s9 + $0x70] sm:$0xff]  }
 0xd40   :  { %9321 = vmatprep.subr.bf16.mxu1 %v9135_v37  ;;  %v12124_v32 = vld [vmem:[%s15692_s9 + $0x28] sm:$0xff]   ;;  %10503 = vmatprep.subr.bf16.mxu0 %v12123_v51  ;;  %v12126_v37 = vld [vmem:[%s15692_s9 + $0x30] sm:$0xff]  }
 0xd42   :  { %10504 = vmatpush3.bf16.msra.mxu0 %v12124_v32 }
 0xd43   :  { %9322 = vmatpush1.bf16.msra.mxu1 %v9134_v21  ;;  %10505 = vmatprep.subr.bf16.mxu0 %v12125_v46  ;;  %v12127_v21 = vld [vmem:[%s15692_s9 + $0x78] sm:$0xff]  }
 0xd44   :  { %9323 = vmatprep.subr.bf16.mxu1 %v9137_v42  ;;  %v12128_v42 = vld [vmem:[%s15692_s9 + $0x38] sm:$0xff]   ;;  %s12291_s9 = smov [#allocation15]  }
 0xd45   :  { %s9597_s1 = sshll.u32 %s12291_s9, 4  ;;  %s9598_s1 = int_to_ptr.vmem [resolvable:$true] %s9597_s1 }
 0xd46   :  { %10506 = vmatpush3.bf16.msra.mxu0 %v12126_v37  ;;  %s12243_s12 = scalar_lea.vmem %s9598_s1, 16  ;;  %s12247_s13 = scalar_lea.vmem %s9598_s1, 32 }
 0xd47   :  { %9324 = vmatpush1.bf16.msra.mxu1 %v9136_v19  ;;  %10507 = vmatprep.subr.bf16.mxu0 %v12127_v21  ;;  %p12244_p12 = scmp.ne.s32.totalorder %s9598_s1, %s12243_s12  ;;  %p12248_p13 = scmp.lt.s32.totalorder %s9598_s1, %s9598_s1 }
 0xd48   :  { %9325 = vmatprep.subr.bf16.mxu1 %v9139_v9  ;;  %p12249_p0 = scmp.lt.s32.totalorder %s12247_s13, %s12243_s12 }
 0xd4a   :  { %10508 = vmatpush3.bf16.msra.mxu0 %v12128_v42  ;;  %p12250_p1 = por %p12249_p0, %p12248_p13 }
 0xd4b   :  { %9326 = vmatpush1.bf16.msra.mxu1 %v9138_v38 }
 0xd4c   :  { %9327 = vmatprep.subr.bf16.mxu1 %v9141_v10  ;;  %p12251_p2 = pnand %p12250_p1, %p12244_p12 }
 0xd4f   :  { %9328 = vmatpush1.bf16.msra.mxu1 %v9140_v8 }
 0xd50   :  { %9329 = vmatprep.subr.bf16.mxu1 %v9143_v28 }
 0xd53   :  { %9330 = vmatpush1.bf16.msra.mxu1 %v9142_v7 }
 0xd54   :  { %9331 = vmatprep.subr.bf16.mxu1 %v9145_v26 }
 0xd57   :  { %9332 = vmatpush1.bf16.msra.mxu1 %v9144_v4 }
 0xd58   :  { %9333 = vmatprep.subr.bf16.mxu1 %v9147_v34 }
 0xd5b   :  { %9334 = vmatpush1.bf16.msra.mxu1 %v9146_v33 }
 0xd5c   :  { %9335 = vmatprep.subr.bf16.mxu1 %v9149_v24 }
 0xd5f   :  { %9336 = vmatpush1.bf16.msra.mxu1 %v9148_v41 }
 0xd60   :  { %9346 = vmatprep.subr.bf16.mxu1 %v9151_v14 }
 0xd62   :  { %9338 = vmatmul.mubr.bf16.vlgmr.msra.gmra.mrb[16].mxu1 %v9018_v54 }
 0xd63   :  { %9347 = vmatpush1.bf16.msra.mxu1 %v9150_v31  ;;  %9378 = vmatprep.mubr.bf16.mxu1 %v9021_v15 }
 0xd64   :  { %9348 = vmatprep.subr.bf16.mxu1 %v9153_v11 }
 0xd67   :  { %9349 = vmatpush1.bf16.msra.mxu1 %v9152_v55 }
 0xd68   :  { %9350 = vmatprep.subr.bf16.mxu1 %v9155_v40 }
 0xd6b   :  { %9351 = vmatpush1.bf16.msra.mxu1 %v9154_v52 }
 0xd6c   :  { %9352 = vmatprep.subr.bf16.mxu1 %v9157_v44 }
 0xd6f   :  { %9353 = vmatpush1.bf16.msra.mxu1 %v9156_v17 }
 0xd70   :  { %9354 = vmatprep.subr.bf16.mxu1 %v9159_v1 }
 0xd73   :  { %9355 = vmatpush1.bf16.msra.mxu1 %v9158_v27 }
 0xd74   :  { %9356 = vmatprep.subr.bf16.mxu1 %v9161_v5 }
 0xd77   :  { %9357 = vmatpush1.bf16.msra.mxu1 %v9160_v58 }
 0xd78   :  { %9358 = vmatprep.subr.bf16.mxu1 %v9163_v30 }
 0xd7b   :  { %9359 = vmatpush1.bf16.msra.mxu1 %v9162_v20 }
 0xd7c   :  { %9360 = vmatprep.subr.bf16.mxu1 %v9165_v3 }
 0xd7f   :  { %9361 = vmatpush1.bf16.msra.mxu1 %v9164_v13 }
 0xd80   :  { %9362 = vmatprep.subr.bf16.mxu1 %v9167_v18 }
 0xd83   :  { %9363 = vmatpush1.bf16.msra.mxu1 %v9166_v22 }
 0xd84   :  { %9364 = vmatprep.subr.bf16.mxu1 %v9169_v57 }
 0xd87   :  { %9365 = vmatpush1.bf16.msra.mxu1 %v9168_v29 }
 0xd88   :  { %9366 = vmatprep.subr.bf16.mxu1 %v9171_v49 }
 0xd8b   :  { %9367 = vmatpush1.bf16.msra.mxu1 %v9170_v16 }
 0xd8c   :  { %9368 = vmatprep.subr.bf16.mxu1 %v9173_v63 }
 0xd8f   :  { %9369 = vmatpush1.bf16.msra.mxu1 %v9172_v43 }
 0xd90   :  { %9370 = vmatprep.subr.bf16.mxu1 %v9175_v62 }
 0xd93   :  { %9371 = vmatpush1.bf16.msra.mxu1 %v9174_v59 }
 0xd94   :  { %9372 = vmatprep.subr.bf16.mxu1 %v9177_v56 }
 0xd97   :  { %9373 = vmatpush1.bf16.msra.mxu1 %v9176_v6 }
 0xd98   :  { %9374 = vmatprep.subr.bf16.mxu1 %v9179_v48 }
 0xd9b   :  { %9375 = vmatpush1.bf16.msra.mxu1 %v9178_v47 }
 0xd9c   :  { %9376 = vmatprep.subr.bf16.mxu1 %v9181_v50 }
 0xd9f   :  { %9377 = vmatpush1.bf16.msra.mxu1 %v9180_v12 }
 0xda2   :  { %9379 = vmatmul.mubr.bf16.vlgmr.msra.gmra.mrb[16].mxu1 %v9020_v2 }
 0xe75   :  { %v9380_v19 = vpop.f32.mrb[16].mxu1 }
 0xe76   :  { %v9382_v9 = vpop.f32.mrb[17].mxu1 }
 0xe77   :  { %v9389_v38 = vcombine.low %v9380_v19, %v9382_v9  ;;  %v9384_v10 = vpop.f32.mrb[18].mxu1 }
 0xe78   :  { %v9385_v8 = vpop.f32.mrb[19].mxu1 }
 0xe79   :  { %v9396_v28 = vrot.slane %v9389_v38, %v15121_v36 }
 0xe7b   :  { %v9403_v7 = vrot.slane %v9396_v28, %v15121_v36 }
 0xe7d   :  { %v9405_v26 = vadd.f32 %v9403_v7, %v15632_v39 }
 0xe7f   :  { %v9406_v4 = vmax.f32 %v9405_v26, 0.0 }
 0xe81   :  { %v9411_v34 = vrot.slane %v9406_v4, %v15477_v53  ;;  %v9415_v33 = vrot.slane %v9406_v4, %v15466_v61 }
 0xe83   :  { %v9418_v25 = vpack.c.bf16 %v9411_v34, %v9411_v34  ;;  %v9419_v24 = vpack.c.bf16 %v9415_v33, %v9415_v33 }
 0xe85   :  { %9581 = vmatprep.mubr.bf16.mxu0 %v9419_v24 }
 0xe86   :  { %9582 = vmatmul.mubr.bf16.vlgmr.msra.gmra.mrb[180].mxu0 %v9418_v25 }
 0xf59   :  { %v10509_v45 = vpop.f32.mrb[180].mxu0 }
 0xf5a   :  { %v10510_v41 = vpop.f32.mrb[181].mxu0 }
 0xf5b   :  { %v10511_v14 = vadd.f32 %v10510_v41, %v10509_v45  ;;  %v10512_v54 = vpop.f32.mrb[182].mxu0 }
 0xf5c   :  { %v10513_v15 = vpop.f32.mrb[183].mxu0 }
 0xf5d   :  { %v9584_v36 = vadd.f32 %v10511_v14, %v9452_v23 }
 0xf5f   :  { %9590 = vst.msk [vmem:[#allocation15] sm:$0x1] %vm9589_vm12, %v9584_v36 }
 0xf60   :  { %12254 = shalt.err (!%p12251_p2)
}
 0xf61   :  { %s12255_s20 = scalar_lea.hbm %s15694_s11, 16 }
 0xf62   :  { %p12256_p3 = scmp.ne.s32.totalorder %s15694_s11, %s12255_s20  ;;  %p12259_p4 = scmp.lt.u32.totalorder %s12255_s20, %s15694_s11 }
 0xf64   :  { %p12261_p5 = pnand %p12259_p4, %p12256_p3 }
 0xf66   :  { %12264 = shalt.err (!%p12261_p5)
}
 0xf67   :  { %9600 = dma.vmem_to_hbm [thread:$0]  %s9598_s1, 16, %s15694_s11, [#allocation8]  }
 0xf68   :  { %12273 = dma.done.wait [#allocation8], 16  }
 0xf69   :  { %12274 = vsyncadd [#allocation8], 4294967280 }
 0xf6a   :  { %9604 = vsyncpa [#allocation7], 1 }
 0xf6b   :  { %9605 = vsyncpa [#allocation10], 1 }
 0xf6c   :  { %9606 = vsyncpa [#allocation13], 1 }
 0xf6d   :  { %9607 = vsyncpa [#allocation8], 1 }
 0xf6e   :  { %9608 = vsyncmov [#allocation5] }
 0xf71   :  { %s9609_s19 = vpop.sfrf %9608 }
 0xf72   :  { %p10087_p6 = scmp.ne.s32.totalorder %s9609_s19, 0 }
 0xf74   :  { %9613 = shalt.err (%p10087_p6)  }

</bundles_post_ra>
